<compile_context>
chip_gen: v6e
topology: v6e:2x2x1
jax: 0.10.0
libtpu: 0.0.40
codegen_flags: <defaults>
</compile_context>

<pallas_src>
import jax
import jax.numpy as jnp
from jax.experimental import pallas as pl
from jax.experimental.pallas import tpu as pltpu


def _pointnet_kernel(x_ref, w1_ref, b1_ref, w2_ref, b2_ref, w3_ref, b3_ref,
                     o_ref):
    # x_ref block: (TB, TN, 3) f32 ; o_ref block: (TB, 1024) f32 (accumulator).
    n_idx = pl.program_id(1)

    @pl.when(n_idx == 0)
    def _():
        o_ref[...] = jnp.full_like(o_ref, -jnp.inf)

    tb, tn, _ = x_ref.shape
    m = tb * tn
    x = x_ref[...].reshape(m, 3)                                # (M, 3) f32

    # conv1 (+ folded bn1) + relu.  K=3 -> three VPU broadcast-FMAs; the VALU
    # slots are otherwise idle while conv3 saturates the MXU.
    h1 = (x[:, 0:1] * w1_ref[0:1, :]
          + x[:, 1:2] * w1_ref[1:2, :]
          + x[:, 2:3] * w1_ref[2:3, :])                         # (M, 64)
    h1 = jnp.maximum(h1 + b1_ref[...], 0.0)

    # conv2 (+ folded bn2) + relu : bf16 MXU matmul, f32 accumulation.
    h2 = jnp.dot(h1.astype(jnp.bfloat16), w2_ref[...],
                 preferred_element_type=jnp.float32)            # (M, 128)
    h2 = jnp.maximum(h2 + b2_ref[...], 0.0)

    # conv3 (+ folded bn3), no relu : bf16 MXU matmul, f32 accumulation.
    h3 = jnp.dot(h2.astype(jnp.bfloat16), w3_ref[...],
                 preferred_element_type=jnp.float32)            # (M, 1024)
    h3 = h3 + b3_ref[...]

    # Running max over the point dimension (per batch row of this tile).
    tile_max = jnp.max(h3.reshape(tb, tn, 1024), axis=1)        # (TB, 1024)
    o_ref[...] = jnp.maximum(o_ref[...], tile_max)


def pointnetfeat_pallas(x_bnc, w1, b1, w2, b2, w3, b3, *, tb=8, tn=128):
    """x_bnc: (B, N, 3) float32; weights already BN-folded, laid out (in, out)."""
    B, N, C = x_bnc.shape
    assert C == 3

    nb = (B + tb - 1) // tb
    nn_tiles = (N + tn - 1) // tn
    b_pad, n_pad = nb * tb, nn_tiles * tn
    if b_pad != B or n_pad != N:
        # Edge replication: duplicated points/batches never change the max;
        # padded batch rows are sliced away below.
        x_bnc = jnp.pad(x_bnc, ((0, b_pad - B), (0, n_pad - N), (0, 0)),
                        mode="edge")

    # bf16 weights for the MXU-bound convs (f32 accumulation in-kernel).
    w2_bf = w2.astype(jnp.bfloat16)
    w3_bf = w3.astype(jnp.bfloat16)

    grid_spec = pltpu.PrefetchScalarGridSpec(
        num_scalar_prefetch=0,
        grid=(nb, nn_tiles),
        in_specs=[
            pl.BlockSpec((tb, tn, 3), lambda b, n: (b, n, 0)),
            pl.BlockSpec((3, 64), lambda b, n: (0, 0)),
            pl.BlockSpec((1, 64), lambda b, n: (0, 0)),
            pl.BlockSpec((64, 128), lambda b, n: (0, 0)),
            pl.BlockSpec((1, 128), lambda b, n: (0, 0)),
            pl.BlockSpec((128, 1024), lambda b, n: (0, 0)),
            pl.BlockSpec((1, 1024), lambda b, n: (0, 0)),
        ],
        out_specs=pl.BlockSpec((tb, 1024), lambda b, n: (b, 0)),
    )
    out = pl.pallas_call(
        _pointnet_kernel,
        out_shape=jax.ShapeDtypeStruct((b_pad, 1024), jnp.float32),
        grid_spec=grid_spec,
        compiler_params=pltpu.CompilerParams(
            dimension_semantics=("parallel", "arbitrary")),
    )(x_bnc, w1, b1, w2_bf, b2, w3_bf, b3)
    return out[:B]


def _fold_bn(w, b, gamma, beta, mean, var, eps=1e-5):
    """Fold eval-mode BatchNorm1d into a kernel-size-1 Conv1d.

    w: (C_out, C_in) conv weight, b: (C_out,) conv bias.
    Returns (w_t, b_f) with w_t laid out (C_in, C_out) for x @ w_t.
    """
    scale = gamma / jnp.sqrt(var + eps)          # (C_out,)
    w_f = w * scale[:, None]                     # (C_out, C_in)
    b_f = (b - mean) * scale + beta              # (C_out,)
    return w_f.T, b_f[None, :]                   # (C_in, C_out), (1, C_out)


def pointnetfeat_reference(x_bnc, w1, b1, w2, b2, w3, b3):
    # Reference uses the same bf16-rounded weights (f32 compute) so the only
    # remaining difference vs the kernel is in-kernel activation rounding.
    w2f = w2.astype(jnp.bfloat16).astype(jnp.float32)
    w3f = w3.astype(jnp.bfloat16).astype(jnp.float32)
    h1 = jnp.maximum(jnp.einsum("bnc,co->bno", x_bnc, w1) + b1, 0.0)
    h2 = jnp.maximum(jnp.einsum("bnc,co->bno", h1, w2f) + b2, 0.0)
    h3 = jnp.einsum("bnc,co->bno", h2, w3f) + b3
    return jnp.max(h3, axis=1)


if __name__ == "__main__":
    key = jax.random.PRNGKey(0)
    keys = jax.random.split(key, 16)

    B, N = 2, 300  # small batch; N not a multiple of the tile (exercises padding)

    # Input in PyTorch layout (B, 3, N) = NCW.
    x_nc_w = jax.random.normal(keys[0], (B, 3, N), dtype=jnp.float32)

    # Deterministic parameters (shapes as in PointNetfeat.__init__).
    def init_conv(kw, kb, c_out, c_in):
        bound = 1.0 / jnp.sqrt(float(c_in))
        w = jax.random.uniform(kw, (c_out, c_in), jnp.float32, -bound, bound)
        b = jax.random.uniform(kb, (c_out,), jnp.float32, -bound, bound)
        return w, b

    cw1, cb1 = init_conv(keys[1], keys[2], 64, 3)
    cw2, cb2 = init_conv(keys[3], keys[4], 128, 64)
    cw3, cb3 = init_conv(keys[5], keys[6], 1024, 128)

    def init_bn(kg, kb, c):
        gamma = 1.0 + 0.1 * jax.random.normal(kg, (c,), jnp.float32)
        beta = 0.1 * jax.random.normal(kb, (c,), jnp.float32)
        running_mean = jnp.zeros((c,), jnp.float32)   # PyTorch default
        running_var = jnp.ones((c,), jnp.float32)     # PyTorch default
        return gamma, beta, running_mean, running_var

    g1, be1, m1, v1 = init_bn(keys[7], keys[8], 64)
    g2, be2, m2, v2 = init_bn(keys[9], keys[10], 128)
    g3, be3, m3, v3 = init_bn(keys[11], keys[12], 1024)

    # Fold BN (eval mode) into the 1x1 convs.
    w1, b1 = _fold_bn(cw1, cb1, g1, be1, m1, v1)
    w2, b2 = _fold_bn(cw2, cb2, g2, be2, m2, v2)
    w3, b3 = _fold_bn(cw3, cb3, g3, be3, m3, v3)

    # layout: transpose NCW -> (B, N, C) for the kernel.
    x_bnc = jnp.transpose(x_nc_w, (0, 2, 1))

    out = pointnetfeat_pallas(x_bnc, w1, b1, w2, b2, w3, b3)
    out = jax.block_until_ready(out)

    ref = pointnetfeat_reference(x_bnc, w1, b1, w2, b2, w3, b3)
    assert out.shape == (B, 1024)
    assert jnp.allclose(out, ref, atol=3e-2, rtol=3e-2), "mismatch vs reference"

    print("KERNEL_OK")
</pallas_src>

<mosaic_0001>
module attributes {stable_mosaic.version = 11 : i64} {
  func.func @_pointnet_kernel(%arg0: i32, %arg1: i32, %arg2: memref<8x128x3xf32, #tpu.memory_space<vmem>>, %arg3: memref<3x64xf32, #tpu.memory_space<vmem>>, %arg4: memref<1x64xf32, #tpu.memory_space<vmem>>, %arg5: memref<64x128xbf16, #tpu.memory_space<vmem>>, %arg6: memref<1x128xf32, #tpu.memory_space<vmem>>, %arg7: memref<128x1024xbf16, #tpu.memory_space<vmem>>, %arg8: memref<1x1024xf32, #tpu.memory_space<vmem>>, %arg9: memref<8x1024xf32, #tpu.memory_space<vmem>>) attributes {dimension_semantics = [#tpu.dimension_semantics<parallel>, #tpu.dimension_semantics<arbitrary>], iteration_bounds = array<i64: 1, 3>, scalar_prefetch = 0 : i64, scratch_operands = 0 : i64, tpu.core_type = #tpu.core_type<tc>, window_params = [{transform_indices = @transform_0, window_bounds = array<i64: 8, 128, 3>}, {pipeline_mode = #tpu.pipeline_mode<synchronous>, transform_indices = @transform_1, window_bounds = array<i64: 3, 64>}, {pipeline_mode = #tpu.pipeline_mode<synchronous>, transform_indices = @transform_2, window_bounds = array<i64: 1, 64>}, {pipeline_mode = #tpu.pipeline_mode<synchronous>, transform_indices = @transform_3, window_bounds = array<i64: 64, 128>}, {pipeline_mode = #tpu.pipeline_mode<synchronous>, transform_indices = @transform_4, window_bounds = array<i64: 1, 128>}, {pipeline_mode = #tpu.pipeline_mode<synchronous>, transform_indices = @transform_5, window_bounds = array<i64: 128, 1024>}, {pipeline_mode = #tpu.pipeline_mode<synchronous>, transform_indices = @transform_6, window_bounds = array<i64: 1, 1024>}, {transform_indices = @transform_7, window_bounds = array<i64: 8, 1024>}]} {
    %c0_i32 = arith.constant 0 : i32
    %0 = arith.cmpi eq, %arg1, %c0_i32 : i32
    %1 = arith.extui %0 : i1 to i32
    %c0_i32_0 = arith.constant 0 : i32
    %2 = arith.cmpi ne, %1, %c0_i32_0 : i32
    scf.if %2 {
      %cst_25 = arith.constant 0xFF800000 : f32
      %46 = vector.broadcast %cst_25 : f32 to vector<8x1024xf32>
      %c0_26 = arith.constant 0 : index
      %c0_27 = arith.constant 0 : index
      %47 = vector.load %arg9[%c0_26, %c0_27] : memref<8x1024xf32, #tpu.memory_space<vmem>>, vector<8x1024xf32>
      tpu.vector_store %arg9[%c0_26, %c0_27], %46 {strides = array<i32>} : memref<8x1024xf32, #tpu.memory_space<vmem>>, vector<8x1024xf32>,
    } else {
    }
    %c0 = arith.constant 0 : index
    %c0_1 = arith.constant 0 : index
    %c0_2 = arith.constant 0 : index
    %3 = vector.load %arg2[%c0, %c0_1, %c0_2] : memref<8x128x3xf32, #tpu.memory_space<vmem>>, vector<8x128x3xf32>
    %4 = vector.shape_cast %3 : vector<8x128x3xf32> to vector<1024x3xf32>
    %5 = vector.extract_strided_slice %4 {offsets = [0, 0], sizes = [1024, 1], strides = [1, 1]} : vector<1024x3xf32> to vector<1024x1xf32>
    %c0_3 = arith.constant 0 : index
    %c0_4 = arith.constant 0 : index
    %6 = vector.load %arg3[%c0_3, %c0_4] : memref<3x64xf32, #tpu.memory_space<vmem>>, vector<1x64xf32>
    %7 = vector.broadcast %5 : vector<1024x1xf32> to vector<1024x64xf32>
    %8 = vector.broadcast %6 : vector<1x64xf32> to vector<1024x64xf32>
    %9 = arith.mulf %7, %8 : vector<1024x64xf32>
    %10 = vector.extract_strided_slice %4 {offsets = [0, 1], sizes = [1024, 1], strides = [1, 1]} : vector<1024x3xf32> to vector<1024x1xf32>
    %c1 = arith.constant 1 : index
    %c0_5 = arith.constant 0 : index
    %11 = vector.load %arg3[%c1, %c0_5] : memref<3x64xf32, #tpu.memory_space<vmem>>, vector<1x64xf32>
    %12 = vector.broadcast %10 : vector<1024x1xf32> to vector<1024x64xf32>
    %13 = vector.broadcast %11 : vector<1x64xf32> to vector<1024x64xf32>
    %14 = arith.mulf %12, %13 : vector<1024x64xf32>
    %15 = arith.addf %9, %14 : vector<1024x64xf32>
    %16 = vector.extract_strided_slice %4 {offsets = [0, 2], sizes = [1024, 1], strides = [1, 1]} : vector<1024x3xf32> to vector<1024x1xf32>
    %c2 = arith.constant 2 : index
    %c0_6 = arith.constant 0 : index
    %17 = vector.load %arg3[%c2, %c0_6] : memref<3x64xf32, #tpu.memory_space<vmem>>, vector<1x64xf32>
    %18 = vector.broadcast %16 : vector<1024x1xf32> to vector<1024x64xf32>
    %19 = vector.broadcast %17 : vector<1x64xf32> to vector<1024x64xf32>
    %20 = arith.mulf %18, %19 : vector<1024x64xf32>
    %21 = arith.addf %15, %20 : vector<1024x64xf32>
    %c0_7 = arith.constant 0 : index
    %c0_8 = arith.constant 0 : index
    %22 = vector.load %arg4[%c0_7, %c0_8] : memref<1x64xf32, #tpu.memory_space<vmem>>, vector<1x64xf32>
    %23 = vector.broadcast %22 : vector<1x64xf32> to vector<1024x64xf32>
    %24 = arith.addf %21, %23 : vector<1024x64xf32>
    %cst = arith.constant 0.000000e+00 : f32
    %25 = vector.broadcast %cst : f32 to vector<1024x64xf32>
    %26 = arith.maximumf %24, %25 : vector<1024x64xf32>
    %27 = arith.truncf %26 : vector<1024x64xf32> to vector<1024x64xbf16>
    %c0_9 = arith.constant 0 : index
    %c0_10 = arith.constant 0 : index
    %28 = vector.load %arg5[%c0_9, %c0_10] : memref<64x128xbf16, #tpu.memory_space<vmem>>, vector<64x128xbf16>
    %cst_11 = arith.constant dense<0.000000e+00> : vector<1024x128xf32>
    %29 = tpu.matmul %27, %28, %cst_11 {dimension_numbers = #tpu.dot_dimension_numbers<[1], [0], [0], [1], [0, 0, 1, 1], [], []>} : vector<1024x64xbf16>, vector<64x128xbf16>, vector<1024x128xf32> -> vector<1024x128xf32>
    %c0_12 = arith.constant 0 : index
    %c0_13 = arith.constant 0 : index
    %30 = vector.load %arg6[%c0_12, %c0_13] : memref<1x128xf32, #tpu.memory_space<vmem>>, vector<1x128xf32>
    %31 = vector.broadcast %30 : vector<1x128xf32> to vector<1024x128xf32>
    %32 = arith.addf %29, %31 : vector<1024x128xf32>
    %cst_14 = arith.constant 0.000000e+00 : f32
    %33 = vector.broadcast %cst_14 : f32 to vector<1024x128xf32>
    %34 = arith.maximumf %32, %33 : vector<1024x128xf32>
    %35 = arith.truncf %34 : vector<1024x128xf32> to vector<1024x128xbf16>
    %c0_15 = arith.constant 0 : index
    %c0_16 = arith.constant 0 : index
    %36 = vector.load %arg7[%c0_15, %c0_16] : memref<128x1024xbf16, #tpu.memory_space<vmem>>, vector<128x1024xbf16>
    %cst_17 = arith.constant dense<0.000000e+00> : vector<1024x1024xf32>
    %37 = tpu.matmul %35, %36, %cst_17 {dimension_numbers = #tpu.dot_dimension_numbers<[1], [0], [0], [1], [0, 0, 1, 1], [], []>} : vector<1024x128xbf16>, vector<128x1024xbf16>, vector<1024x1024xf32> -> vector<1024x1024xf32>
    %c0_18 = arith.constant 0 : index
    %c0_19 = arith.constant 0 : index
    %38 = vector.load %arg8[%c0_18, %c0_19] : memref<1x1024xf32, #tpu.memory_space<vmem>>, vector<1x1024xf32>
    %39 = vector.broadcast %38 : vector<1x1024xf32> to vector<1024x1024xf32>
    %40 = arith.addf %37, %39 : vector<1024x1024xf32>
    %41 = vector.shape_cast %40 : vector<1024x1024xf32> to vector<8x128x1024xf32>
    %cst_20 = arith.constant dense<0xFF800000> : vector<8x1024xf32>
    %42 = vector.multi_reduction <maximumf>, %41, %cst_20 [1] : vector<8x128x1024xf32> to vector<8x1024xf32>
    %c0_21 = arith.constant 0 : index
    %c0_22 = arith.constant 0 : index
    %43 = vector.load %arg9[%c0_21, %c0_22] : memref<8x1024xf32, #tpu.memory_space<vmem>>, vector<8x1024xf32>
    %44 = arith.maximumf %43, %42 : vector<8x1024xf32>
    %c0_23 = arith.constant 0 : index
    %c0_24 = arith.constant 0 : index
    %45 = vector.load %arg9[%c0_23, %c0_24] : memref<8x1024xf32, #tpu.memory_space<vmem>>, vector<8x1024xf32>
    tpu.vector_store %arg9[%c0_23, %c0_24], %44 {strides = array<i32>} : memref<8x1024xf32, #tpu.memory_space<vmem>>, vector<8x1024xf32>,
    return
  }
  func.func @transform_0(%arg0: i32, %arg1: i32) -> (i32, i32, i32) {
    %c0_i32 = arith.constant 0 : i32
    %c0_i32_0 = arith.constant 0 : i32
    return %arg0, %arg1, %c0_i32 : i32, i32, i32
  }
  func.func @transform_1(%arg0: i32, %arg1: i32) -> (i32, i32) {
    %c0_i32 = arith.constant 0 : i32
    %c0_i32_0 = arith.constant 0 : i32
    %c0_i32_1 = arith.constant 0 : i32
    return %c0_i32, %c0_i32_0 : i32, i32
  }
  func.func @transform_2(%arg0: i32, %arg1: i32) -> (i32, i32) {
    %c0_i32 = arith.constant 0 : i32
    %c0_i32_0 = arith.constant 0 : i32
    %c0_i32_1 = arith.constant 0 : i32
    return %c0_i32, %c0_i32_0 : i32, i32
  }
  func.func @transform_3(%arg0: i32, %arg1: i32) -> (i32, i32) {
    %c0_i32 = arith.constant 0 : i32
    %c0_i32_0 = arith.constant 0 : i32
    %c0_i32_1 = arith.constant 0 : i32
    return %c0_i32, %c0_i32_0 : i32, i32
  }
  func.func @transform_4(%arg0: i32, %arg1: i32) -> (i32, i32) {
    %c0_i32 = arith.constant 0 : i32
    %c0_i32_0 = arith.constant 0 : i32
    %c0_i32_1 = arith.constant 0 : i32
    return %c0_i32, %c0_i32_0 : i32, i32
  }
  func.func @transform_5(%arg0: i32, %arg1: i32) -> (i32, i32) {
    %c0_i32 = arith.constant 0 : i32
    %c0_i32_0 = arith.constant 0 : i32
    %c0_i32_1 = arith.constant 0 : i32
    return %c0_i32, %c0_i32_0 : i32, i32
  }
  func.func @transform_6(%arg0: i32, %arg1: i32) -> (i32, i32) {
    %c0_i32 = arith.constant 0 : i32
    %c0_i32_0 = arith.constant 0 : i32
    %c0_i32_1 = arith.constant 0 : i32
    return %c0_i32, %c0_i32_0 : i32, i32
  }
  func.func @transform_7(%arg0: i32, %arg1: i32) -> (i32, i32) {
    %c0_i32 = arith.constant 0 : i32
    %c0_i32_0 = arith.constant 0 : i32
    return %arg0, %c0_i32 : i32, i32
  }
}

</mosaic_0001>

<bundles_post_ra>
// kernel: tpu_custom_call.1
= control target key start
LH: loop header
LB: loop body
LE: loop exit
PB: predicated region body
PF: predicated region fallthrough
CT: control target
= control target key end

     0   :  { %12 = vsyncpa [#allocation4], 0  ;;  %s10019_s24 = smov 0   ;;  %s10021_s25 = smov 0   ;;  %s15044_s0 = inlined_call_operand.vmem [shape: f32[8,384,3], index: 0, kind: input, shape index: {}]   ;;  %s15045_s1 = inlined_call_operand.vmem [shape: f32[3,64], index: 1, kind: input, shape index: {}]   ;;  %s15046_s2 = inlined_call_operand.vmem [shape: f32[1,64], index: 2, kind: input, shape index: {}]   ;;  %s15047_s3 = inlined_call_operand.vmem [shape: bf16[64,128], index: 3, kind: input, shape index: {}]   ;;  %s15048_s4 = inlined_call_operand.vmem [shape: f32[1,128], index: 4, kind: input, shape index: {}]   ;;  %s15049_s5 = inlined_call_operand.vmem [shape: bf16[128,1024], index: 5, kind: input, shape index: {}]   ;;  %s15050_s6 = inlined_call_operand.vmem [shape: f32[1,1024], index: 6, kind: input, shape index: {}]   ;;  %s15051_s7 = inlined_call_operand.hbm [shape: f32[8,1024], index: 7, kind: output, shape index: {}]  }
   0x1   :  { %s10023_s26 = smov 0   ;;  %s10025_s27 = smov 0  }
   0x2   :  { %s10027_s28 = smov 0  }
   0x3 LB: > { %s9279_s29 = sadd.s32 4294967295, %s9972_s28   ;;  %s27_s30 = sadd.s32 1, %s9968_s27  ;;  %s9972_s28 = sphi %s10027_s28, %s18_s28   ;;  %s9968_s27 = sphi %s10025_s27, %s15641_s27   ;;  %s9964_s26 = sphi %s10023_s26, %s15640_s26   ;;  %s9960_s25 = sphi %s10021_s25, %s15639_s25   ;;  %s9956_s24 = sphi %s10019_s24, %s15638_s24  }
   0x4   : > { %p28_p0 = scmp.ge.s32.totalorder %s27_s30, 3  ;;  %p46_p1 = scmp.ne.s32.totalorder %s9960_s25, %s9956_s24 }
   0x5   : > { %p47_p2 = scmp.eq.s32.totalorder %s9972_s28, 0  ;;  %s39_s9 = sadd.s32 1, %s9960_s25 }
   0x6   : > { %s15643_s30 = smov (%p28_p0, %s27_s30), 0  ;;  %p9281_p5 = scmp.ge.s32.totalorder %s9972_s28, 3 }
   0x7   : > { %p48_p3 = por %p47_p2, %p46_p1  ;;  %s35_s8 = ssub.s32 %s9968_s27, %s15643_s30 }
   0x8   : > { %p37_p4 = scmp.eq.s32.totalorder %s35_s8, 0  ;;  %242 = sbr.rel (%p9281_p5) target bundleno = 81 (0x51), region = 40 }
   0xa   : > { %s10055_s10 = scalar_select %p37_p4, %s9960_s25, %s39_s9  }
   0xd   : > { %245 = sbr.rel (!%p48_p3) target bundleno = 81 (0x51), region = 44  ;;  %s247_s11 = sand.u32 (%p48_p3), 1, %s9960_s25  }
   0xe   : > { %s9429_s12 = sshll.u32 (%p48_p3), %s9968_s27, 7  ;;  %s9282_s13 = sshll.u32 (%p48_p3), %s247_s11, 10 }
   0xf   : > { %s10063_s16 = scalar_lea.vmem (%p48_p3), %s15044_s0, %s9429_s12  ;;  %s10068_s17 = scalar_lea.vmem (%p48_p3), [#allocation2], %s9282_s13 }
  0x10   : > { %v538_v0 = vld [vmem:[%s10063_s16] sm:$0xff] (%p48_p3)  ;;  %v540_v1 = vld [vmem:[%s10063_s16 + $0x8] sm:$0xff] (%p48_p3)  ;;  %v542_v2 = vld [vmem:[%s10063_s16 + $0x10] sm:$0xff] (%p48_p3) }
  0x11   : > { %539 = vst [vmem:[%s10068_s17] sm:$0xff] (%p48_p3), %v538_v0  ;;  %541 = vst [vmem:[%s10068_s17 + $0x8] sm:$0xff] (%p48_p3), %v540_v1  ;;  %v544_v3 = vld [vmem:[%s10063_s16 + $0x18] sm:$0xff] (%p48_p3)  ;;  %v546_v4 = vld [vmem:[%s10063_s16 + $0x20] sm:$0xff] (%p48_p3) }
  0x12   : > { %543 = vst [vmem:[%s10068_s17 + $0x10] sm:$0xff] %v542_v2  ;;  %v548_v5 = vld [vmem:[%s10063_s16 + $0x28] sm:$0xff]  ;;  %545 = vst [vmem:[%s10068_s17 + $0x18] sm:$0xff] %v544_v3  ;;  %v550_v6 = vld [vmem:[%s10063_s16 + $0x30] sm:$0xff] }
  0x13   : > { %547 = vst [vmem:[%s10068_s17 + $0x20] sm:$0xff] %v546_v4  ;;  %549 = vst [vmem:[%s10068_s17 + $0x28] sm:$0xff] %v548_v5  ;;  %v552_v7 = vld [vmem:[%s10063_s16 + $0x38] sm:$0xff]  ;;  %v554_v8 = vld [vmem:[%s10063_s16 + $0x40] sm:$0xff] }
  0x14   : > { %551 = vst [vmem:[%s10068_s17 + $0x30] sm:$0xff] %v550_v6  ;;  %553 = vst [vmem:[%s10068_s17 + $0x38] sm:$0xff] %v552_v7  ;;  %v556_v9 = vld [vmem:[%s10063_s16 + $0x48] sm:$0xff]  ;;  %v558_v10 = vld [vmem:[%s10063_s16 + $0x50] sm:$0xff] }
  0x15   : > { %555 = vst [vmem:[%s10068_s17 + $0x40] sm:$0xff] %v554_v8  ;;  %v560_v11 = vld [vmem:[%s10063_s16 + $0x58] sm:$0xff]  ;;  %557 = vst [vmem:[%s10068_s17 + $0x48] sm:$0xff] %v556_v9  ;;  %v562_v12 = vld [vmem:[%s10063_s16 + $0x60] sm:$0xff] }
  0x16   : > { %559 = vst [vmem:[%s10068_s17 + $0x50] sm:$0xff] %v558_v10  ;;  %561 = vst [vmem:[%s10068_s17 + $0x58] sm:$0xff] %v560_v11  ;;  %v564_v13 = vld [vmem:[%s10063_s16 + $0x68] sm:$0xff]  ;;  %v566_v14 = vld [vmem:[%s10063_s16 + $0x70] sm:$0xff] }
  0x17   : > { %563 = vst [vmem:[%s10068_s17 + $0x60] sm:$0xff] %v562_v12  ;;  %565 = vst [vmem:[%s10068_s17 + $0x68] sm:$0xff] %v564_v13  ;;  %v568_v15 = vld [vmem:[%s10063_s16 + $0x78] sm:$0xff]  ;;  %v570_v16 = vld [vmem:[%s10063_s16 + $0x180] sm:$0xff] }
  0x18   : > { %567 = vst [vmem:[%s10068_s17 + $0x70] sm:$0xff] %v566_v14  ;;  %v572_v17 = vld [vmem:[%s10063_s16 + $0x188] sm:$0xff]  ;;  %569 = vst [vmem:[%s10068_s17 + $0x78] sm:$0xff] %v568_v15  ;;  %v574_v18 = vld [vmem:[%s10063_s16 + $0x190] sm:$0xff] }
  0x19   : > { %571 = vst [vmem:[%s10068_s17 + $0x80] sm:$0xff] %v570_v16  ;;  %573 = vst [vmem:[%s10068_s17 + $0x88] sm:$0xff] %v572_v17  ;;  %v576_v19 = vld [vmem:[%s10063_s16 + $0x198] sm:$0xff]  ;;  %v578_v20 = vld [vmem:[%s10063_s16 + $0x1a0] sm:$0xff] }
  0x1a   : > { %575 = vst [vmem:[%s10068_s17 + $0x90] sm:$0xff] %v574_v18  ;;  %577 = vst [vmem:[%s10068_s17 + $0x98] sm:$0xff] %v576_v19  ;;  %v580_v21 = vld [vmem:[%s10063_s16 + $0x1a8] sm:$0xff]  ;;  %v582_v22 = vld [vmem:[%s10063_s16 + $0x1b0] sm:$0xff] }
  0x1b   : > { %579 = vst [vmem:[%s10068_s17 + $0xa0] sm:$0xff] %v578_v20  ;;  %v584_v23 = vld [vmem:[%s10063_s16 + $0x1b8] sm:$0xff]  ;;  %581 = vst [vmem:[%s10068_s17 + $0xa8] sm:$0xff] %v580_v21  ;;  %v586_v24 = vld [vmem:[%s10063_s16 + $0x1c0] sm:$0xff] }
  0x1c   : > { %583 = vst [vmem:[%s10068_s17 + $0xb0] sm:$0xff] %v582_v22  ;;  %585 = vst [vmem:[%s10068_s17 + $0xb8] sm:$0xff] %v584_v23  ;;  %v588_v25 = vld [vmem:[%s10063_s16 + $0x1c8] sm:$0xff]  ;;  %v590_v26 = vld [vmem:[%s10063_s16 + $0x1d0] sm:$0xff] }
  0x1d   : > { %587 = vst [vmem:[%s10068_s17 + $0xc0] sm:$0xff] %v586_v24  ;;  %589 = vst [vmem:[%s10068_s17 + $0xc8] sm:$0xff] %v588_v25  ;;  %v592_v27 = vld [vmem:[%s10063_s16 + $0x1d8] sm:$0xff]  ;;  %v594_v28 = vld [vmem:[%s10063_s16 + $0x1e0] sm:$0xff] }
  0x1e   : > { %591 = vst [vmem:[%s10068_s17 + $0xd0] sm:$0xff] %v590_v26  ;;  %v596_v29 = vld [vmem:[%s10063_s16 + $0x1e8] sm:$0xff]  ;;  %593 = vst [vmem:[%s10068_s17 + $0xd8] sm:$0xff] %v592_v27  ;;  %v598_v30 = vld [vmem:[%s10063_s16 + $0x1f0] sm:$0xff] }
  0x1f   : > { %595 = vst [vmem:[%s10068_s17 + $0xe0] sm:$0xff] %v594_v28  ;;  %597 = vst [vmem:[%s10068_s17 + $0xe8] sm:$0xff] %v596_v29  ;;  %v600_v31 = vld [vmem:[%s10063_s16 + $0x1f8] sm:$0xff]  ;;  %v602_v32 = vld [vmem:[%s10063_s16 + $0x300] sm:$0xff] }
  0x20   : > { %599 = vst [vmem:[%s10068_s17 + $0xf0] sm:$0xff] %v598_v30  ;;  %601 = vst [vmem:[%s10068_s17 + $0xf8] sm:$0xff] %v600_v31  ;;  %v604_v33 = vld [vmem:[%s10063_s16 + $0x308] sm:$0xff]  ;;  %v606_v34 = vld [vmem:[%s10063_s16 + $0x310] sm:$0xff] }
  0x21   : > { %603 = vst [vmem:[%s10068_s17 + $0x100] sm:$0xff] %v602_v32  ;;  %v608_v35 = vld [vmem:[%s10063_s16 + $0x318] sm:$0xff]  ;;  %605 = vst [vmem:[%s10068_s17 + $0x108] sm:$0xff] %v604_v33  ;;  %v610_v36 = vld [vmem:[%s10063_s16 + $0x320] sm:$0xff] }
  0x22   : > { %607 = vst [vmem:[%s10068_s17 + $0x110] sm:$0xff] %v606_v34  ;;  %609 = vst [vmem:[%s10068_s17 + $0x118] sm:$0xff] %v608_v35  ;;  %v612_v37 = vld [vmem:[%s10063_s16 + $0x328] sm:$0xff]  ;;  %v614_v38 = vld [vmem:[%s10063_s16 + $0x330] sm:$0xff] }
  0x23   : > { %611 = vst [vmem:[%s10068_s17 + $0x120] sm:$0xff] %v610_v36  ;;  %613 = vst [vmem:[%s10068_s17 + $0x128] sm:$0xff] %v612_v37  ;;  %v616_v39 = vld [vmem:[%s10063_s16 + $0x338] sm:$0xff]  ;;  %v618_v40 = vld [vmem:[%s10063_s16 + $0x340] sm:$0xff] }
  0x24   : > { %615 = vst [vmem:[%s10068_s17 + $0x130] sm:$0xff] %v614_v38  ;;  %v620_v41 = vld [vmem:[%s10063_s16 + $0x348] sm:$0xff]  ;;  %617 = vst [vmem:[%s10068_s17 + $0x138] sm:$0xff] %v616_v39  ;;  %v622_v42 = vld [vmem:[%s10063_s16 + $0x350] sm:$0xff] }
  0x25   : > { %619 = vst [vmem:[%s10068_s17 + $0x140] sm:$0xff] %v618_v40  ;;  %621 = vst [vmem:[%s10068_s17 + $0x148] sm:$0xff] %v620_v41  ;;  %v624_v43 = vld [vmem:[%s10063_s16 + $0x358] sm:$0xff]  ;;  %v626_v44 = vld [vmem:[%s10063_s16 + $0x360] sm:$0xff] }
  0x26   : > { %623 = vst [vmem:[%s10068_s17 + $0x150] sm:$0xff] %v622_v42  ;;  %625 = vst [vmem:[%s10068_s17 + $0x158] sm:$0xff] %v624_v43  ;;  %v628_v45 = vld [vmem:[%s10063_s16 + $0x368] sm:$0xff]  ;;  %v630_v46 = vld [vmem:[%s10063_s16 + $0x370] sm:$0xff] }
  0x27   : > { %627 = vst [vmem:[%s10068_s17 + $0x160] sm:$0xff] %v626_v44  ;;  %v632_v47 = vld [vmem:[%s10063_s16 + $0x378] sm:$0xff]  ;;  %629 = vst [vmem:[%s10068_s17 + $0x168] sm:$0xff] %v628_v45  ;;  %v634_v48 = vld [vmem:[%s10063_s16 + $0x480] sm:$0xff] }
  0x28   : > { %631 = vst [vmem:[%s10068_s17 + $0x170] sm:$0xff] %v630_v46  ;;  %633 = vst [vmem:[%s10068_s17 + $0x178] sm:$0xff] %v632_v47  ;;  %v636_v49 = vld [vmem:[%s10063_s16 + $0x488] sm:$0xff]  ;;  %v638_v50 = vld [vmem:[%s10063_s16 + $0x490] sm:$0xff] }
  0x29   : > { %635 = vst [vmem:[%s10068_s17 + $0x180] sm:$0xff] %v634_v48  ;;  %637 = vst [vmem:[%s10068_s17 + $0x188] sm:$0xff] %v636_v49  ;;  %v640_v51 = vld [vmem:[%s10063_s16 + $0x498] sm:$0xff]  ;;  %v642_v52 = vld [vmem:[%s10063_s16 + $0x4a0] sm:$0xff] }
  0x2a   : > { %639 = vst [vmem:[%s10068_s17 + $0x190] sm:$0xff] %v638_v50  ;;  %v644_v53 = vld [vmem:[%s10063_s16 + $0x4a8] sm:$0xff]  ;;  %641 = vst [vmem:[%s10068_s17 + $0x198] sm:$0xff] %v640_v51  ;;  %v646_v54 = vld [vmem:[%s10063_s16 + $0x4b0] sm:$0xff] }
  0x2b   : > { %643 = vst [vmem:[%s10068_s17 + $0x1a0] sm:$0xff] %v642_v52  ;;  %645 = vst [vmem:[%s10068_s17 + $0x1a8] sm:$0xff] %v644_v53  ;;  %v648_v55 = vld [vmem:[%s10063_s16 + $0x4b8] sm:$0xff]  ;;  %v650_v56 = vld [vmem:[%s10063_s16 + $0x4c0] sm:$0xff] }
  0x2c   : > { %647 = vst [vmem:[%s10068_s17 + $0x1b0] sm:$0xff] %v646_v54  ;;  %649 = vst [vmem:[%s10068_s17 + $0x1b8] sm:$0xff] %v648_v55  ;;  %v652_v57 = vld [vmem:[%s10063_s16 + $0x4c8] sm:$0xff]  ;;  %v654_v58 = vld [vmem:[%s10063_s16 + $0x4d0] sm:$0xff] }
  0x2d   : > { %651 = vst [vmem:[%s10068_s17 + $0x1c0] sm:$0xff] %v650_v56  ;;  %v656_v59 = vld [vmem:[%s10063_s16 + $0x4d8] sm:$0xff]  ;;  %653 = vst [vmem:[%s10068_s17 + $0x1c8] sm:$0xff] %v652_v57  ;;  %v658_v60 = vld [vmem:[%s10063_s16 + $0x4e0] sm:$0xff] }
  0x2e   : > { %655 = vst [vmem:[%s10068_s17 + $0x1d0] sm:$0xff] %v654_v58  ;;  %657 = vst [vmem:[%s10068_s17 + $0x1d8] sm:$0xff] %v656_v59  ;;  %v660_v61 = vld [vmem:[%s10063_s16 + $0x4e8] sm:$0xff]  ;;  %v662_v62 = vld [vmem:[%s10063_s16 + $0x4f0] sm:$0xff] }
  0x2f   : > { %659 = vst [vmem:[%s10068_s17 + $0x1e0] sm:$0xff] %v658_v60  ;;  %661 = vst [vmem:[%s10068_s17 + $0x1e8] sm:$0xff] %v660_v61  ;;  %v664_v63 = vld [vmem:[%s10063_s16 + $0x4f8] sm:$0xff]  ;;  %v666_v0 = vld [vmem:[%s10063_s16 + $0x600] sm:$0xff] }
  0x30   : > { %663 = vst [vmem:[%s10068_s17 + $0x1f0] sm:$0xff] %v662_v62  ;;  %v668_v1 = vld [vmem:[%s10063_s16 + $0x608] sm:$0xff]  ;;  %665 = vst [vmem:[%s10068_s17 + $0x1f8] sm:$0xff] %v664_v63  ;;  %v670_v2 = vld [vmem:[%s10063_s16 + $0x610] sm:$0xff] }
  0x31   : > { %667 = vst [vmem:[%s10068_s17 + $0x200] sm:$0xff] %v666_v0  ;;  %669 = vst [vmem:[%s10068_s17 + $0x208] sm:$0xff] %v668_v1  ;;  %v672_v3 = vld [vmem:[%s10063_s16 + $0x618] sm:$0xff]  ;;  %v674_v4 = vld [vmem:[%s10063_s16 + $0x620] sm:$0xff] }
  0x32   : > { %671 = vst [vmem:[%s10068_s17 + $0x210] sm:$0xff] %v670_v2  ;;  %673 = vst [vmem:[%s10068_s17 + $0x218] sm:$0xff] %v672_v3  ;;  %v676_v5 = vld [vmem:[%s10063_s16 + $0x628] sm:$0xff]  ;;  %v678_v6 = vld [vmem:[%s10063_s16 + $0x630] sm:$0xff] }
  0x33   : > { %675 = vst [vmem:[%s10068_s17 + $0x220] sm:$0xff] %v674_v4  ;;  %v680_v7 = vld [vmem:[%s10063_s16 + $0x638] sm:$0xff]  ;;  %677 = vst [vmem:[%s10068_s17 + $0x228] sm:$0xff] %v676_v5  ;;  %v682_v8 = vld [vmem:[%s10063_s16 + $0x640] sm:$0xff] }
  0x34   : > { %679 = vst [vmem:[%s10068_s17 + $0x230] sm:$0xff] %v678_v6  ;;  %681 = vst [vmem:[%s10068_s17 + $0x238] sm:$0xff] %v680_v7  ;;  %v684_v9 = vld [vmem:[%s10063_s16 + $0x648] sm:$0xff]  ;;  %v686_v10 = vld [vmem:[%s10063_s16 + $0x650] sm:$0xff] }
  0x35   : > { %683 = vst [vmem:[%s10068_s17 + $0x240] sm:$0xff] %v682_v8  ;;  %685 = vst [vmem:[%s10068_s17 + $0x248] sm:$0xff] %v684_v9  ;;  %v688_v11 = vld [vmem:[%s10063_s16 + $0x658] sm:$0xff]  ;;  %v690_v12 = vld [vmem:[%s10063_s16 + $0x660] sm:$0xff] }
  0x36   : > { %687 = vst [vmem:[%s10068_s17 + $0x250] sm:$0xff] %v686_v10  ;;  %v692_v13 = vld [vmem:[%s10063_s16 + $0x668] sm:$0xff]  ;;  %689 = vst [vmem:[%s10068_s17 + $0x258] sm:$0xff] %v688_v11  ;;  %v694_v14 = vld [vmem:[%s10063_s16 + $0x670] sm:$0xff] }
  0x37   : > { %691 = vst [vmem:[%s10068_s17 + $0x260] sm:$0xff] %v690_v12  ;;  %693 = vst [vmem:[%s10068_s17 + $0x268] sm:$0xff] %v692_v13  ;;  %v696_v15 = vld [vmem:[%s10063_s16 + $0x678] sm:$0xff]  ;;  %v698_v16 = vld [vmem:[%s10063_s16 + $0x780] sm:$0xff] }
  0x38   : > { %695 = vst [vmem:[%s10068_s17 + $0x270] sm:$0xff] %v694_v14  ;;  %697 = vst [vmem:[%s10068_s17 + $0x278] sm:$0xff] %v696_v15  ;;  %v700_v17 = vld [vmem:[%s10063_s16 + $0x788] sm:$0xff]  ;;  %v702_v18 = vld [vmem:[%s10063_s16 + $0x790] sm:$0xff] }
  0x39   : > { %699 = vst [vmem:[%s10068_s17 + $0x280] sm:$0xff] %v698_v16  ;;  %v704_v19 = vld [vmem:[%s10063_s16 + $0x798] sm:$0xff]  ;;  %701 = vst [vmem:[%s10068_s17 + $0x288] sm:$0xff] %v700_v17  ;;  %v706_v20 = vld [vmem:[%s10063_s16 + $0x7a0] sm:$0xff] }
  0x3a   : > { %703 = vst [vmem:[%s10068_s17 + $0x290] sm:$0xff] %v702_v18  ;;  %705 = vst [vmem:[%s10068_s17 + $0x298] sm:$0xff] %v704_v19  ;;  %v708_v21 = vld [vmem:[%s10063_s16 + $0x7a8] sm:$0xff]  ;;  %v710_v22 = vld [vmem:[%s10063_s16 + $0x7b0] sm:$0xff] }
  0x3b   : > { %707 = vst [vmem:[%s10068_s17 + $0x2a0] sm:$0xff] %v706_v20  ;;  %709 = vst [vmem:[%s10068_s17 + $0x2a8] sm:$0xff] %v708_v21  ;;  %v712_v23 = vld [vmem:[%s10063_s16 + $0x7b8] sm:$0xff]  ;;  %v714_v24 = vld [vmem:[%s10063_s16 + $0x7c0] sm:$0xff] }
  0x3c   : > { %711 = vst [vmem:[%s10068_s17 + $0x2b0] sm:$0xff] %v710_v22  ;;  %v716_v25 = vld [vmem:[%s10063_s16 + $0x7c8] sm:$0xff]  ;;  %713 = vst [vmem:[%s10068_s17 + $0x2b8] sm:$0xff] %v712_v23  ;;  %v718_v26 = vld [vmem:[%s10063_s16 + $0x7d0] sm:$0xff] }
  0x3d   : > { %715 = vst [vmem:[%s10068_s17 + $0x2c0] sm:$0xff] %v714_v24  ;;  %717 = vst [vmem:[%s10068_s17 + $0x2c8] sm:$0xff] %v716_v25  ;;  %v720_v27 = vld [vmem:[%s10063_s16 + $0x7d8] sm:$0xff]  ;;  %v722_v28 = vld [vmem:[%s10063_s16 + $0x7e0] sm:$0xff] }
  0x3e   : > { %719 = vst [vmem:[%s10068_s17 + $0x2d0] sm:$0xff] %v718_v26  ;;  %721 = vst [vmem:[%s10068_s17 + $0x2d8] sm:$0xff] %v720_v27  ;;  %v724_v29 = vld [vmem:[%s10063_s16 + $0x7e8] sm:$0xff]  ;;  %v726_v30 = vld [vmem:[%s10063_s16 + $0x7f0] sm:$0xff] }
  0x3f   : > { %723 = vst [vmem:[%s10068_s17 + $0x2e0] sm:$0xff] %v722_v28  ;;  %v728_v31 = vld [vmem:[%s10063_s16 + $0x7f8] sm:$0xff]  ;;  %725 = vst [vmem:[%s10068_s17 + $0x2e8] sm:$0xff] %v724_v29  ;;  %v730_v32 = vld [vmem:[%s10063_s16 + $0x900] sm:$0xff] }
  0x40   : > { %727 = vst [vmem:[%s10068_s17 + $0x2f0] sm:$0xff] %v726_v30  ;;  %729 = vst [vmem:[%s10068_s17 + $0x2f8] sm:$0xff] %v728_v31  ;;  %v732_v33 = vld [vmem:[%s10063_s16 + $0x908] sm:$0xff]  ;;  %v734_v34 = vld [vmem:[%s10063_s16 + $0x910] sm:$0xff] }
  0x41   : > { %731 = vst [vmem:[%s10068_s17 + $0x300] sm:$0xff] %v730_v32  ;;  %733 = vst [vmem:[%s10068_s17 + $0x308] sm:$0xff] %v732_v33  ;;  %v736_v35 = vld [vmem:[%s10063_s16 + $0x918] sm:$0xff]  ;;  %v738_v36 = vld [vmem:[%s10063_s16 + $0x920] sm:$0xff] }
  0x42   : > { %735 = vst [vmem:[%s10068_s17 + $0x310] sm:$0xff] %v734_v34  ;;  %v740_v37 = vld [vmem:[%s10063_s16 + $0x928] sm:$0xff]  ;;  %737 = vst [vmem:[%s10068_s17 + $0x318] sm:$0xff] %v736_v35  ;;  %v742_v38 = vld [vmem:[%s10063_s16 + $0x930] sm:$0xff] }
  0x43   : > { %739 = vst [vmem:[%s10068_s17 + $0x320] sm:$0xff] %v738_v36  ;;  %741 = vst [vmem:[%s10068_s17 + $0x328] sm:$0xff] %v740_v37  ;;  %v744_v39 = vld [vmem:[%s10063_s16 + $0x938] sm:$0xff]  ;;  %v746_v40 = vld [vmem:[%s10063_s16 + $0x940] sm:$0xff] }
  0x44   : > { %743 = vst [vmem:[%s10068_s17 + $0x330] sm:$0xff] %v742_v38  ;;  %745 = vst [vmem:[%s10068_s17 + $0x338] sm:$0xff] %v744_v39  ;;  %v748_v41 = vld [vmem:[%s10063_s16 + $0x948] sm:$0xff]  ;;  %v750_v42 = vld [vmem:[%s10063_s16 + $0x950] sm:$0xff] }
  0x45   : > { %747 = vst [vmem:[%s10068_s17 + $0x340] sm:$0xff] %v746_v40  ;;  %v752_v43 = vld [vmem:[%s10063_s16 + $0x958] sm:$0xff]  ;;  %749 = vst [vmem:[%s10068_s17 + $0x348] sm:$0xff] %v748_v41  ;;  %v754_v44 = vld [vmem:[%s10063_s16 + $0x960] sm:$0xff] }
  0x46   : > { %751 = vst [vmem:[%s10068_s17 + $0x350] sm:$0xff] %v750_v42  ;;  %753 = vst [vmem:[%s10068_s17 + $0x358] sm:$0xff] %v752_v43  ;;  %v756_v45 = vld [vmem:[%s10063_s16 + $0x968] sm:$0xff]  ;;  %v758_v46 = vld [vmem:[%s10063_s16 + $0x970] sm:$0xff] }
  0x47   : > { %755 = vst [vmem:[%s10068_s17 + $0x360] sm:$0xff] %v754_v44  ;;  %757 = vst [vmem:[%s10068_s17 + $0x368] sm:$0xff] %v756_v45  ;;  %v760_v47 = vld [vmem:[%s10063_s16 + $0x978] sm:$0xff]  ;;  %v762_v48 = vld [vmem:[%s10063_s16 + $0xa80] sm:$0xff] }
  0x48   : > { %759 = vst [vmem:[%s10068_s17 + $0x370] sm:$0xff] %v758_v46  ;;  %v764_v49 = vld [vmem:[%s10063_s16 + $0xa88] sm:$0xff]  ;;  %761 = vst [vmem:[%s10068_s17 + $0x378] sm:$0xff] %v760_v47  ;;  %v766_v50 = vld [vmem:[%s10063_s16 + $0xa90] sm:$0xff] }
  0x49   : > { %763 = vst [vmem:[%s10068_s17 + $0x380] sm:$0xff] %v762_v48  ;;  %765 = vst [vmem:[%s10068_s17 + $0x388] sm:$0xff] %v764_v49  ;;  %v768_v51 = vld [vmem:[%s10063_s16 + $0xa98] sm:$0xff]  ;;  %v770_v52 = vld [vmem:[%s10063_s16 + $0xaa0] sm:$0xff] }
  0x4a   : > { %767 = vst [vmem:[%s10068_s17 + $0x390] sm:$0xff] %v766_v50  ;;  %769 = vst [vmem:[%s10068_s17 + $0x398] sm:$0xff] %v768_v51  ;;  %v772_v53 = vld [vmem:[%s10063_s16 + $0xaa8] sm:$0xff]  ;;  %v774_v54 = vld [vmem:[%s10063_s16 + $0xab0] sm:$0xff] }
  0x4b   : > { %771 = vst [vmem:[%s10068_s17 + $0x3a0] sm:$0xff] %v770_v52  ;;  %v776_v55 = vld [vmem:[%s10063_s16 + $0xab8] sm:$0xff]  ;;  %773 = vst [vmem:[%s10068_s17 + $0x3a8] sm:$0xff] %v772_v53  ;;  %v778_v56 = vld [vmem:[%s10063_s16 + $0xac0] sm:$0xff] }
  0x4c   : > { %775 = vst [vmem:[%s10068_s17 + $0x3b0] sm:$0xff] %v774_v54  ;;  %777 = vst [vmem:[%s10068_s17 + $0x3b8] sm:$0xff] %v776_v55  ;;  %v780_v57 = vld [vmem:[%s10063_s16 + $0xac8] sm:$0xff]  ;;  %v782_v58 = vld [vmem:[%s10063_s16 + $0xad0] sm:$0xff] }
  0x4d   : > { %779 = vst [vmem:[%s10068_s17 + $0x3c0] sm:$0xff] %v778_v56  ;;  %781 = vst [vmem:[%s10068_s17 + $0x3c8] sm:$0xff] %v780_v57  ;;  %v784_v59 = vld [vmem:[%s10063_s16 + $0xad8] sm:$0xff]  ;;  %v786_v60 = vld [vmem:[%s10063_s16 + $0xae0] sm:$0xff] }
  0x4e   : > { %783 = vst [vmem:[%s10068_s17 + $0x3d0] sm:$0xff] %v782_v58  ;;  %v788_v61 = vld [vmem:[%s10063_s16 + $0xae8] sm:$0xff]  ;;  %785 = vst [vmem:[%s10068_s17 + $0x3d8] sm:$0xff] %v784_v59  ;;  %v790_v62 = vld [vmem:[%s10063_s16 + $0xaf0] sm:$0xff] }
  0x4f   : > { %787 = vst [vmem:[%s10068_s17 + $0x3e0] sm:$0xff] %v786_v60  ;;  %789 = vst [vmem:[%s10068_s17 + $0x3e8] sm:$0xff] %v788_v61  ;;  %v792_v63 = vld [vmem:[%s10063_s16 + $0xaf8] sm:$0xff] }
  0x50   : > { %791 = vst [vmem:[%s10068_s17 + $0x3f0] sm:$0xff] %v790_v62  ;;  %793 = vst [vmem:[%s10068_s17 + $0x3f8] sm:$0xff] %v792_v63 }
  0x51 PF: > { %p9285_p6 = scmp.ge.s32.totalorder %s9972_s28, 1  ;;  %p798_p7 = scmp.lt.s32.totalorder %s9972_s28, 4 }
  0x53   : > { %p799_p8 = pnand %p9285_p6, %p798_p7 }
  0x55   : > { %802 = sbr.rel (%p799_p8) target bundleno = 2569 (0xa09), region = 82 }
  0x5a   : > { %s805_s18 = sand.u32 1, %s9956_s24   ;;  %p9287_p9 = scmp.ne.s32.totalorder %s9964_s26, 0 }
  0x5b   : > { %s9286_s19 = sshll.u32 %s805_s18, 10 }
  0x5c   : > { %s10326_s20 = scalar_lea.vmem [#allocation2], %s9286_s19  ;;  %837 = sbr.rel (%p9287_p9) target bundleno = 102 (0x66), region = 90 }
  0x61   : > { %v9974_v0 = vmov -inf  }
  0x62   : > { %838 = vst [vmem:[#allocation3] sm:$0xff] %v9974_v0  ;;  %839 = vst [vmem:[#allocation3 + $0x8] sm:$0xff] %v9974_v0 }
  0x63   : > { %840 = vst [vmem:[#allocation3 + $0x10] sm:$0xff] %v9974_v0  ;;  %841 = vst [vmem:[#allocation3 + $0x18] sm:$0xff] %v9974_v0 }
  0x64   : > { %842 = vst [vmem:[#allocation3 + $0x20] sm:$0xff] %v9974_v0  ;;  %843 = vst [vmem:[#allocation3 + $0x28] sm:$0xff] %v9974_v0 }
  0x65   : > { %844 = vst [vmem:[#allocation3 + $0x30] sm:$0xff] %v9974_v0  ;;  %845 = vst [vmem:[#allocation3 + $0x38] sm:$0xff] %v9974_v0 }
  0x66 PF: > { %v848_v1 = vld [vmem:[%s10326_s20 + $0x10] sm:$0xff]  ;;  %v10331_v2 = vld [vmem:[%s10326_s20] sm:$0xff]  ;;  %v15056_v3 = vmov 0   ;;  %v10337_v4 = vld [vmem:[%s10326_s20 + $0x18] sm:$0xff]  ;;  %v15054_v7 = vmov 1   ;;  %v15052_v11 = vmov 2  }
  0x67   : > { %9694 = vset.pattern.permute.xlu1 %v15056_v3  ;;  %9693 = vset.pattern.permute.xlu0 %v15056_v3  ;;  %v10340_v5 = vld [vmem:[%s10326_s20 + $0x8] sm:$0xff]  ;;  %v10345_v6 = vld [vmem:[%s10326_s20 + $0x20] sm:$0xff]  ;;  %v10351_v8 = vld [vmem:[%s10326_s20 + $0x38] sm:$0xff]  ;;  %vm3659_vm0 = vcmask 523264   ;;  %vm9123_vm1 = vcmask 1041409   ;;  %vm9125_vm2 = vcmask 1042434  }
  0x68   : > { %987 = vperm.xlu1 %9694, %v848_v1   ;;  %977 = vperm.xlu0 %9693, %v10331_v2   ;;  %v10355_v9 = vld [vmem:[%s10326_s20 + $0x48] sm:$0xff]  ;;  %v10360_v10 = vld [vmem:[%s10326_s20 + $0x50] sm:$0xff]  ;;  %v10365_v12 = vld [vmem:[%s10326_s20 + $0x60] sm:$0xff]  ;;  %vm9127_vm3 = vcmask 1043459   ;;  %vm9129_vm4 = vcmask 1044484   ;;  %vm9131_vm5 = vcmask 1045509  }
  0x69   : > { %v10370_v13 = vld [vmem:[%s10326_s20 + $0x88] sm:$0xff]  ;;  %v10375_v15 = vld [vmem:[%s10326_s20 + $0x90] sm:$0xff]  ;;  %v10380_v16 = vld [vmem:[%s10326_s20 + $0x200] sm:$0xff]  ;;  %vm9133_vm6 = vcmask 1046534   ;;  %vm9135_vm7 = vcmask 1047559   ;;  %s9978_s21 = smov [#allocation3]  }
  0x6a   : > { %v851_v14 = vld [vmem:[%s10326_s20 + $0x28] sm:$0xff]  ;;  %v852_v18 = vld [vmem:[%s10326_s20 + $0x30] sm:$0xff]  ;;  %v10391_v19 = vld [vmem:[%s10326_s20 + $0xb8] sm:$0xff]  ;;  %s9220_s22 = sshll.u32 %s9978_s21, 4  ;;  %p15014_p10 = scmp.eq.s32.totalorder %s9279_s29, 2  ;;  %s9221_s22 = int_to_ptr.vmem [resolvable:$true] %s9220_s22 }
  0x6b   : > { %v10385_v17 = vld [vmem:[%s10326_s20 + $0xa8] sm:$0xff]  ;;  %v10400_v21 = vld [vmem:[%s10326_s20 + $0x230] sm:$0xff]  ;;  %v10405_v22 = vld [vmem:[%s10326_s20 + $0x240] sm:$0xff]  ;;  %s9906_s24 = scalar_lea.vmem %s9221_s22, 1024  ;;  %p9913_p0 = scmp.lt.s32.totalorder %s9221_s22, %s9221_s22 }
  0x6c   : > { %992 = vperm.xlu1 %9694, %v10337_v4   ;;  %982 = vperm.xlu0 %9693, %v10340_v5   ;;  %v10396_v20 = vld [vmem:[%s10326_s20 + $0x228] sm:$0xff]  ;;  %v854_v24 = vld [vmem:[%s10326_s20 + $0x40] sm:$0xff]  ;;  %v10415_v25 = vld [vmem:[%s10326_s20 + $0xd8] sm:$0xff]  ;;  %p9907_p11 = scmp.ne.s32.totalorder %s9221_s22, %s9906_s24  ;;  %p9914_p1 = scmp.lt.s32.totalorder %s9906_s24, %s9906_s24 }
  0x6d   : > { %v10410_v23 = vld [vmem:[%s10326_s20 + $0xc8] sm:$0xff]  ;;  %v10425_v27 = vld [vmem:[%s10326_s20 + $0x270] sm:$0xff]  ;;  %v10430_v28 = vld [vmem:[%s10326_s20 + $0x280] sm:$0xff] }
  0x6e   : > { %v10420_v26 = vld [vmem:[%s10326_s20 + $0x268] sm:$0xff]  ;;  %v857_v29 = vld [vmem:[%s10326_s20 + $0x58] sm:$0xff]  ;;  %v10450_v33 = vld [vmem:[%s10326_s20 + $0x2b0] sm:$0xff]  ;;  %p9908_p12 = pnand %p9907_p11, %p15014_p10  ;;  %p9915_p2 = por %p9914_p1, %p9913_p0 }
  0x6f   : > { %v10436_v30 = vld [vmem:[%s10326_s20 + $0xe8] sm:$0xff]  ;;  %v10440_v31 = vld [vmem:[%s10326_s20 + $0xf8] sm:$0xff]  ;;  %v10455_v34 = vld [vmem:[%s10326_s20 + $0x2c0] sm:$0xff] }
  0x70   : > { %9695 = vset.pattern.permute.xlu1 %v15054_v7  ;;  %997 = vperm.xlu0 %9693, %v10345_v6   ;;  %v10445_v32 = vld [vmem:[%s10326_s20 + $0x2a8] sm:$0xff]  ;;  %v10465_v37 = vld [vmem:[%s10326_s20 + $0x118] sm:$0xff]  ;;  %v10475_v39 = vld [vmem:[%s10326_s20 + $0x70] sm:$0xff]  ;;  %p9909_p13 = pneg %p9908_p12 }
  0x71   : > { %1749 = vperm.xlu1 %9695, %v10331_v2   ;;  %v879_v35 = vld [vmem:[%s10326_s20 + $0x108] sm:$0xff]  ;;  %v10478_v40 = vld [vmem:[%s10326_s20 + $0x2f0] sm:$0xff]  ;;  %v10484_v41 = vld [vmem:[%s10326_s20 + $0x78] sm:$0xff] }
  0x72   : > { %v10460_v36 = vld [vmem:[%s10326_s20 + $0x68] sm:$0xff]  ;;  %v10487_v42 = vld [vmem:[%s10326_s20 + $0x300] sm:$0xff]  ;;  %v885_v44 = vld [vmem:[%s10326_s20 + $0x138] sm:$0xff]  ;;  %p9916_p3 = pnand %p9915_p2, %p9909_p13 }
  0x73   : > { %v10470_v38 = vld [vmem:[%s10326_s20 + $0x2e8] sm:$0xff]  ;;  %v10508_v50 = vld [vmem:[%s10326_s20 + $0x330] sm:$0xff]  ;;  %v862_v52 = vld [vmem:[%s10326_s20 + $0x80] sm:$0xff] }
  0x74   : > { %1012 = vperm.xlu0 %9693, %v10351_v8   ;;  %v883_v43 = vld [vmem:[%s10326_s20 + $0x128] sm:$0xff]  ;;  %v886_v54 = vld [vmem:[%s10326_s20 + $0x140] sm:$0xff]  ;;  %v888_v60 = vld [vmem:[%s10326_s20 + $0x150] sm:$0xff] }
  0x75   : > { %1757 = vperm.xlu1 %9695, %v848_v1   ;;  %v947_v47 = vld [vmem:[%s10326_s20 + $0x328] sm:$0xff]  ;;  %v865_v63 = vld [vmem:[%s10326_s20 + $0x98] sm:$0xff] }
  0x76   : > { %v951_v57 = vld [vmem:[%s10326_s20 + $0x348] sm:$0xff]  ;;  %v953_v0 = vld [vmem:[%s10326_s20 + $0x358] sm:$0xff] }
  0x78   : > { %1022 = vperm.xlu0 %9693, %v10355_v9  }
  0x79   : > { %1761 = vperm.xlu1 %9695, %v10337_v4  }
  0x7c   : > { %1027 = vperm.xlu0 %9693, %v10360_v10  }
  0x7d   : > { %9696 = vset.pattern.permute.xlu1 %v15052_v11 }
  0x7e   : > { %2526 = vperm.xlu1 %9696, %v10340_v5  }
  0x80   : > { %1037 = vperm.xlu0 %9693, %v10365_v12  }
  0x82   : > { %2530 = vperm.xlu1 %9696, %v848_v1  }
  0x84   : > { %1062 = vperm.xlu0 %9693, %v10370_v13  }
  0x86   : > { %9697 = vset.pattern.permute.xlu1 %v15056_v3 }
  0x87   : > { %1002 = vperm.xlu1 %9697, %v851_v14  }
  0x88   : > { %1067 = vperm.xlu0 %9693, %v10375_v15  }
  0x8b   : > { %9698 = vset.pattern.permute.xlu1 %v15054_v7 }
  0x8c   : > { %1769 = vperm.xlu1 %9698, %v851_v14   ;;  %1297 = vperm.xlu0 %9693, %v10380_v16  }
  0x90   : > { %9699 = vset.pattern.permute.xlu1 %v15056_v3  ;;  %1082 = vperm.xlu0 %9693, %v10385_v17  }
  0x91   : > { %1007 = vperm.xlu1 %9699, %v852_v18  }
  0x94   : > { %1092 = vperm.xlu0 %9693, %v10391_v19  }
  0x95   : > { %9700 = vset.pattern.permute.xlu1 %v15054_v7 }
  0x96   : > { %1773 = vperm.xlu1 %9700, %v852_v18  }
  0x98   : > { %1322 = vperm.xlu0 %9693, %v10396_v20  }
  0x9a   : > { %1777 = vperm.xlu1 %9700, %v10351_v8  }
  0x9c   : > { %1327 = vperm.xlu0 %9693, %v10400_v21  }
  0x9e   : > { %9701 = vset.pattern.permute.xlu1 %v15052_v11 }
  0x9f   : > { %2542 = vperm.xlu1 %9701, %v851_v14  }
  0xa0   : > { %1337 = vperm.xlu0 %9693, %v10405_v22  }
  0xa3   : > { %2546 = vperm.xlu1 %9701, %v852_v18   ;;  %v891_v18 = vld [vmem:[%s10326_s20 + $0x168] sm:$0xff] }
  0xa4   : > { %1102 = vperm.xlu0 %9693, %v10410_v23  }
  0xa7   : > { %9702 = vset.pattern.permute.xlu1 %v15056_v3 }
  0xa8   : > { %1017 = vperm.xlu1 %9702, %v854_v24   ;;  %1112 = vperm.xlu0 %9693, %v10415_v25  }
  0xac   : > { %9703 = vset.pattern.permute.xlu1 %v15054_v7  ;;  %1362 = vperm.xlu0 %9693, %v10420_v26  }
  0xad   : > { %1781 = vperm.xlu1 %9703, %v854_v24  }
  0xb0   : > { %1367 = vperm.xlu0 %9693, %v10425_v27  }
  0xb1   : > { %1785 = vperm.xlu1 %9703, %v10355_v9  }
  0xb4   : > { %1377 = vperm.xlu0 %9693, %v10430_v28  }
  0xb5   : > { %9704 = vset.pattern.permute.xlu1 %v15056_v3 }
  0xb6   : > { %1032 = vperm.xlu1 %9704, %v857_v29  }
  0xb8   : > { %1122 = vperm.xlu0 %9693, %v10436_v30  }
  0xba   : > { %9705 = vset.pattern.permute.xlu1 %v15054_v7 }
  0xbb   : > { %1793 = vperm.xlu1 %9705, %v857_v29  }
  0xbc   : > { %1132 = vperm.xlu0 %9693, %v10440_v31  }
  0xbf   : > { %9706 = vset.pattern.permute.xlu1 %v15052_v11 }
  0xc0   : > { %2554 = vperm.xlu1 %9706, %v854_v24   ;;  %1402 = vperm.xlu0 %9693, %v10445_v32  }
  0xc4   : > { %2562 = vperm.xlu1 %9706, %v10360_v10   ;;  %1407 = vperm.xlu0 %9693, %v10450_v33  }
  0xc8   : > { %2566 = vperm.xlu1 %9706, %v857_v29   ;;  %1417 = vperm.xlu0 %9693, %v10455_v34   ;;  %v893_v29 = vld [vmem:[%s10326_s20 + $0x178] sm:$0xff] }
  0xcc   : > { %9707 = vset.pattern.permute.xlu1 %v15056_v3  ;;  %1142 = vperm.xlu0 %9693, %v879_v35  }
  0xcd   : > { %1042 = vperm.xlu1 %9707, %v10460_v36  }
  0xd0   : > { %1152 = vperm.xlu0 %9693, %v10465_v37  }
  0xd1   : > { %9708 = vset.pattern.permute.xlu1 %v15054_v7 }
  0xd2   : > { %1797 = vperm.xlu1 %9708, %v10365_v12  }
  0xd4   : > { %1442 = vperm.xlu0 %9693, %v10470_v38  }
  0xd6   : > { %9709 = vset.pattern.permute.xlu1 %v15056_v3 }
  0xd7   : > { %1047 = vperm.xlu1 %9709, %v10475_v39  }
  0xd8   : > { %1447 = vperm.xlu0 %9693, %v10478_v40  }
  0xdb   : > { %1052 = vperm.xlu1 %9709, %v10484_v41  }
  0xdc   : > { %1457 = vperm.xlu0 %9693, %v10487_v42  }
  0xdf   : > { %9710 = vset.pattern.permute.xlu1 %v15054_v7 }
  0xe0   : > { %1809 = vperm.xlu1 %9710, %v10484_v41   ;;  %1162 = vperm.xlu0 %9693, %v883_v43  }
  0xe3   : > { %v10495_v45 = vpop.permute.xlu1 %987  ;;  %v10497_v46 = vpop.permute.xlu0 %977 }
  0xe4   : > { %9711 = vset.pattern.permute.xlu1 %v15052_v11  ;;  %1172 = vperm.xlu0 %9693, %v885_v44   ;;  %v894_v44 = vld [vmem:[%s10326_s20 + $0x180] sm:$0xff] }
  0xe5   : > { %2574 = vperm.xlu1 %9711, %v10460_v36  }
  0xe7   : > { %v10502_v48 = vpop.permute.xlu1 %992  ;;  %v10504_v49 = vpop.permute.xlu0 %982 }
  0xe8   : > { %1482 = vperm.xlu0 %9693, %v947_v47  }
  0xe9   : > { %2578 = vperm.xlu1 %9711, %v10475_v39  }
  0xeb   : > { %v10510_v51 = vpop.permute.xlu0 %997 }
  0xec   : > { %v10513_v53 = vpop.permute.xlu1 %1749  ;;  %1487 = vperm.xlu0 %9693, %v10508_v50  }
  0xed   : > { %9712 = vset.pattern.permute.xlu1 %v15056_v3 }
  0xee   : > { %1057 = vperm.xlu1 %9712, %v862_v52  }
  0xef   : > { %v10518_v55 = vpop.permute.xlu0 %1012 }
  0xf0   : > { %15177 = vst [vmem:[#allocation6_spill] sm:$0xff] %v10518_v55  ;;  %v10520_v56 = vpop.permute.xlu1 %1757  ;;  %1177 = vperm.xlu0 %9693, %v886_v54  }
  0xf2   : > { %9713 = vset.pattern.permute.xlu1 %v15054_v7 }
  0xf3   : > { %1813 = vperm.xlu1 %9713, %v862_v52   ;;  %v10524_v58 = vpop.permute.xlu0 %1022 }
  0xf4   : > { %15178 = vst [vmem:[#allocation7_spill] sm:$0xff] %v10524_v58  ;;  %v10526_v59 = vpop.permute.xlu1 %1761  ;;  %1502 = vperm.xlu0 %9693, %v951_v57   ;;  %v959_v57 = vld [vmem:[%s10326_s20 + $0x388] sm:$0xff] }
  0xf7   : > { %1817 = vperm.xlu1 %9713, %v10370_v13   ;;  %v10530_v61 = vpop.permute.xlu0 %1027 }
  0xf8   : > { %15179 = vst [vmem:[#allocation8_spill] sm:$0xff] %v10530_v61  ;;  %1187 = vperm.xlu0 %9693, %v888_v60  }
  0xf9   : > { %v10532_v62 = vpop.permute.xlu1 %2526 }
  0xfa   : > { %15180 = vst [vmem:[#allocation9_spill] sm:$0xff] %v10532_v62 }
  0xfb   : > { %9714 = vset.pattern.permute.xlu1 %v15056_v3  ;;  %v10537_v1 = vpop.permute.xlu0 %1037 }
  0xfc   : > { %15181 = vst [vmem:[#allocation10_spill] sm:$0xff] %v10537_v1  ;;  %1072 = vperm.xlu1 %9714, %v865_v63   ;;  %1512 = vperm.xlu0 %9693, %v953_v0  }
  0xfd   : > { %v10539_v14 = vpop.permute.xlu1 %2530 }
  0xff   : > { %v10542_v24 = vpop.permute.xlu0 %1062 }
 0x100   : > { %15182 = vst [vmem:[#allocation11_spill] sm:$0xff] %v10542_v24  ;;  %9715 = vset.pattern.permute.xlu1 %v15054_v7  ;;  %1202 = vperm.xlu0 %9693, %v891_v18   ;;  %v896_v18 = vld [vmem:[%s10326_s20 + $0x190] sm:$0xff] }
 0x101   : > { %1825 = vperm.xlu1 %9715, %v865_v63  }
 0x102   : > { %v10546_v35 = vpop.permute.xlu1 %1002 }
 0x103   : > { %v10548_v43 = vpop.permute.xlu0 %1067 }
 0x104   : > { %15183 = vst [vmem:[#allocation12_spill] sm:$0xff] %v10548_v43  ;;  %1212 = vperm.xlu0 %9693, %v893_v29   ;;  %v913_v43 = vld [vmem:[%s10326_s20 + $0x218] sm:$0xff] }
 0x105   : > { %9716 = vset.pattern.permute.xlu1 %v15052_v11 }
 0x106   : > { %2586 = vperm.xlu1 %9716, %v862_v52   ;;  %v10566_v52 = vld [vmem:[%s10326_s20 + $0x208] sm:$0xff] }
 0x107   : > { %v10552_v47 = vpop.permute.xlu1 %1769  ;;  %v10554_v54 = vpop.permute.xlu0 %1297 }
 0x108   : > { %15184 = vst [vmem:[#allocation13_spill] sm:$0xff] %v10554_v54  ;;  %1217 = vperm.xlu0 %9693, %v894_v44   ;;  %v961_v44 = vld [vmem:[%s10326_s20 + $0x398] sm:$0xff]  ;;  %v10586_v54 = vld [vmem:[%s10326_s20 + $0x210] sm:$0xff] }
 0x10a   : > { %2594 = vperm.xlu1 %9716, %v10375_v15  }
 0x10b   : > { %v10558_v60 = vpop.permute.xlu0 %1082 }
 0x10c   : > { %15185 = vst [vmem:[#allocation14_spill] sm:$0xff] %v10558_v60  ;;  %v10560_v0 = vpop.permute.xlu1 %1007  ;;  %1542 = vperm.xlu0 %9693, %v959_v57   ;;  %v899_v57 = vld [vmem:[%s10326_s20 + $0x1a8] sm:$0xff]  ;;  %v901_v60 = vld [vmem:[%s10326_s20 + $0x1b8] sm:$0xff] }
 0x10e   : > { %2598 = vperm.xlu1 %9716, %v865_v63  }
 0x10f   : > { %v10563_v29 = vpop.permute.xlu0 %1092 }
 0x110   : > { %15186 = vst [vmem:[#allocation15_spill] sm:$0xff] %v10563_v29  ;;  %1227 = vperm.xlu0 %9693, %v896_v18   ;;  %v15189_v29 = vmov 1  }
 0x111   : > { %v10568_v11 = vpop.permute.xlu1 %1773 }
 0x112   : > { %9717 = vset.pattern.permute.xlu1 %v15056_v3 }
 0x113   : > { %1302 = vperm.xlu1 %9717, %v10566_v52   ;;  %v10573_v7 = vpop.permute.xlu0 %1322 }
 0x114   : > { %15187 = vst [vmem:[#allocation16_spill] sm:$0xff] %v10573_v7  ;;  %1552 = vperm.xlu0 %9693, %v961_v44   ;;  %v15192_v44 = vmov 0  }
 0x115   : > { %v10575_v63 = vpop.permute.xlu1 %1777 }
 0x116   : > { %15188 = vst [vmem:[#allocation17_spill] sm:$0xff] %v10575_v63  ;;  %v902_v63 = vld [vmem:[%s10326_s20 + $0x1c0] sm:$0xff] }
 0x117   : > { %9718 = vset.pattern.permute.xlu1 %v15189_v29  ;;  %v10579_v18 = vpop.permute.xlu0 %1327 }
 0x118   : > { %15190 = vst [vmem:[#allocation18_spill] sm:$0xff] %v10579_v18  ;;  %2005 = vperm.xlu1 %9718, %v10380_v16   ;;  %1242 = vperm.xlu0 %9693, %v899_v57   ;;  %v967_v57 = vld [vmem:[%s10326_s20 + $0x3c8] sm:$0xff] }
 0x11a   : > { %v10583_v3 = vpop.permute.xlu1 %2542 }
 0x11b   : > { %v10588_v7 = vpop.permute.xlu0 %1337 }
 0x11c   : > { %15191 = vst [vmem:[#allocation19_spill] sm:$0xff] %v10588_v7  ;;  %9719 = vset.pattern.permute.xlu1 %v15192_v44  ;;  %1252 = vperm.xlu0 %9693, %v901_v60   ;;  %v904_v60 = vld [vmem:[%s10326_s20 + $0x1d0] sm:$0xff] }
 0x11d   : > { %1307 = vperm.xlu1 %9719, %v10586_v54  }
 0x11e   : > { %v10593_v18 = vpop.permute.xlu1 %2546 }
 0x11f   : > { %v10596_v24 = vpop.permute.xlu0 %1102 }
 0x120   : > { %15193 = vst [vmem:[#allocation20_spill] sm:$0xff] %v10596_v24  ;;  %1257 = vperm.xlu0 %9693, %v902_v63   ;;  %v969_v63 = vld [vmem:[%s10326_s20 + $0x3d8] sm:$0xff]  ;;  %v15198_v24 = vmov 2  }
 0x121   : > { %1312 = vperm.xlu1 %9719, %v913_v43  }
 0x123   : > { %v10599_v1 = vpop.permute.xlu1 %1017  ;;  %v10601_v7 = vpop.permute.xlu0 %1112 }
 0x124   : > { %15194 = vst [vmem:[#allocation21_spill] sm:$0xff] %v10599_v1  ;;  %15195 = vst [vmem:[#allocation22_spill] sm:$0xff] %v10601_v7  ;;  %1582 = vperm.xlu0 %9693, %v967_v57   ;;  %v10617_v57 = vld [vmem:[%s10326_s20 + $0xa0] sm:$0xff]  ;;  %v907_v7 = vld [vmem:[%s10326_s20 + $0x1e8] sm:$0xff] }
 0x125   : > { %9720 = vset.pattern.permute.xlu1 %v15189_v29 }
 0x126   : > { %2017 = vperm.xlu1 %9720, %v913_v43  }
 0x127   : > { %v10605_v62 = vpop.permute.xlu0 %1362 }
 0x128   : > { %15196 = vst [vmem:[#allocation23_spill] sm:$0xff] %v10605_v62  ;;  %v10607_v61 = vpop.permute.xlu1 %1781  ;;  %1267 = vperm.xlu0 %9693, %v904_v60  }
 0x129   : > { %15197 = vst [vmem:[#allocation24_spill] sm:$0xff] %v10607_v61  ;;  %v909_v61 = vld [vmem:[%s10326_s20 + $0x1f8] sm:$0xff] }
 0x12a   : > { %9721 = vset.pattern.permute.xlu1 %v15198_v24 }
 0x12b   : > { %2782 = vperm.xlu1 %9721, %v10566_v52   ;;  %v10612_v1 = vpop.permute.xlu0 %1367 }
 0x12c   : > { %15199 = vst [vmem:[#allocation25_spill] sm:$0xff] %v10612_v1  ;;  %v10614_v58 = vpop.permute.xlu1 %1785  ;;  %1592 = vperm.xlu0 %9693, %v969_v63  }
 0x12d   : > { %15200 = vst [vmem:[#allocation26_spill] sm:$0xff] %v10614_v58 }
 0x12f   : > { %9722 = vset.pattern.permute.xlu1 %v15192_v44  ;;  %v10621_v62 = vpop.permute.xlu0 %1377 }
 0x130   : > { %15201 = vst [vmem:[#allocation27_spill] sm:$0xff] %v10621_v62  ;;  %1077 = vperm.xlu1 %9722, %v10617_v57   ;;  %1282 = vperm.xlu0 %9693, %v907_v7  }
 0x131   : > { %v10624_v60 = vpop.permute.xlu1 %1032 }
 0x133   : > { %v10627_v55 = vpop.permute.xlu0 %1122 }
 0x134   : > { %15202 = vst [vmem:[#allocation28_spill] sm:$0xff] %v10627_v55  ;;  %9723 = vset.pattern.permute.xlu1 %v15189_v29  ;;  %1292 = vperm.xlu0 %9693, %v909_v61  }
 0x135   : > { %1829 = vperm.xlu1 %9723, %v10617_v57  }
 0x136   : > { %v10631_v63 = vpop.permute.xlu1 %1793 }
 0x137   : > { %v10633_v1 = vpop.permute.xlu0 %1132 }
 0x138   : > { %15203 = vst [vmem:[#allocation29_spill] sm:$0xff] %v10633_v1  ;;  %9825 = vset.pattern.permute.xlu0 %v15189_v29  ;;  %v868_v1 = vld [vmem:[%s10326_s20 + $0xb0] sm:$0xff] }
 0x139   : > { %1833 = vperm.xlu1 %9723, %v10385_v17   ;;  %1753 = vperm.xlu0 %9825, %v10340_v5  }
 0x13b   : > { %v10638_v7 = vpop.permute.xlu1 %2554  ;;  %v10640_v62 = vpop.permute.xlu0 %1402 }
 0x13c   : > { %15204 = vst [vmem:[#allocation30_spill] sm:$0xff] %v10640_v62 }
 0x13d   : > { %9724 = vset.pattern.permute.xlu1 %v15198_v24  ;;  %1765 = vperm.xlu0 %9825, %v10345_v6  }
 0x13e   : > { %2790 = vperm.xlu1 %9724, %v913_v43  }
 0x13f   : > { %v10644_v61 = vpop.permute.xlu1 %2562  ;;  %v10646_v55 = vpop.permute.xlu0 %1407 }
 0x140   : > { %15205 = vst [vmem:[#allocation31_spill] sm:$0xff] %v10644_v61  ;;  %15206 = vst [vmem:[#allocation32_spill] sm:$0xff] %v10646_v55 }
 0x141   : > { %1789 = vperm.xlu0 %9825, %v10360_v10  }
 0x142   : > { %9725 = vset.pattern.permute.xlu1 %v15192_v44 }
 0x143   : > { %1087 = vperm.xlu1 %9725, %v868_v1   ;;  %v10651_v5 = vpop.permute.xlu1 %2566  ;;  %v10653_v58 = vpop.permute.xlu0 %1417 }
 0x144   : > { %15207 = vst [vmem:[#allocation33_spill] sm:$0xff] %v10651_v5  ;;  %15208 = vst [vmem:[#allocation34_spill] sm:$0xff] %v10653_v58 }
 0x145   : > { %1801 = vperm.xlu0 %9825, %v10460_v36  }
 0x147   : > { %9726 = vset.pattern.permute.xlu1 %v15189_v29  ;;  %v10657_v62 = vpop.permute.xlu0 %1142 }
 0x148   : > { %15209 = vst [vmem:[#allocation35_spill] sm:$0xff] %v10657_v62  ;;  %1837 = vperm.xlu1 %9726, %v868_v1   ;;  %v10659_v43 = vpop.permute.xlu1 %1042 }
 0x149   : > { %15210 = vst [vmem:[#allocation36_spill] sm:$0xff] %v10659_v43  ;;  %1805 = vperm.xlu0 %9825, %v10475_v39  }
 0x14b   : > { %v10662_v10 = vpop.permute.xlu0 %1152 }
 0x14c   : > { %15211 = vst [vmem:[#allocation37_spill] sm:$0xff] %v10662_v10  ;;  %1841 = vperm.xlu1 %9726, %v10391_v19  }
 0x14d   : > { %v10665_v55 = vpop.permute.xlu1 %1797  ;;  %1821 = vperm.xlu0 %9825, %v10375_v15   ;;  %v914_v15 = vld [vmem:[%s10326_s20 + $0x220] sm:$0xff] }
 0x14e   : > { %15212 = vst [vmem:[#allocation38_spill] sm:$0xff] %v10665_v55 }
 0x14f   : > { %v10668_v36 = vpop.permute.xlu0 %1442 }
 0x150   : > { %15213 = vst [vmem:[#allocation39_spill] sm:$0xff] %v10668_v36  ;;  %9727 = vset.pattern.permute.xlu1 %v15198_v24 }
 0x151   : > { %2606 = vperm.xlu1 %9727, %v10385_v17   ;;  %2009 = vperm.xlu0 %9825, %v10566_v52   ;;  %v10686_v17 = vld [vmem:[%s10326_s20 + $0x248] sm:$0xff] }
 0x152   : > { %v10673_v62 = vpop.permute.xlu1 %1047 }
 0x153   : > { %15214 = vst [vmem:[#allocation40_spill] sm:$0xff] %v10673_v62  ;;  %v10675_v39 = vpop.permute.xlu0 %1447 }
 0x154   : > { %15215 = vst [vmem:[#allocation41_spill] sm:$0xff] %v10675_v39 }
 0x155   : > { %2610 = vperm.xlu1 %9727, %v868_v1   ;;  %2013 = vperm.xlu0 %9825, %v10586_v54   ;;  %v10695_v1 = vld [vmem:[%s10326_s20 + $0x250] sm:$0xff] }
 0x156   : > { %v10678_v10 = vpop.permute.xlu1 %1052 }
 0x157   : > { %15216 = vst [vmem:[#allocation42_spill] sm:$0xff] %v10678_v10  ;;  %v10680_v58 = vpop.permute.xlu0 %1457 }
 0x158   : > { %15217 = vst [vmem:[#allocation43_spill] sm:$0xff] %v10680_v58 }
 0x159   : > { %9728 = vset.pattern.permute.xlu1 %v15192_v44  ;;  %2029 = vperm.xlu0 %9825, %v10400_v21  }
 0x15a   : > { %1317 = vperm.xlu1 %9728, %v914_v15  }
 0x15b   : > { %v10688_v52 = vpop.permute.xlu1 %1809  ;;  %v10690_v39 = vpop.permute.xlu0 %1162 }
 0x15c   : > { %15218 = vst [vmem:[#allocation44_spill] sm:$0xff] %v10688_v52  ;;  %15219 = vst [vmem:[#allocation45_spill] sm:$0xff] %v10690_v39  ;;  %v917_v39 = vld [vmem:[%s10326_s20 + $0x238] sm:$0xff]  ;;  %v10710_v52 = vld [vmem:[%s10326_s20 + $0x288] sm:$0xff] }
 0x15d   : > { %2041 = vperm.xlu0 %9825, %v10686_v17  }
 0x15e   : > { %9729 = vset.pattern.permute.xlu1 %v15189_v29 }
 0x15f   : > { %2021 = vperm.xlu1 %9729, %v914_v15   ;;  %v10697_v58 = vpop.permute.xlu0 %1172 }
 0x160   : > { %15220 = vst [vmem:[#allocation46_spill] sm:$0xff] %v10697_v58  ;;  %v10699_v36 = vpop.permute.xlu1 %2574 }
 0x161   : > { %15221 = vst [vmem:[#allocation47_spill] sm:$0xff] %v10699_v36  ;;  %2045 = vperm.xlu0 %9825, %v10695_v1   ;;  %v10719_v36 = vld [vmem:[%s10326_s20 + $0x290] sm:$0xff] }
 0x163   : > { %2025 = vperm.xlu1 %9729, %v10396_v20   ;;  %v10703_v62 = vpop.permute.xlu0 %1482 }
 0x164   : > { %15222 = vst [vmem:[#allocation48_spill] sm:$0xff] %v10703_v62  ;;  %v10705_v10 = vpop.permute.xlu1 %2578 }
 0x165   : > { %15223 = vst [vmem:[#allocation49_spill] sm:$0xff] %v10705_v10  ;;  %2061 = vperm.xlu0 %9825, %v10425_v27  }
 0x167   : > { %9730 = vset.pattern.permute.xlu1 %v15192_v44  ;;  %v10713_v43 = vpop.permute.xlu0 %1487 }
 0x168   : > { %15224 = vst [vmem:[#allocation50_spill] sm:$0xff] %v10713_v43  ;;  %1332 = vperm.xlu1 %9730, %v917_v39  }
 0x169   : > { %v10715_v58 = vpop.permute.xlu1 %1057  ;;  %2073 = vperm.xlu0 %9825, %v10710_v52  }
 0x16a   : > { %15225 = vst [vmem:[#allocation51_spill] sm:$0xff] %v10715_v58  ;;  %v10734_v58 = vld [vmem:[%s10326_s20 + $0x2c8] sm:$0xff] }
 0x16b   : > { %v10721_v62 = vpop.permute.xlu0 %1177  ;;  %15230 = vst [vmem:[#allocation56_spill] sm:$0xff] %v10734_v58 }
 0x16c   : > { %15226 = vst [vmem:[#allocation52_spill] sm:$0xff] %v10721_v62  ;;  %9731 = vset.pattern.permute.xlu1 %v15189_v29 }
 0x16d   : > { %2033 = vperm.xlu1 %9731, %v917_v39   ;;  %2077 = vperm.xlu0 %9825, %v10719_v36  }
 0x16e   : > { %v10725_v10 = vpop.permute.xlu1 %1813 }
 0x16f   : > { %15227 = vst [vmem:[#allocation53_spill] sm:$0xff] %v10725_v10  ;;  %v10727_v55 = vpop.permute.xlu0 %1502  ;;  %v10741_v10 = vld [vmem:[%s10326_s20 + $0x2d0] sm:$0xff] }
 0x170   : > { %15228 = vst [vmem:[#allocation54_spill] sm:$0xff] %v10727_v55 }
 0x171   : > { %9732 = vset.pattern.permute.xlu1 %v15198_v24  ;;  %2093 = vperm.xlu0 %9825, %v10450_v33  }
 0x172   : > { %2794 = vperm.xlu1 %9732, %v914_v15   ;;  %v10731_v43 = vpop.permute.xlu1 %1817 }
 0x173   : > { %15229 = vst [vmem:[#allocation55_spill] sm:$0xff] %v10731_v43  ;;  %v10736_v62 = vpop.permute.xlu0 %1187 }
 0x174   : > { %15231 = vst [vmem:[#allocation57_spill] sm:$0xff] %v10736_v62  ;;  %v943_v62 = vld [vmem:[%s10326_s20 + $0x308] sm:$0xff] }
 0x175   : > { %2105 = vperm.xlu0 %9825, %v10734_v58  }
 0x176   : > { %2802 = vperm.xlu1 %9732, %v10400_v21  }
 0x177   : > { %v10743_v55 = vpop.permute.xlu1 %1072  ;;  %v10745_v61 = vpop.permute.xlu0 %1512 }
 0x178   : > { %15232 = vst [vmem:[#allocation58_spill] sm:$0xff] %v10743_v55  ;;  %15233 = vst [vmem:[#allocation59_spill] sm:$0xff] %v10745_v61  ;;  %v10761_v61 = vld [vmem:[%s10326_s20 + $0x310] sm:$0xff] }
 0x179   : > { %2109 = vperm.xlu0 %9825, %v10741_v10  }
 0x17a   : > { %2806 = vperm.xlu1 %9732, %v917_v39  }
 0x17b   : > { %v10748_v33 = vpop.permute.xlu0 %1202 }
 0x17c   : > { %15234 = vst [vmem:[#allocation60_spill] sm:$0xff] %v10748_v33  ;;  %v10750_v15 = vpop.permute.xlu1 %1825 }
 0x17d   : > { %15235 = vst [vmem:[#allocation61_spill] sm:$0xff] %v10750_v15  ;;  %2125 = vperm.xlu0 %9825, %v10478_v40  }
 0x17e   : > { %9733 = vset.pattern.permute.xlu1 %v15192_v44 }
 0x17f   : > { %1342 = vperm.xlu1 %9733, %v10686_v17   ;;  %v10756_v21 = vpop.permute.xlu0 %1212 }
 0x180   : > { %15236 = vst [vmem:[#allocation62_spill] sm:$0xff] %v10756_v21  ;;  %v921_v21 = vld [vmem:[%s10326_s20 + $0x258] sm:$0xff] }
 0x181   : > { %v10758_v43 = vpop.permute.xlu1 %2586  ;;  %2137 = vperm.xlu0 %9825, %v943_v62  }
 0x182   : > { %15237 = vst [vmem:[#allocation63_spill] sm:$0xff] %v10758_v43  ;;  %v892_v43 = vld [vmem:[%s10326_s20 + $0x170] sm:$0xff] }
 0x183   : > { %9734 = vset.pattern.permute.xlu1 %v15189_v29  ;;  %v10764_v39 = vpop.permute.xlu0 %1217 }
 0x184   : > { %15238 = vst [vmem:[#allocation64_spill] sm:$0xff] %v10764_v39  ;;  %2037 = vperm.xlu1 %9734, %v10405_v22   ;;  %v887_v39 = vld [vmem:[%s10326_s20 + $0x148] sm:$0xff] }
 0x185   : > { %v10767_v40 = vpop.permute.xlu1 %2594  ;;  %2141 = vperm.xlu0 %9825, %v10761_v61  }
 0x186   : > { %15239 = vst [vmem:[#allocation65_spill] sm:$0xff] %v10767_v40 }
 0x187   : > { %v10770_v33 = vpop.permute.xlu0 %1542 }
 0x188   : > { %15240 = vst [vmem:[#allocation66_spill] sm:$0xff] %v10770_v33  ;;  %9735 = vset.pattern.permute.xlu1 %v15192_v44  ;;  %v10784_v33 = vld [vmem:[%s10326_s20 + $0x158] sm:$0xff] }
 0x189   : > { %1347 = vperm.xlu1 %9735, %v10695_v1   ;;  %v10774_v62 = vpop.permute.xlu1 %2598  ;;  %2157 = vperm.xlu0 %9825, %v10508_v50   ;;  %15244 = vst [vmem:[#allocation70_spill] sm:$0xff] %v10784_v33  ;;  %v890_v50 = vld [vmem:[%s10326_s20 + $0x160] sm:$0xff] }
 0x18a   : > { %15241 = vst [vmem:[#allocation67_spill] sm:$0xff] %v10774_v62 }
 0x18b   : > { %v10779_v55 = vpop.permute.xlu0 %1227 }
 0x18c   : > { %15242 = vst [vmem:[#allocation68_spill] sm:$0xff] %v10779_v55 }
 0x18d   : > { %1352 = vperm.xlu1 %9735, %v921_v21   ;;  %1913 = vperm.xlu0 %9825, %v887_v39   ;;  %v955_v39 = vld [vmem:[%s10326_s20 + $0x368] sm:$0xff] }
 0x18e   : > { %v10781_v40 = vpop.permute.xlu1 %1302 }
 0x18f   : > { %15243 = vst [vmem:[#allocation69_spill] sm:$0xff] %v10781_v40  ;;  %v10786_v15 = vpop.permute.xlu0 %1552 }
 0x190   : > { %15245 = vst [vmem:[#allocation71_spill] sm:$0xff] %v10786_v15 }
 0x191   : > { %9736 = vset.pattern.permute.xlu1 %v15189_v29  ;;  %1921 = vperm.xlu0 %9825, %v10784_v33   ;;  %v10803_v33 = vld [vmem:[%s10326_s20 + $0xc0] sm:$0xff] }
 0x192   : > { %2049 = vperm.xlu1 %9736, %v921_v21  }
 0x193   : > { %v10791_v62 = vpop.permute.xlu1 %2005  ;;  %v10793_v55 = vpop.permute.xlu0 %1242 }
 0x194   : > { %15246 = vst [vmem:[#allocation72_spill] sm:$0xff] %v10791_v62  ;;  %15247 = vst [vmem:[#allocation73_spill] sm:$0xff] %v10793_v55  ;;  %v895_v55 = vld [vmem:[%s10326_s20 + $0x188] sm:$0xff] }
 0x195   : > { %1925 = vperm.xlu0 %9825, %v890_v50  }
 0x196   : > { %9737 = vset.pattern.permute.xlu1 %v15198_v24 }
 0x197   : > { %2814 = vperm.xlu1 %9737, %v10686_v17   ;;  %v10798_v40 = vpop.permute.xlu0 %1252  ;;  %v957_v17 = vld [vmem:[%s10326_s20 + $0x378] sm:$0xff] }
 0x198   : > { %15248 = vst [vmem:[#allocation74_spill] sm:$0xff] %v10798_v40  ;;  %v10800_v15 = vpop.permute.xlu1 %1307 }
 0x199   : > { %15249 = vst [vmem:[#allocation75_spill] sm:$0xff] %v10800_v15  ;;  %2185 = vperm.xlu0 %9825, %v955_v39   ;;  %v897_v15 = vld [vmem:[%s10326_s20 + $0x198] sm:$0xff] }
 0x19b   : > { %9738 = vset.pattern.permute.xlu1 %v15192_v44  ;;  %v10807_v62 = vpop.permute.xlu0 %1257 }
 0x19c   : > { %15250 = vst [vmem:[#allocation76_spill] sm:$0xff] %v10807_v62  ;;  %1097 = vperm.xlu1 %9738, %v10803_v33   ;;  %v10810_v50 = vpop.permute.xlu1 %1312 }
 0x19d   : > { %15251 = vst [vmem:[#allocation77_spill] sm:$0xff] %v10810_v50  ;;  %1933 = vperm.xlu0 %9825, %v892_v43   ;;  %v898_v50 = vld [vmem:[%s10326_s20 + $0x1a0] sm:$0xff] }
 0x19f   : > { %v10813_v40 = vpop.permute.xlu0 %1582 }
 0x1a0   : > { %15252 = vst [vmem:[#allocation78_spill] sm:$0xff] %v10813_v40  ;;  %9739 = vset.pattern.permute.xlu1 %v15189_v29 }
 0x1a1   : > { %1845 = vperm.xlu1 %9739, %v10803_v33   ;;  %v10817_v39 = vpop.permute.xlu1 %2017  ;;  %2193 = vperm.xlu0 %9825, %v957_v17  }
 0x1a2   : > { %15253 = vst [vmem:[#allocation79_spill] sm:$0xff] %v10817_v39 }
 0x1a3   : > { %v10820_v62 = vpop.permute.xlu0 %1267 }
 0x1a4   : > { %15254 = vst [vmem:[#allocation80_spill] sm:$0xff] %v10820_v62  ;;  %v872_v62 = vld [vmem:[%s10326_s20 + $0xd0] sm:$0xff] }
 0x1a5   : > { %1849 = vperm.xlu1 %9739, %v10410_v23   ;;  %1945 = vperm.xlu0 %9825, %v895_v55   ;;  %v963_v55 = vld [vmem:[%s10326_s20 + $0x3a8] sm:$0xff] }
 0x1a6   : > { %v10823_v43 = vpop.permute.xlu1 %2782 }
 0x1a7   : > { %15255 = vst [vmem:[#allocation81_spill] sm:$0xff] %v10823_v43  ;;  %v10826_v40 = vpop.permute.xlu0 %1592 }
 0x1a8   : > { %15256 = vst [vmem:[#allocation82_spill] sm:$0xff] %v10826_v40 }
 0x1a9   : > { %9740 = vset.pattern.permute.xlu1 %v15198_v24  ;;  %1953 = vperm.xlu0 %9825, %v897_v15   ;;  %v900_v15 = vld [vmem:[%s10326_s20 + $0x1b0] sm:$0xff] }
 0x1aa   : > { %2822 = vperm.xlu1 %9740, %v921_v21  }
 0x1ab   : > { %v10830_v39 = vpop.permute.xlu1 %1077  ;;  %v10832_v17 = vpop.permute.xlu0 %1282 }
 0x1ac   : > { %15257 = vst [vmem:[#allocation83_spill] sm:$0xff] %v10830_v39  ;;  %15258 = vst [vmem:[#allocation84_spill] sm:$0xff] %v10832_v17 }
 0x1ad   : > { %1957 = vperm.xlu0 %9825, %v898_v50   ;;  %v965_v50 = vld [vmem:[%s10326_s20 + $0x3b8] sm:$0xff] }
 0x1ae   : > { %9741 = vset.pattern.permute.xlu1 %v15192_v44 }
 0x1af   : > { %1107 = vperm.xlu1 %9741, %v872_v62   ;;  %v10837_v43 = vpop.permute.xlu0 %1292 }
 0x1b0   : > { %15259 = vst [vmem:[#allocation85_spill] sm:$0xff] %v10837_v43  ;;  %v10839_v40 = vpop.permute.xlu1 %1829 }
 0x1b1   : > { %15260 = vst [vmem:[#allocation86_spill] sm:$0xff] %v10839_v40  ;;  %2217 = vperm.xlu0 %9825, %v963_v55   ;;  %v903_v55 = vld [vmem:[%s10326_s20 + $0x1c8] sm:$0xff] }
 0x1b3   : > { %9742 = vset.pattern.permute.xlu1 %v15189_v29 }
 0x1b4   : > { %1853 = vperm.xlu1 %9742, %v872_v62   ;;  %v10843_v21 = vpop.permute.xlu1 %1833  ;;  %v10845_v17 = vpop.permute.xlu0 %1753 }
 0x1b5   : > { %15261 = vst [vmem:[#allocation87_spill] sm:$0xff] %v10843_v21  ;;  %1965 = vperm.xlu0 %9825, %v900_v15   ;;  %v905_v21 = vld [vmem:[%s10326_s20 + $0x1d8] sm:$0xff] }
 0x1b8   : > { %1857 = vperm.xlu1 %9742, %v10415_v25   ;;  %v10849_v39 = vpop.permute.xlu0 %1765 }
 0x1b9   : > { %15262 = vst [vmem:[#allocation88_spill] sm:$0xff] %v10849_v39  ;;  %v10851_v43 = vpop.permute.xlu1 %2790  ;;  %2225 = vperm.xlu0 %9825, %v965_v50   ;;  %v906_v39 = vld [vmem:[%s10326_s20 + $0x1e0] sm:$0xff] }
 0x1ba   : > { %15263 = vst [vmem:[#allocation89_spill] sm:$0xff] %v10851_v43  ;;  %v922_v50 = vld [vmem:[%s10326_s20 + $0x260] sm:$0xff] }
 0x1bc   : > { %9743 = vset.pattern.permute.xlu1 %v15198_v24  ;;  %v10855_v40 = vpop.permute.xlu0 %1789 }
 0x1bd   : > { %2622 = vperm.xlu1 %9743, %v10410_v23   ;;  %1977 = vperm.xlu0 %9825, %v903_v55   ;;  %v971_v23 = vld [vmem:[%s10326_s20 + $0x3e8] sm:$0xff] }
 0x1be   : > { %v10858_v15 = vpop.permute.xlu1 %1087 }
 0x1bf   : > { %15264 = vst [vmem:[#allocation90_spill] sm:$0xff] %v10858_v15 }
 0x1c0   : > { %v10861_v58 = vpop.permute.xlu0 %1801 }
 0x1c1   : > { %2626 = vperm.xlu1 %9743, %v872_v62   ;;  %1985 = vperm.xlu0 %9825, %v905_v21   ;;  %v908_v62 = vld [vmem:[%s10326_s20 + $0x1f0] sm:$0xff] }
 0x1c3   : > { %v10864_v43 = vpop.permute.xlu1 %1837 }
 0x1c4   : > { %15265 = vst [vmem:[#allocation91_spill] sm:$0xff] %v10864_v43  ;;  %v10867_v5 = vpop.permute.xlu0 %1805 }
 0x1c5   : > { %15266 = vst [vmem:[#allocation92_spill] sm:$0xff] %v10867_v5  ;;  %9744 = vset.pattern.permute.xlu1 %v15192_v44  ;;  %1989 = vperm.xlu0 %9825, %v906_v39   ;;  %v973_v5 = vld [vmem:[%s10326_s20 + $0x3f8] sm:$0xff] }
 0x1c6   : > { %1357 = vperm.xlu1 %9744, %v922_v50   ;;  %v9829_v39 = vld [vmem:[%s15047_s3 + $0x18] sm:$0xff]  }
 0x1c7   : > { %v10871_v55 = vpop.permute.xlu1 %1841  ;;  %9498 = vmatprep.subr.bf16.mxu0 %v9829_v39  ;;  %9634 = vmatprep.subr.bf16.mxu1 %v9829_v39 }
 0x1c8   : > { %15267 = vst [vmem:[#allocation93_spill] sm:$0xff] %v10871_v55  ;;  %v10873_v15 = vpop.permute.xlu0 %1821  ;;  %9499 = vmatpush3.bf16.msra.mxu0 %v9829_v39  ;;  %9638 = vmatpush3.bf16.msra.mxu1 %v9829_v39 }
 0x1c9   : > { %15268 = vst [vmem:[#allocation94_spill] sm:$0xff] %v10873_v15  ;;  %2249 = vperm.xlu0 %9825, %v971_v23   ;;  %v925_v23 = vld [vmem:[%s10326_s20 + $0x278] sm:$0xff] }
 0x1ca   : > { %9745 = vset.pattern.permute.xlu1 %v15189_v29 }
 0x1cb   : > { %2053 = vperm.xlu1 %9745, %v922_v50  }
 0x1cc   : > { %v10877_v21 = vpop.permute.xlu1 %2606  ;;  %v10879_v43 = vpop.permute.xlu0 %2009 }
 0x1cd   : > { %15269 = vst [vmem:[#allocation95_spill] sm:$0xff] %v10877_v21  ;;  %15270 = vst [vmem:[#allocation96_spill] sm:$0xff] %v10879_v43  ;;  %1997 = vperm.xlu0 %9825, %v908_v62   ;;  %v9830_v62 = vld [vmem:[%s15047_s3 + $0x10] sm:$0xff]  }
 0x1ce   : > { %9500 = vmatprep.subr.bf16.mxu0 %v9830_v62  ;;  %9635 = vmatprep.subr.bf16.mxu1 %v9830_v62 }
 0x1cf   : > { %2057 = vperm.xlu1 %9745, %v10420_v26   ;;  %9501 = vmatpush3.bf16.msra.mxu0 %v9830_v62 }
 0x1d0   : > { %v10886_v55 = vpop.permute.xlu1 %2610  ;;  %v10888_v15 = vpop.permute.xlu0 %2013  ;;  %9639 = vmatpush3.bf16.msra.mxu1 %v9830_v62 }
 0x1d1   : > { %15271 = vst [vmem:[#allocation97_spill] sm:$0xff] %v10886_v55  ;;  %2257 = vperm.xlu0 %9825, %v973_v5   ;;  %v9831_v5 = vld [vmem:[%s15047_s3 + $0x8] sm:$0xff]  }
 0x1d2   : > { %9502 = vmatprep.subr.bf16.mxu0 %v9831_v5  ;;  %9636 = vmatprep.subr.bf16.mxu1 %v9831_v5 }
 0x1d3   : > { %9746 = vset.pattern.permute.xlu1 %v15192_v44  ;;  %9503 = vmatpush3.bf16.msra.mxu0 %v9831_v5 }
 0x1d4   : > { %1372 = vperm.xlu1 %9746, %v925_v23   ;;  %v10895_v21 = vpop.permute.xlu0 %2029  ;;  %9640 = vmatpush3.bf16.msra.mxu1 %v9831_v5 }
 0x1d5   : > { %v10897_v43 = vpop.permute.xlu1 %1317  ;;  %9827 = vset.pattern.permute.xlu0 %v15198_v24 }
 0x1d6   : > { %15272 = vst [vmem:[#allocation98_spill] sm:$0xff] %v10897_v43  ;;  %2522 = vperm.xlu0 %9827, %v10331_v2   ;;  %v9832_v2 = vld [vmem:[%s15047_s3] sm:$0xff]  }
 0x1d7   : > { %9504 = vmatprep.subr.bf16.mxu0 %v9832_v2  ;;  %9637 = vmatprep.subr.bf16.mxu1 %v9832_v2 }
 0x1d8   : > { %9747 = vset.pattern.permute.xlu1 %v15189_v29  ;;  %v10905_v55 = vpop.permute.xlu0 %2041  ;;  %9505 = vmatpush3.bf16.msra.mxu0 %v9832_v2 }
 0x1d9   : > { %15273 = vst [vmem:[#allocation99_spill] sm:$0xff] %v10905_v55  ;;  %2065 = vperm.xlu1 %9747, %v925_v23   ;;  %9641 = vmatpush3.bf16.msra.mxu1 %v9832_v2 }
 0x1da   : > { %v10907_v39 = vpop.permute.xlu1 %2021  ;;  %2534 = vperm.xlu0 %9827, %v10337_v4  }
 0x1dc   : > { %v10913_v43 = vpop.permute.xlu0 %2045 }
 0x1dd   : > { %15274 = vst [vmem:[#allocation100_spill] sm:$0xff] %v10913_v43  ;;  %9748 = vset.pattern.permute.xlu1 %v15198_v24 }
 0x1de   : > { %2826 = vperm.xlu1 %9748, %v922_v50   ;;  %v10916_v62 = vpop.permute.xlu1 %2025  ;;  %2538 = vperm.xlu0 %9827, %v10345_v6  }
 0x1e0   : > { %v10919_v4 = vpop.permute.xlu0 %2061 }
 0x1e2   : > { %2834 = vperm.xlu1 %9748, %v10425_v27   ;;  %2550 = vperm.xlu0 %9827, %v10351_v8  }
 0x1e3   : > { %v10923_v55 = vpop.permute.xlu1 %1332 }
 0x1e4   : > { %v10925_v5 = vpop.permute.xlu0 %2073 }
 0x1e5   : > { %15275 = vst [vmem:[#allocation101_spill] sm:$0xff] %v10925_v5 }
 0x1e6   : > { %2838 = vperm.xlu1 %9748, %v925_v23   ;;  %2558 = vperm.xlu0 %9827, %v10355_v9  }
 0x1e8   : > { %v10928_v50 = vpop.permute.xlu1 %2033  ;;  %v10930_v43 = vpop.permute.xlu0 %2077 }
 0x1e9   : > { %15276 = vst [vmem:[#allocation102_spill] sm:$0xff] %v10930_v43 }
 0x1ea   : > { %9749 = vset.pattern.permute.xlu1 %v15192_v44  ;;  %2570 = vperm.xlu0 %9827, %v10365_v12  }
 0x1eb   : > { %1382 = vperm.xlu1 %9749, %v10710_v52  }
 0x1ec   : > { %v10935_v6 = vpop.permute.xlu0 %2093 }
 0x1ed   : > { %15277 = vst [vmem:[#allocation103_spill] sm:$0xff] %v10935_v6  ;;  %v10937_v8 = vpop.permute.xlu1 %2794 }
 0x1ee   : > { %2582 = vperm.xlu0 %9827, %v10484_v41   ;;  %v929_v41 = vld [vmem:[%s10326_s20 + $0x298] sm:$0xff] }
 0x1ef   : > { %9750 = vset.pattern.permute.xlu1 %v15189_v29 }
 0x1f0   : > { %2069 = vperm.xlu1 %9750, %v10430_v28   ;;  %v10942_v9 = vpop.permute.xlu0 %2105 }
 0x1f1   : > { %15278 = vst [vmem:[#allocation104_spill] sm:$0xff] %v10942_v9  ;;  %v10944_v27 = vpop.permute.xlu1 %2802 }
 0x1f2   : > { %2590 = vperm.xlu0 %9827, %v10370_v13  }
 0x1f4   : > { %9751 = vset.pattern.permute.xlu1 %v15192_v44  ;;  %v10948_v12 = vpop.permute.xlu0 %2109 }
 0x1f5   : > { %15279 = vst [vmem:[#allocation105_spill] sm:$0xff] %v10948_v12  ;;  %1387 = vperm.xlu1 %9751, %v10719_v36   ;;  %v10951_v23 = vpop.permute.xlu1 %2806 }
 0x1f6   : > { %2778 = vperm.xlu0 %9827, %v10380_v16  }
 0x1f8   : > { %v10955_v2 = vpop.permute.xlu0 %2125 }
 0x1f9   : > { %15280 = vst [vmem:[#allocation106_spill] sm:$0xff] %v10955_v2  ;;  %1392 = vperm.xlu1 %9751, %v929_v41  }
 0x1fa   : > { %v10957_v9 = vpop.permute.xlu1 %1342  ;;  %2786 = vperm.xlu0 %9827, %v10586_v54  }
 0x1fc   : > { %v10960_v13 = vpop.permute.xlu0 %2137 }
 0x1fd   : > { %15281 = vst [vmem:[#allocation107_spill] sm:$0xff] %v10960_v13  ;;  %9752 = vset.pattern.permute.xlu1 %v15189_v29  ;;  %v874_v13 = vld [vmem:[%s10326_s20 + $0xe0] sm:$0xff] }
 0x1fe   : > { %2081 = vperm.xlu1 %9752, %v929_v41   ;;  %2602 = vperm.xlu0 %9827, %v10617_v57  }
 0x1ff   : > { %v10964_v12 = vpop.permute.xlu1 %2037 }
 0x200   : > { %15282 = vst [vmem:[#allocation108_spill] sm:$0xff] %v10964_v12  ;;  %v10966_v6 = vpop.permute.xlu0 %2141  ;;  %v15364_v12 = vld [vmem:[#allocation67_spill] sm:$0xff] }
 0x201   : > { %15283 = vst [vmem:[#allocation109_spill] sm:$0xff] %v10966_v6 }
 0x202   : > { %9753 = vset.pattern.permute.xlu1 %v15198_v24  ;;  %2614 = vperm.xlu0 %9827, %v10391_v19  }
 0x203   : > { %2846 = vperm.xlu1 %9753, %v10710_v52  }
 0x204   : > { %v10971_v16 = vpop.permute.xlu1 %1347  ;;  %v10973_v54 = vpop.permute.xlu0 %2157 }
 0x205   : > { %15284 = vst [vmem:[#allocation110_spill] sm:$0xff] %v10971_v16  ;;  %15285 = vst [vmem:[#allocation111_spill] sm:$0xff] %v10973_v54  ;;  %v15336_v16 = vld [vmem:[#allocation18_spill] sm:$0xff] }
 0x206   : > { %2798 = vperm.xlu0 %9827, %v10396_v20  }
 0x207   : > { %9754 = vset.pattern.permute.xlu1 %v15192_v44 }
 0x208   : > { %1117 = vperm.xlu1 %9754, %v874_v13   ;;  %v10978_v57 = vpop.permute.xlu1 %1352  ;;  %v10980_v2 = vpop.permute.xlu0 %1913 }
 0x209   : > { %15286 = vst [vmem:[#allocation112_spill] sm:$0xff] %v10978_v57  ;;  %15287 = vst [vmem:[#allocation113_spill] sm:$0xff] %v10980_v2 }
 0x20a   : > { %2810 = vperm.xlu0 %9827, %v10405_v22  }
 0x20c   : > { %9755 = vset.pattern.permute.xlu1 %v15189_v29  ;;  %v10984_v19 = vpop.permute.xlu0 %1921 }
 0x20d   : > { %15288 = vst [vmem:[#allocation114_spill] sm:$0xff] %v10984_v19  ;;  %1861 = vperm.xlu1 %9755, %v874_v13   ;;  %v10986_v52 = vpop.permute.xlu1 %2049 }
 0x20e   : > { %15289 = vst [vmem:[#allocation115_spill] sm:$0xff] %v10986_v52  ;;  %2818 = vperm.xlu0 %9827, %v10695_v1   ;;  %v876_v1 = vld [vmem:[%s10326_s20 + $0xf0] sm:$0xff]  ;;  %v15363_v52 = vld [vmem:[#allocation58_spill] sm:$0xff] }
 0x210   : > { %v10989_v20 = vpop.permute.xlu0 %1925 }
 0x211   : > { %15290 = vst [vmem:[#allocation116_spill] sm:$0xff] %v10989_v20  ;;  %1865 = vperm.xlu1 %9755, %v10436_v30  }
 0x212   : > { %v10992_v54 = vpop.permute.xlu1 %2814  ;;  %2618 = vperm.xlu0 %9827, %v10803_v33  }
 0x213   : > { %15291 = vst [vmem:[#allocation117_spill] sm:$0xff] %v10992_v54 }
 0x214   : > { %v10995_v2 = vpop.permute.xlu0 %2185 }
 0x215   : > { %15292 = vst [vmem:[#allocation118_spill] sm:$0xff] %v10995_v2  ;;  %9756 = vset.pattern.permute.xlu1 %v15198_v24 }
 0x216   : > { %2854 = vperm.xlu1 %9756, %v929_v41   ;;  %2630 = vperm.xlu0 %9827, %v10415_v25  }
 0x217   : > { %v10999_v22 = vpop.permute.xlu1 %1097 }
 0x218   : > { %15293 = vst [vmem:[#allocation119_spill] sm:$0xff] %v10999_v22  ;;  %v11001_v19 = vpop.permute.xlu0 %1933 }
 0x219   : > { %15294 = vst [vmem:[#allocation120_spill] sm:$0xff] %v11001_v19  ;;  %v11065_v19 = vld [vmem:[%s15045_s1] ss:$0 sm:$0xff] }
 0x21a   : > { %9757 = vset.pattern.permute.xlu1 %v15192_v44  ;;  %2830 = vperm.xlu0 %9827, %v10420_v26   ;;  %v1621_v43 = vmul.f32 %v11065_v19, %v10495_v45 }
 0x21b   : > { %1127 = vperm.xlu1 %9757, %v876_v1  }
 0x21c   : > { %v11006_v20 = vpop.permute.xlu1 %1845  ;;  %v11008_v33 = vpop.permute.xlu0 %2193 }
 0x21d   : > { %15295 = vst [vmem:[#allocation121_spill] sm:$0xff] %v11006_v20  ;;  %15296 = vst [vmem:[#allocation122_spill] sm:$0xff] %v11008_v33 }
 0x21e   : > { %2842 = vperm.xlu0 %9827, %v10430_v28  }
 0x21f   : > { %9758 = vset.pattern.permute.xlu1 %v15189_v29 }
 0x220   : > { %1869 = vperm.xlu1 %9758, %v876_v1   ;;  %v11012_v25 = vpop.permute.xlu1 %1849  ;;  %v11014_v41 = vpop.permute.xlu0 %1945 }
 0x221   : > { %15297 = vst [vmem:[#allocation123_spill] sm:$0xff] %v11012_v25  ;;  %15298 = vst [vmem:[#allocation124_spill] sm:$0xff] %v11014_v41 }
 0x222   : > { %2850 = vperm.xlu0 %9827, %v10719_v36  }
 0x224   : > { %1873 = vperm.xlu1 %9758, %v10440_v31   ;;  %v11018_v26 = vpop.permute.xlu0 %1953 }
 0x225   : > { %15299 = vst [vmem:[#allocation125_spill] sm:$0xff] %v11018_v26  ;;  %v11020_v2 = vpop.permute.xlu1 %2822  ;;  %v930_v26 = vld [vmem:[%s10326_s20 + $0x2a0] sm:$0xff] }
 0x226   : > { %15300 = vst [vmem:[#allocation126_spill] sm:$0xff] %v11020_v2  ;;  %2634 = vperm.xlu0 %9827, %v874_v13  }
 0x228   : > { %9759 = vset.pattern.permute.xlu1 %v15198_v24  ;;  %v11023_v28 = vpop.permute.xlu0 %1957 }
 0x229   : > { %15301 = vst [vmem:[#allocation127_spill] sm:$0xff] %v11023_v28  ;;  %2638 = vperm.xlu1 %9759, %v10436_v30  }
 0x22a   : > { %v11026_v33 = vpop.permute.xlu1 %1107  ;;  %2646 = vperm.xlu0 %9827, %v10440_v31  }
 0x22b   : > { %15302 = vst [vmem:[#allocation128_spill] sm:$0xff] %v11026_v33  ;;  %v15320_v33 = vld [vmem:[#allocation8_spill] sm:$0xff] }
 0x22c   : > { %v11029_v41 = vpop.permute.xlu0 %2217 }
 0x22d   : > { %15303 = vst [vmem:[#allocation129_spill] sm:$0xff] %v11029_v41  ;;  %2642 = vperm.xlu1 %9759, %v876_v1  }
 0x22e   : > { %2862 = vperm.xlu0 %9827, %v10445_v32  }
 0x22f   : > { %v11032_v36 = vpop.permute.xlu1 %1853 }
 0x230   : > { %15304 = vst [vmem:[#allocation130_spill] sm:$0xff] %v11032_v36  ;;  %v11035_v13 = vpop.permute.xlu0 %1965 }
 0x231   : > { %15305 = vst [vmem:[#allocation131_spill] sm:$0xff] %v11035_v13  ;;  %9760 = vset.pattern.permute.xlu1 %v15192_v44  ;;  %v11050_v13 = vld [vmem:[%s10326_s20 + $0x100] sm:$0xff] }
 0x232   : > { %1397 = vperm.xlu1 %9760, %v930_v26   ;;  %2874 = vperm.xlu0 %9827, %v10455_v34  }
 0x233   : > { %v11039_v30 = vpop.permute.xlu1 %1857 }
 0x234   : > { %15306 = vst [vmem:[#allocation132_spill] sm:$0xff] %v11039_v30  ;;  %v11041_v31 = vpop.permute.xlu0 %2225 }
 0x235   : > { %15307 = vst [vmem:[#allocation133_spill] sm:$0xff] %v11041_v31  ;;  %v11059_v31 = vld [vmem:[%s10326_s20 + $0x2b8] sm:$0xff] }
 0x236   : > { %9761 = vset.pattern.permute.xlu1 %v15189_v29  ;;  %2882 = vperm.xlu0 %9827, %v10741_v10  }
 0x237   : > { %2085 = vperm.xlu1 %9761, %v930_v26  }
 0x238   : > { %v11045_v1 = vpop.permute.xlu1 %2622  ;;  %v11047_v41 = vpop.permute.xlu0 %1977 }
 0x239   : > { %15308 = vst [vmem:[#allocation134_spill] sm:$0xff] %v11045_v1  ;;  %15309 = vst [vmem:[#allocation135_spill] sm:$0xff] %v11047_v41  ;;  %v11070_v41 = vld [vmem:[%s15045_s1 + $0x1] ss:$0 sm:$0xff] }
 0x23a   : > { %2650 = vperm.xlu0 %9827, %v11050_v13   ;;  %v2269_v45 = vmul.f32 %v11070_v41, %v10552_v47  ;;  %v1624_v47 = vmul.f32 %v11065_v19, %v10546_v35  ;;  %v2274_v25 = vmul.f32 %v11070_v41, %v10855_v40  ;;  %v1638_v40 = vmul.f32 %v11065_v19, %v15363_v52 }
 0x23b   : > { %2089 = vperm.xlu1 %9761, %v10445_v32   ;;  %v2266_v32 = vmul.f32 %v11070_v41, %v10520_v56 }
 0x23c   : > { %v11054_v34 = vpop.permute.xlu1 %2626  ;;  %v11056_v28 = vpop.permute.xlu0 %1985 }
 0x23d   : > { %15310 = vst [vmem:[#allocation136_spill] sm:$0xff] %v11054_v34  ;;  %15311 = vst [vmem:[#allocation137_spill] sm:$0xff] %v11056_v28  ;;  %v2394_v56 = vadd.f32 %v2266_v32, %v1621_v43  ;;  %v11108_v43 = vld [vmem:[%s15046_s2] ss:$0 sm:$0xff]  ;;  %v1622_v32 = vmul.f32 %v11065_v19, %v10502_v48 }
 0x23e   : > { %2662 = vperm.xlu0 %9827, %v10465_v37   ;;  %v11081_v37 = vld [vmem:[%s15045_s1 + $0x2] ss:$0 sm:$0xff] }
 0x23f   : > { %9762 = vset.pattern.permute.xlu1 %v15192_v44  ;;  %v3039_v30 = vmul.f32 %v11081_v37, %v10539_v14  ;;  %v3043_v35 = vmul.f32 %v11081_v37, %v10593_v18  ;;  %v15318_v48 = vld [vmem:[#allocation6_spill] sm:$0xff] }
 0x240   : > { %1412 = vperm.xlu1 %9762, %v11059_v31   ;;  %v11076_v28 = vpop.permute.xlu0 %1989 }
 0x241   : > { %15312 = vst [vmem:[#allocation138_spill] sm:$0xff] %v11076_v28  ;;  %v11083_v6 = vpop.permute.xlu1 %1357  ;;  %v1619_v28 = vmul.f32 %v11065_v19, %v10497_v46  ;;  %v3167_v34 = vadd.f32 %v3039_v30, %v2394_v56  ;;  %v2270_v46 = vmul.f32 %v11070_v41, %v10568_v11  ;;  %v11126_v11 = vmul.f32 %v11065_v19, %v10510_v51 }
 0x242   : > { %15313 = vst [vmem:[#allocation139_spill] sm:$0xff] %v11083_v6  ;;  %2894 = vperm.xlu0 %9827, %v10470_v38   ;;  %v2264_v6 = vmul.f32 %v11070_v41, %v10513_v53  ;;  %v2267_v38 = vmul.f32 %v11070_v41, %v10526_v59  ;;  %v1620_v53 = vmul.f32 %v11065_v19, %v10504_v49 }
 0x243   : > { %v2265_v59 = vmul.f32 %v11070_v41, %v10845_v17  ;;  %v1625_v49 = vmul.f32 %v11065_v19, %v10560_v0  ;;  %v11134_v17 = vadd.f32 %v11108_v43, %v3167_v34  ;;  %v2397_v56 = vadd.f32 %v2269_v45, %v1624_v47  ;;  %v15319_v0 = vld [vmem:[#allocation7_spill] sm:$0xff] }
 0x244   : > { %9763 = vset.pattern.permute.xlu1 %v15189_v29  ;;  %v11091_v5 = vpop.permute.xlu0 %2249  ;;  %v1626_v51 = vmul.f32 %v11065_v19, %v15318_v48  ;;  %v1628_v18 = vmul.f32 %v11065_v19, %v15319_v0  ;;  %v3045_v0 = vmul.f32 %v11081_v37, %v10638_v7  ;;  %v1630_v7 = vmul.f32 %v11065_v19, %v10624_v60 }
 0x245   : > { %15314 = vst [vmem:[#allocation140_spill] sm:$0xff] %v11091_v5  ;;  %2097 = vperm.xlu1 %9763, %v11059_v31   ;;  %v2393_v45 = vadd.f32 %v2265_v59, %v1620_v53  ;;  %v15327_v53 = vld [vmem:[#allocation13_spill] sm:$0xff] }
 0x246   : > { %v11100_v14 = vpop.permute.xlu1 %2053  ;;  %2906 = vperm.xlu0 %9827, %v10487_v42   ;;  %v3042_v42 = vmul.f32 %v11081_v37, %v10583_v3  ;;  %v2392_v3 = vadd.f32 %v2264_v6, %v1619_v28  ;;  %v11145_v6 = vmul.f32 %v11065_v19, %v15320_v33  ;;  %v15321_v28 = vld [vmem:[#allocation9_spill] sm:$0xff]  ;;  %v11168_v59 = vmul.f32 %v11065_v19, %v15327_v53 }
 0x247   : > { %15315 = vst [vmem:[#allocation141_spill] sm:$0xff] %v11100_v14  ;;  %v2398_v14 = vadd.f32 %v2270_v46, %v1625_v49  ;;  %v15325_v49 = vld [vmem:[#allocation24_spill] sm:$0xff] }
 0x248   : > { %v11120_v30 = vpop.permute.xlu0 %1997  ;;  %v3170_v34 = vadd.f32 %v3042_v42, %v2397_v56  ;;  %v2272_v33 = vmul.f32 %v11070_v41, %v15325_v49  ;;  %v15328_v56 = vld [vmem:[#allocation17_spill] sm:$0xff]  ;;  %v2402_v52 = vadd.f32 %v2274_v25, %v11145_v6 }
 0x249   : > { %15316 = vst [vmem:[#allocation142_spill] sm:$0xff] %v11120_v30  ;;  %9764 = vset.pattern.permute.xlu1 %v15198_v24  ;;  %v2395_v30 = vadd.f32 %v2267_v38, %v1622_v32  ;;  %v15324_v38 = vld [vmem:[#allocation11_spill] sm:$0xff]  ;;  %v3171_v46 = vadd.f32 %v3043_v35, %v2398_v14  ;;  %v15330_v35 = vld [vmem:[#allocation21_spill] sm:$0xff] }
 0x24a   : > { %2858 = vperm.xlu1 %9764, %v930_v26   ;;  %v11136_v5 = vpop.permute.xlu1 %2057  ;;  %2914 = vperm.xlu0 %9827, %v10761_v61   ;;  %v3038_v26 = vmul.f32 %v11081_v37, %v15321_v28  ;;  %v15323_v61 = vld [vmem:[#allocation10_spill] sm:$0xff]  ;;  %v11157_v32 = vmul.f32 %v11065_v19, %v15324_v38  ;;  %v2271_v28 = vmul.f32 %v11070_v41, %v15328_v56 }
 0x24b   : > { %15317 = vst [vmem:[#allocation143_spill] sm:$0xff] %v11136_v5  ;;  %v11153_v48 = vmul.f32 %v11065_v19, %v15323_v61  ;;  %v15326_v5 = vld [vmem:[#allocation12_spill] sm:$0xff]  ;;  %v15329_v38 = vld [vmem:[#allocation14_spill] sm:$0xff]  ;;  %v1627_v49 = vmul.f32 %v11065_v19, %v15330_v35  ;;  %v11197_v36 = vadd.f32 %v11108_v43, %v3171_v46  ;;  %v15338_v46 = vld [vmem:[#allocation19_spill] sm:$0xff] }
 0x24c   : > { %v11149_v47 = vpop.permute.xlu0 %2257  ;;  %v11164_v42 = vmul.f32 %v11065_v19, %v15326_v5  ;;  %v9833_v61 = vld [vmem:[%s10326_s20 + $0x2b0] sm:$0xff]  ;;  %v11175_v14 = vmul.f32 %v11065_v19, %v15329_v38  ;;  %v2275_v5 = vmul.f32 %v11070_v41, %v10631_v63  ;;  %v11194_v38 = vadd.f32 %v11108_v43, %v3170_v34  ;;  %v15337_v34 = vld [vmem:[#allocation26_spill] sm:$0xff] }
 0x24d   : > { %15322 = vst [vmem:[#allocation6_spill] sm:$0xff] %v11149_v47  ;;  %v15332_v47 = vld [vmem:[#allocation15_spill] sm:$0xff]  ;;  %v3166_v35 = vadd.f32 %v3038_v26, %v2393_v45  ;;  %v2400_v63 = vadd.f32 %v2272_v33, %v1627_v49  ;;  %v11203_v1 = vadd.f32 %v2271_v28, %v1626_v51  ;;  %v2273_v26 = vmul.f32 %v11070_v41, %v15337_v34  ;;  %v15340_v33 = vld [vmem:[#allocation20_spill] sm:$0xff] }
 0x24e   : > { %2866 = vperm.xlu1 %9764, %v9833_v61   ;;  %v11187_v56 = vmul.f32 %v11065_v19, %v15332_v47  ;;  %v15333_v61 = vld [vmem:[#allocation16_spill] sm:$0xff]  ;;  %v11215_v60 = vmul.f32 %v11065_v19, %v15338_v46  ;;  %v11219_v49 = vmul.f32 %v11065_v19, %v15340_v33  ;;  %v2403_v51 = vadd.f32 %v2275_v5, %v1630_v7  ;;  %v15344_v46 = vld [vmem:[#allocation22_spill] sm:$0xff]  ;;  %v15346_v33 = vld [vmem:[#allocation23_spill] sm:$0xff] }
 0x24f   : > { %v11183_v53 = vpop.permute.xlu1 %1372  ;;  %v11191_v22 = vmul.f32 %v11065_v19, %v15333_v61  ;;  %v11207_v61 = vmul.f32 %v11065_v19, %v15336_v16  ;;  %v3173_v28 = vadd.f32 %v3045_v0, %v2400_v63  ;;  %v11234_v5 = vmul.f32 %v11065_v19, %v15346_v33 }
 0x250   : > { %15331 = vst [vmem:[#allocation7_spill] sm:$0xff] %v11183_v53  ;;  %v15335_v53 = vld [vmem:[#allocation33_spill] sm:$0xff]  ;;  %15339 = vst [vmem:[#allocation9_spill] sm:$0xff] %v11215_v60  ;;  %v11230_v60 = vmul.f32 %v11065_v19, %v15344_v46  ;;  %v11236_v7 = vadd.f32 %v2273_v26, %v1628_v18  ;;  %v15350_v46 = vld [vmem:[#allocation27_spill] sm:$0xff] }
 0x251   : > { %15334 = vst [vmem:[#allocation8_spill] sm:$0xff] %v11191_v22  ;;  %v3048_v20 = vmul.f32 %v11081_v37, %v15335_v53  ;;  %v2523_v47 = vpop.permute.xlu0 %2522  ;;  %15341 = vst [vmem:[#allocation10_spill] sm:$0xff] %v11219_v49  ;;  %v15342_v53 = vld [vmem:[#allocation88_spill] sm:$0xff]  ;;  %v11250_v33 = vadd.f32 %v11108_v43, %v3173_v28  ;;  %v15353_v26 = vld [vmem:[#allocation53_spill] sm:$0xff] }
 0x252   : > { %v3037_v45 = vmul.f32 %v11081_v37, %v2523_v47  ;;  %2870 = vperm.xlu1 %9764, %v11059_v31   ;;  %v2268_v2 = vmul.f32 %v11070_v41, %v15342_v53  ;;  %v3301_v31 = vadd.f32 %v11108_v43, %v3166_v35  ;;  %15345 = vst [vmem:[#allocation24_spill] sm:$0xff] %v11230_v60  ;;  %15347 = vst [vmem:[#allocation12_spill] sm:$0xff] %v11234_v5  ;;  %v15348_v53 = vld [vmem:[#allocation25_spill] sm:$0xff]  ;;  %v15356_v60 = vld [vmem:[#allocation51_spill] sm:$0xff] }
 0x253   : > { %v3176_v0 = vadd.f32 %v3048_v20, %v2403_v51  ;;  %v11247_v47 = vmul.f32 %v11065_v19, %v15350_v46  ;;  %v15352_v20 = vld [vmem:[#allocation31_spill] sm:$0xff]  ;;  %v2280_v51 = vmul.f32 %v11070_v41, %v15353_v26 }
 0x254   : > { %v3165_v34 = vadd.f32 %v3037_v45, %v2392_v3  ;;  %v11224_v57 = vpop.permute.xlu1 %2065  ;;  %v11240_v3 = vmul.f32 %v11065_v19, %v15348_v53  ;;  %v11254_v18 = vmul.f32 %v11081_v37, %v15352_v20  ;;  %v15354_v53 = vld [vmem:[#allocation56_spill] sm:$0xff]  ;;  %v3429_v5 = vmax.f32 %v3301_v31, 0.0  ;;  %v15358_v49 = vld [vmem:[#allocation63_spill] sm:$0xff] }
 0x255   : > { %15343 = vst [vmem:[#allocation11_spill] sm:$0xff] %v11224_v57  ;;  %v2535_v63 = vpop.permute.xlu0 %2534  ;;  %15351 = vst [vmem:[#allocation17_spill] sm:$0xff] %v11247_v47  ;;  %v11261_v46 = vadd.f32 %v11108_v43, %v3176_v0  ;;  %v15355_v47 = vld [vmem:[#allocation38_spill] sm:$0xff]  ;;  %v1635_v20 = vmul.f32 %v11065_v19, %v15356_v60  ;;  %v15359_v0 = vld [vmem:[#allocation36_spill] sm:$0xff] }
 0x256   : > { %15349 = vst [vmem:[#allocation13_spill] sm:$0xff] %v11240_v3  ;;  %v3040_v35 = vmul.f32 %v11081_v37, %v2535_v63  ;;  %9765 = vset.pattern.permute.xlu1 %v15192_v44  ;;  %v3300_v45 = vadd.f32 %v11108_v43, %v3165_v34  ;;  %v2396_v63 = vadd.f32 %v2268_v2, %v11126_v11  ;;  %v15361_v60 = vld [vmem:[#allocation61_spill] sm:$0xff] }
 0x257   : > { %1422 = vperm.xlu1 %9765, %v15354_v53   ;;  %v2276_v28 = vmul.f32 %v11070_v41, %v15355_v47  ;;  %v3053_v2 = vmul.f32 %v11081_v37, %v15358_v49  ;;  %v15360_v47 = vld [vmem:[#allocation44_spill] sm:$0xff]  ;;  %v2408_v49 = vadd.f32 %v2280_v51, %v1635_v20  ;;  %v3056_v51 = vmul.f32 %v11081_v37, %v15364_v12 }
 0x258   : > { %v3168_v16 = vadd.f32 %v3040_v35, %v2395_v30  ;;  %v3428_v34 = vmax.f32 %v3300_v45, 0.0  ;;  %v1632_v35 = vmul.f32 %v11065_v19, %v15359_v0  ;;  %v2279_v45 = vmul.f32 %v11070_v41, %v15360_v47  ;;  %v15362_v47 = vld [vmem:[#allocation42_spill] sm:$0xff] }
 0x259   : > { %v11267_v57 = vpop.permute.xlu1 %2826  ;;  %v2539_v26 = vpop.permute.xlu0 %2538  ;;  %v11287_v0 = vadd.f32 %v2276_v28, %v11153_v48  ;;  %v15367_v28 = vld [vmem:[#allocation40_spill] sm:$0xff]  ;;  %v15368_v12 = vmax.f32 %v11134_v17, 0.0 }
 0x25a   : > { %15357 = vst [vmem:[#allocation14_spill] sm:$0xff] %v11267_v57  ;;  %v3303_v30 = vadd.f32 %v11108_v43, %v3168_v16  ;;  %v3041_v11 = vmul.f32 %v11081_v37, %v2539_v26  ;;  %v3556_v31 = vpack.c.bf16 %v3429_v5, %v3428_v34  ;;  %v2283_v57 = vmul.f32 %v11070_v41, %v15361_v60  ;;  %v9834_v34 = vld [vmem:[%s10326_s20 + $0x2c0] sm:$0xff] }
 0x25b   : > { %9766 = vset.pattern.permute.xlu1 %v15189_v29  ;;  %v2277_v16 = vmul.f32 %v11070_v41, %v10861_v58  ;;  %v1634_v60 = vmul.f32 %v11065_v19, %v15362_v47 }
 0x25c   : > { %v3431_v26 = vmax.f32 %v3303_v30, 0.0  ;;  %v3169_v5 = vadd.f32 %v3041_v11, %v2396_v63  ;;  %2101 = vperm.xlu1 %9766, %v9834_v34   ;;  %9506 = vmatprep.mubr.msk.bf16.mxu0 %vm3659_vm0, %v3556_v31  ;;  %v15366_v63 = vld [vmem:[#allocation55_spill] sm:$0xff]  ;;  %v3181_v11 = vadd.f32 %v3053_v2, %v2408_v49  ;;  %v1633_v34 = vmul.f32 %v11065_v19, %v15367_v28 }
 0x25d   : > { %v11295_v20 = vpop.permute.xlu1 %2834  ;;  %v2551_v58 = vpop.permute.xlu0 %2550  ;;  %v2281_v30 = vmul.f32 %v11070_v41, %v15366_v63  ;;  %v2411_v47 = vadd.f32 %v2283_v57, %v1638_v40  ;;  %v2405_v22 = vadd.f32 %v2277_v16, %v1632_v35  ;;  %v3436_v49 = vmax.f32 %v11250_v33, 0.0  ;;  %v15370_v40 = vld [vmem:[#allocation49_spill] sm:$0xff] }
 0x25e   : > { %15365 = vst [vmem:[#allocation21_spill] sm:$0xff] %v11295_v20  ;;  %v3304_v31 = vadd.f32 %v11108_v43, %v3169_v5  ;;  %v3044_v48 = vmul.f32 %v11081_v37, %v2551_v58  ;;  %v3557_v3 = vpack.c.bf16 %v3431_v26, %v15368_v12  ;;  %v11306_v20 = vadd.f32 %v2279_v45, %v1634_v60  ;;  %v15369_v5 = vld [vmem:[#allocation47_spill] sm:$0xff]  ;;  %v11333_v60 = vld [vmem:[%s10326_s20 + $0x2d8] sm:$0xff] }
 0x25f   : > { %v3050_v57 = vmul.f32 %v11081_v37, %v15369_v5  ;;  %v11315_v25 = vmul.f32 %v11081_v37, %v15370_v40  ;;  %v3184_v17 = vadd.f32 %v3056_v51, %v2411_v47  ;;  %v11325_v45 = vadd.f32 %v2281_v30, %v11157_v32  ;;  %v15372_v51 = vld [vmem:[#allocation79_spill] sm:$0xff]  ;;  %v15375_v5 = vld [vmem:[#allocation77_spill] sm:$0xff] }
 0x260   : > { %v3432_v54 = vmax.f32 %v3304_v31, 0.0  ;;  %v3172_v2 = vadd.f32 %v3044_v48, %v11203_v1  ;;  %9767 = vset.pattern.permute.xlu1 %v15192_v44  ;;  %9507 = vmatmul.mubr.msk.bf16.vlgmr.msra.gmra.mxu0 %vm3659_vm0, %v3557_v3  ;;  %v11322_v1 = vld [vmem:[%s10326_s20 + $0x120] sm:$0xff]  ;;  %v11328_v33 = vadd.f32 %v11108_v43, %v3181_v11  ;;  %v2331_v58 = vmul.f32 %v11070_v41, %v15372_v51  ;;  %v15374_v11 = vld [vmem:[#allocation65_spill] sm:$0xff] }
 0x261   : > { %1427 = vperm.xlu1 %9767, %v10741_v10   ;;  %v11319_v6 = vpop.permute.xlu1 %2838  ;;  %v2559_v35 = vpop.permute.xlu0 %2558  ;;  %2666 = vperm.xlu0 %9827, %v11322_v1   ;;  %v15371_v10 = vld [vmem:[#allocation72_spill] sm:$0xff]  ;;  %v3175_v32 = vadd.f32 %v11254_v18, %v2402_v52  ;;  %v15373_v63 = vmax.f32 %v11194_v38, 0.0  ;;  %v11345_v31 = vmul.f32 %v11081_v37, %v15374_v11  ;;  %v3178_v48 = vadd.f32 %v3050_v57, %v2405_v22  ;;  %v15377_v22 = vld [vmem:[#allocation89_spill] sm:$0xff] }
 0x262   : > { %v3307_v16 = vadd.f32 %v11108_v43, %v3172_v2  ;;  %v3046_v26 = vmul.f32 %v11081_v37, %v2559_v35  ;;  %v2328_v3 = vmul.f32 %v11070_v41, %v15371_v10  ;;  %v3439_v12 = vmax.f32 %v11261_v46, 0.0  ;;  %v15376_v52 = vld [vmem:[#allocation92_spill] sm:$0xff] }
 0x263   : > { %v3558_v30 = vpack.c.bf16 %v15373_v63, %v3432_v54  ;;  %v11350_v2 = vadd.f32 %v11108_v43, %v3184_v17  ;;  %v1686_v18 = vmul.f32 %v11065_v19, %v15375_v5  ;;  %v2278_v54 = vmul.f32 %v11070_v41, %v15376_v52 }
 0x264   : > { %v3435_v28 = vmax.f32 %v3307_v16, 0.0  ;;  %v3174_v47 = vadd.f32 %v3046_v26, %v11236_v7  ;;  %v3104_v57 = vmul.f32 %v11081_v37, %v15377_v22  ;;  %v15378_v17 = vmax.f32 %v11197_v36, 0.0  ;;  %v11367_v16 = vld [vmem:[%s10326_s20 + $0x138] sm:$0xff] }
 0x265   : > { %9510 = vmatprep.mubr.msk.bf16.mxu0 %vm3659_vm0, %v3558_v30  ;;  %1432 = vperm.xlu1 %9767, %v11333_v60   ;;  %v2571_v38 = vpop.permute.xlu0 %2570  ;;  %v15379_v26 = vld [vmem:[#allocation69_spill] sm:$0xff]  ;;  %v11373_v51 = vadd.f32 %v2328_v3, %v11168_v59  ;;  %v2459_v63 = vadd.f32 %v2331_v58, %v1686_v18  ;;  %v3310_v30 = vadd.f32 %v11108_v43, %v3175_v32  ;;  %v15382_v59 = vld [vmem:[#allocation94_spill] sm:$0xff] }
 0x266   : > { %v3309_v7 = vadd.f32 %v11108_v43, %v3174_v47  ;;  %v3049_v46 = vmul.f32 %v11081_v37, %v2571_v38  ;;  %v11362_v40 = vpop.permute.xlu1 %1382  ;;  %v3559_v35 = vpack.c.bf16 %v3435_v28, %v15378_v17  ;;  %2678 = vperm.xlu0 %9827, %v11367_v16   ;;  %v1684_v10 = vmul.f32 %v11065_v19, %v15379_v26  ;;  %v15380_v47 = vld [vmem:[#allocation96_spill] sm:$0xff]  ;;  %v15381_v38 = vld [vmem:[#allocation87_spill] sm:$0xff]  ;;  %v15385_v26 = vld [vmem:[#allocation86_spill] sm:$0xff] }
 0x267   : > { %v3313_v11 = vadd.f32 %v11108_v43, %v3178_v48  ;;  %v2329_v5 = vmul.f32 %v11070_v41, %v15380_v47  ;;  %v2285_v22 = vmul.f32 %v11070_v41, %v15381_v38  ;;  %v2406_v17 = vadd.f32 %v2278_v54, %v1633_v34  ;;  %v15384_v34 = vld [vmem:[#allocation83_spill] sm:$0xff] }
 0x268   : > { %v3437_v36 = vmax.f32 %v3309_v7, 0.0  ;;  %v3177_v28 = vadd.f32 %v3049_v46, %v11287_v0  ;;  %v2282_v3 = vmul.f32 %v11070_v41, %v15382_v59  ;;  %9511 = vmatmul.mubr.msk.bf16.gmra.mxu0 %vm3659_vm0, %v3559_v35  ;;  %v3232_v32 = vadd.f32 %v3104_v57, %v2459_v63  ;;  %v15383_v7 = vld [vmem:[#allocation81_spill] sm:$0xff]  ;;  %v11399_v57 = vld [vmem:[%s10326_s20 + $0x328] sm:$0xff] }
 0x269   : > { %9768 = vset.pattern.permute.xlu1 %v15189_v29  ;;  %v2583_v58 = vpop.permute.xlu0 %2582  ;;  %v3102_v46 = vmul.f32 %v11081_v37, %v15383_v7  ;;  %v1639_v54 = vmul.f32 %v11065_v19, %v15384_v34  ;;  %v2284_v35 = vmul.f32 %v11070_v41, %v15385_v26  ;;  %v3438_v47 = vmax.f32 %v3310_v30, 0.0  ;;  %v15386_v7 = vld [vmem:[#allocation95_spill] sm:$0xff] }
 0x26a   : > { %v3312_v48 = vadd.f32 %v11108_v43, %v3177_v28  ;;  %v3052_v0 = vmul.f32 %v11081_v37, %v2583_v58  ;;  %2113 = vperm.xlu1 %9768, %v11333_v60   ;;  %v3560_v18 = vpack.c.bf16 %v3437_v36, %v3436_v49  ;;  %2926 = vperm.xlu0 %9827, %v11399_v57   ;;  %v3441_v63 = vmax.f32 %v3313_v11, 0.0 }
 0x26b   : > { %v11396_v38 = vpop.permute.xlu1 %2069  ;;  %v2457_v28 = vadd.f32 %v2329_v5, %v1684_v10  ;;  %v2413_v36 = vadd.f32 %v2285_v22, %v11175_v14  ;;  %v3179_v58 = vadd.f32 %v11315_v25, %v2406_v17  ;;  %v2410_v30 = vadd.f32 %v2282_v3, %v11164_v42  ;;  %v15387_v10 = vld [vmem:[#allocation91_spill] sm:$0xff]  ;;  %v15388_v25 = vld [vmem:[#allocation93_spill] sm:$0xff]  ;;  %v9837_v3 = vld [vmem:[%s10326_s20 + $0x140] sm:$0xff] }
 0x26c   : > { %v3440_v59 = vmax.f32 %v3312_v48, 0.0  ;;  %v3180_v49 = vadd.f32 %v3052_v0, %v11306_v20  ;;  %9514 = vmatprep.mubr.msk.bf16.mxu0 %vm3659_vm0, %v3560_v18  ;;  %v3058_v34 = vmul.f32 %v11081_v37, %v15386_v7  ;;  %v11410_v52 = vadd.f32 %v11108_v43, %v3232_v32  ;;  %v15389_v32 = vld [vmem:[#allocation75_spill] sm:$0xff]  ;;  %v15390_v7 = vld [vmem:[#allocation90_spill] sm:$0xff] }
 0x26d   : > { %v2591_v26 = vpop.permute.xlu0 %2590  ;;  %v2286_v11 = vmul.f32 %v11070_v41, %v15387_v10  ;;  %v3447_v14 = vmax.f32 %v11350_v2, 0.0  ;;  %v2287_v42 = vmul.f32 %v11070_v41, %v15388_v25  ;;  %v3561_v17 = vpack.c.bf16 %v3439_v12, %v3438_v47 }
 0x26e   : > { %v3562_v20 = vpack.c.bf16 %v3441_v63, %v3440_v59  ;;  %v3054_v5 = vmul.f32 %v11081_v37, %v2591_v26  ;;  %9769 = vset.pattern.permute.xlu1 %v15198_v24  ;;  %v3315_v22 = vadd.f32 %v11108_v43, %v3180_v49  ;;  %2682 = vperm.xlu0 %9827, %v9837_v3   ;;  %v15392_v3 = vmax.f32 %v11328_v33, 0.0 }
 0x26f   : > { %2878 = vperm.xlu1 %9769, %v15354_v53   ;;  %v1685_v48 = vmul.f32 %v11065_v19, %v15389_v32  ;;  %v11424_v0 = vadd.f32 %v2284_v35, %v1639_v54  ;;  %v3230_v18 = vadd.f32 %v3102_v46, %v2457_v28  ;;  %v1641_v26 = vmul.f32 %v11065_v19, %v15390_v7 }
 0x270   : > { %v3182_v63 = vadd.f32 %v3054_v5, %v11325_v45  ;;  %v11427_v59 = vpop.permute.xlu1 %1387  ;;  %v3314_v49 = vadd.f32 %v11108_v43, %v3179_v58  ;;  %v3183_v53 = vadd.f32 %v11345_v31, %v2410_v30  ;;  %v3186_v12 = vadd.f32 %v3058_v34, %v2413_v36  ;;  %9515 = vmatmul.mubr.msk.bf16.gmra.mxu0 %vm3659_vm0, %v3561_v17  ;;  %v15391_v31 = vld [vmem:[#allocation97_spill] sm:$0xff]  ;;  %v11447_v34 = vld [vmem:[%s10326_s20 + $0x348] sm:$0xff] }
 0x271   : > { %v2779_v47 = vpop.permute.xlu0 %2778  ;;  %v3495_v54 = vmax.f32 %v11410_v52, 0.0  ;;  %v2330_v46 = vmul.f32 %v11070_v41, %v10888_v15  ;;  %9518 = vmatprep.mubr.msk.bf16.mxu0 %vm3659_vm0, %v3562_v20  ;;  %v2414_v28 = vadd.f32 %v2286_v11, %v1641_v26  ;;  %v11441_v58 = vadd.f32 %v2287_v42, %v11187_v56 }
 0x272   : > { %v3317_v45 = vadd.f32 %v11108_v43, %v3182_v63  ;;  %v3101_v35 = vmul.f32 %v11081_v37, %v2779_v47  ;;  %v3059_v36 = vmul.f32 %v11081_v37, %v15391_v31  ;;  %v3443_v30 = vmax.f32 %v3315_v22, 0.0  ;;  %2942 = vperm.xlu0 %9827, %v11447_v34  }
 0x273   : > { %9770 = vset.pattern.permute.xlu1 %v15192_v44  ;;  %v2334_v15 = vmul.f32 %v11070_v41, %v10895_v21  ;;  %v3365_v11 = vadd.f32 %v11108_v43, %v3230_v18  ;;  %v3442_v5 = vmax.f32 %v3314_v49, 0.0  ;;  %v3318_v25 = vadd.f32 %v11108_v43, %v3183_v53  ;;  %v15393_v18 = vld [vmem:[#allocation98_spill] sm:$0xff] }
 0x274   : > { %v3445_v10 = vmax.f32 %v3317_v45, 0.0  ;;  %v3229_v20 = vadd.f32 %v3101_v35, %v11373_v51  ;;  %1137 = vperm.xlu1 %9770, %v11050_v13   ;;  %v11454_v56 = vpop.permute.xlu1 %1392  ;;  %v11459_v42 = vadd.f32 %v11108_v43, %v3186_v12  ;;  %v2332_v22 = vmul.f32 %v11070_v41, %v10907_v39  ;;  %v15394_v12 = vld [vmem:[#allocation70_spill] sm:$0xff] }
 0x275   : > { %v2787_v17 = vpop.permute.xlu0 %2786  ;;  %v2458_v21 = vadd.f32 %v2330_v46, %v1685_v48  ;;  %v3187_v7 = vadd.f32 %v3059_v36, %v2414_v28  ;;  %v1687_v26 = vmul.f32 %v11065_v19, %v15393_v18  ;;  %v3105_v49 = vmul.f32 %v11081_v37, %v10937_v8 }
 0x276   : > { %v3564_v51 = vpack.c.bf16 %v3445_v10, %v15392_v3  ;;  %v3103_v32 = vmul.f32 %v11081_v37, %v2787_v17  ;;  %v3364_v63 = vadd.f32 %v11108_v43, %v3229_v20  ;;  %v3563_v53 = vpack.c.bf16 %v3443_v30, %v3442_v5  ;;  %2694 = vperm.xlu0 %9827, %v15394_v12   ;;  %v9839_v20 = vld [vmem:[%s10326_s20 + $0x358] sm:$0xff]  ;;  %v11505_v3 = vld [vmem:[%s10326_s20 + $0x108] sm:$0xff] }
 0x277   : > { %v2462_v39 = vadd.f32 %v2334_v15, %v11207_v61  ;;  %v3493_v47 = vmax.f32 %v3365_v11, 0.0  ;;  %v3446_v46 = vmax.f32 %v3318_v25, 0.0  ;;  %v2460_v45 = vadd.f32 %v2332_v22, %v1687_v26  ;;  %v15395_v22 = vld [vmem:[#allocation99_spill] sm:$0xff] }
 0x278   : > { %v3231_v48 = vadd.f32 %v3103_v32, %v2458_v21  ;;  %9771 = vset.pattern.permute.xlu1 %v15189_v29  ;;  %v3492_v33 = vmax.f32 %v3364_v63, 0.0  ;;  %v2335_v35 = vmul.f32 %v11070_v41, %v10928_v50  ;;  %v3107_v28 = vmul.f32 %v11081_v37, %v10944_v27  ;;  %9519 = vmatmul.mubr.msk.bf16.gmra.mxu0 %vm3659_vm0, %v3563_v53  ;;  %v15398_v53 = vld [vmem:[#allocation8_spill] sm:$0xff] }
 0x279   : > { %1877 = vperm.xlu1 %9771, %v11050_v13   ;;  %v11480_v8 = vpop.permute.xlu1 %2081  ;;  %v2603_v61 = vpop.permute.xlu0 %2602  ;;  %v3449_v31 = vmax.f32 %v11459_v42, 0.0  ;;  %9522 = vmatprep.mubr.msk.bf16.mxu0 %vm3659_vm0, %v3564_v51  ;;  %v11487_v50 = vadd.f32 %v11108_v43, %v3187_v7  ;;  %v1690_v27 = vmul.f32 %v11065_v19, %v10923_v55  ;;  %v3233_v13 = vadd.f32 %v3105_v49, %v2460_v45  ;;  %v15396_v7 = vld [vmem:[#allocation100_spill] sm:$0xff]  ;;  %v15397_v49 = vld [vmem:[#allocation117_spill] sm:$0xff] }
 0x27a   : > { %v3366_v36 = vadd.f32 %v11108_v43, %v3231_v48  ;;  %v3057_v30 = vmul.f32 %v11081_v37, %v2603_v61  ;;  %v3588_v15 = vpack.c.bf16 %v3493_v47, %v3492_v33  ;;  %v3108_v10 = vmul.f32 %v11081_v37, %v10951_v23  ;;  %2950 = vperm.xlu0 %9827, %v9839_v20   ;;  %v15400_v45 = vld [vmem:[#allocation108_spill] sm:$0xff]  ;;  %v15401_v61 = vld [vmem:[#allocation115_spill] sm:$0xff] }
 0x27b   : > { %v2333_v11 = vmul.f32 %v11070_v41, %v10916_v62  ;;  %v2342_v5 = vmul.f32 %v11070_v41, %v10919_v4  ;;  %v2337_v55 = vmul.f32 %v11070_v41, %v15395_v22  ;;  %v2463_v17 = vadd.f32 %v2335_v35, %v1690_v27 }
 0x27c   : > { %v3494_v25 = vmax.f32 %v3366_v36, 0.0  ;;  %v3185_v42 = vadd.f32 %v3057_v30, %v11424_v0  ;;  %9570 = vmatprep.mubr.msk.bf16.mxu1 %vm3659_vm0, %v3588_v15  ;;  %v3235_v21 = vadd.f32 %v3107_v28, %v2462_v39  ;;  %v1692_v23 = vmul.f32 %v11065_v19, %v10957_v9  ;;  %v15399_v39 = vld [vmem:[#allocation13_spill] sm:$0xff] }
 0x27d   : > { %1881 = vperm.xlu1 %9771, %v11505_v3   ;;  %v2615_v62 = vpop.permute.xlu0 %2614  ;;  %v3565_v63 = vpack.c.bf16 %v3447_v14, %v3446_v46  ;;  %v2338_v9 = vmul.f32 %v11070_v41, %v15396_v7  ;;  %v11519_v18 = vadd.f32 %v11108_v43, %v3233_v13  ;;  %v3236_v26 = vadd.f32 %v3108_v10, %v2463_v17  ;;  %v15402_v10 = vld [vmem:[#allocation123_spill] sm:$0xff]  ;;  %v11554_v17 = vld [vmem:[%s10326_s20 + $0x110] sm:$0xff] }
 0x27e   : > { %v3589_v4 = vpack.c.bf16 %v3495_v54, %v3494_v25  ;;  %v3320_v0 = vadd.f32 %v11108_v43, %v3185_v42  ;;  %v3060_v51 = vmul.f32 %v11081_v37, %v2615_v62  ;;  %v11512_v32 = vpop.permute.xlu1 %2846  ;;  %v3110_v52 = vmul.f32 %v11081_v37, %v15397_v49  ;;  %v9841_v54 = vld [vmem:[%s10326_s20 + $0x168] sm:$0xff]  ;;  %v15404_v42 = vld [vmem:[#allocation126_spill] sm:$0xff] }
 0x27f   : > { %2702 = vperm.xlu0 %9827, %v9841_v54   ;;  %v2461_v12 = vadd.f32 %v2333_v11, %v15398_v53  ;;  %v11526_v48 = vadd.f32 %v2342_v5, %v15399_v39  ;;  %v3450_v14 = vmax.f32 %v11487_v50, 0.0  ;;  %v3370_v47 = vadd.f32 %v11108_v43, %v3235_v21  ;;  %v9842_v5 = vld [vmem:[%s10326_s20 + $0x170] sm:$0xff] }
 0x280   : > { %v3448_v33 = vmax.f32 %v3320_v0, 0.0  ;;  %v3188_v2 = vadd.f32 %v3060_v51, %v11441_v58  ;;  %9571 = vmatmul.mubr.msk.bf16.vlgmr.msra.gmra.mxu1 %vm3659_vm0, %v3589_v4  ;;  %v2465_v46 = vadd.f32 %v2337_v55, %v1692_v23  ;;  %v2336_v35 = vmul.f32 %v11070_v41, %v15400_v45  ;;  %9523 = vmatmul.mubr.msk.bf16.gmra.mxu0 %vm3659_vm0, %v3565_v63  ;;  %v15405_v23 = vld [vmem:[#allocation9_spill] sm:$0xff]  ;;  %v15406_v4 = vld [vmem:[#allocation110_spill] sm:$0xff] }
 0x281   : > { %9772 = vset.pattern.permute.xlu1 %v15198_v24  ;;  %v2799_v28 = vpop.permute.xlu0 %2798  ;;  %v2339_v36 = vmul.f32 %v11070_v41, %v15401_v61  ;;  %v3496_v50 = vmax.f32 %v11519_v18, 0.0  ;;  %v3371_v27 = vadd.f32 %v11108_v43, %v3236_v26  ;;  %v2289_v20 = vmul.f32 %v11070_v41, %v15402_v10  ;;  %v15407_v51 = vld [vmem:[#allocation134_spill] sm:$0xff]  ;;  %v15413_v10 = vld [vmem:[#allocation136_spill] sm:$0xff] }
 0x282   : > { %v3566_v58 = vpack.c.bf16 %v3449_v31, %v3448_v33  ;;  %v3323_v30 = vadd.f32 %v11108_v43, %v3188_v2  ;;  %v3106_v15 = vmul.f32 %v11081_v37, %v2799_v28  ;;  %2886 = vperm.xlu1 %9772, %v11333_v60   ;;  %v3238_v13 = vadd.f32 %v3110_v52, %v2465_v46  ;;  %v15403_v31 = vld [vmem:[#allocation112_spill] sm:$0xff]  ;;  %v15409_v33 = vld [vmem:[#allocation10_spill] sm:$0xff] }
 0x283   : > { %v11545_v11 = vpop.permute.xlu1 %1117  ;;  %2706 = vperm.xlu0 %9827, %v9842_v5   ;;  %v1694_v25 = vmul.f32 %v11065_v19, %v15403_v31  ;;  %v3112_v22 = vmul.f32 %v11081_v37, %v15404_v42  ;;  %v3498_v21 = vmax.f32 %v3370_v47, 0.0  ;;  %v2464_v62 = vadd.f32 %v2336_v35, %v15405_v23  ;;  %v15410_v46 = vld [vmem:[#allocation130_spill] sm:$0xff]  ;;  %v15414_v42 = vld [vmem:[#allocation101_spill] sm:$0xff] }
 0x284   : > { %v3451_v55 = vmax.f32 %v3323_v30, 0.0  ;;  %v3234_v60 = vadd.f32 %v3106_v15, %v2461_v12  ;;  %9526 = vmatprep.mubr.msk.bf16.mxu0 %vm3659_vm0, %v3566_v58  ;;  %v1693_v0 = vmul.f32 %v11065_v19, %v15406_v4  ;;  %v3062_v63 = vmul.f32 %v11081_v37, %v15407_v51  ;;  %v15408_v12 = vld [vmem:[#allocation121_spill] sm:$0xff]  ;;  %v15412_v30 = vld [vmem:[#allocation128_spill] sm:$0xff] }
 0x285   : > { %v2811_v7 = vpop.permute.xlu0 %2810  ;;  %v2467_v18 = vadd.f32 %v2339_v36, %v1694_v25  ;;  %v3499_v54 = vmax.f32 %v3371_v27, 0.0  ;;  %v3373_v53 = vadd.f32 %v11108_v43, %v3238_v13  ;;  %v2288_v39 = vmul.f32 %v11070_v41, %v15408_v12  ;;  %v15411_v36 = vld [vmem:[#allocation119_spill] sm:$0xff]  ;;  %v15415_v51 = vld [vmem:[#allocation132_spill] sm:$0xff] }
 0x286   : > { %v3567_v26 = vpack.c.bf16 %v3451_v55, %v3450_v14  ;;  %v3369_v49 = vadd.f32 %v11108_v43, %v3234_v60  ;;  %v3109_v52 = vmul.f32 %v11081_v37, %v2811_v7  ;;  %9773 = vset.pattern.permute.xlu1 %v15192_v44  ;;  %v2417_v2 = vadd.f32 %v2289_v20, %v15409_v33  ;;  %v15418_v33 = vld [vmem:[#allocation139_spill] sm:$0xff] }
 0x287   : > { %1147 = vperm.xlu1 %9773, %v11554_v17   ;;  %v3240_v47 = vadd.f32 %v3112_v22, %v2467_v18  ;;  %v2290_v14 = vmul.f32 %v11070_v41, %v15410_v46  ;;  %v2466_v61 = vadd.f32 %v2338_v9, %v1693_v0  ;;  %v1643_v58 = vmul.f32 %v11065_v19, %v15411_v36  ;;  %v15416_v18 = vld [vmem:[#allocation141_spill] sm:$0xff]  ;;  %v15421_v36 = vld [vmem:[#allocation143_spill] sm:$0xff] }
 0x288   : > { %v3497_v45 = vmax.f32 %v3369_v49, 0.0  ;;  %v3237_v35 = vadd.f32 %v3109_v52, %v2464_v62  ;;  %v11571_v28 = vpop.permute.xlu1 %1861  ;;  %v1645_v15 = vmul.f32 %v11065_v19, %v15412_v30  ;;  %v3190_v27 = vadd.f32 %v3062_v63, %v2417_v2  ;;  %9527 = vmatmul.mubr.msk.bf16.gmra.mxu0 %vm3659_vm0, %v3567_v26 }
 0x289   : > { %v2819_v13 = vpop.permute.xlu0 %2818  ;;  %v3063_v20 = vmul.f32 %v11081_v37, %v15413_v10  ;;  %v2345_v9 = vmul.f32 %v11070_v41, %v15414_v42  ;;  %v3501_v22 = vmax.f32 %v3373_v53, 0.0  ;;  %v2416_v55 = vadd.f32 %v2288_v39, %v1643_v58  ;;  %v15423_v42 = vld [vmem:[#allocation24_spill] sm:$0xff] }
 0x28a   : > { %v3590_v5 = vpack.c.bf16 %v3497_v45, %v3496_v50  ;;  %v3372_v31 = vadd.f32 %v11108_v43, %v3237_v35  ;;  %v3111_v25 = vmul.f32 %v11081_v37, %v2819_v13  ;;  %v3591_v60 = vpack.c.bf16 %v3499_v54, %v3498_v21  ;;  %v15417_v21 = vld [vmem:[#allocation11_spill] sm:$0xff] }
 0x28b   : > { %9774 = vset.pattern.permute.xlu1 %v15189_v29  ;;  %v3375_v23 = vadd.f32 %v11108_v43, %v3240_v47  ;;  %v2418_v62 = vadd.f32 %v2290_v14, %v1645_v15  ;;  %v2291_v63 = vmul.f32 %v11070_v41, %v15415_v51  ;;  %v3325_v7 = vadd.f32 %v11108_v43, %v3190_v27  ;;  %v15419_v47 = vld [vmem:[#allocation7_spill] sm:$0xff]  ;;  %v15420_v14 = vld [vmem:[#allocation14_spill] sm:$0xff]  ;;  %v9843_v27 = vld [vmem:[%s10326_s20 + $0x118] sm:$0xff] }
 0x28c   : > { %v3500_v4 = vmax.f32 %v3372_v31, 0.0  ;;  %v3239_v0 = vadd.f32 %v3111_v25, %v2466_v61  ;;  %1885 = vperm.xlu1 %9774, %v11554_v17   ;;  %v11587_v50 = vpop.permute.xlu1 %1865  ;;  %9574 = vmatprep.mubr.msk.bf16.mxu1 %vm3659_vm0, %v3590_v5  ;;  %v2340_v26 = vmul.f32 %v11070_v41, %v15416_v18  ;;  %v2343_v49 = vmul.f32 %v11070_v41, %v15417_v21  ;;  %v15424_v18 = vld [vmem:[#allocation12_spill] sm:$0xff] }
 0x28d   : > { %9575 = vmatmul.mubr.msk.bf16.gmra.mxu1 %vm3659_vm0, %v3591_v60  ;;  %v2619_v52 = vpop.permute.xlu0 %2618  ;;  %v3191_v54 = vadd.f32 %v3063_v20, %v2418_v62  ;;  %v1695_v2 = vmul.f32 %v11065_v19, %v15418_v33  ;;  %v1698_v46 = vmul.f32 %v11065_v19, %v15419_v47  ;;  %v3113_v45 = vmul.f32 %v11081_v37, %v15420_v14  ;;  %v15422_v20 = vld [vmem:[#allocation21_spill] sm:$0xff]  ;;  %v15425_v14 = vld [vmem:[#allocation102_spill] sm:$0xff] }
 0x28e   : > { %v3592_v53 = vpack.c.bf16 %v3501_v22, %v3500_v4  ;;  %v3374_v12 = vadd.f32 %v11108_v43, %v3239_v0  ;;  %v3061_v39 = vmul.f32 %v11081_v37, %v2619_v52  ;;  %v3116_v35 = vmul.f32 %v11081_v37, %v11319_v6 }
 0x28f   : > { %v3503_v61 = vmax.f32 %v3375_v23, 0.0  ;;  %v2341_v58 = vmul.f32 %v11070_v41, %v15421_v36  ;;  %v2468_v13 = vadd.f32 %v2340_v26, %v1695_v2  ;;  %v2471_v10 = vadd.f32 %v2343_v49, %v1698_v46 }
 0x290   : > { %v3502_v30 = vmax.f32 %v3374_v12, 0.0  ;;  %v3189_v15 = vadd.f32 %v3061_v39, %v2416_v55  ;;  %1889 = vperm.xlu1 %9774, %v9843_v27   ;;  %9578 = vmatprep.mubr.msk.bf16.mxu1 %vm3659_vm0, %v3592_v53  ;;  %v3115_v5 = vmul.f32 %v11081_v37, %v15422_v20  ;;  %v1700_v31 = vmul.f32 %v11065_v19, %v11362_v40 }
 0x291   : > { %v2855_v25 = vpop.permute.xlu1 %2854  ;;  %v2631_v6 = vpop.permute.xlu0 %2630  ;;  %v2419_v22 = vadd.f32 %v2291_v63, %v15423_v42  ;;  %v3453_v62 = vmax.f32 %v3325_v7, 0.0  ;;  %v3326_v4 = vadd.f32 %v11108_v43, %v3191_v54  ;;  %v3241_v0 = vadd.f32 %v3113_v45, %v2468_v13 }
 0x292   : > { %v3593_v60 = vpack.c.bf16 %v3503_v61, %v3502_v30  ;;  %v3324_v23 = vadd.f32 %v11108_v43, %v3189_v15  ;;  %v3064_v55 = vmul.f32 %v11081_v37, %v2631_v6  ;;  %v3244_v51 = vadd.f32 %v3116_v35, %v2471_v10  ;;  %v15426_v61 = vld [vmem:[#allocation17_spill] sm:$0xff] }
 0x293   : > { %v2469_v26 = vadd.f32 %v2341_v58, %v15424_v18  ;;  %v3118_v21 = vmul.f32 %v11081_v37, %v11512_v32  ;;  %v3243_v63 = vadd.f32 %v3115_v5, %v11526_v48  ;;  %v2473_v52 = vadd.f32 %v2345_v9, %v1700_v31  ;;  %v11651_v31 = vld [vmem:[%s10326_s20 + $0x2e0] sm:$0xff] }
 0x294   : > { %v3452_v40 = vmax.f32 %v3324_v23, 0.0  ;;  %v3192_v49 = vadd.f32 %v3064_v55, %v2419_v22  ;;  %9775 = vset.pattern.permute.xlu1 %v15198_v24  ;;  %v2344_v53 = vmul.f32 %v11070_v41, %v11396_v38  ;;  %v2347_v54 = vmul.f32 %v11070_v41, %v11480_v8 }
 0x295   : > { %2654 = vperm.xlu1 %9775, %v11505_v3   ;;  %9579 = vmatmul.mubr.msk.bf16.gmra.mxu1 %vm3659_vm0, %v3593_v60  ;;  %v2831_v7 = vpop.permute.xlu0 %2830  ;;  %v3454_v48 = vmax.f32 %v3326_v4, 0.0  ;;  %v3376_v9 = vadd.f32 %v11108_v43, %v3241_v0  ;;  %v3379_v38 = vadd.f32 %v11108_v43, %v3244_v51  ;;  %v1702_v3 = vmul.f32 %v11065_v19, %v11454_v56 }
 0x296   : > { %v3568_v12 = vpack.c.bf16 %v3453_v62, %v3452_v40  ;;  %v3327_v32 = vadd.f32 %v11108_v43, %v3192_v49  ;;  %v3114_v39 = vmul.f32 %v11081_v37, %v2831_v7  ;;  %v11633_v33 = vpop.permute.xlu1 %1127  ;;  %v3246_v2 = vadd.f32 %v3118_v21, %v2473_v52  ;;  %v15427_v49 = vld [vmem:[#allocation28_spill] sm:$0xff]  ;;  %v15428_v52 = vld [vmem:[#allocation29_spill] sm:$0xff] }
 0x297   : > { %v3120_v47 = vmul.f32 %v11081_v37, %v2855_v25  ;;  %v2346_v45 = vmul.f32 %v11070_v41, %v15425_v14  ;;  %v3378_v35 = vadd.f32 %v11108_v43, %v3243_v63  ;;  %v2472_v36 = vadd.f32 %v2344_v53, %v15426_v61 }
 0x298   : > { %v3455_v46 = vmax.f32 %v3327_v32, 0.0  ;;  %v3242_v8 = vadd.f32 %v3114_v39, %v2469_v26  ;;  %9530 = vmatprep.mubr.msk.bf16.mxu0 %vm3659_vm0, %v3568_v12  ;;  %v1701_v58 = vmul.f32 %v11065_v19, %v11427_v59  ;;  %v2475_v30 = vadd.f32 %v2347_v54, %v1702_v3 }
 0x299   : > { %2658 = vperm.xlu1 %9775, %v11554_v17   ;;  %v2843_v56 = vpop.permute.xlu0 %2842  ;;  %v3504_v10 = vmax.f32 %v3376_v9, 0.0  ;;  %v3507_v20 = vmax.f32 %v3379_v38, 0.0  ;;  %v3381_v25 = vadd.f32 %v11108_v43, %v3246_v2  ;;  %v3506_v59 = vmax.f32 %v3378_v35, 0.0 }
 0x29a   : > { %v3569_v15 = vpack.c.bf16 %v3455_v46, %v3454_v48  ;;  %v3377_v27 = vadd.f32 %v11108_v43, %v3242_v8  ;;  %v3117_v13 = vmul.f32 %v11081_v37, %v2843_v56  ;;  %v3248_v6 = vadd.f32 %v3120_v47, %v2475_v30  ;;  %v9844_v56 = vld [vmem:[%s10326_s20 + $0x2e8] sm:$0xff] }
 0x29b   : > { %v1870_v5 = vpop.permute.xlu1 %1869  ;;  %v2292_v17 = vmul.f32 %v11070_v41, %v11571_v28  ;;  %v2474_v23 = vadd.f32 %v2346_v45, %v1701_v58  ;;  %v1647_v0 = vmul.f32 %v11065_v19, %v11545_v11  ;;  %v3595_v18 = vpack.c.bf16 %v3507_v20, %v3506_v59 }
 0x29c   : > { %v3505_v42 = vmax.f32 %v3377_v27, 0.0  ;;  %v3245_v22 = vadd.f32 %v3117_v13, %v2472_v36  ;;  %9531 = vmatmul.mubr.msk.bf16.gmra.mxu0 %vm3659_vm0, %v3569_v15  ;;  %v3509_v26 = vmax.f32 %v3381_v25, 0.0  ;;  %v3383_v21 = vadd.f32 %v11108_v43, %v3248_v6 }
 0x29d   : > { %9776 = vset.pattern.permute.xlu1 %v15192_v44  ;;  %v2851_v60 = vpop.permute.xlu0 %2850  ;;  %v1648_v63 = vmul.f32 %v11065_v19, %v15427_v49  ;;  %v1650_v53 = vmul.f32 %v11065_v19, %v15428_v52  ;;  %v2420_v7 = vadd.f32 %v2292_v17, %v1647_v0  ;;  %v2293_v54 = vmul.f32 %v11070_v41, %v11587_v50  ;;  %v11708_v0 = vld [vmem:[%s15045_s1 + $0x1] ss:$0 sm:$0xff]  ;;  %v9849_v49 = vld [vmem:[%s10326_s20 + $0x308] sm:$0xff] }
 0x29e   : > { %v3594_v55 = vpack.c.bf16 %v3505_v42, %v3504_v10  ;;  %v3380_v62 = vadd.f32 %v11108_v43, %v3245_v22  ;;  %v3119_v4 = vmul.f32 %v11081_v37, %v2851_v60  ;;  %1437 = vperm.xlu1 %9776, %v11651_v31   ;;  %v3511_v9 = vmax.f32 %v3383_v21, 0.0  ;;  %v941_v10 = vld [vmem:[%s10326_s20 + $0x2f8] sm:$0xff] }
 0x29f   : > { %v1874_v51 = vpop.permute.xlu1 %1873  ;;  %v2421_v50 = vadd.f32 %v2293_v54, %v1648_v63  ;;  %v2294_v47 = vmul.f32 %v11070_v41, %v1870_v5  ;;  %v1649_v61 = vmul.f32 %v11065_v19, %v11633_v33  ;;  %v15430_v63 = vld [vmem:[#allocation32_spill] sm:$0xff] }
 0x2a0   : > { %v3508_v28 = vmax.f32 %v3380_v62, 0.0  ;;  %v3247_v40 = vadd.f32 %v3119_v4, %v2474_v23  ;;  %9582 = vmatprep.mubr.msk.bf16.mxu1 %vm3659_vm0, %v3594_v55  ;;  %v2295_v39 = vmul.f32 %v11070_v41, %v1874_v51  ;;  %v11701_v55 = vld [vmem:[%s15045_s1] ss:$0 sm:$0xff] }
 0x2a1   : > { %9583 = vmatmul.mubr.msk.bf16.gmra.mxu1 %vm3659_vm0, %v3595_v18  ;;  %v2635_v11 = vpop.permute.xlu0 %2634  ;;  %v2422_v27 = vadd.f32 %v2294_v47, %v1649_v61  ;;  %v15429_v62 = vld [vmem:[#allocation30_spill] sm:$0xff]  ;;  %v1705_v52 = vmul.f32 %v11701_v55, %v15430_v63 }
 0x2a2   : > { %v3596_v12 = vpack.c.bf16 %v3509_v26, %v3508_v28  ;;  %v3382_v32 = vadd.f32 %v11108_v43, %v3247_v40  ;;  %v3065_v48 = vmul.f32 %v11081_v37, %v2635_v11  ;;  %9777 = vset.pattern.permute.xlu1 %v15189_v29  ;;  %v2423_v45 = vadd.f32 %v2295_v39, %v1650_v53  ;;  %v11714_v26 = vld [vmem:[%s15045_s1 + $0x2] ss:$0 sm:$0xff]  ;;  %v15431_v53 = vld [vmem:[#allocation103_spill] sm:$0xff] }
 0x2a3   : > { %2117 = vperm.xlu1 %9777, %v11651_v31   ;;  %v1704_v4 = vmul.f32 %v11701_v55, %v15429_v62  ;;  %v15433_v62 = vld [vmem:[#allocation104_spill] sm:$0xff] }
 0x2a4   : > { %v3510_v38 = vmax.f32 %v3382_v32, 0.0  ;;  %v3193_v3 = vadd.f32 %v3065_v48, %v2420_v7  ;;  %v2639_v2 = vpop.permute.xlu1 %2638  ;;  %9586 = vmatprep.mubr.msk.bf16.mxu1 %vm3659_vm0, %v3596_v12  ;;  %v2350_v7 = vmul.f32 %v11708_v0, %v15431_v53  ;;  %v884_v53 = vld [vmem:[%s10326_s20 + $0x130] sm:$0xff] }
 0x2a5   : > { %v3066_v46 = vmul.f32 %v11081_v37, %v2639_v2  ;;  %v2647_v8 = vpop.permute.xlu0 %2646  ;;  %v9851_v2 = vld [vmem:[%s10326_s20 + $0x300] sm:$0xff] }
 0x2a6   : > { %v3597_v14 = vpack.c.bf16 %v3511_v9, %v3510_v38  ;;  %v3068_v35 = vmul.f32 %v11081_v37, %v2647_v8  ;;  %v3328_v36 = vadd.f32 %v11108_v43, %v3193_v3  ;;  %v2478_v48 = vadd.f32 %v2350_v7, %v1705_v52  ;;  %v11730_v9 = vld [vmem:[%s15046_s2] ss:$0 sm:$0xff] }
 0x2a7   : > { %v3194_v58 = vadd.f32 %v3066_v46, %v2421_v50  ;;  %2121 = vperm.xlu1 %9777, %v9844_v56  }
 0x2a8   : > { %v3196_v30 = vadd.f32 %v3068_v35, %v2423_v45  ;;  %v2643_v15 = vpop.permute.xlu1 %2642  ;;  %v3456_v20 = vmax.f32 %v3328_v36, 0.0  ;;  %v9852_v36 = vld [vmem:[%s10326_s20 + $0x310] sm:$0xff] }
 0x2a9   : > { %v3329_v41 = vadd.f32 %v11108_v43, %v3194_v58  ;;  %v3067_v13 = vmul.f32 %v11081_v37, %v2643_v15  ;;  %9587 = vmatmul.mubr.msk.bf16.gmra.mxu1 %vm3659_vm0, %v3597_v14  ;;  %v2863_v51 = vpop.permute.xlu0 %2862 }
 0x2aa   : > { %v3331_v25 = vadd.f32 %v11108_v43, %v3196_v30  ;;  %v3122_v21 = vmul.f32 %v11714_v26, %v2863_v51 }
 0x2ab   : > { %v3457_v5 = vmax.f32 %v3329_v41, 0.0  ;;  %v3195_v19 = vadd.f32 %v3067_v13, %v2422_v27  ;;  %9778 = vset.pattern.permute.xlu1 %v15192_v44  ;;  %v945_v27 = vld [vmem:[%s10326_s20 + $0x318] sm:$0xff] }
 0x2ac   : > { %1452 = vperm.xlu1 %9778, %v941_v10   ;;  %v3459_v22 = vmax.f32 %v3331_v25, 0.0 }
 0x2ad   : > { %v3330_v33 = vadd.f32 %v11108_v43, %v3195_v19  ;;  %v1398_v6 = vpop.permute.xlu1 %1397  ;;  %v3570_v42 = vpack.c.bf16 %v3457_v5, %v3456_v20  ;;  %v9845_v43 = vld [vmem:[%s10326_s20 + $0x2f0] sm:$0xff] }
 0x2ae   : > { %v1703_v54 = vmul.f32 %v11701_v55, %v1398_v6 }
 0x2af   : > { %v3458_v59 = vmax.f32 %v3330_v33, 0.0  ;;  %9534 = vmatprep.mubr.msk.bf16.mxu0 %vm3659_vm0, %v3570_v42 }
 0x2b0   : > { %9779 = vset.pattern.permute.xlu1 %v15189_v29 }
 0x2b1   : > { %2129 = vperm.xlu1 %9779, %v941_v10   ;;  %v3571_v37 = vpack.c.bf16 %v3459_v22, %v3458_v59  ;;  %v15432_v22 = vld [vmem:[#allocation34_spill] sm:$0xff] }
 0x2b2   : > { %v2086_v17 = vpop.permute.xlu1 %2085  ;;  %v1707_v59 = vmul.f32 %v11701_v55, %v15432_v22 }
 0x2b3   : > { %9535 = vmatmul.mubr.msk.bf16.gmra.mxu0 %vm3659_vm0, %v3571_v37  ;;  %v2348_v40 = vmul.f32 %v11708_v0, %v2086_v17  ;;  %v2875_v17 = vpop.permute.xlu0 %2874 }
 0x2b5   : > { %9780 = vset.pattern.permute.xlu1 %v15198_v24  ;;  %v2476_v32 = vadd.f32 %v2348_v40, %v1703_v54 }
 0x2b6   : > { %2890 = vperm.xlu1 %9780, %v11651_v31   ;;  %v2090_v60 = vpop.permute.xlu1 %2089 }
 0x2b7   : > { %v2349_v31 = vmul.f32 %v11708_v0, %v2090_v60 }
 0x2b9   : > { %v2477_v18 = vadd.f32 %v2349_v31, %v1704_v4  ;;  %v2353_v4 = vmul.f32 %v11708_v0, %v15433_v62 }
 0x2ba   : > { %2898 = vperm.xlu1 %9780, %v9845_v43   ;;  %v3125_v43 = vmul.f32 %v11714_v26, %v2875_v17 }
 0x2bb   : > { %v1413_v23 = vpop.permute.xlu1 %1412  ;;  %v3250_v11 = vadd.f32 %v3122_v21, %v2477_v18  ;;  %v9853_v18 = vld [vmem:[%s10326_s20 + $0x128] sm:$0xff] }
 0x2bc   : > { %v1706_v45 = vmul.f32 %v11701_v55, %v1413_v23 }
 0x2bd   : > { %v3385_v38 = vadd.f32 %v11730_v9, %v3250_v11 }
 0x2be   : > { %2902 = vperm.xlu1 %9780, %v941_v10  }
 0x2bf   : > { %v3513_v14 = vmax.f32 %v3385_v38, 0.0  ;;  %v2883_v38 = vpop.permute.xlu0 %2882 }
 0x2c0   : > { %v2098_v28 = vpop.permute.xlu1 %2097 }
 0x2c1   : > { %v2351_v47 = vmul.f32 %v11708_v0, %v2098_v28 }
 0x2c2   : > { %9781 = vset.pattern.permute.xlu1 %v15192_v44 }
 0x2c3   : > { %1462 = vperm.xlu1 %9781, %v9849_v49   ;;  %v2479_v56 = vadd.f32 %v2351_v47, %v1706_v45 }
 0x2c5   : > { %v2859_v12 = vpop.permute.xlu1 %2858 }
 0x2c6   : > { %v3121_v39 = vmul.f32 %v11714_v26, %v2859_v12  ;;  %v15434_v12 = vld [vmem:[#allocation105_spill] sm:$0xff] }
 0x2c7   : > { %9782 = vset.pattern.permute.xlu1 %v15189_v29 }
 0x2c8   : > { %v3249_v3 = vadd.f32 %v3121_v39, %v2476_v32  ;;  %2133 = vperm.xlu1 %9782, %v9851_v2   ;;  %v2354_v32 = vmul.f32 %v11708_v0, %v15434_v12  ;;  %v3127_v2 = vmul.f32 %v11714_v26, %v2883_v38  ;;  %v949_v12 = vld [vmem:[%s10326_s20 + $0x338] sm:$0xff] }
 0x2c9   : > { %v2867_v50 = vpop.permute.xlu1 %2866 }
 0x2ca   : > { %v3384_v46 = vadd.f32 %v11730_v9, %v3249_v3  ;;  %v3123_v8 = vmul.f32 %v11714_v26, %v2867_v50 }
 0x2cc   : > { %v3512_v35 = vmax.f32 %v3384_v46, 0.0  ;;  %v3251_v61 = vadd.f32 %v3123_v8, %v2478_v48  ;;  %9783 = vset.pattern.permute.xlu1 %v15192_v44 }
 0x2cd   : > { %1467 = vperm.xlu1 %9783, %v9852_v36   ;;  %v2871_v58 = vpop.permute.xlu1 %2870 }
 0x2ce   : > { %v3124_v30 = vmul.f32 %v11714_v26, %v2871_v58  ;;  %v3598_v15 = vpack.c.bf16 %v3513_v14, %v3512_v35  ;;  %v3386_v41 = vadd.f32 %v11730_v9, %v3251_v61 }
 0x2d0   : > { %v3252_v13 = vadd.f32 %v3124_v30, %v2479_v56  ;;  %9590 = vmatprep.mubr.msk.bf16.mxu1 %vm3659_vm0, %v3598_v15  ;;  %v3514_v5 = vmax.f32 %v3386_v41, 0.0  ;;  %v11781_v41 = vld [vmem:[%s10326_s20 + $0x370] sm:$0xff] }
 0x2d1   : > { %1472 = vperm.xlu1 %9783, %v945_v27   ;;  %2962 = vperm.xlu0 %9827, %v11781_v41  }
 0x2d2   : > { %v3387_v10 = vadd.f32 %v11730_v9, %v3252_v13  ;;  %v1423_v20 = vpop.permute.xlu1 %1422  ;;  %v2651_v13 = vpop.permute.xlu0 %2650 }
 0x2d3   : > { %v1708_v31 = vmul.f32 %v11701_v55, %v1423_v20  ;;  %v946_v20 = vld [vmem:[%s10326_s20 + $0x320] sm:$0xff] }
 0x2d4   : > { %v3515_v25 = vmax.f32 %v3387_v10, 0.0 }
 0x2d5   : > { %9784 = vset.pattern.permute.xlu1 %v15189_v29  ;;  %v2481_v28 = vadd.f32 %v2353_v4, %v1708_v31  ;;  %v11802_v31 = vld [vmem:[%s10326_s20 + $0x388] sm:$0xff] }
 0x2d6   : > { %2145 = vperm.xlu1 %9784, %v945_v27   ;;  %v3599_v19 = vpack.c.bf16 %v3515_v25, %v3514_v5  ;;  %v2663_v22 = vpop.permute.xlu0 %2662 }
 0x2d7   : > { %v2102_v33 = vpop.permute.xlu1 %2101  ;;  %v3072_v4 = vmul.f32 %v11714_v26, %v2663_v22 }
 0x2d8   : > { %9591 = vmatmul.mubr.msk.bf16.gmra.mxu1 %vm3659_vm0, %v3599_v19  ;;  %v2352_v37 = vmul.f32 %v11708_v0, %v2102_v33  ;;  %v3069_v19 = vmul.f32 %v11714_v26, %v2651_v13 }
 0x2da   : > { %9785 = vset.pattern.permute.xlu1 %v15198_v24  ;;  %v2480_v60 = vadd.f32 %v2352_v37, %v1707_v59  ;;  %v15435_v59 = vld [vmem:[#allocation37_spill] sm:$0xff] }
 0x2db   : > { %2910 = vperm.xlu1 %9785, %v9849_v49   ;;  %v1654_v37 = vmul.f32 %v11701_v55, %v15435_v59 }
 0x2dc   : > { %v1428_v6 = vpop.permute.xlu1 %1427  ;;  %v3253_v51 = vadd.f32 %v3125_v43, %v2480_v60  ;;  %v15436_v43 = vld [vmem:[#allocation35_spill] sm:$0xff] }
 0x2dd   : > { %v1709_v39 = vmul.f32 %v11701_v55, %v1428_v6  ;;  %v11790_v6 = vld [vmem:[%s10326_s20 + $0x180] sm:$0xff] }
 0x2de   : > { %v3388_v49 = vadd.f32 %v11730_v9, %v3253_v51  ;;  %2714 = vperm.xlu0 %9827, %v11790_v6  }
 0x2df   : > { %9786 = vset.pattern.permute.xlu1 %v15192_v44  ;;  %v2482_v3 = vadd.f32 %v2354_v32, %v1709_v39 }
 0x2e0   : > { %1157 = vperm.xlu1 %9786, %v11322_v1   ;;  %v1433_v42 = vpop.permute.xlu1 %1432  ;;  %v3516_v7 = vmax.f32 %v3388_v49, 0.0 }
 0x2e1   : > { %v3255_v46 = vadd.f32 %v3127_v2, %v2482_v3  ;;  %v1710_v8 = vmul.f32 %v11701_v55, %v1433_v42 }
 0x2e2   : > { %2974 = vperm.xlu0 %9827, %v11802_v31  }
 0x2e3   : > { %v3390_v61 = vadd.f32 %v11730_v9, %v3255_v46 }
 0x2e4   : > { %9787 = vset.pattern.permute.xlu1 %v15189_v29 }
 0x2e5   : > { %1893 = vperm.xlu1 %9787, %v11322_v1   ;;  %v2114_v23 = vpop.permute.xlu1 %2113  ;;  %v3518_v30 = vmax.f32 %v3390_v61, 0.0 }
 0x2e6   : > { %v2355_v47 = vmul.f32 %v11708_v0, %v2114_v23  ;;  %v1652_v23 = vmul.f32 %v11701_v55, %v15436_v43 }
 0x2e8   : > { %v2483_v45 = vadd.f32 %v2355_v47, %v1710_v8  ;;  %v11826_v8 = vld [vmem:[%s10326_s20 + $0x1a8] sm:$0xff] }
 0x2e9   : > { %1897 = vperm.xlu1 %9787, %v9853_v18  }
 0x2ea   : > { %v2879_v21 = vpop.permute.xlu1 %2878 }
 0x2eb   : > { %v3126_v40 = vmul.f32 %v11714_v26, %v2879_v21 }
 0x2ed   : > { %v3254_v63 = vadd.f32 %v3126_v40, %v2481_v28  ;;  %9788 = vset.pattern.permute.xlu1 %v15198_v24 }
 0x2ee   : > { %2918 = vperm.xlu1 %9788, %v945_v27  }
 0x2ef   : > { %v3389_v1 = vadd.f32 %v11730_v9, %v3254_v63  ;;  %v1138_v52 = vpop.permute.xlu1 %1137 }
 0x2f0   : > { %v1651_v5 = vmul.f32 %v11701_v55, %v1138_v52  ;;  %v11811_v52 = vld [vmem:[%s10326_s20 + $0x198] sm:$0xff] }
 0x2f1   : > { %v3517_v54 = vmax.f32 %v3389_v1, 0.0  ;;  %2726 = vperm.xlu0 %9827, %v11811_v52  }
 0x2f2   : > { %9789 = vset.pattern.permute.xlu1 %v15192_v44 }
 0x2f3   : > { %1167 = vperm.xlu1 %9789, %v884_v53   ;;  %v3600_v11 = vpack.c.bf16 %v3517_v54, %v3516_v7 }
 0x2f4   : > { %v1878_v48 = vpop.permute.xlu1 %1877 }
 0x2f5   : > { %9594 = vmatprep.mubr.msk.bf16.mxu1 %vm3659_vm0, %v3600_v11 }
 0x2f7   : > { %9790 = vset.pattern.permute.xlu1 %v15189_v29 }
 0x2f8   : > { %1901 = vperm.xlu1 %9790, %v884_v53   ;;  %v1882_v50 = vpop.permute.xlu1 %1881 }
 0x2f9   : > { %v2297_v17 = vmul.f32 %v11708_v0, %v1882_v50 }
 0x2fc   : > { %1905 = vperm.xlu1 %9790, %v11367_v16   ;;  %v2296_v16 = vmul.f32 %v11708_v0, %v1878_v48 }
 0x2fd   : > { %v2887_v14 = vpop.permute.xlu1 %2886 }
 0x2fe   : > { %v3128_v35 = vmul.f32 %v11714_v26, %v2887_v14  ;;  %v2424_v25 = vadd.f32 %v2296_v16, %v1651_v5 }
 0x300   : > { %v3256_v36 = vadd.f32 %v3128_v35, %v2483_v45  ;;  %9791 = vset.pattern.permute.xlu1 %v15198_v24  ;;  %v3197_v60 = vadd.f32 %v3069_v19, %v2424_v25  ;;  %v11832_v35 = vld [vmem:[%s10326_s20 + $0x1b0] sm:$0xff]  ;;  %v11849_v19 = vld [vmem:[%s10326_s20 + $0x340] sm:$0xff] }
 0x301   : > { %2670 = vperm.xlu1 %9791, %v9853_v18   ;;  %v2425_v18 = vadd.f32 %v2297_v17, %v1652_v23 }
 0x302   : > { %v3391_v58 = vadd.f32 %v11730_v9, %v3256_v36  ;;  %v1148_v56 = vpop.permute.xlu1 %1147  ;;  %v3332_v40 = vadd.f32 %v11730_v9, %v3197_v60  ;;  %v9860_v36 = vld [vmem:[%s10326_s20 + $0x330] sm:$0xff]  ;;  %v15439_v60 = vld [vmem:[#allocation106_spill] sm:$0xff] }
 0x303   : > { %v1653_v49 = vmul.f32 %v11701_v55, %v1148_v56  ;;  %v2358_v43 = vmul.f32 %v11708_v0, %v15439_v60 }
 0x304   : > { %v3519_v15 = vmax.f32 %v3391_v58, 0.0  ;;  %v3460_v32 = vmax.f32 %v3332_v40, 0.0 }
 0x305   : > { %2674 = vperm.xlu1 %9791, %v884_v53  }
 0x306   : > { %v3601_v27 = vpack.c.bf16 %v3519_v15, %v3518_v30  ;;  %v2895_v30 = vpop.permute.xlu0 %2894  ;;  %v15437_v15 = vld [vmem:[#allocation39_spill] sm:$0xff] }
 0x307   : > { %v1886_v10 = vpop.permute.xlu1 %1885  ;;  %v1712_v16 = vmul.f32 %v11701_v55, %v15437_v15 }
 0x308   : > { %9595 = vmatmul.mubr.msk.bf16.gmra.mxu1 %vm3659_vm0, %v3601_v27  ;;  %v2298_v21 = vmul.f32 %v11708_v0, %v1886_v10  ;;  %v3130_v10 = vmul.f32 %v11714_v26, %v2895_v30 }
 0x309   : > { %9792 = vset.pattern.permute.xlu1 %v15192_v44 }
 0x30a   : > { %1477 = vperm.xlu1 %9792, %v946_v20   ;;  %v2426_v7 = vadd.f32 %v2298_v21, %v1653_v49  ;;  %v2907_v60 = vpop.permute.xlu0 %2906 }
 0x30b   : > { %v1890_v33 = vpop.permute.xlu1 %1889 }
 0x30c   : > { %v2299_v42 = vmul.f32 %v11708_v0, %v1890_v33 }
 0x30e   : > { %9793 = vset.pattern.permute.xlu1 %v15189_v29  ;;  %v2427_v62 = vadd.f32 %v2299_v42, %v1654_v37  ;;  %v15438_v37 = vld [vmem:[#allocation41_spill] sm:$0xff] }
 0x30f   : > { %2149 = vperm.xlu1 %9793, %v946_v20   ;;  %v1713_v17 = vmul.f32 %v11701_v55, %v15438_v37 }
 0x310   : > { %v2655_v51 = vpop.permute.xlu1 %2654  ;;  %v3200_v63 = vadd.f32 %v3072_v4, %v2427_v62  ;;  %v11858_v62 = vld [vmem:[%s10326_s20 + $0x3b0] sm:$0xff] }
 0x311   : > { %v3070_v28 = vmul.f32 %v11714_v26, %v2655_v51 }
 0x312   : > { %v3335_v39 = vadd.f32 %v11730_v9, %v3200_v63  ;;  %v9862_v63 = vld [vmem:[%s10326_s20 + $0x140] sm:$0xff] }
 0x313   : > { %v3198_v1 = vadd.f32 %v3070_v28, %v2425_v18  ;;  %2153 = vperm.xlu1 %9793, %v11399_v57   ;;  %v11820_v57 = vld [vmem:[%s10326_s20 + $0x398] sm:$0xff]  ;;  %v2486_v28 = vadd.f32 %v2358_v43, %v1713_v17  ;;  %v9869_v43 = vld [vmem:[%s10326_s20 + $0x150] sm:$0xff] }
 0x314   : > { %v2659_v53 = vpop.permute.xlu1 %2658  ;;  %2982 = vperm.xlu0 %9827, %v11820_v57   ;;  %v3463_v47 = vmax.f32 %v3335_v39, 0.0 }
 0x315   : > { %v3333_v54 = vadd.f32 %v11730_v9, %v3198_v1  ;;  %v3071_v11 = vmul.f32 %v11714_v26, %v2659_v53 }
 0x317   : > { %v3461_v48 = vmax.f32 %v3333_v54, 0.0  ;;  %v3199_v38 = vadd.f32 %v3071_v11, %v2426_v7  ;;  %9794 = vset.pattern.permute.xlu1 %v15192_v44  ;;  %v11869_v11 = vld [vmem:[%s10326_s20 + $0x1c0] sm:$0xff] }
 0x318   : > { %1492 = vperm.xlu1 %9794, %v949_v12   ;;  %2734 = vperm.xlu0 %9827, %v11826_v8  }
 0x319   : > { %v3334_v3 = vadd.f32 %v11730_v9, %v3199_v38  ;;  %v1438_v2 = vpop.permute.xlu1 %1437  ;;  %v3572_v50 = vpack.c.bf16 %v3461_v48, %v3460_v32 }
 0x31a   : > { %v1711_v25 = vmul.f32 %v11701_v55, %v1438_v2 }
 0x31b   : > { %v3462_v46 = vmax.f32 %v3334_v3, 0.0  ;;  %9538 = vmatprep.mubr.msk.bf16.mxu0 %vm3659_vm0, %v3572_v50  ;;  %v11877_v3 = vld [vmem:[%s10326_s20 + $0x3c8] sm:$0xff] }
 0x31c   : > { %9795 = vset.pattern.permute.xlu1 %v15189_v29  ;;  %2738 = vperm.xlu0 %9827, %v11832_v35  }
 0x31d   : > { %2161 = vperm.xlu1 %9795, %v949_v12   ;;  %v3573_v14 = vpack.c.bf16 %v3463_v47, %v3462_v46 }
 0x31e   : > { %v2118_v45 = vpop.permute.xlu1 %2117 }
 0x31f   : > { %9539 = vmatmul.mubr.msk.bf16.gmra.mxu0 %vm3659_vm0, %v3573_v14  ;;  %v2356_v5 = vmul.f32 %v11708_v0, %v2118_v45  ;;  %v11883_v45 = vld [vmem:[%s10326_s20 + $0x1d8] sm:$0xff] }
 0x320   : > { %2994 = vperm.xlu0 %9827, %v11858_v62  }
 0x321   : > { %9796 = vset.pattern.permute.xlu1 %v15198_v24  ;;  %v2484_v22 = vadd.f32 %v2356_v5, %v1711_v25 }
 0x322   : > { %2922 = vperm.xlu1 %9796, %v946_v20   ;;  %v2122_v61 = vpop.permute.xlu1 %2121  ;;  %v11844_v20 = vld [vmem:[%s10326_s20 + $0x148] sm:$0xff] }
 0x323   : > { %v2357_v56 = vmul.f32 %v11708_v0, %v2122_v61  ;;  %v11889_v61 = vld [vmem:[%s15048_s4] ss:$0 sm:$0xff] }
 0x324   : > { %2746 = vperm.xlu0 %9827, %v11869_v11  }
 0x325   : > { %v2485_v13 = vadd.f32 %v2357_v56, %v1712_v16  ;;  %v9866_v16 = vld [vmem:[%s10326_s20 + $0x158] sm:$0xff] }
 0x326   : > { %2930 = vperm.xlu1 %9796, %v9860_v36  }
 0x327   : > { %v1453_v58 = vpop.permute.xlu1 %1452  ;;  %v3258_v33 = vadd.f32 %v3130_v10, %v2485_v13  ;;  %v11902_v13 = vld [vmem:[%s10326_s20 + $0x3d8] sm:$0xff] }
 0x328   : > { %v1714_v53 = vmul.f32 %v11701_v55, %v1453_v58  ;;  %3006 = vperm.xlu0 %9827, %v11877_v3  }
 0x329   : > { %v3393_v4 = vadd.f32 %v11730_v9, %v3258_v33 }
 0x32a   : > { %2934 = vperm.xlu1 %9796, %v949_v12  }
 0x32b   : > { %v3521_v1 = vmax.f32 %v3393_v4, 0.0  ;;  %v15440_v4 = vld [vmem:[#allocation43_spill] sm:$0xff] }
 0x32c   : > { %v2130_v27 = vpop.permute.xlu1 %2129  ;;  %2758 = vperm.xlu0 %9827, %v11883_v45  }
 0x32d   : > { %v2359_v40 = vmul.f32 %v11708_v0, %v2130_v27  ;;  %v11899_v27 = vld [vmem:[%s10326_s20 + $0x350] sm:$0xff] }
 0x32e   : > { %9797 = vset.pattern.permute.xlu1 %v15192_v44 }
 0x32f   : > { %1182 = vperm.xlu1 %9797, %v11844_v20   ;;  %v2487_v12 = vadd.f32 %v2359_v40, %v1714_v53  ;;  %v3133_v40 = vmul.f32 %v11714_v26, %v2907_v60  ;;  %v15441_v53 = vld [vmem:[#allocation107_spill] sm:$0xff] }
 0x330   : > { %3014 = vperm.xlu0 %9827, %v11902_v13  }
 0x331   : > { %v2891_v42 = vpop.permute.xlu1 %2890 }
 0x332   : > { %v3129_v59 = vmul.f32 %v11714_v26, %v2891_v42  ;;  %v9868_v42 = vld [vmem:[%s10326_s20 + $0x1e8] sm:$0xff] }
 0x333   : > { %1497 = vperm.xlu1 %9797, %v11849_v19  }
 0x334   : > { %v3257_v23 = vadd.f32 %v3129_v59, %v2484_v22  ;;  %2766 = vperm.xlu0 %9827, %v9868_v42  }
 0x335   : > { %v2899_v51 = vpop.permute.xlu1 %2898 }
 0x336   : > { %v3392_v18 = vadd.f32 %v11730_v9, %v3257_v23  ;;  %v3131_v21 = vmul.f32 %v11714_v26, %v2899_v51  ;;  %v9870_v23 = vld [vmem:[%s10326_s20 + $0x1f0] sm:$0xff]  ;;  %v1715_v51 = vmul.f32 %v11701_v55, %v15440_v4 }
 0x337   : > { %9798 = vset.pattern.permute.xlu1 %v15189_v29 }
 0x338   : > { %v3520_v49 = vmax.f32 %v3392_v18, 0.0  ;;  %1909 = vperm.xlu1 %9798, %v9862_v63   ;;  %v3259_v7 = vadd.f32 %v3131_v21, %v2486_v28  ;;  %2770 = vperm.xlu0 %9827, %v9870_v23   ;;  %v972_v21 = vld [vmem:[%s10326_s20 + $0x3f0] sm:$0xff] }
 0x339   : > { %v2903_v54 = vpop.permute.xlu1 %2902 }
 0x33a   : > { %v3132_v32 = vmul.f32 %v11714_v26, %v2903_v54  ;;  %v3602_v39 = vpack.c.bf16 %v3521_v1, %v3520_v49  ;;  %v3394_v48 = vadd.f32 %v11730_v9, %v3259_v7  ;;  %v2361_v7 = vmul.f32 %v11708_v0, %v15441_v53  ;;  %v2915_v53 = vpop.permute.xlu0 %2914 }
 0x33c   : > { %2165 = vperm.xlu1 %9798, %v11849_v19   ;;  %v3260_v38 = vadd.f32 %v3132_v32, %v2487_v12  ;;  %9598 = vmatprep.mubr.msk.bf16.mxu1 %vm3659_vm0, %v3602_v39  ;;  %v3522_v46 = vmax.f32 %v3394_v48, 0.0 }
 0x33d   : > { %3026 = vperm.xlu0 %9827, %v972_v21  }
 0x33e   : > { %v1463_v2 = vpop.permute.xlu1 %1462  ;;  %v3395_v50 = vadd.f32 %v11730_v9, %v3260_v38 }
 0x33f   : > { %v1716_v54 = vmul.f32 %v11701_v55, %v1463_v2 }
 0x340   : > { %2169 = vperm.xlu1 %9798, %v11447_v34   ;;  %v9572_v47 = vpop.f32.mrf.mxu1  ;;  %v3523_v14 = vmax.f32 %v3395_v50, 0.0 }
 0x341   : > { %v4151_v58 = vadd.f32 %v9572_v47, %v11889_v61  ;;  %v9871_v47 = vld [vmem:[%s10326_s20 + $0x358] sm:$0xff] }
 0x342   : > { %v11891_v36 = vpop.f32.mrf.mxu1  ;;  %v3603_v34 = vpack.c.bf16 %v3523_v14, %v3522_v46  ;;  %v2489_v14 = vadd.f32 %v2361_v7, %v1716_v54 }
 0x343   : > { %v2134_v56 = vpop.permute.xlu1 %2133  ;;  %v4463_v10 = vmax.f32 %v4151_v58, 0.0 }
 0x344   : > { %9799 = vset.pattern.permute.xlu1 %v15192_v44  ;;  %v9573_v30 = vpop.f32.mrf.mxu1  ;;  %9599 = vmatmul.mubr.msk.bf16.gmra.mxu1 %vm3659_vm0, %v3603_v34  ;;  %v2360_v37 = vmul.f32 %v11708_v0, %v2134_v56 }
 0x345   : > { %v4154_v15 = vadd.f32 %v9573_v30, %v11889_v61  ;;  %1192 = vperm.xlu1 %9799, %v9866_v16  }
 0x346   : > { %v11909_v22 = vpop.f32.mrf.mxu1  ;;  %v2488_v28 = vadd.f32 %v2360_v37, %v1715_v51 }
 0x347   : > { %v4464_v5 = vmax.f32 %v4154_v15, 0.0 }
 0x348   : > { %v1468_v25 = vpop.permute.xlu1 %1467  ;;  %v3261_v39 = vadd.f32 %v3133_v40, %v2488_v28  ;;  %v15444_v28 = vld [vmem:[#allocation109_spill] sm:$0xff] }
 0x349   : > { %v11905_v33 = vpack.c.bf16 %v4464_v5, %v4463_v10  ;;  %1507 = vperm.xlu1 %9799, %v11899_v27   ;;  %v2362_v40 = vmul.f32 %v11708_v0, %v15444_v28 }
 0x34a   : > { %v3396_v30 = vadd.f32 %v11730_v9, %v3261_v39 }
 0x34c   : > { %v11911_v59 = vpop.permute.xlu1 %1472  ;;  %v3524_v60 = vmax.f32 %v3396_v30, 0.0 }
 0x34d   : > { %9800 = vset.pattern.permute.xlu1 %v15189_v29  ;;  %v9576_v17 = vpop.f32.mrf.mxu1 }
 0x34e   : > { %1917 = vperm.xlu1 %9800, %v9869_v43   ;;  %v4167_v49 = vadd.f32 %v9576_v17, %v11889_v61 }
 0x34f   : > { %v11919_v18 = vpop.f32.mrf.mxu1 }
 0x350   : > { %v4467_v48 = vmax.f32 %v4167_v49, 0.0  ;;  %v1717_v49 = vmul.f32 %v11701_v55, %v1468_v25 }
 0x351   : > { %v2146_v63 = vpop.permute.xlu1 %2145  ;;  %v9577_v1 = vpop.f32.mrf.mxu1 }
 0x352   : > { %2173 = vperm.xlu1 %9800, %v11899_v27   ;;  %v4170_v12 = vadd.f32 %v9577_v1, %v11889_v61  ;;  %v2490_v54 = vadd.f32 %v2362_v40, %v1717_v49 }
 0x353   : > { %v11929_v32 = vpop.f32.mrf.mxu1 }
 0x354   : > { %v4468_v38 = vmax.f32 %v4170_v12, 0.0  ;;  %v3135_v12 = vmul.f32 %v11714_v26, %v2915_v53 }
 0x355   : > { %v9580_v50 = vpop.f32.mrf.mxu1 }
 0x356   : > { %2177 = vperm.xlu1 %9800, %v9871_v47   ;;  %v2911_v46 = vpop.permute.xlu1 %2910  ;;  %v11932_v58 = vpack.c.bf16 %v4468_v38, %v4467_v48  ;;  %v4183_v2 = vadd.f32 %v9580_v50, %v11889_v61  ;;  %v2363_v38 = vmul.f32 %v11708_v0, %v2146_v63  ;;  %v3263_v47 = vadd.f32 %v3135_v12, %v2490_v54 }
 0x357   : > { %v3134_v56 = vmul.f32 %v11714_v26, %v2911_v46  ;;  %v11935_v34 = vpop.f32.mrf.mxu1 }
 0x358   : > { %15442 = vst [vmem:[#allocation15_spill] sm:$0xff] %v11932_v58  ;;  %v4471_v37 = vmax.f32 %v4183_v2, 0.0 }
 0x359   : > { %v3262_v15 = vadd.f32 %v3134_v56, %v2489_v14  ;;  %v9581_v16 = vpop.f32.mrf.mxu1 }
 0x35a   : > { %v4186_v10 = vadd.f32 %v9581_v16, %v11889_v61  ;;  %9801 = vset.pattern.permute.xlu1 %v15198_v24  ;;  %v3398_v16 = vadd.f32 %v11730_v9, %v3263_v47 }
 0x35b   : > { %v3397_v5 = vadd.f32 %v11730_v9, %v3262_v15  ;;  %2686 = vperm.xlu1 %9801, %v11844_v20   ;;  %v1158_v42 = vpop.permute.xlu1 %1157  ;;  %v11945_v51 = vpop.f32.mrf.mxu1 }
 0x35c   : > { %v4472_v17 = vmax.f32 %v4186_v10, 0.0  ;;  %v3526_v28 = vmax.f32 %v3398_v16, 0.0  ;;  %v15448_v16 = vld [vmem:[#allocation45_spill] sm:$0xff] }
 0x35d   : > { %v3525_v23 = vmax.f32 %v3397_v5, 0.0 }
 0x35e   : > { %v11943_v4 = vpack.c.bf16 %v4472_v17, %v4471_v37  ;;  %v11976_v17 = vld [vmem:[%s10326_s20 + $0x360] sm:$0xff] }
 0x35f   : > { %2938 = vperm.xlu1 %9801, %v11849_v19   ;;  %v3604_v21 = vpack.c.bf16 %v3525_v23, %v3524_v60 }
 0x360   : > { %15443 = vst [vmem:[#allocation16_spill] sm:$0xff] %v11943_v4  ;;  %v1894_v1 = vpop.permute.xlu1 %1893 }
 0x361   : > { %v9584_v20 = vpop.f32.mrf.mxu1  ;;  %9602 = vmatprep.mubr.msk.bf16.mxu1 %vm3659_vm0, %v3604_v21  ;;  %v2300_v12 = vmul.f32 %v11708_v0, %v1894_v1  ;;  %v15447_v1 = vld [vmem:[#allocation46_spill] sm:$0xff] }
 0x362   : > { %v4199_v39 = vadd.f32 %v9584_v20, %v11889_v61 }
 0x363   : > { %2690 = vperm.xlu1 %9801, %v9869_v43   ;;  %v11952_v7 = vpop.f32.mrf.mxu1  ;;  %v1718_v43 = vmul.f32 %v11701_v55, %v11911_v59  ;;  %v11972_v59 = vld [vmem:[%s10326_s20 + $0x160] sm:$0xff] }
 0x364   : > { %v1898_v19 = vpop.permute.xlu1 %1897  ;;  %v4475_v46 = vmax.f32 %v4199_v39, 0.0 }
 0x365   : > { %v9585_v48 = vpop.f32.mrf.mxu1  ;;  %v2491_v30 = vadd.f32 %v2363_v38, %v1718_v43  ;;  %v11985_v38 = vld [vmem:[%s10326_s20 + $0x368] sm:$0xff] }
 0x366   : > { %v4202_v50 = vadd.f32 %v9585_v48, %v11889_v61  ;;  %v2667_v48 = vpop.permute.xlu0 %2666 }
 0x367   : > { %2946 = vperm.xlu1 %9801, %v11899_v27   ;;  %v11959_v25 = vpop.f32.mrf.mxu1  ;;  %v3073_v43 = vmul.f32 %v11714_v26, %v2667_v48 }
 0x368   : > { %v4476_v14 = vmax.f32 %v4202_v50, 0.0  ;;  %v1655_v50 = vmul.f32 %v11701_v55, %v1158_v42 }
 0x369   : > { %v2919_v56 = vpop.permute.xlu1 %2918  ;;  %v9588_v2 = vpop.f32.mrf.mxu1 }
 0x36a   : > { %v11963_v15 = vpack.c.bf16 %v4476_v14, %v4475_v46  ;;  %v3136_v63 = vmul.f32 %v11714_v26, %v2919_v56  ;;  %v4215_v5 = vadd.f32 %v9588_v2, %v11889_v61  ;;  %v2428_v47 = vadd.f32 %v2300_v12, %v1655_v50  ;;  %v2679_v56 = vpop.permute.xlu0 %2678 }
 0x36b   : > { %9802 = vset.pattern.permute.xlu1 %v15192_v44  ;;  %v11967_v27 = vpop.f32.mrf.mxu1  ;;  %v1658_v2 = vmul.f32 %v11701_v55, %v15447_v1 }
 0x36c   : > { %15445 = vst [vmem:[#allocation33_spill] sm:$0xff] %v11963_v15  ;;  %v3264_v10 = vadd.f32 %v3136_v63, %v2491_v30  ;;  %1197 = vperm.xlu1 %9802, %v11972_v59   ;;  %v4479_v49 = vmax.f32 %v4215_v5, 0.0  ;;  %v2301_v30 = vmul.f32 %v11708_v0, %v1898_v19  ;;  %v9874_v63 = vld [vmem:[%s10326_s20 + $0x168] sm:$0xff]  ;;  %v3201_v42 = vadd.f32 %v3073_v43, %v2428_v47 }
 0x36d   : > { %v9589_v37 = vpop.f32.mrf.mxu1 }
 0x36e   : > { %v3399_v60 = vadd.f32 %v11730_v9, %v3264_v10  ;;  %v4218_v23 = vadd.f32 %v9589_v37, %v11889_v61  ;;  %v1168_v21 = vpop.permute.xlu1 %1167  ;;  %v1656_v10 = vmul.f32 %v11701_v55, %v15448_v16  ;;  %v3076_v37 = vmul.f32 %v11714_v26, %v2679_v56 }
 0x36f   : > { %v3336_v19 = vadd.f32 %v11730_v9, %v3201_v42 }
 0x370   : > { %v3527_v40 = vmax.f32 %v3399_v60, 0.0  ;;  %v4480_v53 = vmax.f32 %v4218_v23, 0.0  ;;  %1517 = vperm.xlu1 %9802, %v11976_v17   ;;  %v2429_v23 = vadd.f32 %v2301_v30, %v1656_v10  ;;  %v9876_v10 = vld [vmem:[%s10326_s20 + $0x378] sm:$0xff] }
 0x371   : > { %v3464_v43 = vmax.f32 %v3336_v19, 0.0 }
 0x372   : > { %v11981_v20 = vpack.c.bf16 %v4480_v53, %v4479_v49  ;;  %v3605_v54 = vpack.c.bf16 %v3527_v40, %v3526_v28  ;;  %v1657_v49 = vmul.f32 %v11701_v55, %v1168_v21 }
 0x373   : > { %v1902_v39 = vpop.permute.xlu1 %1901 }
 0x374   : > { %15446 = vst [vmem:[#allocation18_spill] sm:$0xff] %v11981_v20  ;;  %1522 = vperm.xlu1 %9802, %v11985_v38   ;;  %9603 = vmatmul.mubr.msk.bf16.gmra.mxu1 %vm3659_vm0, %v3605_v54  ;;  %v2302_v28 = vmul.f32 %v11708_v0, %v1902_v39  ;;  %v9875_v39 = vld [vmem:[%s10326_s20 + $0x170] sm:$0xff] }
 0x376   : > { %v2430_v48 = vadd.f32 %v2302_v28, %v1657_v49  ;;  %v2927_v28 = vpop.permute.xlu0 %2926  ;;  %v12021_v49 = vpop.f32.mrf.mxu1 }
 0x377   : > { %v1906_v46 = vpop.permute.xlu1 %1905 }
 0x378   : > { %v2303_v14 = vmul.f32 %v11708_v0, %v1906_v46  ;;  %9803 = vset.pattern.permute.xlu1 %v15189_v29 }
 0x379   : > { %1929 = vperm.xlu1 %9803, %v9874_v63  }
 0x37a   : > { %v2431_v5 = vadd.f32 %v2303_v14, %v1658_v2 }
 0x37c   : > { %v2671_v60 = vpop.permute.xlu1 %2670  ;;  %v3204_v53 = vadd.f32 %v3076_v37, %v2431_v5  ;;  %v9877_v37 = vld [vmem:[%s10326_s20 + $0x178] sm:$0xff] }
 0x37d   : > { %v3074_v40 = vmul.f32 %v11714_v26, %v2671_v60  ;;  %2181 = vperm.xlu1 %9803, %v11976_v17  }
 0x37e   : > { %v3339_v46 = vadd.f32 %v11730_v9, %v3204_v53 }
 0x37f   : > { %v3202_v54 = vadd.f32 %v3074_v40, %v2429_v23  ;;  %v15449_v40 = vld [vmem:[#allocation48_spill] sm:$0xff] }
 0x380   : > { %v2675_v12 = vpop.permute.xlu1 %2674  ;;  %v3467_v30 = vmax.f32 %v3339_v46, 0.0  ;;  %v1720_v19 = vmul.f32 %v11701_v55, %v15449_v40 }
 0x381   : > { %v3337_v50 = vadd.f32 %v11730_v9, %v3202_v54  ;;  %v3075_v47 = vmul.f32 %v11714_v26, %v2675_v12  ;;  %9804 = vset.pattern.permute.xlu1 %v15192_v44  ;;  %v3138_v54 = vmul.f32 %v11714_v26, %v2927_v28 }
 0x382   : > { %1207 = vperm.xlu1 %9804, %v9875_v39  }
 0x383   : > { %v3465_v14 = vmax.f32 %v3337_v50, 0.0  ;;  %v3203_v56 = vadd.f32 %v3075_v47, %v2430_v48 }
 0x385   : > { %v3338_v21 = vadd.f32 %v11730_v9, %v3203_v56  ;;  %v1478_v1 = vpop.permute.xlu1 %1477  ;;  %v3574_v2 = vpack.c.bf16 %v3465_v14, %v3464_v43 }
 0x386   : > { %1527 = vperm.xlu1 %9804, %v11781_v41   ;;  %v1719_v39 = vmul.f32 %v11701_v55, %v1478_v1 }
 0x387   : > { %v3466_v63 = vmax.f32 %v3338_v21, 0.0  ;;  %9542 = vmatprep.mubr.msk.bf16.mxu0 %vm3659_vm0, %v3574_v2  ;;  %v15450_v21 = vld [vmem:[#allocation50_spill] sm:$0xff]  ;;  %v15451_v2 = vld [vmem:[#allocation111_spill] sm:$0xff] }
 0x389   : > { %v3575_v16 = vpack.c.bf16 %v3467_v30, %v3466_v63  ;;  %v2366_v30 = vmul.f32 %v11708_v0, %v15451_v2 }
 0x38a   : > { %1532 = vperm.xlu1 %9804, %v9876_v10   ;;  %v2150_v42 = vpop.permute.xlu1 %2149 }
 0x38b   : > { %9543 = vmatmul.mubr.msk.bf16.gmra.mxu0 %vm3659_vm0, %v3575_v16 }
 0x38e   : > { %9805 = vset.pattern.permute.xlu1 %v15189_v29  ;;  %v2154_v5 = vpop.permute.xlu1 %2153 }
 0x38f   : > { %1937 = vperm.xlu1 %9805, %v9877_v37   ;;  %v2365_v23 = vmul.f32 %v11708_v0, %v2154_v5 }
 0x391   : > { %v2493_v53 = vadd.f32 %v2365_v23, %v1720_v19 }
 0x393   : > { %2189 = vperm.xlu1 %9805, %v11781_v41   ;;  %v1493_v60 = vpop.permute.xlu1 %1492  ;;  %v2364_v41 = vmul.f32 %v11708_v0, %v2150_v42  ;;  %v3266_v43 = vadd.f32 %v3138_v54, %v2493_v53 }
 0x395   : > { %v2492_v63 = vadd.f32 %v2364_v41, %v1719_v39  ;;  %v3401_v1 = vadd.f32 %v11730_v9, %v3266_v43  ;;  %v1722_v41 = vmul.f32 %v11701_v55, %v1493_v60 }
 0x397   : > { %9806 = vset.pattern.permute.xlu1 %v15198_v24 }
 0x398   : > { %2698 = vperm.xlu1 %9806, %v11972_v59   ;;  %v2162_v12 = vpop.permute.xlu1 %2161  ;;  %v9592_v48 = vpop.f32.mrf.mxu1  ;;  %v1721_v59 = vmul.f32 %v11701_v55, %v15450_v21 }
 0x399   : > { %v4231_v47 = vadd.f32 %v9592_v48, %v11889_v61  ;;  %v2367_v19 = vmul.f32 %v11708_v0, %v2162_v12  ;;  %v3529_v48 = vmax.f32 %v3401_v1, 0.0 }
 0x39a   : > { %v12027_v50 = vpop.f32.mrf.mxu1  ;;  %v2494_v40 = vadd.f32 %v2366_v30, %v1721_v59 }
 0x39b   : > { %v4483_v42 = vmax.f32 %v4231_v47, 0.0 }
 0x39c   : > { %2954 = vperm.xlu1 %9806, %v11976_v17   ;;  %v9593_v46 = vpop.f32.mrf.mxu1 }
 0x39d   : > { %v4234_v14 = vadd.f32 %v9593_v46, %v11889_v61  ;;  %v2923_v56 = vpop.permute.xlu1 %2922  ;;  %v2495_v46 = vadd.f32 %v2367_v19, %v1722_v41 }
 0x39e   : > { %v3137_v16 = vmul.f32 %v11714_v26, %v2923_v56 }
 0x39f   : > { %v4484_v5 = vmax.f32 %v4234_v14, 0.0 }
 0x3a0   : > { %v3265_v23 = vadd.f32 %v3137_v16, %v2492_v63  ;;  %2958 = vperm.xlu1 %9806, %v11985_v38   ;;  %v12056_v16 = vld [vmem:[%s10326_s20 + $0x380] sm:$0xff] }
 0x3a1   : > { %v12040_v17 = vpack.c.bf16 %v4484_v5, %v4483_v42  ;;  %v2931_v28 = vpop.permute.xlu1 %2930 }
 0x3a2   : > { %v3400_v53 = vadd.f32 %v11730_v9, %v3265_v23  ;;  %v3139_v54 = vmul.f32 %v11714_v26, %v2931_v28  ;;  %v12069_v28 = vld [vmem:[%s10326_s20 + $0x390] sm:$0xff] }
 0x3a3   : > { %15452 = vst [vmem:[#allocation26_spill] sm:$0xff] %v12040_v17 }
 0x3a4   : > { %v3528_v47 = vmax.f32 %v3400_v53, 0.0  ;;  %v3267_v39 = vadd.f32 %v3139_v54, %v2494_v40  ;;  %2710 = vperm.xlu1 %9806, %v9877_v37   ;;  %v12052_v37 = vld [vmem:[%s10326_s20 + $0x188] sm:$0xff]  ;;  %v12071_v40 = vpop.f32.mrf.mxu1  ;;  %v2683_v54 = vpop.permute.xlu0 %2682 }
 0x3a5   : > { %v2935_v43 = vpop.permute.xlu1 %2934 }
 0x3a6   : > { %v3140_v38 = vmul.f32 %v11714_v26, %v2935_v43  ;;  %v3606_v14 = vpack.c.bf16 %v3529_v48, %v3528_v47  ;;  %v3402_v56 = vadd.f32 %v11730_v9, %v3267_v39  ;;  %v15453_v43 = vld [vmem:[#allocation52_spill] sm:$0xff] }
 0x3a8   : > { %v3268_v12 = vadd.f32 %v3140_v38, %v2495_v46  ;;  %2966 = vperm.xlu1 %9806, %v9876_v10   ;;  %9606 = vmatprep.mubr.msk.bf16.mxu1 %vm3659_vm0, %v3606_v14  ;;  %v3530_v60 = vmax.f32 %v3402_v56, 0.0  ;;  %v1659_v46 = vmul.f32 %v11701_v55, %v15453_v43  ;;  %v2943_v38 = vpop.permute.xlu0 %2942 }
 0x3aa   : > { %v3403_v21 = vadd.f32 %v11730_v9, %v3268_v12  ;;  %v1183_v59 = vpop.permute.xlu1 %1182 }
 0x3ab   : > { %v1660_v43 = vmul.f32 %v11701_v55, %v1183_v59 }
 0x3ac   : > { %v3531_v2 = vmax.f32 %v3403_v21, 0.0  ;;  %9807 = vset.pattern.permute.xlu1 %v15192_v44  ;;  %v3077_v21 = vmul.f32 %v11714_v26, %v2683_v54  ;;  %v2695_v54 = vpop.permute.xlu0 %2694 }
 0x3ad   : > { %1222 = vperm.xlu1 %9807, %v12052_v37  }
 0x3ae   : > { %v1498_v30 = vpop.permute.xlu1 %1497  ;;  %v3607_v63 = vpack.c.bf16 %v3531_v2, %v3530_v60 }
 0x3b0   : > { %9607 = vmatmul.mubr.msk.bf16.gmra.mxu1 %vm3659_vm0, %v3607_v63 }
 0x3b1   : > { %1537 = vperm.xlu1 %9807, %v12056_v16  }
 0x3b3   : > { %v1910_v10 = vpop.permute.xlu1 %1909 }
 0x3b4   : > { %v2304_v48 = vmul.f32 %v11708_v0, %v1910_v10  ;;  %v15455_v10 = vld [vmem:[#allocation54_spill] sm:$0xff] }
 0x3b5   : > { %9808 = vset.pattern.permute.xlu1 %v15189_v29 }
 0x3b6   : > { %1941 = vperm.xlu1 %9808, %v11790_v6   ;;  %v2432_v12 = vadd.f32 %v2304_v48, %v1659_v46  ;;  %v3142_v48 = vmul.f32 %v11714_v26, %v2943_v38 }
 0x3b7   : > { %v2166_v42 = vpop.permute.xlu1 %2165 }
 0x3ba   : > { %2197 = vperm.xlu1 %9808, %v12056_v16  }
 0x3bb   : > { %v2170_v5 = vpop.permute.xlu1 %2169 }
 0x3bc   : > { %v2369_v60 = vmul.f32 %v11708_v0, %v2170_v5 }
 0x3be   : > { %2201 = vperm.xlu1 %9808, %v11802_v31  }
 0x3c0   : > { %v1193_v1 = vpop.permute.xlu1 %1192 }
 0x3c1   : > { %v1662_v5 = vmul.f32 %v11701_v55, %v1193_v1 }
 0x3c2   : > { %9809 = vset.pattern.permute.xlu1 %v15192_v44 }
 0x3c3   : > { %1232 = vperm.xlu1 %9809, %v11811_v52   ;;  %v12080_v52 = vld [vmem:[%s10326_s20 + $0x190] sm:$0xff] }
 0x3c4   : > { %v12066_v23 = vpop.permute.xlu1 %1507 }
 0x3c7   : > { %1547 = vperm.xlu1 %9809, %v12069_v28  }
 0x3c8   : > { %v9596_v6 = vpop.f32.mrf.mxu1 }
 0x3c9   : > { %v1918_v19 = vpop.permute.xlu1 %1917  ;;  %v4247_v31 = vadd.f32 %v9596_v6, %v11889_v61  ;;  %v1724_v6 = vmul.f32 %v11701_v55, %v15455_v10  ;;  %v2368_v10 = vmul.f32 %v11708_v0, %v2166_v42 }
 0x3ca   : > { %v12074_v53 = vpop.f32.mrf.mxu1 }
 0x3cb   : > { %9810 = vset.pattern.permute.xlu1 %v15189_v29  ;;  %v4487_v14 = vmax.f32 %v4247_v31, 0.0  ;;  %v3205_v31 = vadd.f32 %v3077_v21, %v2432_v12  ;;  %v3080_v21 = vmul.f32 %v11714_v26, %v2695_v54 }
 0x3cc   : > { %1949 = vperm.xlu1 %9810, %v12080_v52   ;;  %v9597_v41 = vpop.f32.mrf.mxu1 }
 0x3cd   : > { %v4250_v47 = vadd.f32 %v9597_v41, %v11889_v61  ;;  %v2174_v39 = vpop.permute.xlu1 %2173  ;;  %v15456_v41 = vld [vmem:[#allocation113_spill] sm:$0xff]  ;;  %v3340_v59 = vadd.f32 %v11730_v9, %v3205_v31 }
 0x3ce   : > { %v2305_v17 = vmul.f32 %v11708_v0, %v15456_v41 }
 0x3cf   : > { %v4488_v56 = vmax.f32 %v4250_v47, 0.0  ;;  %v2497_v47 = vadd.f32 %v2369_v60, %v1724_v6  ;;  %v2951_v60 = vpop.permute.xlu0 %2950 }
 0x3d0   : > { %2205 = vperm.xlu1 %9810, %v12069_v28  }
 0x3d1   : > { %v12089_v2 = vpack.c.bf16 %v4488_v56, %v4487_v14  ;;  %v2178_v63 = vpop.permute.xlu1 %2177  ;;  %v15457_v14 = vld [vmem:[#allocation114_spill] sm:$0xff]  ;;  %v3270_v12 = vadd.f32 %v3142_v48, %v2497_v47 }
 0x3d2   : > { %v2307_v56 = vmul.f32 %v11708_v0, %v15457_v14  ;;  %v2371_v38 = vmul.f32 %v11708_v0, %v2178_v63  ;;  %v15459_v63 = vld [vmem:[#allocation57_spill] sm:$0xff] }
 0x3d3   : > { %15454 = vst [vmem:[#allocation19_spill] sm:$0xff] %v12089_v2  ;;  %v2433_v2 = vadd.f32 %v2305_v17, %v1660_v43  ;;  %v2306_v17 = vmul.f32 %v11708_v0, %v1918_v19  ;;  %v15458_v43 = vld [vmem:[#allocation59_spill] sm:$0xff]  ;;  %v3405_v0 = vadd.f32 %v11730_v9, %v3270_v12 }
 0x3d4   : > { %2209 = vperm.xlu1 %9810, %v11820_v57   ;;  %v1723_v57 = vmul.f32 %v11701_v55, %v1498_v30  ;;  %v2435_v1 = vadd.f32 %v2307_v56, %v1662_v5  ;;  %v1726_v31 = vmul.f32 %v11701_v55, %v15458_v43  ;;  %v12117_v30 = vld [vmem:[%s15045_s1] ss:$0 sm:$0xff]  ;;  %v12125_v55 = vld [vmem:[%s15045_s1 + $0x2] ss:$0 sm:$0xff] }
 0x3d5   : > { %v3144_v19 = vmul.f32 %v12125_v55, %v2951_v60 }
 0x3d6   : > { %v2687_v46 = vpop.permute.xlu1 %2686  ;;  %v2496_v47 = vadd.f32 %v2368_v10, %v1723_v57  ;;  %v3208_v5 = vadd.f32 %v3080_v21, %v2435_v1  ;;  %v3533_v21 = vmax.f32 %v3405_v0, 0.0  ;;  %v1725_v1 = vmul.f32 %v12117_v30, %v12066_v23 }
 0x3d7   : > { %v3078_v41 = vmul.f32 %v11714_v26, %v2687_v46 }
 0x3d8   : > { %9811 = vset.pattern.permute.xlu1 %v15198_v24 }
 0x3d9   : > { %v3206_v6 = vadd.f32 %v3078_v41, %v2433_v2  ;;  %2718 = vperm.xlu1 %9811, %v12052_v37   ;;  %v1661_v2 = vmul.f32 %v12117_v30, %v15459_v63  ;;  %v3468_v37 = vmax.f32 %v3340_v59, 0.0  ;;  %v12132_v41 = vld [vmem:[%s15045_s1 + $0x1] ss:$0 sm:$0xff] }
 0x3da   : > { %v2939_v42 = vpop.permute.xlu1 %2938  ;;  %v2370_v59 = vmul.f32 %v12132_v41, %v2174_v39 }
 0x3db   : > { %v3341_v48 = vadd.f32 %v11730_v9, %v3206_v6  ;;  %v3141_v54 = vmul.f32 %v11714_v26, %v2939_v42  ;;  %v2499_v26 = vadd.f32 %v2371_v38, %v1726_v31  ;;  %v2434_v56 = vadd.f32 %v2306_v17, %v1661_v2 }
 0x3dc   : > { %v2498_v39 = vadd.f32 %v2370_v59, %v1725_v1 }
 0x3dd   : > { %v3469_v46 = vmax.f32 %v3341_v48, 0.0  ;;  %v3269_v14 = vadd.f32 %v3141_v54, %v2496_v47  ;;  %2970 = vperm.xlu1 %9811, %v12056_v16   ;;  %v12142_v16 = vld [vmem:[%s15046_s2] ss:$0 sm:$0xff]  ;;  %v3272_v6 = vadd.f32 %v3144_v19, %v2499_v26 }
 0x3de   : > { %v2691_v10 = vpop.permute.xlu1 %2690  ;;  %v3343_v38 = vadd.f32 %v12142_v16, %v3208_v5  ;;  %v9884_v5 = vld [vmem:[%s10326_s20 + $0x1a0] sm:$0xff] }
 0x3df   : > { %v3404_v12 = vadd.f32 %v11730_v9, %v3269_v14  ;;  %v3079_v57 = vmul.f32 %v12125_v55, %v2691_v10  ;;  %v3576_v60 = vpack.c.bf16 %v3469_v46, %v3468_v37  ;;  %v3407_v48 = vadd.f32 %v12142_v16, %v3272_v6  ;;  %v12157_v14 = vld [vmem:[%s10326_s20 + $0x3a0] sm:$0xff]  ;;  %v12179_v6 = vld [vmem:[%s10326_s20 + $0x3b8] sm:$0xff] }
 0x3e0   : > { %v3471_v47 = vmax.f32 %v3343_v38, 0.0 }
 0x3e1   : > { %v3532_v17 = vmax.f32 %v3404_v12, 0.0  ;;  %v3207_v42 = vadd.f32 %v3079_v57, %v2434_v56  ;;  %2722 = vperm.xlu1 %9811, %v12080_v52   ;;  %9546 = vmatprep.mubr.msk.bf16.mxu0 %vm3659_vm0, %v3576_v60  ;;  %v3535_v0 = vmax.f32 %v3407_v48, 0.0  ;;  %v12162_v56 = vld [vmem:[%s10326_s20 + $0x3a8] sm:$0xff]  ;;  %v12170_v60 = vpop.f32.mrf.mxu1  ;;  %v9887_v48 = vld [vmem:[%s10326_s20 + $0x1b8] sm:$0xff] }
 0x3e2   : > { %v2947_v9 = vpop.permute.xlu1 %2946 }
 0x3e3   : > { %v3342_v43 = vadd.f32 %v12142_v16, %v3207_v42  ;;  %v3143_v23 = vmul.f32 %v12125_v55, %v2947_v9  ;;  %v3608_v31 = vpack.c.bf16 %v3533_v21, %v3532_v17 }
 0x3e5   : > { %v3470_v54 = vmax.f32 %v3342_v43, 0.0  ;;  %v3271_v63 = vadd.f32 %v3143_v23, %v2498_v39  ;;  %2978 = vperm.xlu1 %9811, %v12069_v28   ;;  %9610 = vmatprep.mubr.msk.bf16.mxu1 %vm3659_vm0, %v3608_v31  ;;  %v2703_v39 = vpop.permute.xlu0 %2702  ;;  %v15460_v43 = vld [vmem:[#allocation60_spill] sm:$0xff] }
 0x3e6   : > { %v1664_v23 = vmul.f32 %v12117_v30, %v15460_v43 }
 0x3e7   : > { %v3406_v52 = vadd.f32 %v12142_v16, %v3271_v63  ;;  %v1198_v2 = vpop.permute.xlu1 %1197  ;;  %v3577_v37 = vpack.c.bf16 %v3471_v47, %v3470_v54  ;;  %v3082_v63 = vmul.f32 %v12125_v55, %v2703_v39 }
 0x3e9   : > { %v3534_v19 = vmax.f32 %v3406_v52, 0.0  ;;  %9812 = vset.pattern.permute.xlu1 %v15192_v44  ;;  %9547 = vmatmul.mubr.msk.bf16.gmra.mxu0 %vm3659_vm0, %v3577_v37  ;;  %v2707_v43 = vpop.permute.xlu0 %2706 }
 0x3ea   : > { %1237 = vperm.xlu1 %9812, %v9884_v5  }
 0x3eb   : > { %v1518_v26 = vpop.permute.xlu1 %1517  ;;  %v3609_v46 = vpack.c.bf16 %v3535_v0, %v3534_v19  ;;  %v1663_v0 = vmul.f32 %v12117_v30, %v1198_v2  ;;  %v15462_v19 = vld [vmem:[#allocation116_spill] sm:$0xff] }
 0x3ec   : > { %v1727_v39 = vmul.f32 %v12117_v30, %v1518_v26 }
 0x3ed   : > { %9611 = vmatmul.mubr.msk.bf16.gmra.mxu1 %vm3659_vm0, %v3609_v46  ;;  %v2308_v46 = vmul.f32 %v12132_v41, %v15462_v19 }
 0x3ee   : > { %1557 = vperm.xlu1 %9812, %v12157_v14  }
 0x3ef   : > { %v1523_v28 = vpop.permute.xlu1 %1522 }
 0x3f2   : > { %1562 = vperm.xlu1 %9812, %v12162_v56  }
 0x3f4   : > { %v1930_v10 = vpop.permute.xlu1 %1929 }
 0x3f6   : > { %9813 = vset.pattern.permute.xlu1 %v15189_v29 }
 0x3f7   : > { %1961 = vperm.xlu1 %9813, %v11826_v8  }
 0x3f8   : > { %v2182_v59 = vpop.permute.xlu1 %2181 }
 0x3fb   : > { %2213 = vperm.xlu1 %9813, %v12157_v14  }
 0x3fd   : > { %v1208_v12 = vpop.permute.xlu1 %1207 }
 0x3ff   : > { %9814 = vset.pattern.permute.xlu1 %v15192_v44 }
 0x400   : > { %1247 = vperm.xlu1 %9814, %v11832_v35   ;;  %v2309_v35 = vmul.f32 %v12132_v41, %v1930_v10 }
 0x401   : > { %v1528_v57 = vpop.permute.xlu1 %1527 }
 0x402   : > { %v2437_v54 = vadd.f32 %v2309_v35, %v1664_v23  ;;  %v1665_v35 = vmul.f32 %v12117_v30, %v1208_v12  ;;  %v15463_v23 = vld [vmem:[#allocation120_spill] sm:$0xff] }
 0x404   : > { %1567 = vperm.xlu1 %9814, %v11858_v62   ;;  %v9600_v21 = vpop.f32.mrf.mxu1  ;;  %v3210_v10 = vadd.f32 %v3082_v63, %v2437_v54 }
 0x405   : > { %v12173_v1 = vpop.permute.xlu1 %1532  ;;  %v4263_v8 = vadd.f32 %v9600_v21, %v11889_v61 }
 0x406   : > { %v12175_v38 = vpop.f32.mrf.mxu1  ;;  %v3345_v2 = vadd.f32 %v12142_v16, %v3210_v10 }
 0x407   : > { %v4491_v31 = vmax.f32 %v4263_v8, 0.0  ;;  %v2436_v8 = vadd.f32 %v2308_v46, %v1663_v0  ;;  %v15464_v0 = vld [vmem:[#allocation118_spill] sm:$0xff]  ;;  %v3083_v46 = vmul.f32 %v12125_v55, %v2707_v43 }
 0x408   : > { %1572 = vperm.xlu1 %9814, %v12179_v6   ;;  %v9601_v17 = vpop.f32.mrf.mxu1  ;;  %v2373_v19 = vmul.f32 %v12132_v41, %v15464_v0  ;;  %v3473_v10 = vmax.f32 %v3345_v2, 0.0  ;;  %v15466_v0 = vld [vmem:[#allocation122_spill] sm:$0xff] }
 0x409   : > { %v4266_v42 = vadd.f32 %v9601_v17, %v11889_v61  ;;  %v2372_v17 = vmul.f32 %v12132_v41, %v2182_v59 }
 0x40a   : > { %v1938_v9 = vpop.permute.xlu1 %1937 }
 0x40b   : > { %v4492_v47 = vmax.f32 %v4266_v42, 0.0  ;;  %v2500_v59 = vadd.f32 %v2372_v17, %v1727_v39  ;;  %v1729_v39 = vmul.f32 %v12117_v30, %v1528_v57  ;;  %v1730_v57 = vmul.f32 %v12117_v30, %v12173_v1 }
 0x40c   : > { %9815 = vset.pattern.permute.xlu1 %v15189_v29 }
 0x40d   : > { %1969 = vperm.xlu1 %9815, %v9887_v48   ;;  %v12189_v52 = vpack.c.bf16 %v4492_v47, %v4491_v31  ;;  %v2310_v31 = vmul.f32 %v12132_v41, %v15463_v23  ;;  %v1728_v47 = vmul.f32 %v12117_v30, %v1523_v28 }
 0x40e   : > { %v2190_v37 = vpop.permute.xlu1 %2189 }
 0x40f   : > { %15461 = vst [vmem:[#allocation20_spill] sm:$0xff] %v12189_v52  ;;  %v2438_v26 = vadd.f32 %v2310_v31, %v1665_v35  ;;  %v2501_v28 = vadd.f32 %v2373_v19, %v1728_v47  ;;  %v15465_v35 = vld [vmem:[#allocation62_spill] sm:$0xff]  ;;  %v2375_v19 = vmul.f32 %v12132_v41, %v15466_v0 }
 0x410   : > { %v1666_v43 = vmul.f32 %v12117_v30, %v15465_v35 }
 0x411   : > { %2221 = vperm.xlu1 %9815, %v11858_v62   ;;  %v3211_v2 = vadd.f32 %v3083_v46, %v2438_v26 }
 0x413   : > { %v2699_v21 = vpop.permute.xlu1 %2698  ;;  %v3346_v26 = vadd.f32 %v12142_v16, %v3211_v2 }
 0x414   : > { %v3081_v42 = vmul.f32 %v12125_v55, %v2699_v21  ;;  %v2963_v21 = vpop.permute.xlu0 %2962 }
 0x415   : > { %9816 = vset.pattern.permute.xlu1 %v15198_v24 }
 0x416   : > { %v3209_v62 = vadd.f32 %v3081_v42, %v2436_v8  ;;  %2730 = vperm.xlu1 %9816, %v9884_v5   ;;  %v2374_v5 = vmul.f32 %v12132_v41, %v2190_v37  ;;  %v3147_v37 = vmul.f32 %v12125_v55, %v2963_v21 }
 0x417   : > { %v2955_v54 = vpop.permute.xlu1 %2954 }
 0x418   : > { %v3344_v63 = vadd.f32 %v12142_v16, %v3209_v62  ;;  %v3145_v12 = vmul.f32 %v12125_v55, %v2955_v54  ;;  %v2311_v62 = vmul.f32 %v12132_v41, %v1938_v9  ;;  %v2502_v31 = vadd.f32 %v2374_v5, %v1729_v39 }
 0x41a   : > { %v3472_v8 = vmax.f32 %v3344_v63, 0.0  ;;  %v3273_v42 = vadd.f32 %v3145_v12, %v2500_v59  ;;  %2986 = vperm.xlu1 %9816, %v12157_v14   ;;  %v2439_v9 = vadd.f32 %v2311_v62, %v1666_v43  ;;  %v3275_v46 = vadd.f32 %v3147_v37, %v2502_v31  ;;  %v12238_v37 = vld [vmem:[%s10326_s20 + $0x1c8] sm:$0xff] }
 0x41b   : > { %v2959_v17 = vpop.permute.xlu1 %2958 }
 0x41c   : > { %v3146_v23 = vmul.f32 %v12125_v55, %v2959_v17  ;;  %v3578_v54 = vpack.c.bf16 %v3473_v10, %v3472_v8  ;;  %v3408_v59 = vadd.f32 %v12142_v16, %v3273_v42  ;;  %v2503_v8 = vadd.f32 %v2375_v19, %v1730_v57  ;;  %v4645_v19 = vld [vmem:[%s15049_s5 + $0x1c0] sm:$0xff] }
 0x41d   : > { %v3474_v17 = vmax.f32 %v3346_v26, 0.0  ;;  %v3410_v39 = vadd.f32 %v12142_v16, %v3275_v46  ;;  %v4649_v26 = vld [vmem:[%s15049_s5 + $0x1e0] sm:$0xff] }
 0x41e   : > { %v3274_v63 = vadd.f32 %v3146_v23, %v2501_v28  ;;  %2990 = vperm.xlu1 %9816, %v12162_v56   ;;  %9550 = vmatprep.mubr.msk.bf16.mxu0 %vm3659_vm0, %v3578_v54  ;;  %v3536_v10 = vmax.f32 %v3408_v59, 0.0  ;;  %v12244_v59 = vld [vmem:[%s10326_s20 + $0x3c0] sm:$0xff] }
 0x41f   : > { %v2711_v14 = vpop.permute.xlu1 %2710  ;;  %v3538_v43 = vmax.f32 %v3410_v39, 0.0 }
 0x420   : > { %v3409_v47 = vadd.f32 %v12142_v16, %v3274_v63  ;;  %v3084_v12 = vmul.f32 %v12125_v55, %v2711_v14  ;;  %v12248_v14 = vpop.f32.mrf.mxu1 }
 0x422   : > { %v3537_v5 = vmax.f32 %v3409_v47, 0.0  ;;  %v3212_v56 = vadd.f32 %v3084_v12, %v2439_v9  ;;  %2742 = vperm.xlu1 %9816, %v9887_v48  }
 0x423   : > { %v2967_v21 = vpop.permute.xlu1 %2966 }
 0x424   : > { %v3347_v42 = vadd.f32 %v12142_v16, %v3212_v56  ;;  %v3148_v1 = vmul.f32 %v12125_v55, %v2967_v21  ;;  %v3610_v28 = vpack.c.bf16 %v3537_v5, %v3536_v10  ;;  %v9417_v5 = vcombine.low %v4645_v19, %v4649_v26  ;;  %v4650_v21 = vld [vmem:[%s15049_s5 + $0x1e8] sm:$0xff] }
 0x425   : > { %v9418_v56 = vcombine.high %v4645_v19, %v4649_v26  ;;  %v12297_v19 = vld [vmem:[%s10326_s20 + $0x1d0] sm:$0xff] }
 0x426   : > { %v3475_v62 = vmax.f32 %v3347_v42, 0.0  ;;  %v3276_v23 = vadd.f32 %v3148_v1, %v2503_v8  ;;  %2998 = vperm.xlu1 %9816, %v12179_v6   ;;  %9614 = vmatprep.mubr.msk.bf16.mxu1 %vm3659_vm0, %v3610_v28 }
 0x427   : > { %5015 = vmatprep.subr.bf16.mxu1 %v9418_v56 }
 0x428   : > { %v3411_v48 = vadd.f32 %v12142_v16, %v3276_v23  ;;  %v12233_v54 = vpop.permute.xlu1 %1222  ;;  %v3579_v35 = vpack.c.bf16 %v3475_v62, %v3474_v17  ;;  %5016 = vmatpush1.bf16.msra.mxu1 %v9417_v5  ;;  %v12279_v62 = vld [vmem:[%s10326_s20 + $0x3d0] sm:$0xff]  ;;  %v4641_v23 = vld [vmem:[%s15049_s5 + $0x1a0] sm:$0xff] }
 0x42a   : > { %v3539_v2 = vmax.f32 %v3411_v48, 0.0  ;;  %9817 = vset.pattern.permute.xlu1 %v15192_v44  ;;  %9551 = vmatmul.mubr.msk.bf16.gmra.mxu0 %vm3659_vm0, %v3579_v35  ;;  %v4638_v48 = vld [vmem:[%s15049_s5 + $0x188] sm:$0xff] }
 0x42b   : > { %1262 = vperm.xlu1 %9817, %v12238_v37  }
 0x42c   : > { %v12241_v31 = vpop.permute.xlu1 %1537  ;;  %v3611_v6 = vpack.c.bf16 %v3539_v2, %v3538_v43  ;;  %v4642_v43 = vld [vmem:[%s15049_s5 + $0x1a8] sm:$0xff] }
 0x42e   : > { %9615 = vmatmul.mubr.msk.bf16.gmra.mxu1 %vm3659_vm0, %v3611_v6  ;;  %v9411_v6 = vcombine.low %v4638_v48, %v4642_v43 }
 0x42f   : > { %1577 = vperm.xlu1 %9817, %v12244_v59  }
 0x431   : > { %v1942_v63 = vpop.permute.xlu1 %1941 }
 0x433   : > { %9818 = vset.pattern.permute.xlu1 %v15189_v29 }
 0x434   : > { %1973 = vperm.xlu1 %9818, %v11869_v11   ;;  %v9604_v57 = vpop.f32.mrf.mxu1  ;;  %v4646_v11 = vld [vmem:[%s15049_s5 + $0x1c8] sm:$0xff] }
 0x435   : > { %v12252_v9 = vpop.permute.xlu1 %2197  ;;  %v4279_v12 = vadd.f32 %v9604_v57, %v11889_v61  ;;  %v9419_v8 = vcombine.low %v4646_v11, %v4650_v21  ;;  %v9420_v42 = vcombine.high %v4646_v11, %v4650_v21  ;;  %v9412_v57 = vcombine.high %v4638_v48, %v4642_v43  ;;  %v15468_v11 = vld [vmem:[#allocation64_spill] sm:$0xff]  ;;  %v15471_v43 = vld [vmem:[#allocation125_spill] sm:$0xff] }
 0x436   : > { %v12254_v47 = vpop.f32.mrf.mxu1 }
 0x437   : > { %v4495_v1 = vmax.f32 %v4279_v12, 0.0  ;;  %5688 = vmatprep.subr.bf16.mxu0 %v9420_v42  ;;  %v2715_v12 = vpop.permute.xlu0 %2714 }
 0x438   : > { %2229 = vperm.xlu1 %9818, %v12244_v59   ;;  %v9605_v0 = vpop.f32.mrf.mxu1  ;;  %5689 = vmatpush1.bf16.msra.mxu0 %v9419_v8  ;;  %v3085_v5 = vmul.f32 %v12125_v55, %v2715_v12 }
 0x439   : > { %v4282_v46 = vadd.f32 %v9605_v0, %v11889_v61  ;;  %v2202_v10 = vpop.permute.xlu1 %2201  ;;  %5690 = vmatprep.subr.bf16.mxu0 %v9412_v57  ;;  %v2312_v0 = vmul.f32 %v12132_v41, %v1942_v63  ;;  %v15469_v63 = vld [vmem:[#allocation66_spill] sm:$0xff] }
 0x43a   : > { %v2377_v8 = vmul.f32 %v12132_v41, %v2202_v10 }
 0x43b   : > { %v4496_v28 = vmax.f32 %v4282_v46, 0.0  ;;  %v1667_v46 = vmul.f32 %v12117_v30, %v15468_v11  ;;  %v2975_v56 = vpop.permute.xlu0 %2974 }
 0x43c   : > { %2233 = vperm.xlu1 %9818, %v11877_v3   ;;  %v4637_v3 = vld [vmem:[%s15049_s5 + $0x180] sm:$0xff]  ;;  %5691 = vmatpush1.bf16.msra.mxu0 %v9411_v6  ;;  %v2315_v6 = vmul.f32 %v12132_v41, %v15471_v43 }
 0x43d   : > { %v12272_v17 = vpack.c.bf16 %v4496_v28, %v4495_v1  ;;  %v9410_v35 = vcombine.high %v4637_v3, %v4641_v23  ;;  %v2440_v21 = vadd.f32 %v2312_v0, %v1667_v46  ;;  %v1732_v1 = vmul.f32 %v12117_v30, %v15469_v63 }
 0x43e   : > { %v1233_v61 = vpop.permute.xlu1 %1232  ;;  %v1668_v28 = vmul.f32 %v12117_v30, %v12233_v54  ;;  %v2376_v54 = vmul.f32 %v12132_v41, %v12252_v9  ;;  %v4630_v9 = vld [vmem:[%s15049_s5 + $0x148] sm:$0xff] }
 0x43f   : > { %15467 = vst [vmem:[#allocation88_spill] sm:$0xff] %v12272_v17  ;;  %5017 = vmatprep.subr.bf16.mxu1 %v9410_v35  ;;  %v2505_v48 = vadd.f32 %v2377_v8, %v1732_v1  ;;  %v15470_v35 = vld [vmem:[#allocation124_spill] sm:$0xff]  ;;  %v2727_v57 = vpop.permute.xlu0 %2726  ;;  %v4633_v8 = vld [vmem:[%s15049_s5 + $0x160] sm:$0xff] }
 0x440   : > { %9819 = vset.pattern.permute.xlu1 %v15192_v44  ;;  %v2313_v10 = vmul.f32 %v12132_v41, %v15470_v35  ;;  %v3088_v0 = vmul.f32 %v12125_v55, %v2727_v57 }
 0x441   : > { %1272 = vperm.xlu1 %9819, %v11883_v45   ;;  %v9409_v45 = vcombine.low %v4637_v3, %v4641_v23  ;;  %v3150_v3 = vmul.f32 %v12125_v55, %v2975_v56  ;;  %v3213_v23 = vadd.f32 %v3085_v5, %v2440_v21  ;;  %v4629_v21 = vld [vmem:[%s15049_s5 + $0x140] sm:$0xff] }
 0x442   : > { %v12276_v39 = vpop.permute.xlu1 %1547  ;;  %v2441_v11 = vadd.f32 %v2313_v10, %v1668_v28  ;;  %v9401_v1 = vcombine.low %v4629_v21, %v4633_v8  ;;  %v9402_v28 = vcombine.high %v4629_v21, %v4633_v8  ;;  %v15472_v10 = vld [vmem:[#allocation71_spill] sm:$0xff] }
 0x443   : > { %5018 = vmatpush1.bf16.msra.mxu1 %v9409_v45  ;;  %v1670_v45 = vmul.f32 %v12117_v30, %v1233_v61  ;;  %v1731_v61 = vmul.f32 %v12117_v30, %v12241_v31  ;;  %v3278_v5 = vadd.f32 %v3150_v3, %v2505_v48  ;;  %v4634_v3 = vld [vmem:[%s15049_s5 + $0x168] sm:$0xff]  ;;  %v1734_v43 = vmul.f32 %v12117_v30, %v15472_v10 }
 0x444   : > { %v9404_v35 = vcombine.high %v4630_v9, %v4634_v3  ;;  %5019 = vmatprep.subr.bf16.mxu1 %v9402_v28 }
 0x445   : > { %1587 = vperm.xlu1 %9819, %v12279_v62   ;;  %v2443_v56 = vadd.f32 %v2315_v6, %v1670_v45  ;;  %v9403_v45 = vcombine.low %v4630_v9, %v4634_v3  ;;  %v2504_v6 = vadd.f32 %v2376_v54, %v1731_v61 }
 0x446   : > { %5692 = vmatprep.subr.bf16.mxu0 %v9404_v35 }
 0x447   : > { %v1950_v2 = vpop.permute.xlu1 %1949  ;;  %5020 = vmatpush1.bf16.msra.mxu1 %v9401_v1  ;;  %v3216_v21 = vadd.f32 %v3088_v0, %v2443_v56  ;;  %5693 = vmatpush1.bf16.msra.mxu0 %v9403_v45  ;;  %v1733_v0 = vmul.f32 %v12117_v30, %v12276_v39 }
 0x449   : > { %9820 = vset.pattern.permute.xlu1 %v15189_v29  ;;  %v3351_v56 = vadd.f32 %v12142_v16, %v3216_v21  ;;  %v4622_v21 = vld [vmem:[%s15049_s5 + $0x108] sm:$0xff] }
 0x44a   : > { %1981 = vperm.xlu1 %9820, %v12297_v19  }
 0x44b   : > { %v2206_v26 = vpop.permute.xlu1 %2205 }
 0x44c   : > { %v2378_v28 = vmul.f32 %v12132_v41, %v2206_v26 }
 0x44e   : > { %2237 = vperm.xlu1 %9820, %v12279_v62   ;;  %v2506_v26 = vadd.f32 %v2378_v28, %v1733_v0  ;;  %v12385_v28 = vld [vmem:[%s10326_s20 + $0x3e0] sm:$0xff]  ;;  %v12394_v0 = vld [vmem:[%s10326_s20 + $0x3e8] sm:$0xff] }
 0x44f   : > { %v2210_v42 = vpop.permute.xlu1 %2209 }
 0x450   : > { %v2379_v31 = vmul.f32 %v12132_v41, %v2210_v42 }
 0x452   : > { %2241 = vperm.xlu1 %9820, %v11902_v13   ;;  %v3348_v13 = vadd.f32 %v12142_v16, %v3213_v23  ;;  %v2314_v23 = vmul.f32 %v12132_v41, %v1950_v2  ;;  %v2983_v2 = vpop.permute.xlu0 %2982  ;;  %v2507_v8 = vadd.f32 %v2379_v31, %v1734_v43 }
 0x453   : > { %v3152_v54 = vmul.f32 %v12125_v55, %v2983_v2  ;;  %v4621_v2 = vld [vmem:[%s15049_s5 + $0x100] sm:$0xff] }
 0x454   : > { %v2719_v12 = vpop.permute.xlu1 %2718 }
 0x455   : > { %v3086_v46 = vmul.f32 %v12125_v55, %v2719_v12  ;;  %v3280_v31 = vadd.f32 %v3152_v54, %v2507_v8  ;;  %v12376_v8 = vld [vmem:[%s10326_s20 + $0x1e0] sm:$0xff]  ;;  %v4626_v54 = vld [vmem:[%s15049_s5 + $0x128] sm:$0xff] }
 0x456   : > { %9821 = vset.pattern.permute.xlu1 %v15198_v24 }
 0x457   : > { %v3214_v63 = vadd.f32 %v3086_v46, %v2441_v11  ;;  %2750 = vperm.xlu1 %9821, %v12238_v37   ;;  %v15473_v37 = vld [vmem:[#allocation68_spill] sm:$0xff]  ;;  %v3476_v11 = vmax.f32 %v3348_v13, 0.0  ;;  %v3413_v46 = vadd.f32 %v12142_v16, %v3278_v5  ;;  %v3415_v39 = vadd.f32 %v12142_v16, %v3280_v31 }
 0x458   : > { %v2971_v48 = vpop.permute.xlu1 %2970  ;;  %v1669_v12 = vmul.f32 %v12117_v30, %v15473_v37 }
 0x459   : > { %v3349_v42 = vadd.f32 %v12142_v16, %v3214_v63  ;;  %v3149_v57 = vmul.f32 %v12125_v55, %v2971_v48  ;;  %v3541_v1 = vmax.f32 %v3413_v46, 0.0 }
 0x45a   : > { %v2442_v61 = vadd.f32 %v2314_v23, %v1669_v12 }
 0x45b   : > { %v3477_v9 = vmax.f32 %v3349_v42, 0.0  ;;  %v3277_v3 = vadd.f32 %v3149_v57, %v2504_v6  ;;  %3002 = vperm.xlu1 %9821, %v12244_v59   ;;  %v3479_v6 = vmax.f32 %v3351_v56, 0.0 }
 0x45c   : > { %v2723_v63 = vpop.permute.xlu1 %2722 }
 0x45d   : > { %v3580_v48 = vpack.c.bf16 %v3477_v9, %v3476_v11  ;;  %v3412_v13 = vadd.f32 %v12142_v16, %v3277_v3  ;;  %v3087_v5 = vmul.f32 %v12125_v55, %v2723_v63  ;;  %v3543_v11 = vmax.f32 %v3415_v39, 0.0 }
 0x45f   : > { %v3540_v59 = vmax.f32 %v3412_v13, 0.0  ;;  %v3215_v45 = vadd.f32 %v3087_v5, %v2442_v61  ;;  %2754 = vperm.xlu1 %9821, %v12297_v19   ;;  %9554 = vmatprep.mubr.msk.bf16.mxu0 %vm3659_vm0, %v3580_v48  ;;  %v9395_v48 = vcombine.low %v4622_v21, %v4626_v54  ;;  %v9396_v13 = vcombine.high %v4622_v21, %v4626_v54 }
 0x460   : > { %v2979_v23 = vpop.permute.xlu1 %2978 }
 0x461   : > { %v3612_v35 = vpack.c.bf16 %v3541_v1, %v3540_v59  ;;  %v3350_v10 = vadd.f32 %v12142_v16, %v3215_v45  ;;  %v3151_v43 = vmul.f32 %v12125_v55, %v2979_v23  ;;  %5694 = vmatprep.subr.bf16.mxu0 %v9396_v13  ;;  %v12391_v1 = vpop.f32.mrf.mxu1  ;;  %v12402_v45 = vld [vmem:[%s15048_s4] ss:$0 sm:$0xff] }
 0x462   : > { %5695 = vmatpush1.bf16.msra.mxu0 %v9395_v48  ;;  %v4605_v13 = vld [vmem:[%s15049_s5 + $0x80] sm:$0xff] }
 0x463   : > { %v3478_v42 = vmax.f32 %v3350_v10, 0.0  ;;  %v3279_v57 = vadd.f32 %v3151_v43, %v2506_v26  ;;  %3010 = vperm.xlu1 %9821, %v12279_v62   ;;  %9618 = vmatprep.mubr.msk.bf16.mxu1 %vm3659_vm0, %v3612_v35  ;;  %v4625_v62 = vld [vmem:[%s15049_s5 + $0x120] sm:$0xff]  ;;  %v9893_v10 = vld [vmem:[%s10326_s20 + $0x1e8] sm:$0xff] }
 0x464   : > { %v9393_v9 = vcombine.low %v4621_v2, %v4625_v62  ;;  %v9394_v3 = vcombine.high %v4621_v2, %v4625_v62  ;;  %v4618_v2 = vld [vmem:[%s15049_s5 + $0xe8] sm:$0xff] }
 0x465   : > { %v3581_v19 = vpack.c.bf16 %v3479_v6, %v3478_v42  ;;  %v3414_v37 = vadd.f32 %v12142_v16, %v3279_v57  ;;  %v12362_v12 = vpop.permute.xlu1 %1237  ;;  %v4613_v57 = vld [vmem:[%s15049_s5 + $0xc0] sm:$0xff] }
 0x466   : > { %5021 = vmatprep.subr.bf16.mxu1 %v9394_v3  ;;  %v9894_v3 = vld [vmem:[%s10326_s20 + $0x1f0] sm:$0xff] }
 0x467   : > { %v3542_v46 = vmax.f32 %v3414_v37, 0.0  ;;  %9822 = vset.pattern.permute.xlu1 %v15192_v44  ;;  %9555 = vmatmul.mubr.msk.bf16.gmra.mxu0 %vm3659_vm0, %v3581_v19  ;;  %v4617_v19 = vld [vmem:[%s15049_s5 + $0xe0] sm:$0xff]  ;;  %v4614_v37 = vld [vmem:[%s15049_s5 + $0xc8] sm:$0xff] }
 0x468   : > { %1277 = vperm.xlu1 %9822, %v12376_v8   ;;  %5022 = vmatpush1.bf16.msra.mxu1 %v9393_v9  ;;  %v9387_v21 = vcombine.low %v4614_v37, %v4618_v2  ;;  %v9388_v9 = vcombine.high %v4614_v37, %v4618_v2  ;;  %v12449_v2 = vld [vmem:[%s10326_s20 + $0x1f8] sm:$0xff] }
 0x469   : > { %v3613_v61 = vpack.c.bf16 %v3543_v11, %v3542_v46  ;;  %v12382_v63 = vpop.permute.xlu1 %1557  ;;  %v9385_v11 = vcombine.low %v4613_v57, %v4617_v19  ;;  %v9386_v46 = vcombine.high %v4613_v57, %v4617_v19 }
 0x46a   : > { %5696 = vmatprep.subr.bf16.mxu0 %v9388_v9 }
 0x46b   : > { %9619 = vmatmul.mubr.msk.bf16.gmra.mxu1 %vm3659_vm0, %v3613_v61  ;;  %5023 = vmatprep.subr.bf16.mxu1 %v9386_v46  ;;  %v9895_v61 = vld [vmem:[%s10326_s20 + $0x3f0] sm:$0xff] }
 0x46c   : > { %1597 = vperm.xlu1 %9822, %v12385_v28   ;;  %5024 = vmatpush1.bf16.msra.mxu1 %v9385_v11  ;;  %v15476_v11 = vld [vmem:[#allocation73_spill] sm:$0xff] }
 0x46d   : > { %v12389_v5 = vpop.permute.xlu1 %1562  ;;  %5697 = vmatpush1.bf16.msra.mxu0 %v9387_v21  ;;  %v1672_v46 = vmul.f32 %v12117_v30, %v15476_v11  ;;  %v15478_v11 = vld [vmem:[#allocation131_spill] sm:$0xff] }
 0x470   : > { %1602 = vperm.xlu1 %9822, %v12394_v0   ;;  %v9608_v56 = vpop.f32.mrf.mxu1 }
 0x471   : > { %v4295_v23 = vadd.f32 %v12402_v45, %v9608_v56  ;;  %v4609_v56 = vld [vmem:[%s15049_s5 + $0xa0] sm:$0xff] }
 0x472   : > { %v1962_v31 = vpop.permute.xlu1 %1961  ;;  %v12397_v59 = vpop.f32.mrf.mxu1 }
 0x473   : > { %15474 = vst [vmem:[#allocation22_spill] sm:$0xff] %v12397_v59  ;;  %v4499_v6 = vmax.f32 %v4295_v23, 0.0  ;;  %v4606_v23 = vld [vmem:[%s15049_s5 + $0x88] sm:$0xff]  ;;  %v2317_v19 = vmul.f32 %v12132_v41, %v1962_v31  ;;  %v1671_v31 = vmul.f32 %v12117_v30, %v12362_v12 }
 0x474   : > { %9823 = vset.pattern.permute.xlu1 %v15189_v29  ;;  %v9609_v26 = vpop.f32.mrf.mxu1 }
 0x475   : > { %v4298_v35 = vadd.f32 %v12402_v45, %v9609_v26  ;;  %1993 = vperm.xlu1 %9823, %v9893_v10   ;;  %v9377_v26 = vcombine.low %v4605_v13, %v4609_v56  ;;  %v4610_v10 = vld [vmem:[%s15049_s5 + $0xa8] sm:$0xff]  ;;  %v2445_v21 = vadd.f32 %v2317_v19, %v1672_v46  ;;  %v1735_v19 = vmul.f32 %v12117_v30, %v12382_v63 }
 0x476   : > { %v2214_v43 = vpop.permute.xlu1 %2213  ;;  %v9380_v57 = vcombine.high %v4606_v23, %v4610_v10  ;;  %v2318_v46 = vmul.f32 %v12132_v41, %v15478_v11 }
 0x477   : > { %v4500_v39 = vmax.f32 %v4298_v35, 0.0  ;;  %v9378_v35 = vcombine.high %v4605_v13, %v4609_v56  ;;  %v15477_v56 = vld [vmem:[#allocation127_spill] sm:$0xff] }
 0x478   : > { %5698 = vmatprep.subr.bf16.mxu0 %v9380_v57 }
 0x479   : > { %v12408_v42 = vpack.c.bf16 %v4500_v39, %v4499_v6  ;;  %2245 = vperm.xlu1 %9823, %v12385_v28   ;;  %v12441_v6 = vld [vmem:[%s10326_s20 + $0x3f8] sm:$0xff]  ;;  %v9379_v39 = vcombine.low %v4606_v23, %v4610_v10  ;;  %5025 = vmatprep.subr.bf16.mxu1 %v9378_v35  ;;  %v2316_v23 = vmul.f32 %v12132_v41, %v15477_v56 }
 0x47a   : > { %5026 = vmatpush1.bf16.msra.mxu1 %v9377_v26 }
 0x47b   : > { %15475 = vst [vmem:[#allocation23_spill] sm:$0xff] %v12408_v42  ;;  %v1248_v62 = vpop.permute.xlu1 %1247  ;;  %5699 = vmatpush1.bf16.msra.mxu0 %v9379_v39  ;;  %v2444_v10 = vadd.f32 %v2316_v23, %v1671_v31  ;;  %v15479_v31 = vld [vmem:[#allocation129_spill] sm:$0xff]  ;;  %v15489_v42 = vld [vmem:[#allocation82_spill] sm:$0xff] }
 0x47c   : > { %v1673_v57 = vmul.f32 %v12117_v30, %v1248_v62  ;;  %v2381_v63 = vmul.f32 %v12132_v41, %v15479_v31 }
 0x47d   : > { %9824 = vset.pattern.permute.xlu1 %v15192_v44 }
 0x47e   : > { %1287 = vperm.xlu1 %9824, %v9894_v3   ;;  %v2735_v3 = vpop.permute.xlu0 %2734  ;;  %v2446_v23 = vadd.f32 %v2318_v46, %v1673_v57 }
 0x47f   : > { %v1568_v54 = vpop.permute.xlu1 %1567  ;;  %v3090_v13 = vmul.f32 %v12125_v55, %v2735_v3 }
 0x481   : > { %v3218_v26 = vadd.f32 %v3090_v13, %v2445_v21 }
 0x482   : > { %1607 = vperm.xlu1 %9824, %v9895_v61   ;;  %v2739_v3 = vpop.permute.xlu0 %2738 }
 0x483   : > { %v12426_v48 = vpop.permute.xlu1 %1572  ;;  %v3353_v12 = vadd.f32 %v12142_v16, %v3218_v26  ;;  %v3091_v56 = vmul.f32 %v12125_v55, %v2739_v3 }
 0x486   : > { %1612 = vperm.xlu1 %9824, %v12441_v6  }
 0x488   : > { %v1970_v37 = vpop.permute.xlu1 %1969 }
 0x489   : > { %v2319_v11 = vmul.f32 %v12132_v41, %v1970_v37 }
 0x48a   : > { %9826 = vset.pattern.permute.xlu1 %v15189_v29  ;;  %v2380_v29 = vmul.f32 %v12132_v41, %v2214_v43  ;;  %v1736_v43 = vmul.f32 %v12117_v30, %v12389_v5  ;;  %v4597_v5 = vld [vmem:[%s15049_s5 + $0x40] sm:$0xff] }
 0x48b   : > { %2001 = vperm.xlu1 %9826, %v12449_v2  }
 0x48c   : > { %v2222_v9 = vpop.permute.xlu1 %2221  ;;  %v2508_v13 = vadd.f32 %v2380_v29, %v1735_v19  ;;  %v4601_v29 = vld [vmem:[%s15049_s5 + $0x60] sm:$0xff]  ;;  %v2509_v57 = vadd.f32 %v2381_v63, %v1736_v43  ;;  %v1737_v19 = vmul.f32 %v12117_v30, %v1568_v54  ;;  %v2995_v54 = vpop.permute.xlu0 %2994 }
 0x48d   : > { %v2382_v26 = vmul.f32 %v12132_v41, %v2222_v9  ;;  %v3155_v37 = vmul.f32 %v12125_v55, %v2995_v54 }
 0x48f   : > { %2253 = vperm.xlu1 %9826, %v9895_v61   ;;  %v2510_v31 = vadd.f32 %v2382_v26, %v1737_v19 }
 0x491   : > { %v2731_v35 = vpop.permute.xlu1 %2730 }
 0x492   : > { %v3089_v39 = vmul.f32 %v12125_v55, %v2731_v35 }
 0x493   : > { %9828 = vset.pattern.permute.xlu1 %v15198_v24 }
 0x494   : > { %v3217_v61 = vadd.f32 %v3089_v39, %v2444_v10  ;;  %2762 = vperm.xlu1 %9828, %v12376_v8   ;;  %v3481_v8 = vmax.f32 %v3353_v12, 0.0  ;;  %v4598_v39 = vld [vmem:[%s15049_s5 + $0x48] sm:$0xff]  ;;  %v9369_v12 = vcombine.low %v4597_v5, %v4601_v29 }
 0x495   : > { %v2987_v21 = vpop.permute.xlu1 %2986 }
 0x496   : > { %v3352_v62 = vadd.f32 %v12142_v16, %v3217_v61  ;;  %v3153_v24 = vmul.f32 %v12125_v55, %v2987_v21  ;;  %v9370_v61 = vcombine.high %v4597_v5, %v4601_v29 }
 0x498   : > { %v3480_v35 = vmax.f32 %v3352_v62, 0.0  ;;  %v3281_v10 = vadd.f32 %v3153_v24, %v2508_v13  ;;  %3018 = vperm.xlu1 %9828, %v12385_v28   ;;  %v4602_v28 = vld [vmem:[%s15049_s5 + $0x68] sm:$0xff]  ;;  %v15480_v13 = vld [vmem:[#allocation74_spill] sm:$0xff]  ;;  %v3219_v24 = vadd.f32 %v3091_v56, %v2446_v23  ;;  %5027 = vmatprep.subr.bf16.mxu1 %v9370_v61 }
 0x499   : > { %v2991_v9 = vpop.permute.xlu1 %2990  ;;  %v9371_v3 = vcombine.low %v4598_v39, %v4602_v28  ;;  %v1674_v62 = vmul.f32 %v12117_v30, %v15480_v13  ;;  %v9372_v43 = vcombine.high %v4598_v39, %v4602_v28  ;;  %5028 = vmatpush1.bf16.msra.mxu1 %v9369_v12  ;;  %v3283_v39 = vadd.f32 %v3155_v37, %v2510_v31  ;;  %v4589_v31 = vld [vmem:[%s15049_s5] sm:$0xff] }
 0x49a   : > { %v3582_v46 = vpack.c.bf16 %v3481_v8, %v3480_v35  ;;  %v3154_v21 = vmul.f32 %v12125_v55, %v2991_v9  ;;  %v3416_v63 = vadd.f32 %v12142_v16, %v3281_v10  ;;  %v1738_v35 = vmul.f32 %v12117_v30, %v12426_v48  ;;  %v15481_v10 = vld [vmem:[#allocation133_spill] sm:$0xff] }
 0x49b   : > { %5700 = vmatprep.subr.bf16.mxu0 %v9372_v43  ;;  %v2447_v56 = vadd.f32 %v2319_v11, %v1674_v62  ;;  %v2383_v29 = vmul.f32 %v12132_v41, %v15481_v10  ;;  %v12524_v10 = vpop.f32.mrf.mxu1 }
 0x49c   : > { %v3282_v5 = vadd.f32 %v3154_v21, %v2509_v57  ;;  %3022 = vperm.xlu1 %9828, %v12394_v0   ;;  %9558 = vmatprep.mubr.msk.bf16.mxu0 %vm3659_vm0, %v3582_v46  ;;  %v3354_v0 = vadd.f32 %v12142_v16, %v3219_v24  ;;  %v3544_v57 = vmax.f32 %v3416_v63, 0.0  ;;  %v3418_v21 = vadd.f32 %v12142_v16, %v3283_v39  ;;  %v4593_v63 = vld [vmem:[%s15049_s5 + $0x20] sm:$0xff] }
 0x49d   : > { %v2743_v8 = vpop.permute.xlu1 %2742  ;;  %5701 = vmatpush1.bf16.msra.mxu0 %v9371_v3  ;;  %v2511_v61 = vadd.f32 %v2383_v29, %v1738_v35  ;;  %v9362_v37 = vcombine.high %v4589_v31, %v4593_v63  ;;  %15482 = vst [vmem:[#allocation25_spill] sm:$0xff] %v12524_v10 }
 0x49e   : > { %v3417_v23 = vadd.f32 %v12142_v16, %v3282_v5  ;;  %v3092_v26 = vmul.f32 %v12125_v55, %v2743_v8  ;;  %v3482_v46 = vmax.f32 %v3354_v0, 0.0  ;;  %v3546_v43 = vmax.f32 %v3418_v21, 0.0  ;;  %v4594_v8 = vld [vmem:[%s15049_s5 + $0x28] sm:$0xff] }
 0x49f   : > { %v9361_v5 = vcombine.low %v4589_v31, %v4593_v63  ;;  %5029 = vmatprep.subr.bf16.mxu1 %v9362_v37 }
 0x4a0   : > { %v3545_v19 = vmax.f32 %v3417_v23, 0.0  ;;  %v3220_v9 = vadd.f32 %v3092_v26, %v2447_v56  ;;  %2774 = vperm.xlu1 %9828, %v12449_v2  }
 0x4a1   : > { %v2999_v12 = vpop.permute.xlu1 %2998  ;;  %5030 = vmatpush1.bf16.msra.mxu1 %v9361_v5  ;;  %v2747_v5 = vpop.permute.xlu0 %2746 }
 0x4a2   : > { %v3614_v48 = vpack.c.bf16 %v3545_v19, %v3544_v57  ;;  %v3355_v28 = vadd.f32 %v12142_v16, %v3220_v9  ;;  %v3156_v11 = vmul.f32 %v12125_v55, %v2999_v12 }
 0x4a4   : > { %v3483_v3 = vmax.f32 %v3355_v28, 0.0  ;;  %v3284_v13 = vadd.f32 %v3156_v11, %v2511_v61  ;;  %3030 = vperm.xlu1 %9828, %v12441_v6   ;;  %9622 = vmatprep.mubr.msk.bf16.mxu1 %vm3659_vm0, %v3614_v48  ;;  %v4590_v6 = vld [vmem:[%s15049_s5 + $0x8] sm:$0xff]  ;;  %v12534_v28 = vld [vmem:[%s15049_s5 + $0x1d0] sm:$0xff] }
 0x4a5   : > { %v9363_v23 = vcombine.low %v4590_v6, %v4594_v8  ;;  %v9364_v26 = vcombine.high %v4590_v6, %v4594_v8  ;;  %v12539_v11 = vld [vmem:[%s15049_s5 + $0x1f0] sm:$0xff] }
 0x4a6   : > { %v3583_v62 = vpack.c.bf16 %v3483_v3, %v3482_v46  ;;  %v3419_v24 = vadd.f32 %v12142_v16, %v3284_v13  ;;  %v1263_v2 = vpop.permute.xlu1 %1262  ;;  %v12544_v46 = vld [vmem:[%s15049_s5 + $0x1d8] sm:$0xff] }
 0x4a7   : > { %5702 = vmatprep.subr.bf16.mxu0 %v9364_v26 }
 0x4a8   : > { %v3547_v54 = vmax.f32 %v3419_v24, 0.0  ;;  %9559 = vmatmul.mubr.msk.bf16.gmra.mxu0 %vm3659_vm0, %v3583_v62  ;;  %v9422_v62 = vcombine.high %v12534_v28, %v12539_v11  ;;  %v12555_v24 = vld [vmem:[%s15049_s5 + $0x1f8] sm:$0xff] }
 0x4a9   : > { %5703 = vmatpush1.bf16.msra.mxu0 %v9363_v23 }
 0x4aa   : > { %v3615_v35 = vpack.c.bf16 %v3547_v54, %v3546_v43  ;;  %v1578_v56 = vpop.permute.xlu1 %1577  ;;  %v9424_v54 = vcombine.high %v12544_v46, %v12555_v24  ;;  %6361 = vmatprep.subr.bf16.mxu1 %v9422_v62  ;;  %v1676_v62 = vmul.f32 %v12117_v30, %v1263_v2  ;;  %v15487_v43 = vld [vmem:[#allocation135_spill] sm:$0xff]  ;;  %v15488_v2 = vld [vmem:[#allocation137_spill] sm:$0xff] }
 0x4ac   : > { %9623 = vmatmul.mubr.msk.bf16.gmra.mxu1 %vm3659_vm0, %v3615_v35  ;;  %7034 = vmatprep.subr.bf16.mxu0 %v9424_v54  ;;  %v15485_v35 = vld [vmem:[#allocation76_spill] sm:$0xff] }
 0x4ad   : > { %v9612_v29 = vpop.f32.mrf.mxu1  ;;  %v1675_v23 = vmul.f32 %v12117_v30, %v15485_v35  ;;  %v12580_v35 = vld [vmem:[%s15045_s1 + $0x2] ss:$0 sm:$0xff] }
 0x4ae   : > { %v4311_v57 = vadd.f32 %v12402_v45, %v9612_v29 }
 0x4af   : > { %v1974_v0 = vpop.permute.xlu1 %1973  ;;  %v12527_v39 = vpop.f32.mrf.mxu1 }
 0x4b0   : > { %15483 = vst [vmem:[#allocation27_spill] sm:$0xff] %v12527_v39  ;;  %v4503_v61 = vmax.f32 %v4311_v57, 0.0  ;;  %v2320_v37 = vmul.f32 %v12132_v41, %v1974_v0  ;;  %v3007_v57 = vpop.permute.xlu0 %3006  ;;  %v2321_v0 = vmul.f32 %v12132_v41, %v15487_v43 }
 0x4b1   : > { %v9613_v19 = vpop.f32.mrf.mxu1 }
 0x4b2   : > { %v4314_v9 = vadd.f32 %v12402_v45, %v9613_v19  ;;  %v2448_v26 = vadd.f32 %v2320_v37, %v1675_v23  ;;  %v12574_v37 = vld [vmem:[%s15045_s1] ss:$0 sm:$0xff]  ;;  %v2449_v43 = vadd.f32 %v2321_v0, %v1676_v62 }
 0x4b3   : > { %v2230_v12 = vpop.permute.xlu1 %2229  ;;  %v1742_v62 = vmul.f32 %v12574_v37, %v15489_v42 }
 0x4b4   : > { %v4504_v48 = vmax.f32 %v4314_v9, 0.0  ;;  %v15486_v9 = vld [vmem:[#allocation78_spill] sm:$0xff]  ;;  %v2759_v23 = vpop.permute.xlu0 %2758 }
 0x4b6   : > { %v12546_v21 = vpack.c.bf16 %v4504_v48, %v4503_v61  ;;  %v1740_v61 = vmul.f32 %v12117_v30, %v15486_v9  ;;  %v3093_v48 = vmul.f32 %v12125_v55, %v2747_v5  ;;  %v3158_v55 = vmul.f32 %v12580_v35, %v3007_v57  ;;  %v12592_v57 = vld [vmem:[%s15045_s1 + $0x1] ss:$0 sm:$0xff] }
 0x4b7   : > { %v2234_v3 = vpop.permute.xlu1 %2233  ;;  %v2323_v5 = vmul.f32 %v12132_v41, %v15488_v2 }
 0x4b8   : > { %15484 = vst [vmem:[#allocation31_spill] sm:$0xff] %v12546_v21  ;;  %v2385_v29 = vmul.f32 %v12132_v41, %v2234_v3  ;;  %v3221_v54 = vadd.f32 %v3093_v48, %v2448_v26  ;;  %v2384_v26 = vmul.f32 %v12132_v41, %v2230_v12 }
 0x4ba   : > { %v2513_v13 = vadd.f32 %v2385_v29, %v1740_v61  ;;  %v3356_v9 = vadd.f32 %v12142_v16, %v3221_v54  ;;  %v1739_v61 = vmul.f32 %v12574_v37, %v1578_v56  ;;  %v3096_v16 = vmul.f32 %v12580_v35, %v2759_v23  ;;  %v12602_v56 = vld [vmem:[%s15046_s2] ss:$0 sm:$0xff] }
 0x4bc   : > { %v1273_v31 = vpop.permute.xlu1 %1272 }
 0x4bd   : > { %v1678_v3 = vmul.f32 %v12574_v37, %v1273_v31  ;;  %v3286_v31 = vadd.f32 %v3158_v55, %v2513_v13  ;;  %v2512_v13 = vadd.f32 %v2384_v26, %v1739_v61  ;;  %v3484_v55 = vmax.f32 %v3356_v9, 0.0 }
 0x4bf   : > { %v2451_v48 = vadd.f32 %v2323_v5, %v1678_v3  ;;  %v3421_v42 = vadd.f32 %v12602_v56, %v3286_v31 }
 0x4c0   : > { %v1588_v63 = vpop.permute.xlu1 %1587 }
 0x4c1   : > { %v1741_v9 = vmul.f32 %v12574_v37, %v1588_v63 }
 0x4c5   : > { %v1982_v6 = vpop.permute.xlu1 %1981 }
 0x4c6   : > { %v2322_v41 = vmul.f32 %v12592_v57, %v1982_v6  ;;  %v3015_v6 = vpop.permute.xlu0 %3014 }
 0x4c7   : > { %v3160_v26 = vmul.f32 %v12580_v35, %v3015_v6 }
 0x4c9   : > { %v2238_v8 = vpop.permute.xlu1 %2237 }
 0x4ca   : > { %v2386_v39 = vmul.f32 %v12592_v57, %v2238_v8 }
 0x4cd   : > { %v2242_v19 = vpop.permute.xlu1 %2241 }
 0x4ce   : > { %v2387_v21 = vmul.f32 %v12592_v57, %v2242_v19  ;;  %v15490_v19 = vld [vmem:[#allocation80_spill] sm:$0xff] }
 0x4cf   : > { %v1677_v3 = vmul.f32 %v12574_v37, %v15490_v19  ;;  %v3549_v19 = vmax.f32 %v3421_v42, 0.0 }
 0x4d0   : > { %v2515_v5 = vadd.f32 %v2387_v21, %v1742_v62 }
 0x4d2   : > { %v2751_v30 = vpop.permute.xlu1 %2750 }
 0x4d3   : > { %v3094_v29 = vmul.f32 %v12580_v35, %v2751_v30  ;;  %v3224_v30 = vadd.f32 %v3096_v16, %v2451_v48  ;;  %v3288_v48 = vadd.f32 %v3160_v26, %v2515_v5  ;;  %v12623_v26 = vpop.f32.mrf.mxu1 }
 0x4d4   : > { %15491 = vst [vmem:[#allocation53_spill] sm:$0xff] %v12623_v26 }
 0x4d5   : > { %v3222_v2 = vadd.f32 %v3094_v29, %v2449_v43  ;;  %v2450_v29 = vadd.f32 %v2322_v41, %v1677_v3  ;;  %v3359_v31 = vadd.f32 %v12602_v56, %v3224_v30  ;;  %v2514_v41 = vadd.f32 %v2386_v39, %v1741_v9 }
 0x4d6   : > { %v3003_v12 = vpop.permute.xlu1 %3002  ;;  %v3423_v3 = vadd.f32 %v12602_v56, %v3288_v48 }
 0x4d7   : > { %v3357_v54 = vadd.f32 %v12602_v56, %v3222_v2  ;;  %v3157_v0 = vmul.f32 %v12580_v35, %v3003_v12 }
 0x4d8   : > { %v3551_v30 = vmax.f32 %v3423_v3, 0.0 }
 0x4d9   : > { %v3485_v23 = vmax.f32 %v3357_v54, 0.0  ;;  %v3285_v43 = vadd.f32 %v3157_v0, %v2512_v13  ;;  %v3487_v0 = vmax.f32 %v3359_v31, 0.0 }
 0x4da   : > { %v2755_v61 = vpop.permute.xlu1 %2754 }
 0x4db   : > { %v3584_v2 = vpack.c.bf16 %v3485_v23, %v3484_v55  ;;  %v3420_v12 = vadd.f32 %v12602_v56, %v3285_v43  ;;  %v3095_v17 = vmul.f32 %v12580_v35, %v2755_v61 }
 0x4dd   : > { %v3548_v21 = vmax.f32 %v3420_v12, 0.0  ;;  %v3223_v62 = vadd.f32 %v3095_v17, %v2450_v29  ;;  %9562 = vmatprep.mubr.msk.bf16.mxu0 %vm3659_vm0, %v3584_v2 }
 0x4de   : > { %v3011_v16 = vpop.permute.xlu1 %3010 }
 0x4df   : > { %v3616_v13 = vpack.c.bf16 %v3549_v19, %v3548_v21  ;;  %v3358_v8 = vadd.f32 %v12602_v56, %v3223_v62  ;;  %v3159_v54 = vmul.f32 %v12580_v35, %v3011_v16 }
 0x4e1   : > { %v3486_v55 = vmax.f32 %v3358_v8, 0.0  ;;  %v3287_v42 = vadd.f32 %v3159_v54, %v2514_v41  ;;  %9626 = vmatprep.mubr.msk.bf16.mxu1 %vm3659_vm0, %v3616_v13 }
 0x4e3   : > { %v3585_v63 = vpack.c.bf16 %v3487_v0, %v3486_v55  ;;  %v3422_v6 = vadd.f32 %v12602_v56, %v3287_v42  ;;  %v1278_v17 = vpop.permute.xlu1 %1277  ;;  %v15494_v0 = vld [vmem:[#allocation84_spill] sm:$0xff]  ;;  %v12634_v55 = vpop.f32.mrf.mxu0 }
 0x4e4   : > { %v1680_v3 = vmul.f32 %v12574_v37, %v15494_v0 }
 0x4e5   : > { %v3550_v5 = vmax.f32 %v3422_v6, 0.0  ;;  %9563 = vmatmul.mubr.msk.bf16.gmra.mxu0 %vm3659_vm0, %v3585_v63  ;;  %v2767_v6 = vpop.permute.xlu0 %2766 }
 0x4e7   : > { %v3617_v39 = vpack.c.bf16 %v3551_v30, %v3550_v5  ;;  %v1598_v23 = vpop.permute.xlu1 %1597  ;;  %v3098_v30 = vmul.f32 %v12580_v35, %v2767_v6  ;;  %v1679_v5 = vmul.f32 %v12574_v37, %v1278_v17 }
 0x4e8   : > { %v1743_v6 = vmul.f32 %v12574_v37, %v1598_v23 }
 0x4e9   : > { %9627 = vmatmul.mubr.msk.bf16.gmra.mxu1 %vm3659_vm0, %v3617_v39  ;;  %v15495_v39 = vld [vmem:[#allocation138_spill] sm:$0xff] }
 0x4eb   : > { %v1603_v43 = vpop.permute.xlu1 %1602 }
 0x4ee   : > { %v9616_v29 = vpop.f32.mrf.mxu1 }
 0x4ef   : > { %v4327_v12 = vadd.f32 %v12402_v45, %v9616_v29  ;;  %v2324_v29 = vmul.f32 %v12592_v57, %v15495_v39  ;;  %v15496_v39 = vld [vmem:[#allocation142_spill] sm:$0xff] }
 0x4f0   : > { %v1994_v61 = vpop.permute.xlu1 %1993  ;;  %v12625_v2 = vpop.f32.mrf.mxu1 }
 0x4f1   : > { %15492 = vst [vmem:[#allocation56_spill] sm:$0xff] %v12625_v2  ;;  %v4507_v48 = vmax.f32 %v4327_v12, 0.0  ;;  %v2325_v8 = vmul.f32 %v12592_v57, %v1994_v61  ;;  %v12640_v12 = vpop.f32.mrf.mxu0  ;;  %v2326_v2 = vmul.f32 %v12592_v57, %v15496_v39 }
 0x4f2   : > { %v9617_v19 = vpop.f32.mrf.mxu1 }
 0x4f3   : > { %v4330_v9 = vadd.f32 %v12402_v45, %v9617_v19  ;;  %v2453_v42 = vadd.f32 %v2325_v8, %v1680_v3  ;;  %v12645_v0 = vpop.f32.mrf.mxu0  ;;  %v2771_v3 = vpop.permute.xlu0 %2770 }
 0x4f4   : > { %v2246_v31 = vpop.permute.xlu1 %2245  ;;  %v3099_v39 = vmul.f32 %v12580_v35, %v2771_v3 }
 0x4f5   : > { %v4508_v21 = vmax.f32 %v4330_v9, 0.0  ;;  %v3226_v19 = vadd.f32 %v3098_v30, %v2453_v42  ;;  %v2452_v9 = vadd.f32 %v2324_v29, %v1679_v5  ;;  %v1744_v42 = vmul.f32 %v12574_v37, %v1603_v43  ;;  %v3889_v59 = vpop.f32.mrf.mxu0 }
 0x4f7   : > { %v12629_v62 = vpack.c.bf16 %v4508_v21, %v4507_v48  ;;  %v2388_v48 = vmul.f32 %v12592_v57, %v2246_v31  ;;  %v3361_v17 = vadd.f32 %v12602_v56, %v3226_v19  ;;  %v3027_v52 = vpop.permute.xlu0 %3026 }
 0x4f9   : > { %15493 = vst [vmem:[#allocation38_spill] sm:$0xff] %v12629_v62  ;;  %v1288_v16 = vpop.permute.xlu1 %1287  ;;  %v2516_v5 = vadd.f32 %v2388_v48, %v1743_v6  ;;  %v3489_v23 = vmax.f32 %v3361_v17, 0.0  ;;  %v12663_v17 = vpop.f32.mrf.mxu0 }
 0x4fa   : > { %v1681_v8 = vmul.f32 %v12574_v37, %v1288_v16  ;;  %v15497_v16 = vld [vmem:[#allocation140_spill] sm:$0xff] }
 0x4fc   : > { %v2454_v26 = vadd.f32 %v2326_v2, %v1681_v8  ;;  %v15498_v2 = vld [vmem:[#allocation85_spill] sm:$0xff] }
 0x4fd   : > { %v1608_v41 = vpop.permute.xlu1 %1607  ;;  %v1682_v8 = vmul.f32 %v12574_v37, %v15498_v2 }
 0x4fe   : > { %v1745_v48 = vmul.f32 %v12574_v37, %v1608_v41 }
 0x501   : > { %v1613_v13 = vpop.permute.xlu1 %1612 }
 0x506   : > { %v2002_v54 = vpop.permute.xlu1 %2001 }
 0x50a   : > { %v2254_v63 = vpop.permute.xlu1 %2253 }
 0x50b   : > { %v2390_v19 = vmul.f32 %v12592_v57, %v2254_v63 }
 0x50d   : > { %v2518_v63 = vadd.f32 %v2390_v19, %v1745_v48 }
 0x50f   : > { %v2763_v61 = vpop.permute.xlu1 %2762 }
 0x510   : > { %v3097_v21 = vmul.f32 %v12580_v35, %v2763_v61  ;;  %v2389_v61 = vmul.f32 %v12592_v57, %v15497_v16  ;;  %v3227_v16 = vadd.f32 %v3099_v39, %v2454_v26 }
 0x512   : > { %v3225_v62 = vadd.f32 %v3097_v21, %v2452_v9  ;;  %v2517_v10 = vadd.f32 %v2389_v61, %v1744_v42  ;;  %v3163_v42 = vmul.f32 %v12580_v35, %v3027_v52  ;;  %v15499_v61 = vld [vmem:[#allocation6_spill] sm:$0xff]  ;;  %v3362_v19 = vadd.f32 %v12602_v56, %v3227_v16 }
 0x513   : > { %v3019_v30 = vpop.permute.xlu1 %3018 }
 0x514   : > { %v3360_v31 = vadd.f32 %v12602_v56, %v3225_v62  ;;  %v3161_v29 = vmul.f32 %v12580_v35, %v3019_v30  ;;  %v2327_v62 = vmul.f32 %v12592_v57, %v2002_v54  ;;  %v1746_v54 = vmul.f32 %v12574_v37, %v1613_v13 }
 0x516   : > { %v3488_v9 = vmax.f32 %v3360_v31, 0.0  ;;  %v3289_v21 = vadd.f32 %v3161_v29, %v2516_v5  ;;  %v2455_v31 = vadd.f32 %v2327_v62, %v1682_v8  ;;  %v3890_v8 = vadd.f32 %v12402_v45, %v3889_v59  ;;  %v4640_v59 = vld [vmem:[%s15049_s5 + $0x198] sm:$0xff] }
 0x517   : > { %v3023_v43 = vpop.permute.xlu1 %3022 }
 0x518   : > { %v3586_v6 = vpack.c.bf16 %v3489_v23, %v3488_v9  ;;  %v3162_v30 = vmul.f32 %v12580_v35, %v3023_v43  ;;  %v3424_v5 = vadd.f32 %v12602_v56, %v3289_v21  ;;  %v2391_v23 = vmul.f32 %v12592_v57, %v15499_v61  ;;  %v12674_v9 = vpop.f32.mrf.mxu0 }
 0x51a   : > { %v3290_v3 = vadd.f32 %v3162_v30, %v2517_v10  ;;  %9566 = vmatprep.mubr.msk.bf16.mxu0 %vm3659_vm0, %v3586_v6  ;;  %v3291_v10 = vadd.f32 %v3163_v42, %v2518_v63  ;;  %v3552_v21 = vmax.f32 %v3424_v5, 0.0  ;;  %v2519_v48 = vadd.f32 %v2391_v23, %v1746_v54  ;;  %v12678_v62 = vpop.f32.mrf.mxu0 }
 0x51b   : > { %v2775_v41 = vpop.permute.xlu1 %2774  ;;  %v3490_v30 = vmax.f32 %v3362_v19, 0.0  ;;  %v4398_v54 = vmax.f32 %v3890_v8, 0.0  ;;  %v3898_v23 = vadd.f32 %v12402_v45, %v12645_v0 }
 0x51c   : > { %v3425_v29 = vadd.f32 %v12602_v56, %v3290_v3  ;;  %v3100_v26 = vmul.f32 %v12580_v35, %v2775_v41  ;;  %v3426_v57 = vadd.f32 %v12602_v56, %v3291_v10  ;;  %v3887_v3 = vadd.f32 %v12402_v45, %v12640_v12  ;;  %v3905_v42 = vpop.f32.mrf.mxu0 }
 0x51e   : > { %v3553_v39 = vmax.f32 %v3425_v29, 0.0  ;;  %v3228_v43 = vadd.f32 %v3100_v26, %v2455_v31  ;;  %v3554_v41 = vmax.f32 %v3426_v57, 0.0  ;;  %v12688_v29 = vpop.f32.mrf.mxu1  ;;  %v4397_v12 = vmax.f32 %v3887_v3, 0.0  ;;  %v12696_v26 = vpop.f32.mrf.mxu0 }
 0x51f   : > { %v3031_v52 = vpop.permute.xlu1 %3030  ;;  %15500 = vst [vmem:[#allocation51_spill] sm:$0xff] %v12688_v29  ;;  %v3906_v3 = vadd.f32 %v12402_v45, %v3905_v42  ;;  %v4636_v42 = vld [vmem:[%s15049_s5 + $0x178] sm:$0xff] }
 0x520   : > { %v3618_v6 = vpack.c.bf16 %v3553_v39, %v3552_v21  ;;  %v3363_v37 = vadd.f32 %v12602_v56, %v3228_v43  ;;  %v3164_v13 = vmul.f32 %v12580_v35, %v3031_v52  ;;  %v12702_v19 = vpack.c.bf16 %v4398_v54, %v4397_v12  ;;  %v4639_v39 = vld [vmem:[%s15049_s5 + $0x190] sm:$0xff] }
 0x521   : > { %v4643_v43 = vld [vmem:[%s15049_s5 + $0x1b0] sm:$0xff]  ;;  %v3895_v52 = vadd.f32 %v12402_v45, %v12634_v55 }
 0x522   : > { %v3491_v2 = vmax.f32 %v3363_v37, 0.0  ;;  %v3292_v16 = vadd.f32 %v3164_v13, %v2519_v48  ;;  %9630 = vmatprep.mubr.msk.bf16.mxu1 %vm3659_vm0, %v3618_v6  ;;  %15501 = vst [vmem:[#allocation63_spill] sm:$0xff] %v12702_v19  ;;  %v3918_v48 = vpop.f32.mrf.mxu0  ;;  %v15503_v37 = vcombine.low %v12544_v46, %v12555_v24  ;;  %v4400_v13 = vmax.f32 %v3898_v23, 0.0 }
 0x523   : > { %v9414_v57 = vcombine.high %v4639_v39, %v4643_v43  ;;  %v9413_v46 = vcombine.low %v4639_v39, %v4643_v43  ;;  %v4402_v23 = vmax.f32 %v3906_v3, 0.0 }
 0x524   : > { %v3587_v63 = vpack.c.bf16 %v3491_v2, %v3490_v30  ;;  %v3427_v5 = vadd.f32 %v12602_v56, %v3292_v16  ;;  %v4644_v56 = vld [vmem:[%s15049_s5 + $0x1b8] sm:$0xff]  ;;  %v4399_v16 = vmax.f32 %v3895_v52, 0.0  ;;  %v9517_v55 = vpop.f32.mrf.mxu0  ;;  %v3911_v52 = vadd.f32 %v12402_v45, %v12663_v17 }
 0x525   : > { %v9416_v10 = vcombine.high %v4640_v59, %v4644_v56  ;;  %v9415_v2 = vcombine.low %v4640_v59, %v4644_v56 }
 0x526   : > { %v3555_v35 = vmax.f32 %v3427_v5, 0.0  ;;  %9567 = vmatmul.mubr.msk.bf16.gmra.mxu0 %vm3659_vm0, %v3587_v63  ;;  %v15504_v5 = vcombine.low %v12534_v28, %v12539_v11  ;;  %v12726_v24 = vpack.c.bf16 %v4400_v13, %v4399_v16  ;;  %v4635_v28 = vld [vmem:[%s15049_s5 + $0x170] sm:$0xff]  ;;  %v4632_v11 = vld [vmem:[%s15049_s5 + $0x158] sm:$0xff]  ;;  %v3921_v59 = vpop.f32.mrf.mxu0 }
 0x527   : > { %5720 = vmatprep.mubr.bf16.mxu0 %v15192_v44  ;;  %v9407_v56 = vcombine.low %v4632_v11, %v4636_v42  ;;  %v9408_v12 = vcombine.high %v4632_v11, %v4636_v42 }
 0x528   : > { %v3619_v31 = vpack.c.bf16 %v3555_v35, %v3554_v41  ;;  %15505 = vst [vmem:[#allocation44_spill] sm:$0xff] %v12726_v24  ;;  %v4631_v35 = vld [vmem:[%s15049_s5 + $0x150] sm:$0xff]  ;;  %v9520_v39 = vpop.f32.mrf.mxu0 }
 0x529   : > { %v9406_v54 = vcombine.high %v4631_v35, %v4635_v28 }
 0x52a   : > { %9631 = vmatmul.mubr.msk.bf16.gmra.mxu1 %vm3659_vm0, %v3619_v31  ;;  %v3903_v31 = vadd.f32 %v12402_v45, %v12674_v9  ;;  %v3914_v9 = vadd.f32 %v12402_v45, %v12678_v62  ;;  %v3922_v62 = vadd.f32 %v12402_v45, %v3921_v59 }
 0x52b   : > { %v9620_v61 = vpop.f32.mrf.mxu1  ;;  %5047 = vmatprep.mubr.bf16.mxu1 %v15192_v44 }
 0x52c   : > { %v4343_v6 = vadd.f32 %v12402_v45, %v9620_v61  ;;  %v9405_v61 = vcombine.low %v4631_v35, %v4635_v28  ;;  %v4406_v17 = vmax.f32 %v3922_v62, 0.0 }
 0x52d   : > { %v12704_v21 = vpop.f32.mrf.mxu1 }
 0x52e   : > { %15502 = vst [vmem:[#allocation36_spill] sm:$0xff] %v12704_v21  ;;  %5721 = vmatmul.mubr.bf16.vlgmr.msra.gmra.mxu0 %v12702_v19  ;;  %v4511_v8 = vmax.f32 %v4343_v6, 0.0  ;;  %v3934_v6 = vpop.f32.mrf.mxu0 }
 0x52f   : > { %v9621_v0 = vpop.f32.mrf.mxu1  ;;  %7035 = vmatpush1.bf16.msra.mxu0 %v15503_v37  ;;  %5730 = vmatprep.mubr.bf16.mxu0 %v15192_v44  ;;  %v4403_v37 = vmax.f32 %v3911_v52, 0.0 }
 0x530   : > { %v4346_v30 = vadd.f32 %v12402_v45, %v9621_v0  ;;  %7036 = vmatprep.subr.bf16.mxu0 %v9416_v10  ;;  %v4401_v10 = vmax.f32 %v3903_v31, 0.0  ;;  %v4404_v0 = vmax.f32 %v3914_v9, 0.0  ;;  %v9521_v13 = vpop.f32.mrf.mxu0 }
 0x532   : > { %v4512_v63 = vmax.f32 %v4346_v30, 0.0  ;;  %5048 = vmatmul.mubr.bf16.vlgmr.msra.gmra.mxu1 %v12702_v19  ;;  %v12751_v43 = vpack.c.bf16 %v4402_v23, %v4401_v10  ;;  %v12759_v30 = vpack.c.bf16 %v4404_v0, %v4403_v37 }
 0x533   : > { %6362 = vmatpush1.bf16.msra.mxu1 %v15504_v5  ;;  %5057 = vmatprep.mubr.bf16.mxu1 %v15192_v44 }
 0x534   : > { %v12729_v41 = vpack.c.bf16 %v4512_v63, %v4511_v8  ;;  %6363 = vmatprep.subr.bf16.mxu1 %v9414_v57  ;;  %7037 = vmatpush1.bf16.msra.mxu0 %v9415_v2  ;;  %15507 = vst [vmem:[#allocation42_spill] sm:$0xff] %v12751_v43  ;;  %15508 = vst [vmem:[#allocation58_spill] sm:$0xff] %v12759_v30  ;;  %v3919_v57 = vadd.f32 %v12402_v45, %v3918_v48  ;;  %v3937_v2 = vpop.f32.mrf.mxu0 }
 0x535   : > { %7038 = vmatprep.subr.bf16.mxu0 %v9408_v12  ;;  %v3930_v63 = vadd.f32 %v12402_v45, %v9517_v55  ;;  %v3938_v55 = vadd.f32 %v12402_v45, %v3937_v2  ;;  %v12802_v2 = vpop.f32.mrf.mxu1 }
 0x536   : > { %15506 = vst [vmem:[#allocation61_spill] sm:$0xff] %v12729_v41  ;;  %5731 = vmatmul.mubr.bf16.gmra.mxu0 %v12726_v24  ;;  %v4405_v16 = vmax.f32 %v3919_v57, 0.0  ;;  %v9524_v8 = vpop.f32.mrf.mxu0  ;;  %15513 = vst [vmem:[#allocation49_spill] sm:$0xff] %v12802_v2 }
 0x537   : > { %5740 = vmatprep.mubr.bf16.mxu0 %v15192_v44  ;;  %6364 = vmatpush1.bf16.msra.mxu1 %v9413_v46  ;;  %v3927_v46 = vadd.f32 %v12402_v45, %v12696_v26  ;;  %v4408_v3 = vmax.f32 %v3930_v63, 0.0  ;;  %v4410_v26 = vmax.f32 %v3938_v55, 0.0 }
 0x538   : > { %6365 = vmatprep.subr.bf16.mxu1 %v9406_v54  ;;  %7039 = vmatpush1.bf16.msra.mxu0 %v9407_v56  ;;  %v12768_v5 = vpack.c.bf16 %v4406_v17, %v4405_v16  ;;  %v3950_v48 = vpop.f32.mrf.mxu0  ;;  %v3935_v54 = vadd.f32 %v12402_v45, %v3934_v6  ;;  %v3946_v56 = vadd.f32 %v12402_v45, %v9521_v13 }
 0x539   : > { %v4407_v35 = vmax.f32 %v3927_v46, 0.0  ;;  %v3951_v37 = vadd.f32 %v12402_v45, %v3950_v48  ;;  %v3959_v48 = vadd.f32 %v12402_v45, %v9524_v8 }
 0x53a   : > { %5058 = vmatmul.mubr.bf16.gmra.mxu1 %v12726_v24  ;;  %15509 = vst [vmem:[#allocation67_spill] sm:$0xff] %v12768_v5  ;;  %v9525_v28 = vpop.f32.mrf.mxu0  ;;  %v4409_v31 = vmax.f32 %v3935_v54, 0.0  ;;  %v4412_v10 = vmax.f32 %v3946_v56, 0.0 }
 0x53b   : > { %5067 = vmatprep.mubr.bf16.mxu1 %v15192_v44  ;;  %6366 = vmatpush1.bf16.msra.mxu1 %v9405_v61  ;;  %v12776_v11 = vpack.c.bf16 %v4408_v3, %v4407_v35  ;;  %v3943_v61 = vadd.f32 %v12402_v45, %v9520_v39  ;;  %v4413_v57 = vmax.f32 %v3951_v37, 0.0  ;;  %v3962_v17 = vadd.f32 %v12402_v45, %v9525_v28  ;;  %v4627_v37 = vld [vmem:[%s15049_s5 + $0x130] sm:$0xff] }
 0x53c   : > { %v3953_v42 = vpop.f32.mrf.mxu0  ;;  %v12787_v12 = vpack.c.bf16 %v4410_v26, %v4409_v31  ;;  %v4415_v28 = vmax.f32 %v3959_v48, 0.0  ;;  %v4628_v48 = vld [vmem:[%s15049_s5 + $0x138] sm:$0xff] }
 0x53d   : > { %15510 = vst [vmem:[#allocation55_spill] sm:$0xff] %v12776_v11  ;;  %v4411_v9 = vmax.f32 %v3943_v61, 0.0  ;;  %v3954_v0 = vadd.f32 %v12402_v45, %v3953_v42  ;;  %v4416_v55 = vmax.f32 %v3962_v17, 0.0 }
 0x53e   : > { %5741 = vmatmul.mubr.bf16.gmra.mxu0 %v12751_v43  ;;  %v12782_v59 = vpop.f32.mrf.mxu0  ;;  %15511 = vst [vmem:[#allocation40_spill] sm:$0xff] %v12787_v12 }
 0x53f   : > { %5750 = vmatprep.mubr.bf16.mxu0 %v15192_v44  ;;  %v12794_v6 = vpack.c.bf16 %v4412_v10, %v4411_v9  ;;  %v4414_v39 = vmax.f32 %v3954_v0, 0.0  ;;  %v12818_v8 = vpack.c.bf16 %v4416_v55, %v4415_v28  ;;  %v4623_v0 = vld [vmem:[%s15049_s5 + $0x110] sm:$0xff] }
 0x540   : > { %v3966_v23 = vpop.f32.mrf.mxu0 }
 0x541   : > { %15512 = vst [vmem:[#allocation47_spill] sm:$0xff] %v12794_v6  ;;  %v12807_v16 = vpack.c.bf16 %v4414_v39, %v4413_v57  ;;  %15516 = vst [vmem:[#allocation65_spill] sm:$0xff] %v12818_v8  ;;  %v4624_v39 = vld [vmem:[%s15049_s5 + $0x118] sm:$0xff]  ;;  %v3967_v57 = vadd.f32 %v12402_v45, %v3966_v23  ;;  %v12845_v23 = vld [vmem:[%s15048_s4] ss:$0 sm:$0xff] }
 0x542   : > { %5068 = vmatmul.mubr.bf16.gmra.mxu1 %v12751_v43  ;;  %v9529_v52 = vpop.f32.mrf.mxu0  ;;  %v9400_v55 = vcombine.high %v4624_v39, %v4628_v48 }
 0x543   : > { %5077 = vmatprep.mubr.bf16.mxu1 %v15192_v44  ;;  %15514 = vst [vmem:[#allocation72_spill] sm:$0xff] %v12807_v16  ;;  %v3978_v28 = vadd.f32 %v12845_v23, %v9529_v52 }
 0x544   : > { %v3969_v13 = vpop.f32.mrf.mxu0  ;;  %7040 = vmatprep.subr.bf16.mxu0 %v9400_v55 }
 0x545   : > { %v3970_v61 = vadd.f32 %v12402_v45, %v3969_v13  ;;  %v9397_v13 = vcombine.low %v4623_v0, %v4627_v37 }
 0x546   : > { %5751 = vmatmul.mubr.bf16.gmra.mxu0 %v12759_v30  ;;  %v12800_v62 = vpop.f32.mrf.mxu0 }
 0x547   : > { %5760 = vmatprep.mubr.bf16.mxu0 %v15192_v44 }
 0x548   : > { %v3982_v63 = vpop.f32.mrf.mxu0 }
 0x54a   : > { %5078 = vmatmul.mubr.bf16.gmra.mxu1 %v12759_v30  ;;  %v9533_v54 = vpop.f32.mrf.mxu0 }
 0x54b   : > { %5087 = vmatprep.mubr.bf16.mxu1 %v15192_v44  ;;  %v3994_v55 = vadd.f32 %v12845_v23, %v9533_v54 }
 0x54c   : > { %v3985_v10 = vpop.f32.mrf.mxu0 }
 0x54d   : > { %v3986_v52 = vadd.f32 %v12845_v23, %v3985_v10  ;;  %v3991_v10 = vadd.f32 %v12845_v23, %v12800_v62 }
 0x54e   : > { %5761 = vmatmul.mubr.bf16.gmra.mxu0 %v12768_v5  ;;  %v12833_v17 = vpop.f32.mrf.mxu0 }
 0x54f   : > { %5770 = vmatprep.mubr.bf16.mxu0 %v15192_v44 }
 0x552   : > { %5088 = vmatmul.mubr.bf16.gmra.mxu1 %v12768_v5 }
 0x553   : > { %5097 = vmatprep.mubr.bf16.mxu1 %v15192_v44 }
 0x556   : > { %5771 = vmatmul.mubr.bf16.gmra.mxu0 %v12776_v11 }
 0x557   : > { %5780 = vmatprep.mubr.bf16.mxu0 %v15192_v44 }
 0x55a   : > { %5098 = vmatmul.mubr.bf16.gmra.mxu1 %v12776_v11 }
 0x55b   : > { %5107 = vmatprep.mubr.bf16.mxu1 %v15192_v44 }
 0x55e   : > { %5781 = vmatmul.mubr.bf16.gmra.mxu0 %v12787_v12 }
 0x55f   : > { %5790 = vmatprep.mubr.bf16.mxu0 %v15192_v44 }
 0x562   : > { %5108 = vmatmul.mubr.bf16.gmra.mxu1 %v12787_v12 }
 0x563   : > { %5117 = vmatprep.mubr.bf16.mxu1 %v15192_v44 }
 0x566   : > { %5791 = vmatmul.mubr.bf16.gmra.mxu0 %v12794_v6 }
 0x567   : > { %5800 = vmatprep.mubr.bf16.mxu0 %v15192_v44 }
 0x56a   : > { %5118 = vmatmul.mubr.bf16.gmra.mxu1 %v12794_v6 }
 0x56b   : > { %5127 = vmatprep.mubr.bf16.mxu1 %v15192_v44 }
 0x56c   : > { %v9624_v46 = vpop.f32.mrf.mxu1 }
 0x56d   : > { %v4359_v35 = vadd.f32 %v12402_v45, %v9624_v46  ;;  %v9398_v46 = vcombine.high %v4623_v0, %v4627_v37  ;;  %v4420_v0 = vmax.f32 %v3978_v28, 0.0 }
 0x56e   : > { %v12810_v3 = vpop.f32.mrf.mxu1  ;;  %5801 = vmatmul.mubr.bf16.gmra.mxu0 %v12807_v16 }
 0x56f   : > { %15515 = vst [vmem:[#allocation79_spill] sm:$0xff] %v12810_v3  ;;  %5810 = vmatprep.mubr.bf16.mxu0 %v15192_v44  ;;  %v4515_v31 = vmax.f32 %v4359_v35, 0.0  ;;  %v9399_v35 = vcombine.low %v4624_v39, %v4628_v48  ;;  %6367 = vmatprep.subr.bf16.mxu1 %v9398_v46  ;;  %v3983_v46 = vadd.f32 %v12845_v23, %v3982_v63  ;;  %v4424_v63 = vmax.f32 %v3994_v55, 0.0 }
 0x570   : > { %v9625_v42 = vpop.f32.mrf.mxu1  ;;  %6368 = vmatpush1.bf16.msra.mxu1 %v9397_v13 }
 0x571   : > { %v4362_v26 = vadd.f32 %v12402_v45, %v9625_v42  ;;  %v4418_v42 = vmax.f32 %v3970_v61, 0.0  ;;  %v3998_v45 = vpop.f32.mrf.mxu0  ;;  %7041 = vmatpush1.bf16.msra.mxu0 %v9399_v35  ;;  %v4421_v35 = vmax.f32 %v3983_v46, 0.0 }
 0x572   : > { %5128 = vmatmul.mubr.bf16.gmra.mxu1 %v12807_v16 }
 0x573   : > { %v4516_v56 = vmax.f32 %v4362_v26, 0.0  ;;  %5137 = vmatprep.mubr.bf16.mxu1 %v15192_v44  ;;  %v4417_v26 = vmax.f32 %v3967_v57, 0.0  ;;  %v9537_v61 = vpop.f32.mrf.mxu0 }
 0x574   : > { %v4010_v55 = vadd.f32 %v12845_v23, %v9537_v61 }
 0x575   : > { %v12821_v9 = vpack.c.bf16 %v4516_v56, %v4515_v31  ;;  %v12848_v31 = vpack.c.bf16 %v4418_v42, %v4417_v26  ;;  %v3975_v56 = vadd.f32 %v12845_v23, %v12782_v59  ;;  %v4001_v39 = vpop.f32.mrf.mxu0  ;;  %v4422_v59 = vmax.f32 %v3986_v52, 0.0 }
 0x576   : > { %5811 = vmatmul.mubr.bf16.gmra.mxu0 %v12818_v8  ;;  %v3999_v52 = vadd.f32 %v12845_v23, %v3998_v45 }
 0x577   : > { %15517 = vst [vmem:[#allocation77_spill] sm:$0xff] %v12821_v9  ;;  %5820 = vmatprep.mubr.bf16.mxu0 %v15192_v44  ;;  %15518 = vst [vmem:[#allocation92_spill] sm:$0xff] %v12848_v31  ;;  %v4419_v37 = vmax.f32 %v3975_v56, 0.0  ;;  %v9540_v13 = vpop.f32.mrf.mxu0  ;;  %v12865_v42 = vpack.c.bf16 %v4422_v59, %v4421_v35  ;;  %v4423_v56 = vmax.f32 %v3991_v10, 0.0 }
 0x578   : > { %v4425_v59 = vmax.f32 %v3999_v52, 0.0 }
 0x579   : > { %v12856_v57 = vpack.c.bf16 %v4420_v0, %v4419_v37  ;;  %v4014_v48 = vpop.f32.mrf.mxu0  ;;  %15520 = vst [vmem:[#allocation69_spill] sm:$0xff] %v12865_v42  ;;  %v12875_v54 = vpack.c.bf16 %v4424_v63, %v4423_v56  ;;  %v4002_v37 = vadd.f32 %v12845_v23, %v4001_v39  ;;  %v4007_v39 = vadd.f32 %v12845_v23, %v12833_v17 }
 0x57a   : > { %5138 = vmatmul.mubr.bf16.gmra.mxu1 %v12818_v8  ;;  %v4428_v63 = vmax.f32 %v4010_v55, 0.0  ;;  %v4015_v17 = vadd.f32 %v12845_v23, %v4014_v48 }
 0x57b   : > { %5147 = vmatprep.mubr.bf16.mxu1 %v15192_v44  ;;  %15519 = vst [vmem:[#allocation89_spill] sm:$0xff] %v12856_v57  ;;  %v9541_v26 = vpop.f32.mrf.mxu0  ;;  %15521 = vst [vmem:[#allocation96_spill] sm:$0xff] %v12875_v54  ;;  %v4426_v46 = vmax.f32 %v4002_v37, 0.0  ;;  %v4427_v37 = vmax.f32 %v4007_v39, 0.0 }
 0x57d   : > { %v4017_v28 = vpop.f32.mrf.mxu0  ;;  %v12884_v10 = vpack.c.bf16 %v4426_v46, %v4425_v59  ;;  %v12894_v52 = vpack.c.bf16 %v4428_v63, %v4427_v37  ;;  %v12901_v59 = vpop.f32.mrf.mxu1 }
 0x57e   : > { %5821 = vmatmul.mubr.bf16.gmra.mxu0 %v12848_v31  ;;  %v4018_v61 = vadd.f32 %v12845_v23, %v4017_v28  ;;  %15524 = vst [vmem:[#allocation81_spill] sm:$0xff] %v12901_v59  ;;  %v4026_v28 = vadd.f32 %v12845_v23, %v9541_v26 }
 0x57f   : > { %5830 = vmatprep.mubr.bf16.mxu0 %v15192_v44  ;;  %v12871_v0 = vpop.f32.mrf.mxu0  ;;  %15522 = vst [vmem:[#allocation87_spill] sm:$0xff] %v12884_v10  ;;  %15523 = vst [vmem:[#allocation94_spill] sm:$0xff] %v12894_v52 }
 0x580   : > { %v4430_v55 = vmax.f32 %v4018_v61, 0.0  ;;  %v4023_v61 = vadd.f32 %v12845_v23, %v9540_v13 }
 0x581   : > { %v4030_v62 = vpop.f32.mrf.mxu0 }
 0x582   : > { %5148 = vmatmul.mubr.bf16.gmra.mxu1 %v12848_v31  ;;  %v4431_v26 = vmax.f32 %v4023_v61, 0.0  ;;  %v4615_v61 = vld [vmem:[%s15049_s5 + $0xd0] sm:$0xff] }
 0x583   : > { %5157 = vmatprep.mubr.bf16.mxu1 %v15192_v44  ;;  %v9545_v35 = vpop.f32.mrf.mxu0 }
 0x585   : > { %v4033_v45 = vpop.f32.mrf.mxu0 }
 0x586   : > { %5831 = vmatmul.mubr.bf16.gmra.mxu0 %v12856_v57 }
 0x587   : > { %5840 = vmatprep.mubr.bf16.mxu0 %v15192_v44  ;;  %v12890_v56 = vpop.f32.mrf.mxu0 }
 0x589   : > { %v12897_v46 = vpop.f32.mrf.mxu0 }
 0x58a   : > { %5158 = vmatmul.mubr.bf16.gmra.mxu1 %v12856_v57 }
 0x58b   : > { %5167 = vmatprep.mubr.bf16.mxu1 %v15192_v44  ;;  %v12904_v39 = vpop.f32.mrf.mxu0 }
 0x58d   : > { %v4049_v37 = vpop.f32.mrf.mxu0 }
 0x58e   : > { %5841 = vmatmul.mubr.bf16.gmra.mxu0 %v12865_v42 }
 0x58f   : > { %5850 = vmatprep.mubr.bf16.mxu0 %v15192_v44  ;;  %v12915_v31 = vpop.f32.mrf.mxu0 }
 0x592   : > { %5168 = vmatmul.mubr.bf16.gmra.mxu1 %v12865_v42 }
 0x593   : > { %5177 = vmatprep.mubr.bf16.mxu1 %v15192_v44 }
 0x596   : > { %5851 = vmatmul.mubr.bf16.gmra.mxu0 %v12875_v54 }
 0x597   : > { %5860 = vmatprep.mubr.bf16.mxu0 %v15192_v44 }
 0x59a   : > { %5178 = vmatmul.mubr.bf16.gmra.mxu1 %v12875_v54  ;;  %v4429_v54 = vmax.f32 %v4015_v17, 0.0 }
 0x59b   : > { %5187 = vmatprep.mubr.bf16.mxu1 %v15192_v44 }
 0x59c   : > { %v12911_v48 = vpack.c.bf16 %v4430_v55, %v4429_v54  ;;  %v12920_v54 = vpop.f32.mrf.mxu0 }
 0x59e   : > { %5861 = vmatmul.mubr.bf16.gmra.mxu0 %v12884_v10  ;;  %15526 = vst [vmem:[#allocation86_spill] sm:$0xff] %v12911_v48  ;;  %v12930_v6 = vpop.f32.mrf.mxu0 }
 0x59f   : > { %5870 = vmatprep.mubr.bf16.mxu0 %v15192_v44 }
 0x5a2   : > { %5188 = vmatmul.mubr.bf16.gmra.mxu1 %v12884_v10 }
 0x5a3   : > { %5197 = vmatprep.mubr.bf16.mxu1 %v15192_v44 }
 0x5a6   : > { %5871 = vmatmul.mubr.bf16.gmra.mxu0 %v12894_v52 }
 0x5a7   : > { %5880 = vmatprep.mubr.bf16.mxu0 %v15192_v44 }
 0x5a9   : > { %v9628_v10 = vpop.f32.mrf.mxu1 }
 0x5aa   : > { %5198 = vmatmul.mubr.bf16.gmra.mxu1 %v12894_v52  ;;  %v4375_v42 = vadd.f32 %v12845_v23, %v9628_v10  ;;  %v4432_v52 = vmax.f32 %v4026_v28, 0.0  ;;  %v4031_v10 = vadd.f32 %v12845_v23, %v4030_v62  ;;  %v4039_v62 = vadd.f32 %v12845_v23, %v12871_v0 }
 0x5ab   : > { %v12907_v63 = vpop.f32.mrf.mxu1  ;;  %5207 = vmatprep.mubr.bf16.mxu1 %v15192_v44 }
 0x5ac   : > { %15525 = vst [vmem:[#allocation83_spill] sm:$0xff] %v12907_v63  ;;  %v4519_v8 = vmax.f32 %v4375_v42, 0.0  ;;  %v12926_v13 = vpack.c.bf16 %v4432_v52, %v4431_v26  ;;  %v4433_v28 = vmax.f32 %v4031_v10, 0.0 }
 0x5ad   : > { %v9629_v57 = vpop.f32.mrf.mxu1 }
 0x5ae   : > { %v4378_v17 = vadd.f32 %v12845_v23, %v9629_v57  ;;  %5881 = vmatmul.mubr.bf16.gmra.mxu0 %v12911_v48  ;;  %15528 = vst [vmem:[#allocation91_spill] sm:$0xff] %v12926_v13  ;;  %v4034_v57 = vadd.f32 %v12845_v23, %v4033_v45 }
 0x5af   : > { %5890 = vmatprep.mubr.bf16.mxu0 %v15192_v44 }
 0x5b0   : > { %v4520_v16 = vmax.f32 %v4378_v17, 0.0  ;;  %v4434_v42 = vmax.f32 %v4034_v57, 0.0  ;;  %v4619_v17 = vld [vmem:[%s15049_s5 + $0xf0] sm:$0xff] }
 0x5b1   : > { %v9389_v10 = vcombine.low %v4615_v61, %v4619_v17  ;;  %v9390_v0 = vcombine.high %v4615_v61, %v4619_v17  ;;  %v4047_v61 = vadd.f32 %v12845_v23, %v12897_v46  ;;  %v4055_v46 = vadd.f32 %v12845_v23, %v12890_v56 }
 0x5b2   : > { %v12922_v55 = vpack.c.bf16 %v4520_v16, %v4519_v8  ;;  %5208 = vmatmul.mubr.bf16.gmra.mxu1 %v12911_v48  ;;  %v4065_v16 = vpop.f32.mrf.mxu0  ;;  %v4042_v8 = vadd.f32 %v12845_v23, %v9545_v35  ;;  %v12937_v52 = vpack.c.bf16 %v4434_v42, %v4433_v28  ;;  %v4616_v35 = vld [vmem:[%s15049_s5 + $0xd8] sm:$0xff]  ;;  %v4435_v48 = vmax.f32 %v4039_v62, 0.0 }
 0x5b3   : > { %5217 = vmatprep.mubr.bf16.mxu1 %v15192_v44  ;;  %v4620_v42 = vld [vmem:[%s15049_s5 + $0xf8] sm:$0xff]  ;;  %6369 = vmatprep.subr.bf16.mxu1 %v9390_v0  ;;  %v4063_v56 = vadd.f32 %v12845_v23, %v12920_v54 }
 0x5b4   : > { %15527 = vst [vmem:[#allocation95_spill] sm:$0xff] %v12922_v55  ;;  %15529 = vst [vmem:[#allocation93_spill] sm:$0xff] %v12937_v52  ;;  %v12939_v45 = vpop.f32.mrf.mxu0  ;;  %v4436_v26 = vmax.f32 %v4042_v8, 0.0  ;;  %v9391_v28 = vcombine.low %v4616_v35, %v4620_v42  ;;  %v4050_v8 = vadd.f32 %v12845_v23, %v4049_v37  ;;  %6370 = vmatpush1.bf16.msra.mxu1 %v9389_v10  ;;  %v4439_v10 = vmax.f32 %v4055_v46, 0.0 }
 0x5b5   : > { %v4071_v46 = vadd.f32 %v12845_v23, %v12915_v31  ;;  %v4087_v30 = vadd.f32 %v12845_v23, %v12939_v45 }
 0x5b6   : > { %5891 = vmatmul.mubr.bf16.gmra.mxu0 %v12926_v13  ;;  %v4078_v57 = vpop.f32.mrf.mxu0  ;;  %v12959_v12 = vpack.c.bf16 %v4436_v26, %v4435_v48  ;;  %v4438_v62 = vmax.f32 %v4050_v8, 0.0  ;;  %v4058_v48 = vadd.f32 %v12845_v23, %v12904_v39 }
 0x5b7   : > { %5900 = vmatprep.mubr.bf16.mxu0 %v15192_v44  ;;  %v4079_v31 = vadd.f32 %v12845_v23, %v4078_v57  ;;  %v4447_v3 = vmax.f32 %v4087_v30, 0.0 }
 0x5b8   : > { %15530 = vst [vmem:[#allocation75_spill] sm:$0xff] %v12959_v12  ;;  %v12962_v11 = vpop.f32.mrf.mxu0  ;;  %v4440_v26 = vmax.f32 %v4058_v48, 0.0 }
 0x5ba   : > { %5218 = vmatmul.mubr.bf16.gmra.mxu1 %v12926_v13  ;;  %v9392_v13 = vcombine.high %v4616_v35, %v4620_v42  ;;  %v4081_v17 = vpop.f32.mrf.mxu0  ;;  %v4437_v35 = vmax.f32 %v4047_v61, 0.0  ;;  %v12986_v39 = vpack.c.bf16 %v4440_v26, %v4439_v10 }
 0x5bb   : > { %5227 = vmatprep.mubr.bf16.mxu1 %v15192_v44 }
 0x5bc   : > { %7042 = vmatprep.subr.bf16.mxu0 %v9392_v13  ;;  %v12968_v0 = vpop.f32.mrf.mxu0  ;;  %v12974_v37 = vpack.c.bf16 %v4438_v62, %v4437_v35  ;;  %15532 = vst [vmem:[#allocation97_spill] sm:$0xff] %v12986_v39  ;;  %v4441_v35 = vmax.f32 %v4063_v56, 0.0 }
 0x5bd   : > { %7043 = vmatpush1.bf16.msra.mxu0 %v9391_v28  ;;  %v4066_v28 = vadd.f32 %v12845_v23, %v4065_v16  ;;  %v4074_v16 = vadd.f32 %v12845_v23, %v12930_v6  ;;  %v4655_v6 = vlaneseq }
 0x5be   : > { %5901 = vmatmul.mubr.bf16.gmra.mxu0 %v12937_v52  ;;  %15531 = vst [vmem:[#allocation90_spill] sm:$0xff] %v12974_v37  ;;  %v12978_v13 = vpop.f32.mrf.mxu0 }
 0x5bf   : > { %5910 = vmatprep.mubr.bf16.mxu0 %v15192_v44  ;;  %v4442_v61 = vmax.f32 %v4066_v28, 0.0  ;;  %v4444_v26 = vmax.f32 %v4074_v16, 0.0  ;;  %v4443_v28 = vmax.f32 %v4071_v46, 0.0  ;;  %v13023_v16 = vshrl.u32 %v4655_v6, 7 }
 0x5c0   : > { %v12982_v42 = vpop.f32.mrf.mxu0 }
 0x5c1   : > { %v13001_v48 = vpack.c.bf16 %v4442_v61, %v4441_v35  ;;  %v13013_v56 = vpack.c.bf16 %v4444_v26, %v4443_v28  ;;  %v4082_v61 = vadd.f32 %v12845_v23, %v4081_v17  ;;  %15535 = vst [vmem:[#allocation99_spill] sm:$0xff] %v13023_v16  ;;  %v4445_v26 = vmax.f32 %v4079_v31, 0.0  ;;  %v4653_v31 = vld [vmem:[%s15050_s6] sm:$0xff] }
 0x5c2   : > { %5228 = vmatmul.mubr.bf16.gmra.mxu1 %v12937_v52  ;;  %v12991_v8 = vpop.f32.mrf.mxu0  ;;  %v4665_v57 = vsub.s32 2, %v13023_v16  ;;  %v4661_v63 = vsub.s32 1, %v13023_v16 }
 0x5c3   : > { %5237 = vmatprep.mubr.bf16.mxu1 %v15192_v44  ;;  %15533 = vst [vmem:[#allocation98_spill] sm:$0xff] %v13001_v48  ;;  %15534 = vst [vmem:[#allocation70_spill] sm:$0xff] %v13013_v56  ;;  %v4446_v46 = vmax.f32 %v4082_v61, 0.0 }
 0x5c4   : > { %v12995_v62 = vpop.f32.mrf.mxu0  ;;  %v13051_v19 = vrot.slane %v4653_v31, %v4665_v57  ;;  %v13070_v30 = vrot.slane %v4653_v31, %v4661_v63 }
 0x5c5   : > { %v13036_v6 = vpack.c.bf16 %v4446_v46, %v4445_v26  ;;  %v4657_v46 = vsub.s32 0, %v13023_v16 }
 0x5c6   : > { %5911 = vmatmul.mubr.bf16.gmra.mxu0 %v12959_v12  ;;  %v13003_v54 = vpop.f32.mrf.mxu0 }
 0x5c7   : > { %5920 = vmatprep.mubr.bf16.mxu0 %v15192_v44  ;;  %15537 = vst [vmem:[#allocation117_spill] sm:$0xff] %v13036_v6  ;;  %v13058_v21 = vrot.slane %v4653_v31, %v4657_v46 }
 0x5c8   : > { %v13009_v10 = vpop.f32.mrf.mxu0 }
 0x5ca   : > { %5238 = vmatmul.mubr.bf16.gmra.mxu1 %v12959_v12  ;;  %v13016_v35 = vpop.f32.mrf.mxu0  ;;  %v4090_v12 = vadd.f32 %v12845_v23, %v12962_v11 }
 0x5cb   : > { %5247 = vmatprep.mubr.bf16.mxu1 %v15192_v44 }
 0x5ce   : > { %5921 = vmatmul.mubr.bf16.gmra.mxu0 %v12974_v37 }
 0x5cf   : > { %5930 = vmatprep.mubr.bf16.mxu0 %v15192_v44 }
 0x5d2   : > { %5248 = vmatmul.mubr.bf16.gmra.mxu1 %v12974_v37 }
 0x5d3   : > { %5257 = vmatprep.mubr.bf16.mxu1 %v15192_v44 }
 0x5d6   : > { %5931 = vmatmul.mubr.bf16.gmra.mxu0 %v12986_v39 }
 0x5d7   : > { %5940 = vmatprep.mubr.bf16.mxu0 %v15192_v44 }
 0x5da   : > { %5258 = vmatmul.mubr.bf16.gmra.mxu1 %v12986_v39 }
 0x5db   : > { %5267 = vmatprep.mubr.bf16.mxu1 %v15192_v44 }
 0x5de   : > { %5941 = vmatmul.mubr.bf16.gmra.mxu0 %v13001_v48 }
 0x5df   : > { %5950 = vmatprep.mubr.bf16.mxu0 %v15192_v44 }
 0x5e2   : > { %5268 = vmatmul.mubr.bf16.gmra.mxu1 %v13001_v48  ;;  %v13025_v48 = vpop.f32.mrf.mxu1 }
 0x5e3   : > { %5277 = vmatprep.mubr.bf16.mxu1 %v15192_v44  ;;  %15536 = vst [vmem:[#allocation100_spill] sm:$0xff] %v13025_v48 }
 0x5e6   : > { %v13019_v39 = vpop.f32.mrf.mxu0  ;;  %5951 = vmatmul.mubr.bf16.gmra.mxu0 %v13013_v56 }
 0x5e7   : > { %5960 = vmatprep.mubr.bf16.mxu0 %v15192_v44 }
 0x5e8   : > { %v13027_v37 = vpop.f32.mrf.mxu0 }
 0x5ea   : > { %v13029_v28 = vpop.f32.mrf.mxu0  ;;  %v9632_v17 = vpop.f32.mrf.mxu1  ;;  %5278 = vmatmul.mubr.bf16.gmra.mxu1 %v13013_v56  ;;  %v4669_v56 = vsub.s32 3, %v13023_v16 }
 0x5eb   : > { %5287 = vmatprep.mubr.bf16.mxu1 %v15192_v44  ;;  %v4391_v5 = vadd.f32 %v12845_v23, %v9632_v17  ;;  %v4448_v17 = vmax.f32 %v4090_v12, 0.0 }
 0x5ec   : > { %v13038_v61 = vpop.f32.mrf.mxu0  ;;  %v4382_v52 = vpop.f32.mrf.mxu1  ;;  %v13056_v41 = vrot.slane %v4653_v31, %v4669_v56 }
 0x5ed   : > { %v4383_v43 = vadd.f32 %v12845_v23, %v4382_v52  ;;  %v4523_v45 = vmax.f32 %v4391_v5, 0.0 }
 0x5ee   : > { %v9633_v24 = vpop.f32.mrf.mxu1  ;;  %v5722_v11 = vpop.f32.mrf.mxu0  ;;  %5961 = vmatmul.mubr.bf16.gmra.mxu0 %v13036_v6 }
 0x5ef   : > { %v4394_v26 = vadd.f32 %v12845_v23, %v9633_v24  ;;  %5970 = vmatprep.mubr.bf16.mxu0 %v15192_v44  ;;  %v4521_v59 = vmax.f32 %v4383_v43, 0.0  ;;  %v5723_v12 = vadd.f32 %v5722_v11, %v13051_v19  ;;  %v4098_v43 = vadd.f32 %v12845_v23, %v12991_v8 }
 0x5f0   : > { %v4385_v55 = vpop.f32.mrf.mxu1  ;;  %v5724_v9 = vpop.f32.mrf.mxu0 }
 0x5f1   : > { %v4524_v48 = vmax.f32 %v4394_v26, 0.0  ;;  %v4386_v52 = vadd.f32 %v12845_v23, %v4385_v55  ;;  %v13066_v55 = vpack.c.bf16 %v4448_v17, %v4447_v3 }
 0x5f2   : > { %v5049_v24 = vpop.f32.mrf.mxu1  ;;  %5288 = vmatmul.mubr.bf16.gmra.mxu1 %v13036_v6  ;;  %v5726_v57 = vpop.f32.mrf.mxu0 }
 0x5f3   : > { %v13061_v2 = vpack.c.bf16 %v4524_v48, %v4523_v45  ;;  %v4522_v29 = vmax.f32 %v4386_v52, 0.0  ;;  %v5727_v5 = vadd.f32 %v5726_v57, %v13051_v19  ;;  %5297 = vmatprep.mubr.bf16.mxu1 %v15192_v44  ;;  %15539 = vst [vmem:[#allocation13_spill] sm:$0xff] %v13066_v55  ;;  %v5725_v48 = vadd.f32 %v5724_v9, %v13056_v41 }
 0x5f4   : > { %v5051_v56 = vpop.f32.mrf.mxu1  ;;  %v5728_v46 = vpop.f32.mrf.mxu0  ;;  %v4095_v52 = vadd.f32 %v12845_v23, %v12978_v13  ;;  %v5050_v8 = vadd.f32 %v5049_v24, %v13058_v21  ;;  %v4450_v9 = vmax.f32 %v4098_v43, 0.0 }
 0x5f5   : > { %15538 = vst [vmem:[#allocation8_spill] sm:$0xff] %v13061_v2  ;;  %v13072_v26 = vpack.c.bf16 %v4522_v29, %v4521_v59  ;;  %v7749_v45 = vmax.f32 %v5723_v12, %v5727_v5  ;;  %v5729_v11 = vadd.f32 %v5728_v46, %v13056_v41  ;;  %v5052_v59 = vadd.f32 %v5051_v56, %v13070_v30 }
 0x5f6   : > { %v5053_v57 = vpop.f32.mrf.mxu1  ;;  %v5732_v3 = vpop.f32.mrf.mxu0  ;;  %5971 = vmatmul.mubr.bf16.gmra.mxu0 %v13066_v55  ;;  %v4449_v16 = vmax.f32 %v4095_v52, 0.0  ;;  %v4106_v56 = vadd.f32 %v12845_v23, %v12982_v42 }
 0x5f7   : > { %15540 = vst [vmem:[#allocation108_spill] sm:$0xff] %v13072_v26  ;;  %v7770_v63 = vmax.f32 %v5725_v48, %v5729_v11  ;;  %v5054_v31 = vadd.f32 %v5053_v57, %v13058_v21  ;;  %v5733_v29 = vadd.f32 %v5732_v3, %v13051_v19  ;;  %5980 = vmatprep.mubr.bf16.mxu0 %v15192_v44 }
 0x5f8   : > { %v5055_v17 = vpop.f32.mrf.mxu1  ;;  %v5734_v12 = vpop.f32.mrf.mxu0 }
 0x5f9   : > { %v7707_v5 = vmax.f32 %v5050_v8, %v5054_v31  ;;  %v7750_v13 = vmax.f32 %v7749_v45, %v5733_v29  ;;  %v5056_v46 = vadd.f32 %v5055_v17, %v13070_v30  ;;  %v5735_v6 = vadd.f32 %v5734_v12, %v13056_v41 }
 0x5fa   : > { %v5059_v24 = vpop.f32.mrf.mxu1  ;;  %5298 = vmatmul.mubr.bf16.gmra.mxu1 %v13066_v55  ;;  %v5736_v48 = vpop.f32.mrf.mxu0  ;;  %v13092_v45 = vpack.c.bf16 %v4450_v9, %v4449_v16  ;;  %v4452_v9 = vmax.f32 %v4106_v56, 0.0  ;;  %v4608_v56 = vld [vmem:[%s15049_s5 + $0x98] sm:$0xff] }
 0x5fb   : > { %v7728_v11 = vmax.f32 %v5052_v59, %v5056_v46  ;;  %v7771_v57 = vmax.f32 %v7770_v63, %v5735_v6  ;;  %v5060_v3 = vadd.f32 %v5059_v24, %v13058_v21  ;;  %v5737_v43 = vadd.f32 %v5736_v48, %v13051_v19  ;;  %5307 = vmatprep.mubr.bf16.mxu1 %v15192_v44 }
 0x5fc   : > { %15541 = vst [vmem:[#allocation115_spill] sm:$0xff] %v13092_v45  ;;  %v5061_v8 = vpop.f32.mrf.mxu1  ;;  %v5738_v31 = vpop.f32.mrf.mxu0  ;;  %v4103_v6 = vadd.f32 %v12845_v23, %v12968_v0 }
 0x5fd   : > { %v7708_v52 = vmax.f32 %v7707_v5, %v5060_v3  ;;  %v7751_v29 = vmax.f32 %v7750_v13, %v5737_v43  ;;  %v5062_v17 = vadd.f32 %v5061_v8, %v13070_v30  ;;  %v5739_v59 = vadd.f32 %v5738_v31, %v13056_v41 }
 0x5fe   : > { %v5063_v63 = vpop.f32.mrf.mxu1  ;;  %v5742_v12 = vpop.f32.mrf.mxu0  ;;  %5981 = vmatmul.mubr.bf16.gmra.mxu0 %v13092_v45  ;;  %v4451_v8 = vmax.f32 %v4103_v6, 0.0  ;;  %v4114_v6 = vadd.f32 %v12845_v23, %v13016_v35 }
 0x5ff   : > { %v7729_v46 = vmax.f32 %v7728_v11, %v5062_v17  ;;  %v7772_v24 = vmax.f32 %v7771_v57, %v5739_v59  ;;  %v5064_v42 = vadd.f32 %v5063_v63, %v13058_v21  ;;  %v5743_v16 = vadd.f32 %v5742_v12, %v13051_v19  ;;  %5990 = vmatprep.mubr.bf16.mxu0 %v15192_v44  ;;  %v4607_v11 = vld [vmem:[%s15049_s5 + $0x90] sm:$0xff]  ;;  %v4612_v59 = vld [vmem:[%s15049_s5 + $0xb8] sm:$0xff] }
 0x600   : > { %v5065_v5 = vpop.f32.mrf.mxu1  ;;  %v5744_v13 = vpop.f32.mrf.mxu0  ;;  %v4611_v57 = vld [vmem:[%s15049_s5 + $0xb0] sm:$0xff] }
 0x601   : > { %v7709_v48 = vmax.f32 %v7708_v52, %v5064_v42  ;;  %v7752_v3 = vmax.f32 %v7751_v29, %v5743_v16  ;;  %v5066_v43 = vadd.f32 %v5065_v5, %v13070_v30  ;;  %v5745_v0 = vadd.f32 %v5744_v13, %v13056_v41 }
 0x602   : > { %v5069_v31 = vpop.f32.mrf.mxu1  ;;  %5308 = vmatmul.mubr.bf16.gmra.mxu1 %v13092_v45  ;;  %v5746_v52 = vpop.f32.mrf.mxu0  ;;  %v9381_v29 = vcombine.low %v4607_v11, %v4611_v57  ;;  %v9382_v17 = vcombine.high %v4607_v11, %v4611_v57  ;;  %v13120_v5 = vpack.c.bf16 %v4452_v9, %v4451_v8  ;;  %v9383_v11 = vcombine.low %v4608_v56, %v4612_v59 }
 0x603   : > { %v7730_v63 = vmax.f32 %v7729_v46, %v5066_v43  ;;  %v7773_v12 = vmax.f32 %v7772_v24, %v5745_v0  ;;  %v5070_v42 = vadd.f32 %v5069_v31, %v13058_v21  ;;  %v5747_v16 = vadd.f32 %v5746_v52, %v13051_v19  ;;  %5317 = vmatprep.mubr.bf16.mxu1 %v15192_v44 }
 0x604   : > { %v5071_v13 = vpop.f32.mrf.mxu1  ;;  %v5748_v45 = vpop.f32.mrf.mxu0  ;;  %6371 = vmatprep.subr.bf16.mxu1 %v9382_v17  ;;  %v9384_v57 = vcombine.high %v4608_v56, %v4612_v59  ;;  %v4111_v43 = vadd.f32 %v12845_v23, %v13003_v54 }
 0x605   : > { %v7710_v55 = vmax.f32 %v7709_v48, %v5070_v42  ;;  %v7753_v2 = vmax.f32 %v7752_v3, %v5747_v16  ;;  %v5072_v46 = vadd.f32 %v5071_v13, %v13070_v30  ;;  %v5749_v24 = vadd.f32 %v5748_v45, %v13056_v41  ;;  %6372 = vmatpush1.bf16.msra.mxu1 %v9381_v29 }
 0x606   : > { %v5073_v9 = vpop.f32.mrf.mxu1  ;;  %v5752_v0 = vpop.f32.mrf.mxu0  ;;  %5991 = vmatmul.mubr.bf16.gmra.mxu0 %v13120_v5  ;;  %7044 = vmatprep.subr.bf16.mxu0 %v9384_v57  ;;  %v4454_v3 = vmax.f32 %v4114_v6, 0.0  ;;  %v4453_v59 = vmax.f32 %v4111_v43, 0.0 }
 0x607   : > { %v7731_v35 = vmax.f32 %v7730_v63, %v5072_v46  ;;  %v7774_v8 = vmax.f32 %v7773_v12, %v5749_v24  ;;  %v5074_v31 = vadd.f32 %v5073_v9, %v13058_v21  ;;  %v5753_v48 = vadd.f32 %v5752_v0, %v13051_v19  ;;  %6000 = vmatprep.mubr.bf16.mxu0 %v15192_v44 }
 0x608   : > { %v5075_v56 = vpop.f32.mrf.mxu1  ;;  %v5754_v45 = vpop.f32.mrf.mxu0  ;;  %7045 = vmatpush1.bf16.msra.mxu0 %v9383_v11  ;;  %v4119_v0 = vadd.f32 %v12845_v23, %v12995_v62 }
 0x609   : > { %v7711_v52 = vmax.f32 %v7710_v55, %v5074_v31  ;;  %v7754_v29 = vmax.f32 %v7753_v2, %v5753_v48  ;;  %v5076_v54 = vadd.f32 %v5075_v56, %v13070_v30  ;;  %v5755_v17 = vadd.f32 %v5754_v45, %v13056_v41 }
 0x60a   : > { %v5079_v42 = vpop.f32.mrf.mxu1  ;;  %5318 = vmatmul.mubr.bf16.gmra.mxu1 %v13120_v5  ;;  %v5756_v63 = vpop.f32.mrf.mxu0  ;;  %v4122_v2 = vadd.f32 %v12845_v23, %v13009_v10  ;;  %v13140_v55 = vpack.c.bf16 %v4454_v3, %v4453_v59  ;;  %v4455_v59 = vmax.f32 %v4119_v0, 0.0 }
 0x60b   : > { %v7732_v12 = vmax.f32 %v7731_v35, %v5076_v54  ;;  %v7775_v16 = vmax.f32 %v7774_v8, %v5755_v17  ;;  %v5080_v13 = vadd.f32 %v5079_v42, %v13058_v21  ;;  %v5757_v6 = vadd.f32 %v5756_v63, %v13051_v19  ;;  %5327 = vmatprep.mubr.bf16.mxu1 %v15192_v44 }
 0x60c   : > { %v5081_v11 = vpop.f32.mrf.mxu1  ;;  %v5758_v57 = vpop.f32.mrf.mxu0  ;;  %v4456_v56 = vmax.f32 %v4122_v2, 0.0 }
 0x60d   : > { %v7712_v46 = vmax.f32 %v7711_v52, %v5080_v13  ;;  %v7755_v24 = vmax.f32 %v7754_v29, %v5757_v6  ;;  %v5082_v43 = vadd.f32 %v5081_v11, %v13070_v30  ;;  %v5759_v9 = vadd.f32 %v5758_v57, %v13056_v41 }
 0x60e   : > { %v5083_v35 = vpop.f32.mrf.mxu1  ;;  %v5762_v8 = vpop.f32.mrf.mxu0  ;;  %6001 = vmatmul.mubr.bf16.gmra.mxu0 %v13140_v55  ;;  %v13156_v2 = vpack.c.bf16 %v4456_v56, %v4455_v59  ;;  %v4130_v11 = vadd.f32 %v12845_v23, %v13038_v61 }
 0x60f   : > { %v7733_v31 = vmax.f32 %v7732_v12, %v5082_v43  ;;  %v7776_v48 = vmax.f32 %v7775_v16, %v5759_v9  ;;  %v5084_v10 = vadd.f32 %v5083_v35, %v13058_v21  ;;  %v5763_v3 = vadd.f32 %v5762_v8, %v13051_v19  ;;  %6010 = vmatprep.mubr.bf16.mxu0 %v15192_v44 }
 0x610   : > { %v5085_v45 = vpop.f32.mrf.mxu1  ;;  %v5764_v52 = vpop.f32.mrf.mxu0  ;;  %v4127_v35 = vadd.f32 %v12845_v23, %v13027_v37  ;;  %v4458_v56 = vmax.f32 %v4130_v11, 0.0 }
 0x611   : > { %v7713_v29 = vmax.f32 %v7712_v46, %v5084_v10  ;;  %v7756_v54 = vmax.f32 %v7755_v24, %v5763_v3  ;;  %v5086_v17 = vadd.f32 %v5085_v45, %v13070_v30  ;;  %v5765_v62 = vadd.f32 %v5764_v52, %v13056_v41 }
 0x612   : > { %v5089_v42 = vpop.f32.mrf.mxu1  ;;  %5328 = vmatmul.mubr.bf16.gmra.mxu1 %v13140_v55  ;;  %v5766_v63 = vpop.f32.mrf.mxu0 }
 0x613   : > { %v7734_v12 = vmax.f32 %v7733_v31, %v5086_v17  ;;  %v7777_v16 = vmax.f32 %v7776_v48, %v5765_v62  ;;  %v5090_v13 = vadd.f32 %v5089_v42, %v13058_v21  ;;  %v5767_v6 = vadd.f32 %v5766_v63, %v13051_v19  ;;  %5337 = vmatprep.mubr.bf16.mxu1 %v15192_v44 }
 0x614   : > { %v5091_v57 = vpop.f32.mrf.mxu1  ;;  %v5768_v46 = vpop.f32.mrf.mxu0  ;;  %v4457_v62 = vmax.f32 %v4127_v35, 0.0  ;;  %v4135_v35 = vadd.f32 %v12845_v23, %v13019_v39 }
 0x615   : > { %v7714_v24 = vmax.f32 %v7713_v29, %v5090_v13  ;;  %v7757_v43 = vmax.f32 %v7756_v54, %v5767_v6  ;;  %v5092_v9 = vadd.f32 %v5091_v57, %v13070_v30  ;;  %v5769_v0 = vadd.f32 %v5768_v46, %v13056_v41 }
 0x616   : > { %v5093_v8 = vpop.f32.mrf.mxu1  ;;  %v5772_v31 = vpop.f32.mrf.mxu0  ;;  %6011 = vmatmul.mubr.bf16.gmra.mxu0 %v13156_v2  ;;  %v4138_v6 = vadd.f32 %v12845_v23, %v13029_v28  ;;  %v13176_v11 = vpack.c.bf16 %v4458_v56, %v4457_v62 }
 0x617   : > { %v7735_v48 = vmax.f32 %v7734_v12, %v5092_v9  ;;  %v7778_v10 = vmax.f32 %v7777_v16, %v5769_v0  ;;  %v5094_v3 = vadd.f32 %v5093_v8, %v13058_v21  ;;  %v5773_v61 = vadd.f32 %v5772_v31, %v13051_v19  ;;  %6020 = vmatprep.mubr.bf16.mxu0 %v15192_v44 }
 0x618   : > { %v5095_v45 = vpop.f32.mrf.mxu1  ;;  %v5774_v52 = vpop.f32.mrf.mxu0 }
 0x619   : > { %v7715_v29 = vmax.f32 %v7714_v24, %v5094_v3  ;;  %v7758_v54 = vmax.f32 %v7757_v43, %v5773_v61  ;;  %v5096_v17 = vadd.f32 %v5095_v45, %v13070_v30  ;;  %v5775_v37 = vadd.f32 %v5774_v52, %v13056_v41 }
 0x61a   : > { %v5099_v59 = vpop.f32.mrf.mxu1  ;;  %5338 = vmatmul.mubr.bf16.gmra.mxu1 %v13156_v2  ;;  %v5776_v42 = vpop.f32.mrf.mxu0  ;;  %v4460_v61 = vmax.f32 %v4138_v6, 0.0 }
 0x61b   : > { %v7736_v63 = vmax.f32 %v7735_v48, %v5096_v17  ;;  %v7779_v12 = vmax.f32 %v7778_v10, %v5775_v37  ;;  %v5100_v16 = vadd.f32 %v5099_v59, %v13058_v21  ;;  %v5777_v13 = vadd.f32 %v5776_v42, %v13051_v19  ;;  %5347 = vmatprep.mubr.bf16.mxu1 %v15192_v44 }
 0x61c   : > { %v5101_v57 = vpop.f32.mrf.mxu1  ;;  %v5778_v46 = vpop.f32.mrf.mxu0  ;;  %v4459_v17 = vmax.f32 %v4135_v35, 0.0 }
 0x61d   : > { %v7716_v24 = vmax.f32 %v7715_v29, %v5100_v16  ;;  %v7759_v43 = vmax.f32 %v7758_v54, %v5777_v13  ;;  %v5102_v9 = vadd.f32 %v5101_v57, %v13070_v30  ;;  %v5779_v0 = vadd.f32 %v5778_v46, %v13056_v41 }
 0x61e   : > { %v5103_v8 = vpop.f32.mrf.mxu1  ;;  %v5782_v31 = vpop.f32.mrf.mxu0  ;;  %6021 = vmatmul.mubr.bf16.gmra.mxu0 %v13176_v11  ;;  %v4146_v16 = vadd.f32 %v12845_v23, %v11909_v22  ;;  %v13194_v13 = vpack.c.bf16 %v4460_v61, %v4459_v17 }
 0x61f   : > { %v7737_v48 = vmax.f32 %v7736_v63, %v5102_v9  ;;  %v7780_v10 = vmax.f32 %v7779_v12, %v5779_v0  ;;  %v5104_v28 = vadd.f32 %v5103_v8, %v13058_v21  ;;  %v5783_v3 = vadd.f32 %v5782_v31, %v13051_v19  ;;  %6030 = vmatprep.mubr.bf16.mxu0 %v15192_v44 }
 0x620   : > { %v5105_v56 = vpop.f32.mrf.mxu1  ;;  %v5784_v45 = vpop.f32.mrf.mxu0  ;;  %v4143_v0 = vadd.f32 %v12845_v23, %v11891_v36 }
 0x621   : > { %v7717_v52 = vmax.f32 %v7716_v24, %v5104_v28  ;;  %v7760_v29 = vmax.f32 %v7759_v43, %v5783_v3  ;;  %v5106_v54 = vadd.f32 %v5105_v56, %v13070_v30  ;;  %v5785_v39 = vadd.f32 %v5784_v45, %v13056_v41 }
 0x622   : > { %v5109_v37 = vpop.f32.mrf.mxu1  ;;  %5348 = vmatmul.mubr.bf16.gmra.mxu1 %v13176_v11  ;;  %v5786_v62 = vpop.f32.mrf.mxu0  ;;  %v4462_v28 = vmax.f32 %v4146_v16, 0.0 }
 0x623   : > { %v7738_v59 = vmax.f32 %v7737_v48, %v5106_v54  ;;  %v7781_v42 = vmax.f32 %v7780_v10, %v5785_v39  ;;  %v5110_v63 = vadd.f32 %v5109_v37, %v13058_v21  ;;  %v5787_v12 = vadd.f32 %v5786_v62, %v13051_v19  ;;  %5357 = vmatprep.mubr.bf16.mxu1 %v15192_v44 }
 0x624   : > { %v5111_v6 = vpop.f32.mrf.mxu1  ;;  %v5788_v57 = vpop.f32.mrf.mxu0 }
 0x625   : > { %v7718_v46 = vmax.f32 %v7717_v52, %v5110_v63  ;;  %v7761_v24 = vmax.f32 %v7760_v29, %v5787_v12  ;;  %v5112_v43 = vadd.f32 %v5111_v6, %v13070_v30  ;;  %v5789_v9 = vadd.f32 %v5788_v57, %v13056_v41 }
 0x626   : > { %v5113_v35 = vpop.f32.mrf.mxu1  ;;  %v5792_v8 = vpop.f32.mrf.mxu0  ;;  %6031 = vmatmul.mubr.bf16.gmra.mxu0 %v13194_v13  ;;  %v4461_v29 = vmax.f32 %v4143_v0, 0.0 }
 0x627   : > { %v7739_v31 = vmax.f32 %v7738_v59, %v5112_v43  ;;  %v7782_v48 = vmax.f32 %v7781_v42, %v5789_v9  ;;  %v5114_v22 = vadd.f32 %v5113_v35, %v13058_v21  ;;  %v5793_v10 = vadd.f32 %v5792_v8, %v13051_v19  ;;  %6040 = vmatprep.mubr.bf16.mxu0 %v15192_v44 }
 0x628   : > { %v5115_v3 = vpop.f32.mrf.mxu1  ;;  %v5794_v61 = vpop.f32.mrf.mxu0  ;;  %v13210_v42 = vpack.c.bf16 %v4462_v28, %v4461_v29  ;;  %v4159_v29 = vadd.f32 %v12845_v23, %v11919_v18 }
 0x629   : > { %v7719_v56 = vmax.f32 %v7718_v46, %v5114_v22  ;;  %v7762_v45 = vmax.f32 %v7761_v24, %v5793_v10  ;;  %v5116_v52 = vadd.f32 %v5115_v3, %v13070_v30  ;;  %v5795_v36 = vadd.f32 %v5794_v61, %v13056_v41 }
 0x62a   : > { %v5119_v54 = vpop.f32.mrf.mxu1  ;;  %5358 = vmatmul.mubr.bf16.gmra.mxu1 %v13194_v13  ;;  %v5796_v39 = vpop.f32.mrf.mxu0  ;;  %v4162_v3 = vadd.f32 %v12845_v23, %v11929_v32 }
 0x62b   : > { %v7740_v17 = vmax.f32 %v7739_v31, %v5116_v52  ;;  %v7783_v37 = vmax.f32 %v7782_v48, %v5795_v36  ;;  %v5120_v62 = vadd.f32 %v5119_v54, %v13058_v21  ;;  %v5797_v59 = vadd.f32 %v5796_v39, %v13051_v19  ;;  %5367 = vmatprep.mubr.bf16.mxu1 %v15192_v44 }
 0x62c   : > { %v5121_v63 = vpop.f32.mrf.mxu1  ;;  %v5798_v12 = vpop.f32.mrf.mxu0 }
 0x62d   : > { %v7720_v16 = vmax.f32 %v7719_v56, %v5120_v62  ;;  %v13212_v6 = vmax.f32 %v7762_v45, %v5797_v59  ;;  %v5122_v57 = vadd.f32 %v5121_v63, %v13070_v30  ;;  %v5799_v46 = vadd.f32 %v5798_v12, %v13056_v41 }
 0x62e   : > { %v5123_v24 = vpop.f32.mrf.mxu1  ;;  %v5802_v43 = vpop.f32.mrf.mxu0  ;;  %6041 = vmatmul.mubr.bf16.gmra.mxu0 %v13210_v42  ;;  %v4466_v62 = vmax.f32 %v4162_v3, 0.0 }
 0x62f   : > { %v7741_v9 = vmax.f32 %v7740_v17, %v5122_v57  ;;  %v13217_v0 = vmax.f32 %v7783_v37, %v5799_v46  ;;  %v5124_v35 = vadd.f32 %v5123_v24, %v13058_v21  ;;  %6050 = vmatprep.mubr.bf16.mxu0 %v15192_v44  ;;  %v5803_v56 = vadd.f32 %v5802_v43, %v13051_v19 }
 0x630   : > { %v5125_v8 = vpop.f32.mrf.mxu1  ;;  %v5804_v31 = vpop.f32.mrf.mxu0  ;;  %v4465_v57 = vmax.f32 %v4159_v29, 0.0 }
 0x631   : > { %v13221_v48 = vmax.f32 %v7720_v16, %v5124_v35  ;;  %v5126_v22 = vadd.f32 %v5125_v8, %v13070_v30  ;;  %v5805_v54 = vadd.f32 %v5804_v31, %v13056_v41 }
 0x632   : > { %v5129_v10 = vpop.f32.mrf.mxu1  ;;  %5368 = vmatmul.mubr.bf16.gmra.mxu1 %v13210_v42  ;;  %v5806_v28 = vpop.f32.mrf.mxu0 }
 0x633   : > { %v13227_v61 = vmax.f32 %v7741_v9, %v5126_v22  ;;  %5377 = vmatprep.mubr.bf16.mxu1 %v15192_v44  ;;  %v5807_v45 = vadd.f32 %v5806_v28, %v13051_v19  ;;  %v5130_v59 = vadd.f32 %v5129_v10, %v13058_v21  ;;  %v13247_v10 = vpack.c.bf16 %v4466_v62, %v4465_v57 }
 0x634   : > { %v5131_v52 = vpop.f32.mrf.mxu1  ;;  %v5808_v36 = vpop.f32.mrf.mxu0 }
 0x635   : > { %v7917_v39 = vmax.f32 %v5803_v56, %v5807_v45  ;;  %v5809_v17 = vadd.f32 %v5808_v36, %v13056_v41  ;;  %v5132_v46 = vadd.f32 %v5131_v52, %v13070_v30  ;;  %15542 = vst [vmem:[#allocation123_spill] sm:$0xff] %v13247_v10 }
 0x636   : > { %v5133_v37 = vpop.f32.mrf.mxu1  ;;  %v5812_v32 = vpop.f32.mrf.mxu0  ;;  %6051 = vmatmul.mubr.bf16.gmra.mxu0 %v11905_v33 }
 0x637   : > { %6060 = vmatprep.mubr.bf16.mxu0 %v15192_v44  ;;  %v7938_v63 = vmax.f32 %v5805_v54, %v5809_v17  ;;  %v5134_v12 = vadd.f32 %v5133_v37, %v13058_v21  ;;  %v5813_v16 = vadd.f32 %v5812_v32, %v13051_v19 }
 0x638   : > { %v5135_v18 = vpop.f32.mrf.mxu1  ;;  %v5814_v23 = vpop.f32.mrf.mxu0 }
 0x639   : > { %v7875_v24 = vmax.f32 %v5130_v59, %v5134_v12  ;;  %v7918_v43 = vmax.f32 %v7917_v39, %v5813_v16  ;;  %v5136_v9 = vadd.f32 %v5135_v18, %v13070_v30  ;;  %v5815_v35 = vadd.f32 %v5814_v23, %v13056_v41 }
 0x63a   : > { %v5139_v8 = vpop.f32.mrf.mxu1  ;;  %5378 = vmatmul.mubr.bf16.gmra.mxu1 %v11905_v33  ;;  %v5816_v31 = vpop.f32.mrf.mxu0 }
 0x63b   : > { %v5140_v22 = vadd.f32 %v5139_v8, %v13058_v21  ;;  %5387 = vmatprep.mubr.bf16.mxu1 %v15192_v44  ;;  %v7896_v28 = vmax.f32 %v5132_v46, %v5136_v9  ;;  %v7939_v3 = vmax.f32 %v7938_v63, %v5815_v35  ;;  %v5817_v56 = vadd.f32 %v5816_v31, %v13051_v19  ;;  %v4600_v9 = vld [vmem:[%s15049_s5 + $0x58] sm:$0xff] }
 0x63c   : > { %v5141_v45 = vpop.f32.mrf.mxu1  ;;  %v5818_v52 = vpop.f32.mrf.mxu0 }
 0x63d   : > { %v7876_v36 = vmax.f32 %v7875_v24, %v5140_v22  ;;  %v5142_v29 = vadd.f32 %v5141_v45, %v13070_v30  ;;  %v7919_v54 = vmax.f32 %v7918_v43, %v5817_v56  ;;  %v5819_v39 = vadd.f32 %v5818_v52, %v13056_v41  ;;  %v4599_v24 = vld [vmem:[%s15049_s5 + $0x50] sm:$0xff] }
 0x63e   : > { %v5143_v17 = vpop.f32.mrf.mxu1  ;;  %v5822_v37 = vpop.f32.mrf.mxu0  ;;  %6061 = vmatmul.mubr.bf16.gmra.mxu0 %v13247_v10  ;;  %v4603_v43 = vld [vmem:[%s15049_s5 + $0x70] sm:$0xff] }
 0x63f   : > { %v7897_v32 = vmax.f32 %v7896_v28, %v5142_v29  ;;  %v5144_v62 = vadd.f32 %v5143_v17, %v13058_v21  ;;  %v5823_v59 = vadd.f32 %v5822_v37, %v13051_v19  ;;  %6070 = vmatprep.mubr.bf16.mxu0 %v15192_v44  ;;  %v7940_v63 = vmax.f32 %v7939_v3, %v5819_v39  ;;  %v4604_v28 = vld [vmem:[%s15049_s5 + $0x78] sm:$0xff] }
 0x640   : > { %v5145_v12 = vpop.f32.mrf.mxu1  ;;  %v5824_v16 = vpop.f32.mrf.mxu0  ;;  %v9373_v31 = vcombine.low %v4599_v24, %v4603_v43  ;;  %v9374_v22 = vcombine.high %v4599_v24, %v4603_v43  ;;  %v9375_v17 = vcombine.low %v4600_v9, %v4604_v28  ;;  %v9376_v37 = vcombine.high %v4600_v9, %v4604_v28 }
 0x641   : > { %v7877_v18 = vmax.f32 %v7876_v36, %v5144_v62  ;;  %v7920_v23 = vmax.f32 %v7919_v54, %v5823_v59  ;;  %v5146_v57 = vadd.f32 %v5145_v12, %v13070_v30  ;;  %v5825_v46 = vadd.f32 %v5824_v16, %v13056_v41  ;;  %v13277_v36 = vld [vmem:[%s15048_s4] ss:$0 sm:$0xff] }
 0x642   : > { %v5149_v35 = vpop.f32.mrf.mxu1  ;;  %5388 = vmatmul.mubr.bf16.gmra.mxu1 %v13247_v10  ;;  %v5826_v8 = vpop.f32.mrf.mxu0  ;;  %v4178_v29 = vadd.f32 %v13277_v36, %v11945_v51  ;;  %6373 = vmatprep.subr.bf16.mxu1 %v9374_v22  ;;  %v4175_v12 = vadd.f32 %v13277_v36, %v11935_v34 }
 0x643   : > { %v7898_v3 = vmax.f32 %v7897_v32, %v5146_v57  ;;  %v7941_v56 = vmax.f32 %v7940_v63, %v5825_v46  ;;  %v5150_v45 = vadd.f32 %v5149_v35, %v13058_v21  ;;  %v5827_v52 = vadd.f32 %v5826_v8, %v13051_v19  ;;  %5397 = vmatprep.mubr.bf16.mxu1 %v15192_v44 }
 0x644   : > { %v5151_v54 = vpop.f32.mrf.mxu1  ;;  %v5828_v39 = vpop.f32.mrf.mxu0  ;;  %6374 = vmatpush1.bf16.msra.mxu1 %v9373_v31  ;;  %7046 = vmatprep.subr.bf16.mxu0 %v9376_v37  ;;  %v4469_v22 = vmax.f32 %v4175_v12, 0.0 }
 0x645   : > { %v7878_v32 = vmax.f32 %v7877_v18, %v5150_v45  ;;  %v7921_v62 = vmax.f32 %v7920_v23, %v5827_v52  ;;  %v5152_v59 = vadd.f32 %v5151_v54, %v13070_v30  ;;  %v5829_v63 = vadd.f32 %v5828_v39, %v13056_v41  ;;  %7047 = vmatpush1.bf16.msra.mxu0 %v9375_v17 }
 0x646   : > { %v5153_v16 = vpop.f32.mrf.mxu1  ;;  %v5832_v57 = vpop.f32.mrf.mxu0  ;;  %6071 = vmatmul.mubr.bf16.gmra.mxu0 %v11932_v58  ;;  %v4470_v23 = vmax.f32 %v4178_v29, 0.0 }
 0x647   : > { %v7899_v51 = vmax.f32 %v7898_v3, %v5152_v59  ;;  %v7942_v46 = vmax.f32 %v7941_v56, %v5829_v63  ;;  %v5154_v24 = vadd.f32 %v5153_v16, %v13058_v21  ;;  %v5833_v18 = vadd.f32 %v5832_v57, %v13051_v19  ;;  %6080 = vmatprep.mubr.bf16.mxu0 %v15192_v44 }
 0x648   : > { %v5155_v43 = vpop.f32.mrf.mxu1  ;;  %v5834_v9 = vpop.f32.mrf.mxu0  ;;  %v13295_v54 = vpack.c.bf16 %v4470_v23, %v4469_v22 }
 0x649   : > { %v7879_v35 = vmax.f32 %v7878_v32, %v5154_v24  ;;  %v7922_v8 = vmax.f32 %v7921_v62, %v5833_v18  ;;  %v5156_v34 = vadd.f32 %v5155_v43, %v13070_v30  ;;  %v5835_v31 = vadd.f32 %v5834_v9, %v13056_v41 }
 0x64a   : > { %v5159_v28 = vpop.f32.mrf.mxu1  ;;  %5398 = vmatmul.mubr.bf16.gmra.mxu1 %v11932_v58  ;;  %v5836_v3 = vpop.f32.mrf.mxu0  ;;  %15543 = vst [vmem:[#allocation112_spill] sm:$0xff] %v13295_v54 }
 0x64b   : > { %v7900_v56 = vmax.f32 %v7899_v51, %v5156_v34  ;;  %v7943_v45 = vmax.f32 %v7942_v46, %v5835_v31  ;;  %v5160_v52 = vadd.f32 %v5159_v28, %v13058_v21  ;;  %v5837_v29 = vadd.f32 %v5836_v3, %v13051_v19  ;;  %5407 = vmatprep.mubr.bf16.mxu1 %v15192_v44 }
 0x64c   : > { %v5161_v39 = vpop.f32.mrf.mxu1  ;;  %v5838_v17 = vpop.f32.mrf.mxu0 }
 0x64d   : > { %v7880_v37 = vmax.f32 %v7879_v35, %v5160_v52  ;;  %v7923_v32 = vmax.f32 %v7922_v8, %v5837_v29  ;;  %v5162_v62 = vadd.f32 %v5161_v39, %v13070_v30  ;;  %v5839_v59 = vadd.f32 %v5838_v17, %v13056_v41 }
 0x64e   : > { %v5163_v63 = vpop.f32.mrf.mxu1  ;;  %v5842_v12 = vpop.f32.mrf.mxu0  ;;  %6081 = vmatmul.mubr.bf16.gmra.mxu0 %v13295_v54 }
 0x64f   : > { %v7901_v16 = vmax.f32 %v7900_v56, %v5162_v62  ;;  %v7944_v57 = vmax.f32 %v7943_v45, %v5839_v59  ;;  %v5164_v51 = vadd.f32 %v5163_v63, %v13058_v21  ;;  %v5843_v46 = vadd.f32 %v5842_v12, %v13051_v19  ;;  %6090 = vmatprep.mubr.bf16.mxu0 %v15192_v44 }
 0x650   : > { %v5165_v24 = vpop.f32.mrf.mxu1  ;;  %v5844_v18 = vpop.f32.mrf.mxu0  ;;  %v4194_v56 = vadd.f32 %v13277_v36, %v11959_v25 }
 0x651   : > { %v7881_v23 = vmax.f32 %v7880_v37, %v5164_v51  ;;  %v7924_v43 = vmax.f32 %v7923_v32, %v5843_v46  ;;  %v5166_v9 = vadd.f32 %v5165_v24, %v13070_v30  ;;  %v5845_v35 = vadd.f32 %v5844_v18, %v13056_v41 }
 0x652   : > { %v5169_v8 = vpop.f32.mrf.mxu1  ;;  %5408 = vmatmul.mubr.bf16.gmra.mxu1 %v13295_v54  ;;  %v5846_v34 = vpop.f32.mrf.mxu0  ;;  %v4191_v32 = vadd.f32 %v13277_v36, %v11952_v7 }
 0x653   : > { %v7902_v31 = vmax.f32 %v7901_v16, %v5166_v9  ;;  %v7945_v22 = vmax.f32 %v7944_v57, %v5845_v35  ;;  %v5170_v28 = vadd.f32 %v5169_v8, %v13058_v21  ;;  %v5847_v3 = vadd.f32 %v5846_v34, %v13051_v19  ;;  %5417 = vmatprep.mubr.bf16.mxu1 %v15192_v44 }
 0x654   : > { %v5171_v45 = vpop.f32.mrf.mxu1  ;;  %v5848_v52 = vpop.f32.mrf.mxu0  ;;  %v4474_v57 = vmax.f32 %v4194_v56, 0.0 }
 0x655   : > { %v7882_v29 = vmax.f32 %v7881_v23, %v5170_v28  ;;  %v7925_v39 = vmax.f32 %v7924_v43, %v5847_v3  ;;  %v5172_v17 = vadd.f32 %v5171_v45, %v13070_v30  ;;  %v5849_v37 = vadd.f32 %v5848_v52, %v13056_v41 }
 0x656   : > { %v5173_v62 = vpop.f32.mrf.mxu1  ;;  %v5852_v59 = vpop.f32.mrf.mxu0  ;;  %6091 = vmatmul.mubr.bf16.gmra.mxu0 %v11943_v4  ;;  %v4473_v43 = vmax.f32 %v4191_v32, 0.0 }
 0x657   : > { %v7903_v63 = vmax.f32 %v7902_v31, %v5172_v17  ;;  %v7946_v12 = vmax.f32 %v7945_v22, %v5849_v37  ;;  %v5174_v16 = vadd.f32 %v5173_v62, %v13058_v21  ;;  %v5853_v25 = vadd.f32 %v5852_v59, %v13051_v19  ;;  %6100 = vmatprep.mubr.bf16.mxu0 %v15192_v44 }
 0x658   : > { %v5175_v51 = vpop.f32.mrf.mxu1  ;;  %v5854_v46 = vpop.f32.mrf.mxu0  ;;  %v13325_v28 = vpack.c.bf16 %v4474_v57, %v4473_v43  ;;  %v7764_v17 = vrot.slane %v13212_v6, 4  ;;  %v7785_v37 = vrot.slane %v13217_v0, 4 }
 0x659   : > { %v7883_v24 = vmax.f32 %v7882_v29, %v5174_v16  ;;  %v7926_v18 = vmax.f32 %v7925_v39, %v5853_v25  ;;  %v5176_v23 = vadd.f32 %v5175_v51, %v13070_v30  ;;  %v5855_v7 = vadd.f32 %v5854_v46, %v13056_v41 }
 0x65a   : > { %v5179_v9 = vpop.f32.mrf.mxu1  ;;  %5418 = vmatmul.mubr.bf16.gmra.mxu1 %v11943_v4  ;;  %v5856_v35 = vpop.f32.mrf.mxu0  ;;  %15544 = vst [vmem:[#allocation126_spill] sm:$0xff] %v13325_v28  ;;  %v7722_v25 = vrot.slane %v13221_v48, 4  ;;  %v7786_v43 = vmax.f32 %v13217_v0, %v7785_v37  ;;  %v4207_v37 = vadd.f32 %v13277_v36, %v11967_v27 }
 0x65b   : > { %v7904_v8 = vmax.f32 %v7903_v63, %v5176_v23  ;;  %v7947_v34 = vmax.f32 %v7946_v12, %v5855_v7  ;;  %v5180_v31 = vadd.f32 %v5179_v9, %v13058_v21  ;;  %v5857_v22 = vadd.f32 %v5856_v35, %v13051_v19  ;;  %5427 = vmatprep.mubr.bf16.mxu1 %v15192_v44 }
 0x65c   : > { %v5181_v3 = vpop.f32.mrf.mxu1  ;;  %v5858_v56 = vpop.f32.mrf.mxu0  ;;  %v7765_v7 = vmax.f32 %v13212_v6, %v7764_v17  ;;  %v7743_v6 = vrot.slane %v13227_v61, 4 }
 0x65d   : > { %v7884_v45 = vmax.f32 %v7883_v24, %v5180_v31  ;;  %v7927_v52 = vmax.f32 %v7926_v18, %v5857_v22  ;;  %v5182_v29 = vadd.f32 %v5181_v3, %v13070_v30  ;;  %v5859_v39 = vadd.f32 %v5858_v56, %v13056_v41 }
 0x65e   : > { %v5183_v32 = vpop.f32.mrf.mxu1  ;;  %v5862_v62 = vpop.f32.mrf.mxu0  ;;  %6101 = vmatmul.mubr.bf16.gmra.mxu0 %v13325_v28  ;;  %v4210_v3 = vadd.f32 %v13277_v36, %v12021_v49  ;;  %v7723_v56 = vmax.f32 %v13221_v48, %v7722_v25 }
 0x65f   : > { %v7905_v59 = vmax.f32 %v7904_v8, %v5182_v29  ;;  %v7948_v63 = vmax.f32 %v7947_v34, %v5859_v39  ;;  %v5184_v12 = vadd.f32 %v5183_v32, %v13058_v21  ;;  %v5863_v16 = vadd.f32 %v5862_v62, %v13051_v19  ;;  %6110 = vmatprep.mubr.bf16.mxu0 %v15192_v44 }
 0x660   : > { %v5185_v57 = vpop.f32.mrf.mxu1  ;;  %v5864_v51 = vpop.f32.mrf.mxu0  ;;  %v7766_v32 = vrot.slane %v7765_v7, 2  ;;  %v7787_v62 = vrot.slane %v7786_v43, 2  ;;  %v4478_v25 = vmax.f32 %v4210_v3, 0.0 }
 0x661   : > { %v7885_v46 = vmax.f32 %v7884_v45, %v5184_v12  ;;  %v7928_v24 = vmax.f32 %v7927_v52, %v5863_v16  ;;  %v5186_v18 = vadd.f32 %v5185_v57, %v13070_v30  ;;  %v5865_v23 = vadd.f32 %v5864_v51, %v13056_v41 }
 0x662   : > { %v5189_v9 = vpop.f32.mrf.mxu1  ;;  %5428 = vmatmul.mubr.bf16.gmra.mxu1 %v13325_v28  ;;  %v5866_v35 = vpop.f32.mrf.mxu0  ;;  %v7724_v57 = vrot.slane %v7723_v56, 2  ;;  %v7744_v51 = vmax.f32 %v13227_v61, %v7743_v6 }
 0x663   : > { %v7906_v8 = vmax.f32 %v7905_v59, %v5186_v18  ;;  %v7949_v34 = vmax.f32 %v7948_v63, %v5865_v23  ;;  %v5190_v31 = vadd.f32 %v5189_v9, %v13058_v21  ;;  %v5867_v22 = vadd.f32 %v5866_v35, %v13051_v19  ;;  %5437 = vmatprep.mubr.bf16.mxu1 %v15192_v44 }
 0x664   : > { %v5191_v0 = vpop.f32.mrf.mxu1  ;;  %v5868_v45 = vpop.f32.mrf.mxu0  ;;  %v4477_v35 = vmax.f32 %v4207_v37, 0.0 }
 0x665   : > { %v7886_v52 = vmax.f32 %v7885_v46, %v5190_v31  ;;  %v7929_v29 = vmax.f32 %v7928_v24, %v5867_v22  ;;  %v5192_v39 = vadd.f32 %v5191_v0, %v13070_v30  ;;  %v5869_v17 = vadd.f32 %v5868_v45, %v13056_v41 }
 0x666   : > { %v5193_v59 = vpop.f32.mrf.mxu1  ;;  %v5872_v63 = vpop.f32.mrf.mxu0  ;;  %6111 = vmatmul.mubr.bf16.gmra.mxu0 %v11963_v15  ;;  %v7788_v31 = vmax.f32 %v7786_v43, %v7787_v62 }
 0x667   : > { %v7907_v49 = vmax.f32 %v7906_v8, %v5192_v39  ;;  %v7950_v48 = vmax.f32 %v7949_v34, %v5869_v17  ;;  %v5194_v12 = vadd.f32 %v5193_v59, %v13058_v21  ;;  %v5873_v16 = vadd.f32 %v5872_v63, %v13051_v19  ;;  %6120 = vmatprep.mubr.bf16.mxu0 %v15192_v44 }
 0x668   : > { %v5195_v46 = vpop.f32.mrf.mxu1  ;;  %v5874_v27 = vpop.f32.mrf.mxu0  ;;  %v4226_v8 = vadd.f32 %v13277_v36, %v12071_v40  ;;  %v7767_v34 = vmax.f32 %v7765_v7, %v7766_v32  ;;  %v7725_v40 = vmax.f32 %v7723_v56, %v7724_v57  ;;  %v7745_v7 = vrot.slane %v7744_v51, 2 }
 0x669   : > { %v7887_v24 = vmax.f32 %v7886_v52, %v5194_v12  ;;  %v7930_v18 = vmax.f32 %v7929_v29, %v5873_v16  ;;  %v5196_v23 = vadd.f32 %v5195_v46, %v13070_v30  ;;  %v5875_v9 = vadd.f32 %v5874_v27, %v13056_v41 }
 0x66a   : > { %v5199_v22 = vpop.f32.mrf.mxu1  ;;  %5438 = vmatmul.mubr.bf16.gmra.mxu1 %v11963_v15  ;;  %v5876_v3 = vpop.f32.mrf.mxu0  ;;  %v13365_v52 = vpack.c.bf16 %v4478_v25, %v4477_v35  ;;  %v4223_v29 = vadd.f32 %v13277_v36, %v12027_v50  ;;  %v4482_v59 = vmax.f32 %v4226_v8, 0.0  ;;  %v7768_v63 = vrot.slane %v7767_v34, 1 }
 0x66b   : > { %v7908_v0 = vmax.f32 %v7907_v49, %v5196_v23  ;;  %v7951_v61 = vmax.f32 %v7950_v48, %v5875_v9  ;;  %v5200_v6 = vadd.f32 %v5199_v22, %v13058_v21  ;;  %v5877_v45 = vadd.f32 %v5876_v3, %v13051_v19  ;;  %5447 = vmatprep.mubr.bf16.mxu1 %v15192_v44 }
 0x66c   : > { %15545 = vst [vmem:[#allocation9_spill] sm:$0xff] %v13365_v52  ;;  %v5201_v43 = vpop.f32.mrf.mxu1  ;;  %v5878_v39 = vpop.f32.mrf.mxu0  ;;  %v7789_v49 = vrot.slane %v7788_v31, 1  ;;  %v4481_v57 = vmax.f32 %v4223_v29, 0.0  ;;  %v7726_v46 = vrot.slane %v7725_v40, 1  ;;  %v13374_v27 = vmax.f32 %v7744_v51, %v7745_v7 }
 0x66d   : > { %v7888_v17 = vmax.f32 %v7887_v24, %v5200_v6  ;;  %v7931_v37 = vmax.f32 %v7930_v18, %v5877_v45  ;;  %v5202_v32 = vadd.f32 %v5201_v43, %v13070_v30  ;;  %v5879_v62 = vadd.f32 %v5878_v39, %v13056_v41 }
 0x66e   : > { %v5203_v48 = vpop.f32.mrf.mxu1  ;;  %v5882_v12 = vpop.f32.mrf.mxu0  ;;  %6121 = vmatmul.mubr.bf16.gmra.mxu0 %v13365_v52  ;;  %v13377_v22 = vpack.c.bf16 %v4482_v59, %v4481_v57  ;;  %v7769_v3 = vmax.f32 %v7767_v34, %v7768_v63  ;;  %v7727_v43 = vmax.f32 %v7725_v40, %v7726_v46  ;;  %v7747_v39 = vrot.slane %v13374_v27, 1 }
 0x66f   : > { %v7932_v16 = vrot.slane %v7931_v37, 4  ;;  %v7909_v25 = vmax.f32 %v7908_v0, %v5202_v32  ;;  %v7952_v50 = vmax.f32 %v7951_v61, %v5879_v62  ;;  %v5204_v56 = vadd.f32 %v5203_v48, %v13058_v21  ;;  %6130 = vmatprep.mubr.bf16.mxu0 %v15192_v44 }
 0x670   : > { %v5205_v24 = vpop.f32.mrf.mxu1  ;;  %v5884_v18 = vpop.f32.mrf.mxu0  ;;  %15546 = vst [vmem:[#allocation110_spill] sm:$0xff] %v13377_v22  ;;  %v7790_v0 = vmax.f32 %v7788_v31, %v7789_v49 }
 0x671   : > { %v7933_v23 = vmax.f32 %v7931_v37, %v7932_v16  ;;  %v7953_v9 = vrot.slane %v7952_v50, 4  ;;  %v7889_v35 = vmax.f32 %v7888_v17, %v5204_v56  ;;  %v5206_v8 = vadd.f32 %v5205_v24, %v13070_v30 }
 0x672   : > { %v5209_v61 = vpop.f32.mrf.mxu1  ;;  %5448 = vmatmul.mubr.bf16.gmra.mxu1 %v13365_v52  ;;  %v5886_v6 = vpop.f32.mrf.mxu0  ;;  %v5883_v17 = vadd.f32 %v5882_v12, %v13051_v19  ;;  %v5885_v49 = vadd.f32 %v5884_v18, %v13056_v41 }
 0x673   : > { %v7934_v45 = vrot.slane %v7933_v23, 2  ;;  %v7954_v29 = vmax.f32 %v7952_v50, %v7953_v9  ;;  %v7890_v51 = vrot.slane %v7889_v35, 4  ;;  %v7910_v7 = vmax.f32 %v7909_v25, %v5206_v8  ;;  %5457 = vmatprep.mubr.bf16.mxu1 %v15192_v44 }
 0x674   : > { %v5887_v37 = vadd.f32 %v5886_v6, %v13051_v19  ;;  %v5211_v34 = vpop.f32.mrf.mxu1  ;;  %v5888_v31 = vpop.f32.mrf.mxu0  ;;  %v5210_v48 = vadd.f32 %v5209_v61, %v13058_v21 }
 0x675   : > { %v7935_v32 = vmax.f32 %v7933_v23, %v7934_v45  ;;  %v7955_v62 = vrot.slane %v7954_v29, 2  ;;  %v7891_v59 = vmax.f32 %v7889_v35, %v7890_v51  ;;  %v7911_v63 = vrot.slane %v7910_v7, 4 }
 0x676   : > { %v8085_v16 = vmax.f32 %v5883_v17, %v5887_v37  ;;  %v5889_v25 = vadd.f32 %v5888_v31, %v13056_v41  ;;  %v5213_v40 = vpop.f32.mrf.mxu1  ;;  %v5892_v50 = vpop.f32.mrf.mxu0  ;;  %6131 = vmatmul.mubr.bf16.gmra.mxu0 %v11981_v20  ;;  %v5212_v24 = vadd.f32 %v5211_v34, %v13070_v30 }
 0x677   : > { %v7936_v12 = vrot.slane %v7935_v32, 1  ;;  %v7956_v56 = vmax.f32 %v7954_v29, %v7955_v62  ;;  %v7892_v57 = vrot.slane %v7891_v59, 2  ;;  %v7912_v46 = vmax.f32 %v7910_v7, %v7911_v63  ;;  %6140 = vmatprep.mubr.bf16.mxu0 %v15192_v44 }
 0x678   : > { %v8106_v23 = vmax.f32 %v5885_v49, %v5889_v25  ;;  %v5214_v18 = vadd.f32 %v5213_v40, %v13058_v21  ;;  %v5893_v9 = vadd.f32 %v5892_v50, %v13051_v19  ;;  %v5215_v35 = vpop.f32.mrf.mxu1  ;;  %v5894_v8 = vpop.f32.mrf.mxu0 }
 0x679   : > { %v7937_v61 = vmax.f32 %v7935_v32, %v7936_v12  ;;  %v7957_v6 = vrot.slane %v7956_v56, 1  ;;  %v7893_v45 = vmax.f32 %v7891_v59, %v7892_v57  ;;  %v7913_v51 = vrot.slane %v7912_v46, 2 }
 0x67a   : > { %v8043_v17 = vmax.f32 %v5210_v48, %v5214_v18  ;;  %v8086_v37 = vmax.f32 %v8085_v16, %v5893_v9  ;;  %v5216_v29 = vadd.f32 %v5215_v35, %v13070_v30  ;;  %v5895_v7 = vadd.f32 %v5894_v8, %v13056_v41  ;;  %v5219_v31 = vpop.f32.mrf.mxu1  ;;  %5458 = vmatmul.mubr.bf16.gmra.mxu1 %v11981_v20  ;;  %v5896_v34 = vpop.f32.mrf.mxu0 }
 0x67b   : > { %v13396_v62 = vsel %vm9123_vm1, %v7937_v61, %v7769_v3  ;;  %v7958_v63 = vmax.f32 %v7956_v56, %v7957_v6  ;;  %v7894_v49 = vrot.slane %v7893_v45, 1  ;;  %v7914_v25 = vmax.f32 %v7912_v46, %v7913_v51  ;;  %5467 = vmatprep.mubr.bf16.mxu1 %v15192_v44 }
 0x67c   : > { %v8064_v32 = vmax.f32 %v5212_v24, %v5216_v29  ;;  %v8107_v59 = vmax.f32 %v8106_v23, %v5895_v7  ;;  %v5220_v48 = vadd.f32 %v5219_v31, %v13058_v21  ;;  %v5897_v16 = vadd.f32 %v5896_v34, %v13051_v19  ;;  %v5221_v40 = vpop.f32.mrf.mxu1  ;;  %v5898_v50 = vpop.f32.mrf.mxu0  ;;  %v4591_v7 = vld [vmem:[%s15049_s5 + $0x10] sm:$0xff]  ;;  %v4592_v34 = vld [vmem:[%s15049_s5 + $0x18] sm:$0xff] }
 0x67d   : > { %v13402_v12 = vsel %vm9123_vm1, %v7958_v63, %v7790_v0  ;;  %v7895_v57 = vmax.f32 %v7893_v45, %v7894_v49  ;;  %v7915_v18 = vrot.slane %v7914_v25, 1  ;;  %v5222_v3 = vadd.f32 %v5221_v40, %v13070_v30  ;;  %v4595_v31 = vld [vmem:[%s15049_s5 + $0x30] sm:$0xff] }
 0x67e   : > { %v7748_v56 = vmax.f32 %v13374_v27, %v7747_v39  ;;  %v8044_v46 = vmax.f32 %v8043_v17, %v5220_v48  ;;  %v8087_v9 = vmax.f32 %v8086_v37, %v5897_v16  ;;  %v5899_v24 = vadd.f32 %v5898_v50, %v13056_v41  ;;  %v5223_v23 = vpop.f32.mrf.mxu1  ;;  %v5902_v35 = vpop.f32.mrf.mxu0  ;;  %6141 = vmatmul.mubr.bf16.gmra.mxu0 %v13377_v22  ;;  %v4596_v48 = vld [vmem:[%s15049_s5 + $0x38] sm:$0xff] }
 0x67f   : > { %v13409_v8 = vsel %vm9123_vm1, %v7895_v57, %v7727_v43  ;;  %v7916_v61 = vmax.f32 %v7914_v25, %v7915_v18  ;;  %v8065_v0 = vmax.f32 %v8064_v32, %v5222_v3  ;;  %v5224_v6 = vadd.f32 %v5223_v23, %v13058_v21  ;;  %6150 = vmatprep.mubr.bf16.mxu0 %v15192_v44 }
 0x680   : > { %v8108_v45 = vmax.f32 %v8107_v59, %v5899_v24  ;;  %v5903_v27 = vadd.f32 %v5902_v35, %v13051_v19  ;;  %v5225_v39 = vpop.f32.mrf.mxu1  ;;  %v5904_v51 = vpop.f32.mrf.mxu0  ;;  %v9365_v32 = vcombine.low %v4591_v7, %v4595_v31  ;;  %v9366_v59 = vcombine.high %v4591_v7, %v4595_v31 }
 0x681   : > { %v13415_v17 = vsel %vm9123_vm1, %v7916_v61, %v7748_v56  ;;  %v8045_v37 = vmax.f32 %v8044_v46, %v5224_v6  ;;  %v5226_v29 = vadd.f32 %v5225_v39, %v13070_v30  ;;  %v5905_v43 = vadd.f32 %v5904_v51, %v13056_v41 }
 0x682   : > { %v8088_v63 = vmax.f32 %v8087_v9, %v5903_v27  ;;  %v5229_v49 = vpop.f32.mrf.mxu1  ;;  %5468 = vmatmul.mubr.bf16.gmra.mxu1 %v13377_v22  ;;  %v5906_v25 = vpop.f32.mrf.mxu0  ;;  %v4242_v18 = vadd.f32 %v13277_v36, %v12170_v60  ;;  %6375 = vmatprep.subr.bf16.mxu1 %v9366_v59  ;;  %v9367_v46 = vcombine.low %v4592_v34, %v4596_v48  ;;  %v15547_v27 = vld [vmem:[#allocation26_spill] sm:$0xff] }
 0x683   : > { %v8066_v16 = vmax.f32 %v8065_v0, %v5226_v29  ;;  %v8109_v40 = vmax.f32 %v8108_v45, %v5905_v43  ;;  %v5230_v50 = vadd.f32 %v5229_v49, %v13058_v21  ;;  %v5907_v57 = vadd.f32 %v5906_v25, %v13051_v19  ;;  %5477 = vmatprep.mubr.bf16.mxu1 %v15192_v44 }
 0x684   : > { %v5231_v3 = vpop.f32.mrf.mxu1  ;;  %v5908_v56 = vpop.f32.mrf.mxu0  ;;  %v9368_v9 = vcombine.high %v4592_v34, %v4596_v48  ;;  %6376 = vmatpush1.bf16.msra.mxu1 %v9365_v32  ;;  %v4239_v0 = vadd.f32 %v13277_v36, %v12074_v53  ;;  %v4486_v29 = vmax.f32 %v4242_v18, 0.0 }
 0x685   : > { %v8046_v24 = vmax.f32 %v8045_v37, %v5230_v50  ;;  %v8089_v23 = vmax.f32 %v8088_v63, %v5907_v57  ;;  %v5232_v35 = vadd.f32 %v5231_v3, %v13070_v30  ;;  %v5909_v61 = vadd.f32 %v5908_v56, %v13056_v41 }
 0x686   : > { %v5233_v6 = vpop.f32.mrf.mxu1  ;;  %v5912_v45 = vpop.f32.mrf.mxu0  ;;  %6151 = vmatmul.mubr.bf16.gmra.mxu0 %v15547_v27  ;;  %7048 = vmatprep.subr.bf16.mxu0 %v9368_v9  ;;  %v4485_v49 = vmax.f32 %v4239_v0, 0.0 }
 0x687   : > { %v8067_v60 = vmax.f32 %v8066_v16, %v5232_v35  ;;  %v8110_v39 = vmax.f32 %v8109_v40, %v5909_v61  ;;  %v5234_v51 = vadd.f32 %v5233_v6, %v13058_v21  ;;  %v5913_v37 = vadd.f32 %v5912_v45, %v13051_v19  ;;  %6160 = vmatprep.mubr.bf16.mxu0 %v15192_v44 }
 0x688   : > { %v5235_v43 = vpop.f32.mrf.mxu1  ;;  %v5914_v7 = vpop.f32.mrf.mxu0  ;;  %7049 = vmatpush1.bf16.msra.mxu0 %v9367_v46  ;;  %v13451_v50 = vpack.c.bf16 %v4486_v29, %v4485_v49  ;;  %v4258_v49 = vadd.f32 %v13277_v36, %v12248_v14 }
 0x689   : > { %v8047_v31 = vmax.f32 %v8046_v24, %v5234_v51  ;;  %v8090_v34 = vmax.f32 %v8089_v23, %v5913_v37  ;;  %v5236_v53 = vadd.f32 %v5235_v43, %v13070_v30  ;;  %v5915_v63 = vadd.f32 %v5914_v7, %v13056_v41 }
 0x68a   : > { %v5239_v25 = vpop.f32.mrf.mxu1  ;;  %5478 = vmatmul.mubr.bf16.gmra.mxu1 %v15547_v27  ;;  %v5916_v32 = vpop.f32.mrf.mxu0  ;;  %15548 = vst [vmem:[#allocation134_spill] sm:$0xff] %v13451_v50 }
 0x68b   : > { %v8068_v59 = vmax.f32 %v8067_v60, %v5236_v53  ;;  %v8111_v48 = vmax.f32 %v8110_v39, %v5915_v63  ;;  %v5240_v16 = vadd.f32 %v5239_v25, %v13058_v21  ;;  %v5917_v40 = vadd.f32 %v5916_v32, %v13051_v19  ;;  %5487 = vmatprep.mubr.bf16.mxu1 %v15192_v44 }
 0x68c   : > { %v5241_v57 = vpop.f32.mrf.mxu1  ;;  %v5918_v18 = vpop.f32.mrf.mxu0 }
 0x68d   : > { %v8048_v3 = vmax.f32 %v8047_v31, %v5240_v16  ;;  %v8091_v56 = vmax.f32 %v8090_v34, %v5917_v40  ;;  %v5242_v46 = vadd.f32 %v5241_v57, %v13070_v30  ;;  %v5919_v9 = vadd.f32 %v5918_v18, %v13056_v41 }
 0x68e   : > { %v5243_v24 = vpop.f32.mrf.mxu1  ;;  %v5922_v23 = vpop.f32.mrf.mxu0  ;;  %6161 = vmatmul.mubr.bf16.gmra.mxu0 %v13451_v50  ;;  %v4255_v57 = vadd.f32 %v13277_v36, %v12175_v38 }
 0x68f   : > { %v8069_v35 = vmax.f32 %v8068_v59, %v5242_v46  ;;  %v8112_v61 = vmax.f32 %v8111_v48, %v5919_v9  ;;  %v5244_v0 = vadd.f32 %v5243_v24, %v13058_v21  ;;  %v5923_v6 = vadd.f32 %v5922_v23, %v13051_v19  ;;  %6170 = vmatprep.mubr.bf16.mxu0 %v15192_v44 }
 0x690   : > { %v5245_v45 = vpop.f32.mrf.mxu1  ;;  %v5924_v60 = vpop.f32.mrf.mxu0  ;;  %v4490_v23 = vmax.f32 %v4258_v49, 0.0 }
 0x691   : > { %v8049_v39 = vmax.f32 %v8048_v3, %v5244_v0  ;;  %v8092_v51 = vmax.f32 %v8091_v56, %v5923_v6  ;;  %v5246_v37 = vadd.f32 %v5245_v45, %v13070_v30  ;;  %v5925_v29 = vadd.f32 %v5924_v60, %v13056_v41  ;;  %v15549_v56 = vld [vmem:[#allocation19_spill] sm:$0xff] }
 0x692   : > { %v5249_v43 = vpop.f32.mrf.mxu1  ;;  %5488 = vmatmul.mubr.bf16.gmra.mxu1 %v13451_v50  ;;  %v5926_v7 = vpop.f32.mrf.mxu0  ;;  %v4489_v60 = vmax.f32 %v4255_v57, 0.0 }
 0x693   : > { %v8070_v31 = vmax.f32 %v8069_v35, %v5246_v37  ;;  %v8113_v34 = vmax.f32 %v8112_v61, %v5925_v29  ;;  %v5250_v53 = vadd.f32 %v5249_v43, %v13058_v21  ;;  %v5927_v63 = vadd.f32 %v5926_v7, %v13051_v19  ;;  %5497 = vmatprep.mubr.bf16.mxu1 %v15192_v44 }
 0x694   : > { %v5251_v25 = vpop.f32.mrf.mxu1  ;;  %v5928_v32 = vpop.f32.mrf.mxu0 }
 0x695   : > { %v8050_v59 = vmax.f32 %v8049_v39, %v5250_v53  ;;  %v8093_v48 = vmax.f32 %v8092_v51, %v5927_v63  ;;  %v5252_v16 = vadd.f32 %v5251_v25, %v13070_v30  ;;  %v5929_v40 = vadd.f32 %v5928_v32, %v13056_v41 }
 0x696   : > { %v5253_v18 = vpop.f32.mrf.mxu1  ;;  %v5932_v3 = vpop.f32.mrf.mxu0  ;;  %6171 = vmatmul.mubr.bf16.gmra.mxu0 %v15549_v56 }
 0x697   : > { %v8071_v46 = vmax.f32 %v8070_v31, %v5252_v16  ;;  %v8114_v9 = vmax.f32 %v8113_v34, %v5929_v40  ;;  %v5254_v24 = vadd.f32 %v5253_v18, %v13058_v21  ;;  %v5933_v14 = vadd.f32 %v5932_v3, %v13051_v19  ;;  %6180 = vmatprep.mubr.bf16.mxu0 %v15192_v44 }
 0x698   : > { %v5255_v35 = vpop.f32.mrf.mxu1  ;;  %v5934_v61 = vpop.f32.mrf.mxu0  ;;  %v13481_v31 = vpack.c.bf16 %v4490_v23, %v4489_v60  ;;  %v4274_v60 = vadd.f32 %v13277_v36, %v12391_v1 }
 0x699   : > { %v8051_v0 = vmax.f32 %v8050_v59, %v5254_v24  ;;  %v8094_v6 = vmax.f32 %v8093_v48, %v5933_v14  ;;  %v5256_v45 = vadd.f32 %v5255_v35, %v13070_v30  ;;  %v5935_v38 = vadd.f32 %v5934_v61, %v13056_v41 }
 0x69a   : > { %v5259_v39 = vpop.f32.mrf.mxu1  ;;  %5498 = vmatmul.mubr.bf16.gmra.mxu1 %v15549_v56  ;;  %v5936_v51 = vpop.f32.mrf.mxu0  ;;  %15550 = vst [vmem:[#allocation121_spill] sm:$0xff] %v13481_v31 }
 0x69b   : > { %v8072_v37 = vmax.f32 %v8071_v46, %v5256_v45  ;;  %v8115_v29 = vmax.f32 %v8114_v9, %v5935_v38  ;;  %v5260_v43 = vadd.f32 %v5259_v39, %v13058_v21  ;;  %v5937_v7 = vadd.f32 %v5936_v51, %v13051_v19  ;;  %5507 = vmatprep.mubr.bf16.mxu1 %v15192_v44 }
 0x69c   : > { %v5261_v34 = vpop.f32.mrf.mxu1  ;;  %v5938_v53 = vpop.f32.mrf.mxu0 }
 0x69d   : > { %v8052_v63 = vmax.f32 %v8051_v0, %v5260_v43  ;;  %v8095_v49 = vmax.f32 %v8094_v6, %v5937_v7  ;;  %v5262_v25 = vadd.f32 %v5261_v34, %v13070_v30  ;;  %v5939_v32 = vadd.f32 %v5938_v53, %v13056_v41 }
 0x69e   : > { %v5263_v59 = vpop.f32.mrf.mxu1  ;;  %v5942_v48 = vpop.f32.mrf.mxu0  ;;  %6181 = vmatmul.mubr.bf16.gmra.mxu0 %v13481_v31  ;;  %v4271_v34 = vadd.f32 %v13277_v36, %v12254_v47 }
 0x69f   : > { %v8073_v16 = vmax.f32 %v8072_v37, %v5262_v25  ;;  %v8116_v40 = vmax.f32 %v8115_v29, %v5939_v32  ;;  %v5264_v57 = vadd.f32 %v5263_v59, %v13058_v21  ;;  %v5943_v18 = vadd.f32 %v5942_v48, %v13051_v19  ;;  %6190 = vmatprep.mubr.bf16.mxu0 %v15192_v44 }
 0x6a0   : > { %v5265_v3 = vpop.f32.mrf.mxu1  ;;  %v5944_v46 = vpop.f32.mrf.mxu0  ;;  %v4494_v48 = vmax.f32 %v4274_v60, 0.0 }
 0x6a1   : > { %v8053_v9 = vmax.f32 %v8052_v63, %v5264_v57  ;;  %v8096_v24 = vmax.f32 %v8095_v49, %v5943_v18  ;;  %v5266_v14 = vadd.f32 %v5265_v3, %v13070_v30  ;;  %v5945_v23 = vadd.f32 %v5944_v46, %v13056_v41  ;;  %v15551_v49 = vld [vmem:[#allocation20_spill] sm:$0xff] }
 0x6a2   : > { %v5269_v35 = vpop.f32.mrf.mxu1  ;;  %5508 = vmatmul.mubr.bf16.gmra.mxu1 %v13481_v31  ;;  %v5946_v61 = vpop.f32.mrf.mxu0  ;;  %v4493_v46 = vmax.f32 %v4271_v34, 0.0 }
 0x6a3   : > { %v8074_v0 = vmax.f32 %v8073_v16, %v5266_v14  ;;  %v8117_v6 = vmax.f32 %v8116_v40, %v5945_v23  ;;  %v5270_v45 = vadd.f32 %v5269_v35, %v13058_v21  ;;  %v5947_v38 = vadd.f32 %v5946_v61, %v13051_v19  ;;  %5517 = vmatprep.mubr.bf16.mxu1 %v15192_v44 }
 0x6a4   : > { %v5271_v39 = vpop.f32.mrf.mxu1  ;;  %v5948_v51 = vpop.f32.mrf.mxu0 }
 0x6a5   : > { %v8054_v37 = vmax.f32 %v8053_v9, %v5270_v45  ;;  %v8097_v29 = vmax.f32 %v8096_v24, %v5947_v38  ;;  %v5272_v43 = vadd.f32 %v5271_v39, %v13070_v30  ;;  %v5949_v7 = vadd.f32 %v5948_v51, %v13056_v41 }
 0x6a6   : > { %v5273_v53 = vpop.f32.mrf.mxu1  ;;  %v5952_v63 = vpop.f32.mrf.mxu0  ;;  %6191 = vmatmul.mubr.bf16.gmra.mxu0 %v15551_v49 }
 0x6a7   : > { %v8075_v25 = vmax.f32 %v8074_v0, %v5272_v43  ;;  %v8118_v32 = vmax.f32 %v8117_v6, %v5949_v7  ;;  %v5274_v59 = vadd.f32 %v5273_v53, %v13058_v21  ;;  %v5953_v1 = vadd.f32 %v5952_v63, %v13051_v19  ;;  %6200 = vmatprep.mubr.bf16.mxu0 %v15192_v44  ;;  %v15553_v6 = vld [vmem:[#allocation25_spill] sm:$0xff]  ;;  %v15554_v43 = vld [vmem:[#allocation22_spill] sm:$0xff] }
 0x6a8   : > { %v5275_v16 = vpop.f32.mrf.mxu1  ;;  %v5954_v40 = vpop.f32.mrf.mxu0  ;;  %v13511_v0 = vpack.c.bf16 %v4494_v48, %v4493_v46  ;;  %v4290_v45 = vadd.f32 %v13277_v36, %v15553_v6  ;;  %v4287_v7 = vadd.f32 %v13277_v36, %v15554_v43 }
 0x6a9   : > { %v8055_v57 = vmax.f32 %v8054_v37, %v5274_v59  ;;  %v8098_v18 = vmax.f32 %v8097_v29, %v5953_v1  ;;  %v5276_v3 = vadd.f32 %v5275_v16, %v13070_v30  ;;  %v5955_v47 = vadd.f32 %v5954_v40, %v13056_v41 }
 0x6aa   : > { %v5279_v9 = vpop.f32.mrf.mxu1  ;;  %5518 = vmatmul.mubr.bf16.gmra.mxu1 %v15551_v49  ;;  %v5956_v24 = vpop.f32.mrf.mxu0  ;;  %15552 = vst [vmem:[#allocation10_spill] sm:$0xff] %v13511_v0  ;;  %v4498_v1 = vmax.f32 %v4290_v45, 0.0  ;;  %v4497_v36 = vmax.f32 %v4287_v7, 0.0  ;;  %v15599_v49 = vld [vmem:[#allocation90_spill] sm:$0xff] }
 0x6ab   : > { %v8076_v14 = vmax.f32 %v8075_v25, %v5276_v3  ;;  %v8119_v23 = vmax.f32 %v8118_v32, %v5955_v47  ;;  %v5280_v35 = vadd.f32 %v5279_v9, %v13058_v21  ;;  %v5957_v61 = vadd.f32 %v5956_v24, %v13051_v19  ;;  %5527 = vmatprep.mubr.bf16.mxu1 %v15192_v44 }
 0x6ac   : > { %v5281_v38 = vpop.f32.mrf.mxu1  ;;  %v5958_v60 = vpop.f32.mrf.mxu0 }
 0x6ad   : > { %v8056_v39 = vmax.f32 %v8055_v57, %v5280_v35  ;;  %v8099_v51 = vmax.f32 %v8098_v18, %v5957_v61  ;;  %v5282_v37 = vadd.f32 %v5281_v38, %v13070_v30  ;;  %v5959_v29 = vadd.f32 %v5958_v60, %v13056_v41 }
 0x6ae   : > { %v5283_v34 = vpop.f32.mrf.mxu1  ;;  %v5962_v53 = vpop.f32.mrf.mxu0  ;;  %6201 = vmatmul.mubr.bf16.gmra.mxu0 %v13511_v0  ;;  %v13525_v35 = vpack.c.bf16 %v4498_v1, %v4497_v36 }
 0x6af   : > { %v8100_v63 = vrot.slane %v8099_v51, 4  ;;  %v8077_v25 = vmax.f32 %v8076_v14, %v5282_v37  ;;  %v8120_v32 = vmax.f32 %v8119_v23, %v5959_v29  ;;  %v5284_v59 = vadd.f32 %v5283_v34, %v13058_v21  ;;  %6210 = vmatprep.mubr.bf16.mxu0 %v15192_v44 }
 0x6b0   : > { %v5285_v48 = vpop.f32.mrf.mxu1  ;;  %v5964_v16 = vpop.f32.mrf.mxu0  ;;  %15555 = vst [vmem:[#allocation130_spill] sm:$0xff] %v13525_v35  ;;  %v5963_v61 = vadd.f32 %v5962_v53, %v13051_v19 }
 0x6b1   : > { %v8101_v40 = vmax.f32 %v8099_v51, %v8100_v63  ;;  %v8121_v57 = vrot.slane %v8120_v32, 4  ;;  %v8057_v18 = vmax.f32 %v8056_v39, %v5284_v59  ;;  %v5286_v3 = vadd.f32 %v5285_v48, %v13070_v30 }
 0x6b2   : > { %v5289_v47 = vpop.f32.mrf.mxu1  ;;  %5528 = vmatmul.mubr.bf16.gmra.mxu1 %v13511_v0  ;;  %v5966_v46 = vpop.f32.mrf.mxu0  ;;  %v5965_v29 = vadd.f32 %v5964_v16, %v13056_v41 }
 0x6b3   : > { %v8102_v9 = vrot.slane %v8101_v40, 2  ;;  %v8122_v24 = vmax.f32 %v8120_v32, %v8121_v57  ;;  %v8058_v14 = vrot.slane %v8057_v18, 4  ;;  %v8078_v23 = vmax.f32 %v8077_v25, %v5286_v3  ;;  %5537 = vmatprep.mubr.bf16.mxu1 %v15192_v44  ;;  %v15556_v32 = vld [vmem:[#allocation88_spill] sm:$0xff] }
 0x6b4   : > { %v5967_v6 = vadd.f32 %v5966_v46, %v13051_v19  ;;  %v5291_v45 = vpop.f32.mrf.mxu1  ;;  %v5968_v38 = vpop.f32.mrf.mxu0  ;;  %v5290_v43 = vadd.f32 %v5289_v47, %v13058_v21 }
 0x6b5   : > { %v8103_v60 = vmax.f32 %v8101_v40, %v8102_v9  ;;  %v8123_v39 = vrot.slane %v8122_v24, 2  ;;  %v8059_v51 = vmax.f32 %v8057_v18, %v8058_v14  ;;  %v8079_v37 = vrot.slane %v8078_v23, 4 }
 0x6b6   : > { %v8253_v7 = vmax.f32 %v5963_v61, %v5967_v6  ;;  %v5969_v34 = vadd.f32 %v5968_v38, %v13056_v41  ;;  %v5293_v63 = vpop.f32.mrf.mxu1  ;;  %v5972_v25 = vpop.f32.mrf.mxu0  ;;  %6211 = vmatmul.mubr.bf16.gmra.mxu0 %v15556_v32  ;;  %v5292_v40 = vadd.f32 %v5291_v45, %v13070_v30 }
 0x6b7   : > { %v8104_v53 = vrot.slane %v8103_v60, 1  ;;  %v8124_v59 = vmax.f32 %v8122_v24, %v8123_v39  ;;  %v8060_v1 = vrot.slane %v8059_v51, 2  ;;  %v8080_v48 = vmax.f32 %v8078_v23, %v8079_v37  ;;  %6220 = vmatprep.mubr.bf16.mxu0 %v15192_v44 }
 0x6b8   : > { %v8274_v57 = vmax.f32 %v5965_v29, %v5969_v34  ;;  %v5294_v16 = vadd.f32 %v5293_v63, %v13058_v21  ;;  %v5973_v18 = vadd.f32 %v5972_v25, %v13051_v19  ;;  %v5295_v3 = vpop.f32.mrf.mxu1  ;;  %v5974_v36 = vpop.f32.mrf.mxu0 }
 0x6b9   : > { %v8105_v47 = vmax.f32 %v8103_v60, %v8104_v53  ;;  %v8125_v46 = vrot.slane %v8124_v59, 1  ;;  %v8061_v9 = vmax.f32 %v8059_v51, %v8060_v1  ;;  %v8081_v14 = vrot.slane %v8080_v48, 2 }
 0x6ba   : > { %v8211_v61 = vmax.f32 %v5290_v43, %v5294_v16  ;;  %v8254_v6 = vmax.f32 %v8253_v7, %v5973_v18  ;;  %v5296_v24 = vadd.f32 %v5295_v3, %v13070_v30  ;;  %v5975_v23 = vadd.f32 %v5974_v36, %v13056_v41  ;;  %v5299_v38 = vpop.f32.mrf.mxu1  ;;  %5538 = vmatmul.mubr.bf16.gmra.mxu1 %v15556_v32  ;;  %v5976_v45 = vpop.f32.mrf.mxu0 }
 0x6bb   : > { %v13542_v39 = vsel %vm9125_vm2, %v8105_v47, %v13396_v62  ;;  %v8126_v37 = vmax.f32 %v8124_v59, %v8125_v46  ;;  %v8062_v29 = vrot.slane %v8061_v9, 1  ;;  %v8082_v60 = vmax.f32 %v8080_v48, %v8081_v14  ;;  %5547 = vmatprep.mubr.bf16.mxu1 %v15192_v44 }
 0x6bc   : > { %v8232_v51 = vmax.f32 %v5292_v40, %v5296_v24  ;;  %v8275_v43 = vmax.f32 %v8274_v57, %v5975_v23  ;;  %v5300_v7 = vadd.f32 %v5299_v38, %v13058_v21  ;;  %v5977_v34 = vadd.f32 %v5976_v45, %v13051_v19  ;;  %v5301_v63 = vpop.f32.mrf.mxu1  ;;  %v5978_v25 = vpop.f32.mrf.mxu0 }
 0x6bd   : > { %v13549_v53 = vsel %vm9125_vm2, %v8126_v37, %v13402_v12  ;;  %v8063_v1 = vmax.f32 %v8061_v9, %v8062_v29  ;;  %v8083_v62 = vrot.slane %v8082_v60, 1  ;;  %v5302_v59 = vadd.f32 %v5301_v63, %v13070_v30 }
 0x6be   : > { %v8212_v16 = vmax.f32 %v8211_v61, %v5300_v7  ;;  %v8255_v48 = vmax.f32 %v8254_v6, %v5977_v34  ;;  %v5979_v18 = vadd.f32 %v5978_v25, %v13056_v41  ;;  %v5303_v40 = vpop.f32.mrf.mxu1  ;;  %v5982_v57 = vpop.f32.mrf.mxu0  ;;  %6221 = vmatmul.mubr.bf16.gmra.mxu0 %v13525_v35  ;;  %v15557_v7 = vld [vmem:[#allocation53_spill] sm:$0xff] }
 0x6bf   : > { %v13556_v3 = vsel %vm9125_vm2, %v8063_v1, %v13409_v8  ;;  %v8084_v36 = vmax.f32 %v8082_v60, %v8083_v62  ;;  %v8233_v47 = vmax.f32 %v8232_v51, %v5302_v59  ;;  %v5304_v12 = vadd.f32 %v5303_v40, %v13058_v21  ;;  %6230 = vmatprep.mubr.bf16.mxu0 %v15192_v44 }
 0x6c0   : > { %v8276_v46 = vmax.f32 %v8275_v43, %v5979_v18  ;;  %v5983_v9 = vadd.f32 %v5982_v57, %v13051_v19  ;;  %v5305_v14 = vpop.f32.mrf.mxu1  ;;  %v5984_v61 = vpop.f32.mrf.mxu0 }
 0x6c1   : > { %v13563_v6 = vsel %vm9125_vm2, %v8084_v36, %v13415_v17  ;;  %v8213_v24 = vmax.f32 %v8212_v16, %v5304_v12  ;;  %v5306_v23 = vadd.f32 %v5305_v14, %v13070_v30  ;;  %v5985_v8 = vadd.f32 %v5984_v61, %v13056_v41  ;;  %v13574_v17 = vld [vmem:[%s15048_s4] ss:$0 sm:$0xff]  ;;  %v15559_v36 = vld [vmem:[#allocation23_spill] sm:$0xff] }
 0x6c2   : > { %v8256_v38 = vmax.f32 %v8255_v48, %v5983_v9  ;;  %v5309_v45 = vpop.f32.mrf.mxu1  ;;  %5548 = vmatmul.mubr.bf16.gmra.mxu1 %v13525_v35  ;;  %v5986_v37 = vpop.f32.mrf.mxu0  ;;  %v4306_v34 = vadd.f32 %v13574_v17, %v15557_v7  ;;  %v15558_v48 = vld [vmem:[#allocation27_spill] sm:$0xff] }
 0x6c3   : > { %v8234_v29 = vmax.f32 %v8233_v47, %v5306_v23  ;;  %v8277_v60 = vmax.f32 %v8276_v46, %v5985_v8  ;;  %v5310_v51 = vadd.f32 %v5309_v45, %v13058_v21  ;;  %v5987_v43 = vadd.f32 %v5986_v37, %v13051_v19  ;;  %5557 = vmatprep.mubr.bf16.mxu1 %v15192_v44 }
 0x6c4   : > { %v5311_v63 = vpop.f32.mrf.mxu1  ;;  %v5988_v25 = vpop.f32.mrf.mxu0  ;;  %v4303_v18 = vadd.f32 %v13574_v17, %v15558_v48  ;;  %v4502_v14 = vmax.f32 %v4306_v34, 0.0 }
 0x6c5   : > { %v8214_v1 = vmax.f32 %v8213_v24, %v5310_v51  ;;  %v8257_v62 = vmax.f32 %v8256_v38, %v5987_v43  ;;  %v5312_v59 = vadd.f32 %v5311_v63, %v13070_v30  ;;  %v5989_v16 = vadd.f32 %v5988_v25, %v13056_v41 }
 0x6c6   : > { %v5313_v40 = vpop.f32.mrf.mxu1  ;;  %v5992_v57 = vpop.f32.mrf.mxu0  ;;  %6231 = vmatmul.mubr.bf16.gmra.mxu0 %v15559_v36  ;;  %v4501_v37 = vmax.f32 %v4303_v18, 0.0 }
 0x6c7   : > { %v8235_v47 = vmax.f32 %v8234_v29, %v5312_v59  ;;  %v8278_v12 = vmax.f32 %v8277_v60, %v5989_v16  ;;  %v5314_v46 = vadd.f32 %v5313_v40, %v13058_v21  ;;  %v5993_v9 = vadd.f32 %v5992_v57, %v13051_v19  ;;  %6240 = vmatprep.mubr.bf16.mxu0 %v15192_v44 }
 0x6c8   : > { %v5315_v61 = vpop.f32.mrf.mxu1  ;;  %v5994_v24 = vpop.f32.mrf.mxu0  ;;  %v13592_v34 = vpack.c.bf16 %v4502_v14, %v4501_v37 }
 0x6c9   : > { %v8215_v23 = vmax.f32 %v8214_v1, %v5314_v46  ;;  %v8258_v8 = vmax.f32 %v8257_v62, %v5993_v9  ;;  %v5316_v38 = vadd.f32 %v5315_v61, %v13070_v30  ;;  %v5995_v45 = vadd.f32 %v5994_v24, %v13056_v41 }
 0x6ca   : > { %v5319_v51 = vpop.f32.mrf.mxu1  ;;  %5558 = vmatmul.mubr.bf16.gmra.mxu1 %v15559_v36  ;;  %v5996_v29 = vpop.f32.mrf.mxu0  ;;  %15560 = vst [vmem:[#allocation119_spill] sm:$0xff] %v13592_v34 }
 0x6cb   : > { %v8236_v60 = vmax.f32 %v8235_v47, %v5316_v38  ;;  %v8279_v43 = vmax.f32 %v8278_v12, %v5995_v45  ;;  %v5320_v7 = vadd.f32 %v5319_v51, %v13058_v21  ;;  %v5997_v63 = vadd.f32 %v5996_v29, %v13051_v19  ;;  %5567 = vmatprep.mubr.bf16.mxu1 %v15192_v44 }
 0x6cc   : > { %v5321_v25 = vpop.f32.mrf.mxu1  ;;  %v5998_v1 = vpop.f32.mrf.mxu0 }
 0x6cd   : > { %v8216_v62 = vmax.f32 %v8215_v23, %v5320_v7  ;;  %v8259_v59 = vmax.f32 %v8258_v8, %v5997_v63  ;;  %v5322_v16 = vadd.f32 %v5321_v25, %v13070_v30  ;;  %v5999_v48 = vadd.f32 %v5998_v1, %v13056_v41 }
 0x6ce   : > { %v5323_v18 = vpop.f32.mrf.mxu1  ;;  %v6002_v40 = vpop.f32.mrf.mxu0  ;;  %6241 = vmatmul.mubr.bf16.gmra.mxu0 %v13592_v34 }
 0x6cf   : > { %v8237_v57 = vmax.f32 %v8236_v60, %v5322_v16  ;;  %v8280_v47 = vmax.f32 %v8279_v43, %v5999_v48  ;;  %v5324_v12 = vadd.f32 %v5323_v18, %v13058_v21  ;;  %v6003_v46 = vadd.f32 %v6002_v40, %v13051_v19  ;;  %6250 = vmatprep.mubr.bf16.mxu0 %v15192_v44  ;;  %v15561_v43 = vld [vmem:[#allocation51_spill] sm:$0xff]  ;;  %v15562_v48 = vld [vmem:[#allocation56_spill] sm:$0xff] }
 0x6d0   : > { %v5325_v9 = vpop.f32.mrf.mxu1  ;;  %v6004_v14 = vpop.f32.mrf.mxu0  ;;  %v4322_v7 = vadd.f32 %v13574_v17, %v15561_v43  ;;  %v4319_v18 = vadd.f32 %v13574_v17, %v15562_v48 }
 0x6d1   : > { %v8217_v61 = vmax.f32 %v8216_v62, %v5324_v12  ;;  %v8260_v24 = vmax.f32 %v8259_v59, %v6003_v46  ;;  %v5326_v23 = vadd.f32 %v5325_v9, %v13070_v30  ;;  %v6005_v8 = vadd.f32 %v6004_v14, %v13056_v41 }
 0x6d2   : > { %v5329_v38 = vpop.f32.mrf.mxu1  ;;  %5568 = vmatmul.mubr.bf16.gmra.mxu1 %v13592_v34  ;;  %v6006_v45 = vpop.f32.mrf.mxu0 }
 0x6d3   : > { %v8238_v37 = vmax.f32 %v8237_v57, %v5326_v23  ;;  %v8281_v51 = vmax.f32 %v8280_v47, %v6005_v8  ;;  %v5330_v29 = vadd.f32 %v5329_v38, %v13058_v21  ;;  %v6007_v60 = vadd.f32 %v6006_v45, %v13051_v19  ;;  %5577 = vmatprep.mubr.bf16.mxu1 %v15192_v44  ;;  %v15563_v47 = vld [vmem:[#allocation31_spill] sm:$0xff] }
 0x6d4   : > { %v5331_v63 = vpop.f32.mrf.mxu1  ;;  %v6008_v25 = vpop.f32.mrf.mxu0 }
 0x6d5   : > { %v8218_v1 = vmax.f32 %v8217_v61, %v5330_v29  ;;  %v8261_v62 = vmax.f32 %v8260_v24, %v6007_v60  ;;  %v5332_v59 = vadd.f32 %v5331_v63, %v13070_v30  ;;  %v6009_v16 = vadd.f32 %v6008_v25, %v13056_v41 }
 0x6d6   : > { %v5333_v40 = vpop.f32.mrf.mxu1  ;;  %v6012_v57 = vpop.f32.mrf.mxu0  ;;  %6251 = vmatmul.mubr.bf16.gmra.mxu0 %v15563_v47  ;;  %v4506_v61 = vmax.f32 %v4322_v7, 0.0  ;;  %v4505_v60 = vmax.f32 %v4319_v18, 0.0 }
 0x6d7   : > { %v8239_v12 = vmax.f32 %v8238_v37, %v5332_v59  ;;  %v8282_v46 = vmax.f32 %v8281_v51, %v6009_v16  ;;  %v5334_v9 = vadd.f32 %v5333_v40, %v13058_v21  ;;  %v6013_v14 = vadd.f32 %v6012_v57, %v13051_v19  ;;  %6260 = vmatprep.mubr.bf16.mxu0 %v15192_v44 }
 0x6d8   : > { %v5335_v24 = vpop.f32.mrf.mxu1  ;;  %v6014_v23 = vpop.f32.mrf.mxu0  ;;  %v13622_v7 = vpack.c.bf16 %v4506_v61, %v4505_v60 }
 0x6d9   : > { %v8219_v8 = vmax.f32 %v8218_v1, %v5334_v9  ;;  %v8262_v38 = vmax.f32 %v8261_v62, %v6013_v14  ;;  %v5336_v45 = vadd.f32 %v5335_v24, %v13070_v30  ;;  %v6015_v29 = vadd.f32 %v6014_v23, %v13056_v41 }
 0x6da   : > { %v5339_v43 = vpop.f32.mrf.mxu1  ;;  %5578 = vmatmul.mubr.bf16.gmra.mxu1 %v15563_v47  ;;  %v6016_v37 = vpop.f32.mrf.mxu0  ;;  %15564 = vst [vmem:[#allocation128_spill] sm:$0xff] %v13622_v7 }
 0x6db   : > { %v8240_v51 = vmax.f32 %v8239_v12, %v5336_v45  ;;  %v8283_v63 = vmax.f32 %v8282_v46, %v6015_v29  ;;  %v5340_v25 = vadd.f32 %v5339_v43, %v13058_v21  ;;  %v6017_v59 = vadd.f32 %v6016_v37, %v13051_v19  ;;  %5587 = vmatprep.mubr.bf16.mxu1 %v15192_v44 }
 0x6dc   : > { %v5341_v1 = vpop.f32.mrf.mxu1  ;;  %v6018_v62 = vpop.f32.mrf.mxu0 }
 0x6dd   : > { %v8220_v16 = vmax.f32 %v8219_v8, %v5340_v25  ;;  %v8263_v48 = vmax.f32 %v8262_v38, %v6017_v59  ;;  %v5342_v18 = vadd.f32 %v5341_v1, %v13070_v30  ;;  %v6019_v40 = vadd.f32 %v6018_v62, %v13056_v41  ;;  %v15565_v59 = vld [vmem:[#allocation49_spill] sm:$0xff] }
 0x6de   : > { %v5343_v57 = vpop.f32.mrf.mxu1  ;;  %v6022_v9 = vpop.f32.mrf.mxu0  ;;  %6261 = vmatmul.mubr.bf16.gmra.mxu0 %v13622_v7  ;;  %v4338_v1 = vadd.f32 %v13574_v17, %v15565_v59 }
 0x6df   : > { %v8241_v12 = vmax.f32 %v8240_v51, %v5342_v18  ;;  %v8284_v46 = vmax.f32 %v8283_v63, %v6019_v40  ;;  %v5344_v14 = vadd.f32 %v5343_v57, %v13058_v21  ;;  %v6023_v24 = vadd.f32 %v6022_v9, %v13051_v19  ;;  %6270 = vmatprep.mubr.bf16.mxu0 %v15192_v44  ;;  %v15566_v9 = vld [vmem:[#allocation36_spill] sm:$0xff] }
 0x6e0   : > { %v5345_v61 = vpop.f32.mrf.mxu1  ;;  %v6024_v23 = vpop.f32.mrf.mxu0 }
 0x6e1   : > { %v8221_v8 = vmax.f32 %v8220_v16, %v5344_v14  ;;  %v8264_v38 = vmax.f32 %v8263_v48, %v6023_v24  ;;  %v5346_v45 = vadd.f32 %v5345_v61, %v13070_v30  ;;  %v6025_v29 = vadd.f32 %v6024_v23, %v13056_v41  ;;  %v15567_v24 = vld [vmem:[#allocation38_spill] sm:$0xff] }
 0x6e2   : > { %v5349_v60 = vpop.f32.mrf.mxu1  ;;  %5588 = vmatmul.mubr.bf16.gmra.mxu1 %v13622_v7  ;;  %v6026_v43 = vpop.f32.mrf.mxu0 }
 0x6e3   : > { %v8242_v37 = vmax.f32 %v8241_v12, %v5346_v45  ;;  %v8285_v51 = vmax.f32 %v8284_v46, %v6025_v29  ;;  %v5350_v63 = vadd.f32 %v5349_v60, %v13058_v21  ;;  %v6027_v25 = vadd.f32 %v6026_v43, %v13051_v19  ;;  %5597 = vmatprep.mubr.bf16.mxu1 %v15192_v44 }
 0x6e4   : > { %v5351_v62 = vpop.f32.mrf.mxu1  ;;  %v6028_v16 = vpop.f32.mrf.mxu0  ;;  %v4335_v12 = vadd.f32 %v13574_v17, %v15566_v9 }
 0x6e5   : > { %v8222_v48 = vmax.f32 %v8221_v8, %v5350_v63  ;;  %v8265_v18 = vmax.f32 %v8264_v38, %v6027_v25  ;;  %v5352_v40 = vadd.f32 %v5351_v62, %v13070_v30  ;;  %v6029_v57 = vadd.f32 %v6028_v16, %v13056_v41 }
 0x6e6   : > { %v5353_v46 = vpop.f32.mrf.mxu1  ;;  %v6032_v14 = vpop.f32.mrf.mxu0  ;;  %6271 = vmatmul.mubr.bf16.gmra.mxu0 %v15567_v24  ;;  %v4510_v8 = vmax.f32 %v4338_v1, 0.0  ;;  %v4509_v62 = vmax.f32 %v4335_v12, 0.0 }
 0x6e7   : > { %v8243_v61 = vmax.f32 %v8242_v37, %v5352_v40  ;;  %v8286_v23 = vmax.f32 %v8285_v51, %v6029_v57  ;;  %v5354_v45 = vadd.f32 %v5353_v46, %v13058_v21  ;;  %v6033_v29 = vadd.f32 %v6032_v14, %v13051_v19  ;;  %6280 = vmatprep.mubr.bf16.mxu0 %v15192_v44 }
 0x6e8   : > { %v5355_v38 = vpop.f32.mrf.mxu1  ;;  %v6034_v60 = vpop.f32.mrf.mxu0  ;;  %v13652_v1 = vpack.c.bf16 %v4510_v8, %v4509_v62 }
 0x6e9   : > { %v8223_v43 = vmax.f32 %v8222_v48, %v5354_v45  ;;  %v8266_v63 = vmax.f32 %v8265_v18, %v6033_v29  ;;  %v5356_v25 = vadd.f32 %v5355_v38, %v13070_v30  ;;  %v6035_v59 = vadd.f32 %v6034_v60, %v13056_v41  ;;  %v15569_v48 = vld [vmem:[#allocation81_spill] sm:$0xff] }
 0x6ea   : > { %v5359_v16 = vpop.f32.mrf.mxu1  ;;  %5598 = vmatmul.mubr.bf16.gmra.mxu1 %v15567_v24  ;;  %v6036_v37 = vpop.f32.mrf.mxu0  ;;  %15568 = vst [vmem:[#allocation136_spill] sm:$0xff] %v13652_v1  ;;  %v4354_v18 = vadd.f32 %v13574_v17, %v15569_v48 }
 0x6eb   : > { %v8244_v51 = vmax.f32 %v8243_v61, %v5356_v25  ;;  %v8287_v40 = vmax.f32 %v8286_v23, %v6035_v59  ;;  %v5360_v57 = vadd.f32 %v5359_v16, %v13058_v21  ;;  %v6037_v9 = vadd.f32 %v6036_v37, %v13051_v19  ;;  %5607 = vmatprep.mubr.bf16.mxu1 %v15192_v44  ;;  %v15570_v23 = vld [vmem:[#allocation79_spill] sm:$0xff] }
 0x6ec   : > { %v5361_v46 = vpop.f32.mrf.mxu1  ;;  %v6038_v14 = vpop.f32.mrf.mxu0  ;;  %v4351_v38 = vadd.f32 %v13574_v17, %v15570_v23 }
 0x6ed   : > { %v8224_v12 = vmax.f32 %v8223_v43, %v5360_v57  ;;  %v8267_v45 = vmax.f32 %v8266_v63, %v6037_v9  ;;  %v5362_v29 = vadd.f32 %v5361_v46, %v13070_v30  ;;  %v6039_v61 = vadd.f32 %v6038_v14, %v13056_v41 }
 0x6ee   : > { %v5363_v60 = vpop.f32.mrf.mxu1  ;;  %v6042_v25 = vpop.f32.mrf.mxu0  ;;  %6281 = vmatmul.mubr.bf16.gmra.mxu0 %v13652_v1  ;;  %v4514_v43 = vmax.f32 %v4354_v18, 0.0  ;;  %v4513_v14 = vmax.f32 %v4351_v38, 0.0 }
 0x6ef   : > { %v8268_v8 = vrot.slane %v8267_v45, 4  ;;  %v8245_v59 = vmax.f32 %v8244_v51, %v5362_v29  ;;  %v8288_v62 = vmax.f32 %v8287_v40, %v6039_v61  ;;  %v5364_v16 = vadd.f32 %v5363_v60, %v13058_v21  ;;  %6290 = vmatprep.mubr.bf16.mxu0 %v15192_v44 }
 0x6f0   : > { %v5365_v63 = vpop.f32.mrf.mxu1  ;;  %v6044_v37 = vpop.f32.mrf.mxu0  ;;  %v13666_v61 = vpack.c.bf16 %v4514_v43, %v4513_v14  ;;  %v6043_v18 = vadd.f32 %v6042_v25, %v13051_v19  ;;  %v15572_v14 = vld [vmem:[#allocation61_spill] sm:$0xff] }
 0x6f1   : > { %v8269_v57 = vmax.f32 %v8267_v45, %v8268_v8  ;;  %v8289_v9 = vrot.slane %v8288_v62, 4  ;;  %v8225_v48 = vmax.f32 %v8224_v12, %v5364_v16  ;;  %v5366_v46 = vadd.f32 %v5365_v63, %v13070_v30 }
 0x6f2   : > { %v5369_v23 = vpop.f32.mrf.mxu1  ;;  %5608 = vmatmul.mubr.bf16.gmra.mxu1 %v13652_v1  ;;  %v6046_v24 = vpop.f32.mrf.mxu0  ;;  %15571 = vst [vmem:[#allocation101_spill] sm:$0xff] %v13666_v61  ;;  %v6045_v1 = vadd.f32 %v6044_v37, %v13056_v41 }
 0x6f3   : > { %v8270_v7 = vrot.slane %v8269_v57, 2  ;;  %v8290_v51 = vmax.f32 %v8288_v62, %v8289_v9  ;;  %v8226_v40 = vrot.slane %v8225_v48, 4  ;;  %v8246_v29 = vmax.f32 %v8245_v59, %v5366_v46  ;;  %5617 = vmatprep.mubr.bf16.mxu1 %v15192_v44 }
 0x6f4   : > { %v6047_v12 = vadd.f32 %v6046_v24, %v13051_v19  ;;  %v5371_v45 = vpop.f32.mrf.mxu1  ;;  %v6048_v60 = vpop.f32.mrf.mxu0  ;;  %v5370_v62 = vadd.f32 %v5369_v23, %v13058_v21 }
 0x6f5   : > { %v8271_v38 = vmax.f32 %v8269_v57, %v8270_v7  ;;  %v8291_v8 = vrot.slane %v8290_v51, 2  ;;  %v8227_v16 = vmax.f32 %v8225_v48, %v8226_v40  ;;  %v8247_v63 = vrot.slane %v8246_v29, 4 }
 0x6f6   : > { %v8421_v59 = vmax.f32 %v6043_v18, %v6047_v12  ;;  %v6049_v9 = vadd.f32 %v6048_v60, %v13056_v41  ;;  %v5373_v43 = vpop.f32.mrf.mxu1  ;;  %v6052_v46 = vpop.f32.mrf.mxu0  ;;  %6291 = vmatmul.mubr.bf16.gmra.mxu0 %v15572_v14  ;;  %v5372_v7 = vadd.f32 %v5371_v45, %v13070_v30 }
 0x6f7   : > { %v8272_v25 = vrot.slane %v8271_v38, 1  ;;  %v8292_v47 = vmax.f32 %v8290_v51, %v8291_v8  ;;  %v8228_v24 = vrot.slane %v8227_v16, 2  ;;  %v8248_v34 = vmax.f32 %v8246_v29, %v8247_v63  ;;  %6300 = vmatprep.mubr.bf16.mxu0 %v15192_v44 }
 0x6f8   : > { %v8442_v57 = vmax.f32 %v6045_v1, %v6049_v9  ;;  %v5374_v37 = vadd.f32 %v5373_v43, %v13058_v21  ;;  %v6053_v48 = vadd.f32 %v6052_v46, %v13051_v19  ;;  %v5375_v23 = vpop.f32.mrf.mxu1  ;;  %v6054_v40 = vpop.f32.mrf.mxu0 }
 0x6f9   : > { %v8273_v18 = vmax.f32 %v8271_v38, %v8272_v25  ;;  %v8293_v12 = vrot.slane %v8292_v47, 1  ;;  %v8229_v60 = vmax.f32 %v8227_v16, %v8228_v24  ;;  %v8249_v36 = vrot.slane %v8248_v34, 2 }
 0x6fa   : > { %v8379_v35 = vmax.f32 %v5370_v62, %v5374_v37  ;;  %v8422_v32 = vmax.f32 %v8421_v59, %v6053_v48  ;;  %v5376_v51 = vadd.f32 %v5375_v23, %v13070_v30  ;;  %v6055_v29 = vadd.f32 %v6054_v40, %v13056_v41  ;;  %v5379_v8 = vpop.f32.mrf.mxu1  ;;  %5618 = vmatmul.mubr.bf16.gmra.mxu1 %v15572_v14  ;;  %v6056_v1 = vpop.f32.mrf.mxu0 }
 0x6fb   : > { %v13683_v45 = vsel %vm9127_vm3, %v8273_v18, %v13542_v39  ;;  %v8294_v63 = vmax.f32 %v8292_v47, %v8293_v12  ;;  %v8230_v9 = vrot.slane %v8229_v60, 1  ;;  %v8250_v38 = vmax.f32 %v8248_v34, %v8249_v36  ;;  %5627 = vmatprep.mubr.bf16.mxu1 %v15192_v44 }
 0x6fc   : > { %v8400_v16 = vmax.f32 %v5372_v7, %v5376_v51  ;;  %v8443_v62 = vmax.f32 %v8442_v57, %v6055_v29  ;;  %v5380_v59 = vadd.f32 %v5379_v8, %v13058_v21  ;;  %v6057_v43 = vadd.f32 %v6056_v1, %v13051_v19  ;;  %v5381_v46 = vpop.f32.mrf.mxu1  ;;  %v6058_v25 = vpop.f32.mrf.mxu0 }
 0x6fd   : > { %v13690_v24 = vsel %vm9127_vm3, %v8294_v63, %v13549_v53  ;;  %v8231_v37 = vmax.f32 %v8229_v60, %v8230_v9  ;;  %v8251_v39 = vrot.slane %v8250_v38, 1  ;;  %v5382_v47 = vadd.f32 %v5381_v46, %v13070_v30 }
 0x6fe   : > { %v8380_v48 = vmax.f32 %v8379_v35, %v5380_v59  ;;  %v8423_v36 = vmax.f32 %v8422_v32, %v6057_v43  ;;  %v6059_v34 = vadd.f32 %v6058_v25, %v13056_v41  ;;  %v5383_v7 = vpop.f32.mrf.mxu1  ;;  %v6062_v57 = vpop.f32.mrf.mxu0  ;;  %6301 = vmatmul.mubr.bf16.gmra.mxu0 %v13666_v61 }
 0x6ff   : > { %v13697_v23 = vsel %vm9127_vm3, %v8231_v37, %v13556_v3  ;;  %v8252_v40 = vmax.f32 %v8250_v38, %v8251_v39  ;;  %v8401_v18 = vmax.f32 %v8400_v16, %v5382_v47  ;;  %v5384_v53 = vadd.f32 %v5383_v7, %v13058_v21  ;;  %6310 = vmatprep.mubr.bf16.mxu0 %v15192_v44 }
 0x700   : > { %v8444_v12 = vmax.f32 %v8443_v62, %v6059_v34  ;;  %v6063_v35 = vadd.f32 %v6062_v57, %v13051_v19  ;;  %v5385_v32 = vpop.f32.mrf.mxu1  ;;  %v6064_v60 = vpop.f32.mrf.mxu0 }
 0x701   : > { %v13704_v51 = vsel %vm9127_vm3, %v8252_v40, %v13563_v6  ;;  %v8381_v29 = vmax.f32 %v8380_v48, %v5384_v53  ;;  %v5386_v8 = vadd.f32 %v5385_v32, %v13070_v30  ;;  %v6065_v3 = vadd.f32 %v6064_v60, %v13056_v41  ;;  %v15573_v6 = vld [vmem:[#allocation100_spill] sm:$0xff]  ;;  %v15575_v40 = vld [vmem:[#allocation77_spill] sm:$0xff] }
 0x702   : > { %v8424_v1 = vmax.f32 %v8423_v36, %v6063_v35  ;;  %v5389_v63 = vpop.f32.mrf.mxu1  ;;  %5628 = vmatmul.mubr.bf16.gmra.mxu1 %v13666_v61  ;;  %v6066_v9 = vpop.f32.mrf.mxu0  ;;  %v4370_v43 = vadd.f32 %v13574_v17, %v15573_v6  ;;  %v15574_v36 = vld [vmem:[#allocation83_spill] sm:$0xff] }
 0x703   : > { %v8402_v38 = vmax.f32 %v8401_v18, %v5386_v8  ;;  %v8445_v16 = vmax.f32 %v8444_v12, %v6065_v3  ;;  %v5390_v62 = vadd.f32 %v5389_v63, %v13058_v21  ;;  %v6067_v59 = vadd.f32 %v6066_v9, %v13051_v19  ;;  %5637 = vmatprep.mubr.bf16.mxu1 %v15192_v44 }
 0x704   : > { %v5391_v46 = vpop.f32.mrf.mxu1  ;;  %v6068_v25 = vpop.f32.mrf.mxu0  ;;  %v4367_v34 = vadd.f32 %v13574_v17, %v15574_v36  ;;  %v4518_v32 = vmax.f32 %v4370_v43, 0.0 }
 0x705   : > { %v8382_v37 = vmax.f32 %v8381_v29, %v5390_v62  ;;  %v8425_v39 = vmax.f32 %v8424_v1, %v6067_v59  ;;  %v5392_v47 = vadd.f32 %v5391_v46, %v13070_v30  ;;  %v6069_v48 = vadd.f32 %v6068_v25, %v13056_v41 }
 0x706   : > { %v5393_v7 = vpop.f32.mrf.mxu1  ;;  %v6072_v57 = vpop.f32.mrf.mxu0  ;;  %6311 = vmatmul.mubr.bf16.gmra.mxu0 %v15575_v40  ;;  %v4517_v63 = vmax.f32 %v4367_v34, 0.0 }
 0x707   : > { %v8403_v18 = vmax.f32 %v8402_v38, %v5392_v47  ;;  %v8446_v53 = vmax.f32 %v8445_v16, %v6069_v48  ;;  %v5394_v12 = vadd.f32 %v5393_v7, %v13058_v21  ;;  %v6073_v35 = vadd.f32 %v6072_v57, %v13051_v19  ;;  %6320 = vmatprep.mubr.bf16.mxu0 %v15192_v44 }
 0x708   : > { %v5395_v60 = vpop.f32.mrf.mxu1  ;;  %v6074_v29 = vpop.f32.mrf.mxu0  ;;  %v13728_v43 = vpack.c.bf16 %v4518_v32, %v4517_v63 }
 0x709   : > { %v8383_v8 = vmax.f32 %v8382_v37, %v5394_v12  ;;  %v8426_v3 = vmax.f32 %v8425_v39, %v6073_v35  ;;  %v5396_v1 = vadd.f32 %v5395_v60, %v13070_v30  ;;  %v6075_v17 = vadd.f32 %v6074_v29, %v13056_v41 }
 0x70a   : > { %v5399_v9 = vpop.f32.mrf.mxu1  ;;  %5638 = vmatmul.mubr.bf16.gmra.mxu1 %v15575_v40  ;;  %v6076_v38 = vpop.f32.mrf.mxu0  ;;  %15576 = vst [vmem:[#allocation132_spill] sm:$0xff] %v13728_v43 }
 0x70b   : > { %v8404_v16 = vmax.f32 %v8403_v18, %v5396_v1  ;;  %v8447_v62 = vmax.f32 %v8446_v53, %v6075_v17  ;;  %v5400_v59 = vadd.f32 %v5399_v9, %v13058_v21  ;;  %v6077_v6 = vadd.f32 %v6076_v38, %v13051_v19  ;;  %5647 = vmatprep.mubr.bf16.mxu1 %v15192_v44 }
 0x70c   : > { %v5401_v46 = vpop.f32.mrf.mxu1  ;;  %v6078_v25 = vpop.f32.mrf.mxu0 }
 0x70d   : > { %v8384_v37 = vmax.f32 %v8383_v8, %v5400_v59  ;;  %v8427_v39 = vmax.f32 %v8426_v3, %v6077_v6  ;;  %v5402_v47 = vadd.f32 %v5401_v46, %v13070_v30  ;;  %v6079_v48 = vadd.f32 %v6078_v25, %v13056_v41 }
 0x70e   : > { %v5403_v36 = vpop.f32.mrf.mxu1  ;;  %v6082_v34 = vpop.f32.mrf.mxu0  ;;  %6321 = vmatmul.mubr.bf16.gmra.mxu0 %v13728_v43 }
 0x70f   : > { %v8405_v7 = vmax.f32 %v8404_v16, %v5402_v47  ;;  %v8448_v57 = vmax.f32 %v8447_v62, %v6079_v48  ;;  %v5404_v18 = vadd.f32 %v5403_v36, %v13058_v21  ;;  %v6083_v53 = vadd.f32 %v6082_v34, %v13051_v19  ;;  %6330 = vmatprep.mubr.bf16.mxu0 %v15192_v44  ;;  %v15577_v47 = vld [vmem:[#allocation95_spill] sm:$0xff] }
 0x710   : > { %v5405_v12 = vpop.f32.mrf.mxu1  ;;  %v6084_v35 = vpop.f32.mrf.mxu0 }
 0x711   : > { %v8385_v32 = vmax.f32 %v8384_v37, %v5404_v18  ;;  %v8428_v60 = vmax.f32 %v8427_v39, %v6083_v53  ;;  %v5406_v29 = vadd.f32 %v5405_v12, %v13070_v30  ;;  %v6085_v8 = vadd.f32 %v6084_v35, %v13056_v41 }
 0x712   : > { %v5409_v3 = vpop.f32.mrf.mxu1  ;;  %5648 = vmatmul.mubr.bf16.gmra.mxu1 %v13728_v43  ;;  %v6086_v1 = vpop.f32.mrf.mxu0 }
 0x713   : > { %v8406_v17 = vmax.f32 %v8405_v7, %v5406_v29  ;;  %v8449_v63 = vmax.f32 %v8448_v57, %v6085_v8  ;;  %v5410_v9 = vadd.f32 %v5409_v3, %v13058_v21  ;;  %v6087_v38 = vadd.f32 %v6086_v1, %v13051_v19  ;;  %5657 = vmatprep.mubr.bf16.mxu1 %v15192_v44 }
 0x714   : > { %v5411_v16 = vpop.f32.mrf.mxu1  ;;  %v6088_v62 = vpop.f32.mrf.mxu0 }
 0x715   : > { %v8386_v59 = vmax.f32 %v8385_v32, %v5410_v9  ;;  %v8429_v6 = vmax.f32 %v8428_v60, %v6087_v38  ;;  %v5412_v46 = vadd.f32 %v5411_v16, %v13070_v30  ;;  %v6089_v25 = vadd.f32 %v6088_v62, %v13056_v41 }
 0x716   : > { %v5413_v37 = vpop.f32.mrf.mxu1  ;;  %v6092_v39 = vpop.f32.mrf.mxu0  ;;  %6331 = vmatmul.mubr.bf16.gmra.mxu0 %v15577_v47 }
 0x717   : > { %v8407_v48 = vmax.f32 %v8406_v17, %v5412_v46  ;;  %v8450_v36 = vmax.f32 %v8449_v63, %v6089_v25  ;;  %v5414_v34 = vadd.f32 %v5413_v37, %v13058_v21  ;;  %v6093_v7 = vadd.f32 %v6092_v39, %v13051_v19  ;;  %6340 = vmatprep.mubr.bf16.mxu0 %v15192_v44 }
 0x718   : > { %v5415_v57 = vpop.f32.mrf.mxu1  ;;  %v6094_v18 = vpop.f32.mrf.mxu0 }
 0x719   : > { %v8387_v53 = vmax.f32 %v8386_v59, %v5414_v34  ;;  %v8430_v12 = vmax.f32 %v8429_v6, %v6093_v7  ;;  %v5416_v35 = vadd.f32 %v5415_v57, %v13070_v30  ;;  %v6095_v32 = vadd.f32 %v6094_v18, %v13056_v41 }
 0x71a   : > { %v5419_v60 = vpop.f32.mrf.mxu1  ;;  %5658 = vmatmul.mubr.bf16.gmra.mxu1 %v15577_v47  ;;  %v6096_v29 = vpop.f32.mrf.mxu0 }
 0x71b   : > { %v8408_v8 = vmax.f32 %v8407_v48, %v5416_v35  ;;  %v8451_v3 = vmax.f32 %v8450_v36, %v6095_v32  ;;  %v5420_v1 = vadd.f32 %v5419_v60, %v13058_v21  ;;  %v6097_v17 = vadd.f32 %v6096_v29, %v13051_v19  ;;  %5667 = vmatprep.mubr.bf16.mxu1 %v15192_v44 }
 0x71c   : > { %v5421_v63 = vpop.f32.mrf.mxu1  ;;  %v6098_v9 = vpop.f32.mrf.mxu0 }
 0x71d   : > { %v8388_v38 = vmax.f32 %v8387_v53, %v5420_v1  ;;  %v8431_v16 = vmax.f32 %v8430_v12, %v6097_v17  ;;  %v5422_v62 = vadd.f32 %v5421_v63, %v13070_v30  ;;  %v6099_v59 = vadd.f32 %v6098_v9, %v13056_v41 }
 0x71e   : > { %v5423_v6 = vpop.f32.mrf.mxu1  ;;  %v6102_v46 = vpop.f32.mrf.mxu0  ;;  %6341 = vmatmul.mubr.bf16.gmra.mxu0 %v13072_v26 }
 0x71f   : > { %v8409_v25 = vmax.f32 %v8408_v8, %v5422_v62  ;;  %v8452_v37 = vmax.f32 %v8451_v3, %v6099_v59  ;;  %v5424_v39 = vadd.f32 %v5423_v6, %v13058_v21  ;;  %v6103_v48 = vadd.f32 %v6102_v46, %v13051_v19  ;;  %6350 = vmatprep.mubr.bf16.mxu0 %v15192_v44  ;;  %v15578_v59 = vld [vmem:[#allocation8_spill] sm:$0xff] }
 0x720   : > { %v5425_v36 = vpop.f32.mrf.mxu1  ;;  %v6104_v34 = vpop.f32.mrf.mxu0 }
 0x721   : > { %v8389_v7 = vmax.f32 %v8388_v38, %v5424_v39  ;;  %v8432_v57 = vmax.f32 %v8431_v16, %v6103_v48  ;;  %v5426_v18 = vadd.f32 %v5425_v36, %v13070_v30  ;;  %v6105_v53 = vadd.f32 %v6104_v34, %v13056_v41 }
 0x722   : > { %v5429_v12 = vpop.f32.mrf.mxu1  ;;  %5668 = vmatmul.mubr.bf16.gmra.mxu1 %v13072_v26  ;;  %v6106_v35 = vpop.f32.mrf.mxu0 }
 0x723   : > { %v8410_v32 = vmax.f32 %v8409_v25, %v5426_v18  ;;  %v8453_v60 = vmax.f32 %v8452_v37, %v6105_v53  ;;  %v5430_v29 = vadd.f32 %v5429_v12, %v13058_v21  ;;  %v6107_v8 = vadd.f32 %v6106_v35, %v13051_v19  ;;  %5677 = vmatprep.mubr.bf16.mxu1 %v15192_v44 }
 0x724   : > { %v5431_v3 = vpop.f32.mrf.mxu1  ;;  %v6108_v1 = vpop.f32.mrf.mxu0 }
 0x725   : > { %v8390_v17 = vmax.f32 %v8389_v7, %v5430_v29  ;;  %v8433_v63 = vmax.f32 %v8432_v57, %v6107_v8  ;;  %v5432_v9 = vadd.f32 %v5431_v3, %v13070_v30  ;;  %v6109_v38 = vadd.f32 %v6108_v1, %v13056_v41 }
 0x726   : > { %v5433_v16 = vpop.f32.mrf.mxu1  ;;  %v6112_v62 = vpop.f32.mrf.mxu0  ;;  %6351 = vmatmul.mubr.bf16.gmra.mxu0 %v15578_v59 }
 0x727   : > { %v8411_v6 = vmax.f32 %v8410_v32, %v5432_v9  ;;  %v8454_v46 = vmax.f32 %v8453_v60, %v6109_v38  ;;  %v5434_v25 = vadd.f32 %v5433_v16, %v13058_v21  ;;  %v6113_v37 = vadd.f32 %v6112_v62, %v13051_v19  ;;  %7066 = vmatprep.mubr.bf16.mxu0 %v15192_v44  ;;  %v15579_v16 = vld [vmem:[#allocation63_spill] sm:$0xff] }
 0x728   : > { %v5435_v39 = vpop.f32.mrf.mxu1  ;;  %v6114_v48 = vpop.f32.mrf.mxu0 }
 0x729   : > { %v8391_v36 = vmax.f32 %v8390_v17, %v5434_v25  ;;  %v8434_v34 = vmax.f32 %v8433_v63, %v6113_v37  ;;  %v5436_v7 = vadd.f32 %v5435_v39, %v13070_v30  ;;  %v6115_v57 = vadd.f32 %v6114_v48, %v13056_v41 }
 0x72a   : > { %v5439_v18 = vpop.f32.mrf.mxu1  ;;  %5678 = vmatmul.mubr.bf16.gmra.mxu1 %v15578_v59  ;;  %v6116_v53 = vpop.f32.mrf.mxu0 }
 0x72b   : > { %v8412_v12 = vmax.f32 %v8411_v6, %v5436_v7  ;;  %v8455_v35 = vmax.f32 %v8454_v46, %v6115_v57  ;;  %v5440_v32 = vadd.f32 %v5439_v18, %v13058_v21  ;;  %v6117_v60 = vadd.f32 %v6116_v53, %v13051_v19  ;;  %6393 = vmatprep.mubr.bf16.mxu1 %v15192_v44 }
 0x72c   : > { %v5441_v29 = vpop.f32.mrf.mxu1  ;;  %v6118_v8 = vpop.f32.mrf.mxu0 }
 0x72d   : > { %v8392_v3 = vmax.f32 %v8391_v36, %v5440_v32  ;;  %v8435_v1 = vmax.f32 %v8434_v34, %v6117_v60  ;;  %v5442_v17 = vadd.f32 %v5441_v29, %v13070_v30  ;;  %v6119_v63 = vadd.f32 %v6118_v8, %v13056_v41 }
 0x72e   : > { %v5443_v9 = vpop.f32.mrf.mxu1  ;;  %v6122_v38 = vpop.f32.mrf.mxu0  ;;  %7067 = vmatmul.mubr.bf16.vlgmr.msra.gmra.mxu0 %v15579_v16 }
 0x72f   : > { %v8436_v62 = vrot.slane %v8435_v1, 4  ;;  %v8413_v6 = vmax.f32 %v8412_v12, %v5442_v17  ;;  %v8456_v46 = vmax.f32 %v8455_v35, %v6119_v63  ;;  %v5444_v25 = vadd.f32 %v5443_v9, %v13058_v21  ;;  %7076 = vmatprep.mubr.bf16.mxu0 %v15192_v44 }
 0x730   : > { %v5445_v37 = vpop.f32.mrf.mxu1  ;;  %v6124_v39 = vpop.f32.mrf.mxu0  ;;  %v6123_v35 = vadd.f32 %v6122_v38, %v13051_v19 }
 0x731   : > { %v8437_v48 = vmax.f32 %v8435_v1, %v8436_v62  ;;  %v8457_v36 = vrot.slane %v8456_v46, 4  ;;  %v8393_v34 = vmax.f32 %v8392_v3, %v5444_v25  ;;  %v5446_v7 = vadd.f32 %v5445_v37, %v13070_v30 }
 0x732   : > { %v5449_v57 = vpop.f32.mrf.mxu1  ;;  %v6126_v18 = vpop.f32.mrf.mxu0  ;;  %6394 = vmatmul.mubr.bf16.vlgmr.msra.gmra.mxu1 %v15579_v16  ;;  %v6125_v62 = vadd.f32 %v6124_v39, %v13056_v41 }
 0x733   : > { %v8438_v53 = vrot.slane %v8437_v48, 2  ;;  %v8458_v32 = vmax.f32 %v8456_v46, %v8457_v36  ;;  %v8394_v60 = vrot.slane %v8393_v34, 4  ;;  %v8414_v12 = vmax.f32 %v8413_v6, %v5446_v7  ;;  %6403 = vmatprep.mubr.bf16.mxu1 %v15192_v44  ;;  %v15580_v36 = vld [vmem:[#allocation44_spill] sm:$0xff] }
 0x734   : > { %v6127_v29 = vadd.f32 %v6126_v18, %v13051_v19  ;;  %v5451_v8 = vpop.f32.mrf.mxu1  ;;  %v6128_v1 = vpop.f32.mrf.mxu0  ;;  %v5450_v16 = vadd.f32 %v5449_v57, %v13058_v21 }
 0x735   : > { %v8439_v3 = vmax.f32 %v8437_v48, %v8438_v53  ;;  %v8459_v17 = vrot.slane %v8458_v32, 2  ;;  %v8395_v63 = vmax.f32 %v8393_v34, %v8394_v60  ;;  %v8415_v9 = vrot.slane %v8414_v12, 4 }
 0x736   : > { %v8589_v46 = vmax.f32 %v6123_v35, %v6127_v29  ;;  %v6129_v6 = vadd.f32 %v6128_v1, %v13056_v41  ;;  %v5453_v25 = vpop.f32.mrf.mxu1  ;;  %v6132_v37 = vpop.f32.mrf.mxu0  ;;  %7077 = vmatmul.mubr.bf16.gmra.mxu0 %v15580_v36  ;;  %v5452_v48 = vadd.f32 %v5451_v8, %v13070_v30 }
 0x737   : > { %v8440_v38 = vrot.slane %v8439_v3, 1  ;;  %v8460_v7 = vmax.f32 %v8458_v32, %v8459_v17  ;;  %v8396_v18 = vrot.slane %v8395_v63, 2  ;;  %v8416_v59 = vmax.f32 %v8414_v12, %v8415_v9  ;;  %7086 = vmatprep.mubr.bf16.mxu0 %v15192_v44 }
 0x738   : > { %v8610_v34 = vmax.f32 %v6125_v62, %v6129_v6  ;;  %v5454_v39 = vadd.f32 %v5453_v25, %v13058_v21  ;;  %v6133_v57 = vadd.f32 %v6132_v37, %v13051_v19  ;;  %v5455_v53 = vpop.f32.mrf.mxu1  ;;  %v6134_v60 = vpop.f32.mrf.mxu0 }
 0x739   : > { %v8441_v35 = vmax.f32 %v8439_v3, %v8440_v38  ;;  %v8461_v29 = vrot.slane %v8460_v7, 1  ;;  %v8397_v1 = vmax.f32 %v8395_v63, %v8396_v18  ;;  %v8417_v26 = vrot.slane %v8416_v59, 2 }
 0x73a   : > { %v8547_v47 = vmax.f32 %v5450_v16, %v5454_v39  ;;  %v8590_v43 = vmax.f32 %v8589_v46, %v6133_v57  ;;  %v5456_v32 = vadd.f32 %v5455_v53, %v13070_v30  ;;  %v6135_v12 = vadd.f32 %v6134_v60, %v13056_v41  ;;  %v5459_v17 = vpop.f32.mrf.mxu1  ;;  %v6136_v9 = vpop.f32.mrf.mxu0  ;;  %6404 = vmatmul.mubr.bf16.gmra.mxu1 %v15580_v36  ;;  %v15581_v57 = vld [vmem:[#allocation42_spill] sm:$0xff] }
 0x73b   : > { %v13801_v8 = vsel %vm9129_vm4, %v8441_v35, %v13683_v45  ;;  %v8462_v62 = vmax.f32 %v8460_v7, %v8461_v29  ;;  %v8398_v6 = vrot.slane %v8397_v1, 1  ;;  %v8418_v3 = vmax.f32 %v8416_v59, %v8417_v26  ;;  %6413 = vmatprep.mubr.bf16.mxu1 %v15192_v44 }
 0x73c   : > { %v8568_v63 = vmax.f32 %v5452_v48, %v5456_v32  ;;  %v8611_v16 = vmax.f32 %v8610_v34, %v6135_v12  ;;  %v5460_v46 = vadd.f32 %v5459_v17, %v13058_v21  ;;  %v6137_v25 = vadd.f32 %v6136_v9, %v13051_v19  ;;  %v5461_v37 = vpop.f32.mrf.mxu1  ;;  %v6138_v38 = vpop.f32.mrf.mxu0 }
 0x73d   : > { %v13808_v36 = vsel %vm9129_vm4, %v8462_v62, %v13690_v24  ;;  %v8399_v18 = vmax.f32 %v8397_v1, %v8398_v6  ;;  %v8419_v45 = vrot.slane %v8418_v3, 1  ;;  %v5462_v7 = vadd.f32 %v5461_v37, %v13070_v30 }
 0x73e   : > { %v8548_v39 = vmax.f32 %v8547_v47, %v5460_v46  ;;  %v8591_v26 = vmax.f32 %v8590_v43, %v6137_v25  ;;  %v6139_v59 = vadd.f32 %v6138_v38, %v13056_v41  ;;  %v5463_v48 = vpop.f32.mrf.mxu1  ;;  %v6142_v34 = vpop.f32.mrf.mxu0  ;;  %7087 = vmatmul.mubr.bf16.gmra.mxu0 %v15581_v57 }
 0x73f   : > { %v13815_v53 = vsel %vm9129_vm4, %v8399_v18, %v13697_v23  ;;  %v8420_v60 = vmax.f32 %v8418_v3, %v8419_v45  ;;  %v8569_v35 = vmax.f32 %v8568_v63, %v5462_v7  ;;  %v5464_v24 = vadd.f32 %v5463_v48, %v13058_v21  ;;  %7096 = vmatprep.mubr.bf16.mxu0 %v15192_v44 }
 0x740   : > { %v8612_v29 = vmax.f32 %v8611_v16, %v6139_v59  ;;  %v6143_v47 = vadd.f32 %v6142_v34, %v13051_v19  ;;  %v5465_v43 = vpop.f32.mrf.mxu1  ;;  %v6144_v1 = vpop.f32.mrf.mxu0 }
 0x741   : > { %v13822_v32 = vsel %vm9129_vm4, %v8420_v60, %v13704_v51  ;;  %v8549_v12 = vmax.f32 %v8548_v39, %v5464_v24  ;;  %v5466_v17 = vadd.f32 %v5465_v43, %v13070_v30  ;;  %v6145_v23 = vadd.f32 %v6144_v1, %v13056_v41 }
 0x742   : > { %v8592_v9 = vmax.f32 %v8591_v26, %v6143_v47  ;;  %v5469_v62 = vpop.f32.mrf.mxu1  ;;  %v6146_v6 = vpop.f32.mrf.mxu0  ;;  %6414 = vmatmul.mubr.bf16.gmra.mxu1 %v15581_v57  ;;  %v15582_v26 = vld [vmem:[#allocation58_spill] sm:$0xff] }
 0x743   : > { %v8570_v3 = vmax.f32 %v8569_v35, %v5466_v17  ;;  %v8613_v63 = vmax.f32 %v8612_v29, %v6145_v23  ;;  %v5470_v16 = vadd.f32 %v5469_v62, %v13058_v21  ;;  %v6147_v46 = vadd.f32 %v6146_v6, %v13051_v19  ;;  %6423 = vmatprep.mubr.bf16.mxu1 %v15192_v44 }
 0x744   : > { %v5471_v51 = vpop.f32.mrf.mxu1  ;;  %v6148_v25 = vpop.f32.mrf.mxu0 }
 0x745   : > { %v8550_v37 = vmax.f32 %v8549_v12, %v5470_v16  ;;  %v8593_v38 = vmax.f32 %v8592_v9, %v6147_v46  ;;  %v5472_v18 = vadd.f32 %v5471_v51, %v13070_v30  ;;  %v6149_v45 = vadd.f32 %v6148_v25, %v13056_v41 }
 0x746   : > { %v5473_v7 = vpop.f32.mrf.mxu1  ;;  %v6152_v39 = vpop.f32.mrf.mxu0  ;;  %7097 = vmatmul.mubr.bf16.gmra.mxu0 %v15582_v26 }
 0x747   : > { %v8571_v59 = vmax.f32 %v8570_v3, %v5472_v18  ;;  %v8614_v48 = vmax.f32 %v8613_v63, %v6149_v45  ;;  %v5474_v34 = vadd.f32 %v5473_v7, %v13058_v21  ;;  %v6153_v57 = vadd.f32 %v6152_v39, %v13051_v19  ;;  %7106 = vmatprep.mubr.bf16.mxu0 %v15192_v44 }
 0x748   : > { %v5475_v60 = vpop.f32.mrf.mxu1  ;;  %v6154_v35 = vpop.f32.mrf.mxu0 }
 0x749   : > { %v8551_v24 = vmax.f32 %v8550_v37, %v5474_v34  ;;  %v8594_v29 = vmax.f32 %v8593_v38, %v6153_v57  ;;  %v5476_v47 = vadd.f32 %v5475_v60, %v13070_v30  ;;  %v6155_v43 = vadd.f32 %v6154_v35, %v13056_v41  ;;  %v15583_v38 = vld [vmem:[#allocation67_spill] sm:$0xff] }
 0x74a   : > { %v5479_v1 = vpop.f32.mrf.mxu1  ;;  %v6156_v12 = vpop.f32.mrf.mxu0  ;;  %6424 = vmatmul.mubr.bf16.gmra.mxu1 %v15582_v26 }
 0x74b   : > { %v8572_v17 = vmax.f32 %v8571_v59, %v5476_v47  ;;  %v8615_v23 = vmax.f32 %v8614_v48, %v6155_v43  ;;  %v5480_v9 = vadd.f32 %v5479_v1, %v13058_v21  ;;  %v6157_v62 = vadd.f32 %v6156_v12, %v13051_v19  ;;  %6433 = vmatprep.mubr.bf16.mxu1 %v15192_v44 }
 0x74c   : > { %v5481_v6 = vpop.f32.mrf.mxu1  ;;  %v6158_v3 = vpop.f32.mrf.mxu0 }
 0x74d   : > { %v8552_v63 = vmax.f32 %v8551_v24, %v5480_v9  ;;  %v8595_v16 = vmax.f32 %v8594_v29, %v6157_v62  ;;  %v5482_v46 = vadd.f32 %v5481_v6, %v13070_v30  ;;  %v6159_v51 = vadd.f32 %v6158_v3, %v13056_v41 }
 0x74e   : > { %v5483_v25 = vpop.f32.mrf.mxu1  ;;  %v6162_v37 = vpop.f32.mrf.mxu0  ;;  %7107 = vmatmul.mubr.bf16.gmra.mxu0 %v15583_v38 }
 0x74f   : > { %v8573_v18 = vmax.f32 %v8572_v17, %v5482_v46  ;;  %v8616_v45 = vmax.f32 %v8615_v23, %v6159_v51  ;;  %v5484_v7 = vadd.f32 %v5483_v25, %v13058_v21  ;;  %v6163_v39 = vadd.f32 %v6162_v37, %v13051_v19  ;;  %7116 = vmatprep.mubr.bf16.mxu0 %v15192_v44 }
 0x750   : > { %v5485_v26 = vpop.f32.mrf.mxu1  ;;  %v6164_v59 = vpop.f32.mrf.mxu0 }
 0x751   : > { %v8553_v48 = vmax.f32 %v8552_v63, %v5484_v7  ;;  %v8596_v34 = vmax.f32 %v8595_v16, %v6163_v39  ;;  %v5486_v57 = vadd.f32 %v5485_v26, %v13070_v30  ;;  %v6165_v60 = vadd.f32 %v6164_v59, %v13056_v41  ;;  %v15584_v16 = vld [vmem:[#allocation55_spill] sm:$0xff] }
 0x752   : > { %v5489_v35 = vpop.f32.mrf.mxu1  ;;  %v6166_v24 = vpop.f32.mrf.mxu0  ;;  %6434 = vmatmul.mubr.bf16.gmra.mxu1 %v15583_v38 }
 0x753   : > { %v8574_v29 = vmax.f32 %v8573_v18, %v5486_v57  ;;  %v8617_v47 = vmax.f32 %v8616_v45, %v6165_v60  ;;  %v5490_v43 = vadd.f32 %v5489_v35, %v13058_v21  ;;  %v6167_v1 = vadd.f32 %v6166_v24, %v13051_v19  ;;  %6443 = vmatprep.mubr.bf16.mxu1 %v15192_v44 }
 0x754   : > { %v5491_v12 = vpop.f32.mrf.mxu1  ;;  %v6168_v17 = vpop.f32.mrf.mxu0 }
 0x755   : > { %v8554_v23 = vmax.f32 %v8553_v48, %v5490_v43  ;;  %v8597_v9 = vmax.f32 %v8596_v34, %v6167_v1  ;;  %v5492_v62 = vadd.f32 %v5491_v12, %v13070_v30  ;;  %v6169_v6 = vadd.f32 %v6168_v17, %v13056_v41 }
 0x756   : > { %v5493_v3 = vpop.f32.mrf.mxu1  ;;  %v6172_v63 = vpop.f32.mrf.mxu0  ;;  %7117 = vmatmul.mubr.bf16.gmra.mxu0 %v15584_v16 }
 0x757   : > { %v8575_v46 = vmax.f32 %v8574_v29, %v5492_v62  ;;  %v8618_v51 = vmax.f32 %v8617_v47, %v6169_v6  ;;  %v5494_v25 = vadd.f32 %v5493_v3, %v13058_v21  ;;  %v6173_v37 = vadd.f32 %v6172_v63, %v13051_v19  ;;  %7126 = vmatprep.mubr.bf16.mxu0 %v15192_v44 }
 0x758   : > { %v5495_v38 = vpop.f32.mrf.mxu1  ;;  %v6174_v18 = vpop.f32.mrf.mxu0 }
 0x759   : > { %v8555_v45 = vmax.f32 %v8554_v23, %v5494_v25  ;;  %v8598_v7 = vmax.f32 %v8597_v9, %v6173_v37  ;;  %v5496_v39 = vadd.f32 %v5495_v38, %v13070_v30  ;;  %v6175_v26 = vadd.f32 %v6174_v18, %v13056_v41  ;;  %v15585_v9 = vld [vmem:[#allocation40_spill] sm:$0xff] }
 0x75a   : > { %v5499_v59 = vpop.f32.mrf.mxu1  ;;  %v6176_v48 = vpop.f32.mrf.mxu0  ;;  %6444 = vmatmul.mubr.bf16.gmra.mxu1 %v15584_v16 }
 0x75b   : > { %v8576_v34 = vmax.f32 %v8575_v46, %v5496_v39  ;;  %v8619_v57 = vmax.f32 %v8618_v51, %v6175_v26  ;;  %v5500_v60 = vadd.f32 %v5499_v59, %v13058_v21  ;;  %v6177_v35 = vadd.f32 %v6176_v48, %v13051_v19  ;;  %6453 = vmatprep.mubr.bf16.mxu1 %v15192_v44 }
 0x75c   : > { %v5501_v24 = vpop.f32.mrf.mxu1  ;;  %v6178_v29 = vpop.f32.mrf.mxu0 }
 0x75d   : > { %v8556_v47 = vmax.f32 %v8555_v45, %v5500_v60  ;;  %v8599_v43 = vmax.f32 %v8598_v7, %v6177_v35  ;;  %v5502_v1 = vadd.f32 %v5501_v24, %v13070_v30  ;;  %v6179_v12 = vadd.f32 %v6178_v29, %v13056_v41 }
 0x75e   : > { %v5503_v17 = vpop.f32.mrf.mxu1  ;;  %v6182_v23 = vpop.f32.mrf.mxu0  ;;  %7127 = vmatmul.mubr.bf16.gmra.mxu0 %v15585_v9 }
 0x75f   : > { %v8577_v62 = vmax.f32 %v8576_v34, %v5502_v1  ;;  %v8620_v6 = vmax.f32 %v8619_v57, %v6179_v12  ;;  %v5504_v3 = vadd.f32 %v5503_v17, %v13058_v21  ;;  %v6183_v63 = vadd.f32 %v6182_v23, %v13051_v19  ;;  %7136 = vmatprep.mubr.bf16.mxu0 %v15192_v44 }
 0x760   : > { %v5505_v16 = vpop.f32.mrf.mxu1  ;;  %v6184_v46 = vpop.f32.mrf.mxu0 }
 0x761   : > { %v8557_v51 = vmax.f32 %v8556_v47, %v5504_v3  ;;  %v8600_v25 = vmax.f32 %v8599_v43, %v6183_v63  ;;  %v5506_v37 = vadd.f32 %v5505_v16, %v13070_v30  ;;  %v6185_v38 = vadd.f32 %v6184_v46, %v13056_v41  ;;  %v15586_v43 = vld [vmem:[#allocation47_spill] sm:$0xff] }
 0x762   : > { %v5509_v18 = vpop.f32.mrf.mxu1  ;;  %v6186_v45 = vpop.f32.mrf.mxu0  ;;  %6454 = vmatmul.mubr.bf16.gmra.mxu1 %v15585_v9 }
 0x763   : > { %v8578_v7 = vmax.f32 %v8577_v62, %v5506_v37  ;;  %v8621_v39 = vmax.f32 %v8620_v6, %v6185_v38  ;;  %v5510_v26 = vadd.f32 %v5509_v18, %v13058_v21  ;;  %v6187_v59 = vadd.f32 %v6186_v45, %v13051_v19  ;;  %6463 = vmatprep.mubr.bf16.mxu1 %v15192_v44 }
 0x764   : > { %v5511_v48 = vpop.f32.mrf.mxu1  ;;  %v6188_v34 = vpop.f32.mrf.mxu0 }
 0x765   : > { %v8558_v57 = vmax.f32 %v8557_v51, %v5510_v26  ;;  %v8601_v60 = vmax.f32 %v8600_v25, %v6187_v59  ;;  %v5512_v35 = vadd.f32 %v5511_v48, %v13070_v30  ;;  %v6189_v24 = vadd.f32 %v6188_v34, %v13056_v41 }
 0x766   : > { %v5513_v29 = vpop.f32.mrf.mxu1  ;;  %v6192_v47 = vpop.f32.mrf.mxu0  ;;  %7137 = vmatmul.mubr.bf16.gmra.mxu0 %v15586_v43 }
 0x767   : > { %v8579_v1 = vmax.f32 %v8578_v7, %v5512_v35  ;;  %v8622_v12 = vmax.f32 %v8621_v39, %v6189_v24  ;;  %v5514_v17 = vadd.f32 %v5513_v29, %v13058_v21  ;;  %v6193_v23 = vadd.f32 %v6192_v47, %v13051_v19  ;;  %7146 = vmatprep.mubr.bf16.mxu0 %v15192_v44 }
 0x768   : > { %v5515_v9 = vpop.f32.mrf.mxu1  ;;  %v6194_v62 = vpop.f32.mrf.mxu0 }
 0x769   : > { %v8559_v6 = vmax.f32 %v8558_v57, %v5514_v17  ;;  %v8602_v3 = vmax.f32 %v8601_v60, %v6193_v23  ;;  %v5516_v63 = vadd.f32 %v5515_v9, %v13070_v30  ;;  %v6195_v16 = vadd.f32 %v6194_v62, %v13056_v41  ;;  %v15587_v60 = vld [vmem:[#allocation72_spill] sm:$0xff] }
 0x76a   : > { %v5519_v46 = vpop.f32.mrf.mxu1  ;;  %v6196_v51 = vpop.f32.mrf.mxu0  ;;  %6464 = vmatmul.mubr.bf16.gmra.mxu1 %v15586_v43 }
 0x76b   : > { %v8580_v25 = vmax.f32 %v8579_v1, %v5516_v63  ;;  %v8623_v37 = vmax.f32 %v8622_v12, %v6195_v16  ;;  %v5520_v38 = vadd.f32 %v5519_v46, %v13058_v21  ;;  %v6197_v18 = vadd.f32 %v6196_v51, %v13051_v19  ;;  %6473 = vmatprep.mubr.bf16.mxu1 %v15192_v44 }
 0x76c   : > { %v5521_v45 = vpop.f32.mrf.mxu1  ;;  %v6198_v7 = vpop.f32.mrf.mxu0 }
 0x76d   : > { %v8560_v39 = vmax.f32 %v8559_v6, %v5520_v38  ;;  %v8603_v26 = vmax.f32 %v8602_v3, %v6197_v18  ;;  %v5522_v59 = vadd.f32 %v5521_v45, %v13070_v30  ;;  %v6199_v48 = vadd.f32 %v6198_v7, %v13056_v41 }
 0x76e   : > { %v5523_v34 = vpop.f32.mrf.mxu1  ;;  %v6202_v57 = vpop.f32.mrf.mxu0  ;;  %7147 = vmatmul.mubr.bf16.gmra.mxu0 %v15587_v60 }
 0x76f   : > { %v8604_v35 = vrot.slane %v8603_v26, 4  ;;  %v8581_v24 = vmax.f32 %v8580_v25, %v5522_v59  ;;  %v8624_v29 = vmax.f32 %v8623_v37, %v6199_v48  ;;  %v5524_v47 = vadd.f32 %v5523_v34, %v13058_v21  ;;  %7156 = vmatprep.mubr.bf16.mxu0 %v15192_v44 }
 0x770   : > { %v5525_v43 = vpop.f32.mrf.mxu1  ;;  %v6204_v1 = vpop.f32.mrf.mxu0  ;;  %v6203_v51 = vadd.f32 %v6202_v57, %v13051_v19 }
 0x771   : > { %v8605_v12 = vmax.f32 %v8603_v26, %v8604_v35  ;;  %v8625_v17 = vrot.slane %v8624_v29, 4  ;;  %v8561_v23 = vmax.f32 %v8560_v39, %v5524_v47  ;;  %v5526_v9 = vadd.f32 %v5525_v43, %v13070_v30 }
 0x772   : > { %v5529_v62 = vpop.f32.mrf.mxu1  ;;  %v6206_v6 = vpop.f32.mrf.mxu0  ;;  %6474 = vmatmul.mubr.bf16.gmra.mxu1 %v15587_v60  ;;  %v6205_v26 = vadd.f32 %v6204_v1, %v13056_v41 }
 0x773   : > { %v8606_v3 = vrot.slane %v8605_v12, 2  ;;  %v8626_v63 = vmax.f32 %v8624_v29, %v8625_v17  ;;  %v8562_v16 = vrot.slane %v8561_v23, 4  ;;  %v8582_v46 = vmax.f32 %v8581_v24, %v5526_v9  ;;  %6483 = vmatprep.mubr.bf16.mxu1 %v15192_v44  ;;  %v15588_v24 = vld [vmem:[#allocation65_spill] sm:$0xff] }
 0x774   : > { %v6207_v25 = vadd.f32 %v6206_v6, %v13051_v19  ;;  %v5531_v37 = vpop.f32.mrf.mxu1  ;;  %v6208_v38 = vpop.f32.mrf.mxu0  ;;  %v5530_v59 = vadd.f32 %v5529_v62, %v13058_v21 }
 0x775   : > { %v8607_v18 = vmax.f32 %v8605_v12, %v8606_v3  ;;  %v8627_v45 = vrot.slane %v8626_v63, 2  ;;  %v8563_v7 = vmax.f32 %v8561_v23, %v8562_v16  ;;  %v8583_v39 = vrot.slane %v8582_v46, 4 }
 0x776   : > { %v8757_v48 = vmax.f32 %v6203_v51, %v6207_v25  ;;  %v6209_v34 = vadd.f32 %v6208_v38, %v13056_v41  ;;  %v5533_v60 = vpop.f32.mrf.mxu1  ;;  %v6212_v35 = vpop.f32.mrf.mxu0  ;;  %7157 = vmatmul.mubr.bf16.gmra.mxu0 %v15588_v24  ;;  %v5532_v12 = vadd.f32 %v5531_v37, %v13070_v30 }
 0x777   : > { %v8608_v57 = vrot.slane %v8607_v18, 1  ;;  %v8628_v29 = vmax.f32 %v8626_v63, %v8627_v45  ;;  %v8564_v47 = vrot.slane %v8563_v7, 2  ;;  %v8584_v43 = vmax.f32 %v8582_v46, %v8583_v39  ;;  %7166 = vmatprep.mubr.bf16.mxu0 %v15192_v44 }
 0x778   : > { %v8778_v17 = vmax.f32 %v6205_v26, %v6209_v34  ;;  %v5534_v1 = vadd.f32 %v5533_v60, %v13058_v21  ;;  %v6213_v23 = vadd.f32 %v6212_v35, %v13051_v19  ;;  %v5535_v9 = vpop.f32.mrf.mxu1  ;;  %v6214_v62 = vpop.f32.mrf.mxu0 }
 0x779   : > { %v8609_v6 = vmax.f32 %v8607_v18, %v8608_v57  ;;  %v8629_v3 = vrot.slane %v8628_v29, 1  ;;  %v8565_v16 = vmax.f32 %v8563_v7, %v8564_v47  ;;  %v8585_v51 = vrot.slane %v8584_v43, 2 }
 0x77a   : > { %v8715_v25 = vmax.f32 %v5530_v59, %v5534_v1  ;;  %v8758_v38 = vmax.f32 %v8757_v48, %v6213_v23  ;;  %v5536_v63 = vadd.f32 %v5535_v9, %v13070_v30  ;;  %v6215_v46 = vadd.f32 %v6214_v62, %v13056_v41  ;;  %v5539_v45 = vpop.f32.mrf.mxu1  ;;  %v6216_v39 = vpop.f32.mrf.mxu0  ;;  %6484 = vmatmul.mubr.bf16.gmra.mxu1 %v15588_v24  ;;  %v15589_v9 = vld [vmem:[#allocation92_spill] sm:$0xff] }
 0x77b   : > { %v13913_v37 = vsel %vm9131_vm5, %v8609_v6, %v13801_v8  ;;  %v8630_v26 = vmax.f32 %v8628_v29, %v8629_v3  ;;  %v8566_v34 = vrot.slane %v8565_v16, 1  ;;  %v8586_v18 = vmax.f32 %v8584_v43, %v8585_v51  ;;  %6493 = vmatprep.mubr.bf16.mxu1 %v15192_v44 }
 0x77c   : > { %v8736_v7 = vmax.f32 %v5532_v12, %v5536_v63  ;;  %v8779_v59 = vmax.f32 %v8778_v17, %v6215_v46  ;;  %v5540_v48 = vadd.f32 %v5539_v45, %v13058_v21  ;;  %v6217_v60 = vadd.f32 %v6216_v39, %v13051_v19  ;;  %v5541_v35 = vpop.f32.mrf.mxu1  ;;  %v6218_v57 = vpop.f32.mrf.mxu0 }
 0x77d   : > { %v13920_v24 = vsel %vm9131_vm5, %v8630_v26, %v13808_v36  ;;  %v8567_v47 = vmax.f32 %v8565_v16, %v8566_v34  ;;  %v8587_v8 = vrot.slane %v8586_v18, 1  ;;  %v5542_v29 = vadd.f32 %v5541_v35, %v13070_v30 }
 0x77e   : > { %v8716_v1 = vmax.f32 %v8715_v25, %v5540_v48  ;;  %v8759_v43 = vmax.f32 %v8758_v38, %v6217_v60  ;;  %v6219_v23 = vadd.f32 %v6218_v57, %v13056_v41  ;;  %v5543_v12 = vpop.f32.mrf.mxu1  ;;  %v6222_v17 = vpop.f32.mrf.mxu0  ;;  %7167 = vmatmul.mubr.bf16.gmra.mxu0 %v15589_v9 }
 0x77f   : > { %v13927_v62 = vsel %vm9131_vm5, %v8567_v47, %v13815_v53  ;;  %v8588_v6 = vmax.f32 %v8586_v18, %v8587_v8  ;;  %v8737_v3 = vmax.f32 %v8736_v7, %v5542_v29  ;;  %v5544_v36 = vadd.f32 %v5543_v12, %v13058_v21  ;;  %7176 = vmatprep.mubr.bf16.mxu0 %v15192_v44 }
 0x780   : > { %v8780_v16 = vmax.f32 %v8779_v59, %v6219_v23  ;;  %v6223_v51 = vadd.f32 %v6222_v17, %v13051_v19  ;;  %v5545_v25 = vpop.f32.mrf.mxu1  ;;  %v6224_v38 = vpop.f32.mrf.mxu0 }
 0x781   : > { %v13934_v63 = vsel %vm9131_vm5, %v8588_v6, %v13822_v32  ;;  %v8717_v46 = vmax.f32 %v8716_v1, %v5544_v36  ;;  %v5546_v45 = vadd.f32 %v5545_v25, %v13070_v30  ;;  %v6225_v53 = vadd.f32 %v6224_v38, %v13056_v41 }
 0x782   : > { %v8760_v39 = vmax.f32 %v8759_v43, %v6223_v51  ;;  %v5549_v26 = vpop.f32.mrf.mxu1  ;;  %v6226_v34 = vpop.f32.mrf.mxu0  ;;  %6494 = vmatmul.mubr.bf16.gmra.mxu1 %v15589_v9  ;;  %v15590_v43 = vld [vmem:[#allocation89_spill] sm:$0xff] }
 0x783   : > { %v8738_v18 = vmax.f32 %v8737_v3, %v5546_v45  ;;  %v8781_v7 = vmax.f32 %v8780_v16, %v6225_v53  ;;  %v5550_v59 = vadd.f32 %v5549_v26, %v13058_v21  ;;  %v6227_v48 = vadd.f32 %v6226_v34, %v13051_v19  ;;  %6503 = vmatprep.mubr.bf16.mxu1 %v15192_v44 }
 0x784   : > { %v5551_v32 = vpop.f32.mrf.mxu1  ;;  %v6228_v60 = vpop.f32.mrf.mxu0 }
 0x785   : > { %v8718_v35 = vmax.f32 %v8717_v46, %v5550_v59  ;;  %v8761_v57 = vmax.f32 %v8760_v39, %v6227_v48  ;;  %v5552_v47 = vadd.f32 %v5551_v32, %v13070_v30  ;;  %v6229_v8 = vadd.f32 %v6228_v60, %v13056_v41 }
 0x786   : > { %v5553_v29 = vpop.f32.mrf.mxu1  ;;  %v6232_v1 = vpop.f32.mrf.mxu0  ;;  %7177 = vmatmul.mubr.bf16.gmra.mxu0 %v15590_v43 }
 0x787   : > { %v8739_v23 = vmax.f32 %v8738_v18, %v5552_v47  ;;  %v8782_v12 = vmax.f32 %v8781_v7, %v6229_v8  ;;  %v5554_v17 = vadd.f32 %v5553_v29, %v13058_v21  ;;  %v6233_v9 = vadd.f32 %v6232_v1, %v13051_v19  ;;  %7186 = vmatprep.mubr.bf16.mxu0 %v15192_v44 }
 0x788   : > { %v5555_v6 = vpop.f32.mrf.mxu1  ;;  %v6234_v3 = vpop.f32.mrf.mxu0 }
 0x789   : > { %v8719_v36 = vmax.f32 %v8718_v35, %v5554_v17  ;;  %v8762_v16 = vmax.f32 %v8761_v57, %v6233_v9  ;;  %v5556_v51 = vadd.f32 %v5555_v6, %v13070_v30  ;;  %v6235_v25 = vadd.f32 %v6234_v3, %v13056_v41  ;;  %v15591_v57 = vld [vmem:[#allocation69_spill] sm:$0xff] }
 0x78a   : > { %v5559_v38 = vpop.f32.mrf.mxu1  ;;  %v6236_v46 = vpop.f32.mrf.mxu0  ;;  %6504 = vmatmul.mubr.bf16.gmra.mxu1 %v15590_v43 }
 0x78b   : > { %v8740_v45 = vmax.f32 %v8739_v23, %v5556_v51  ;;  %v8783_v53 = vmax.f32 %v8782_v12, %v6235_v25  ;;  %v5560_v39 = vadd.f32 %v5559_v38, %v13058_v21  ;;  %v6237_v26 = vadd.f32 %v6236_v46, %v13051_v19  ;;  %6513 = vmatprep.mubr.bf16.mxu1 %v15192_v44 }
 0x78c   : > { %v5561_v34 = vpop.f32.mrf.mxu1  ;;  %v6238_v18 = vpop.f32.mrf.mxu0 }
 0x78d   : > { %v8720_v7 = vmax.f32 %v8719_v36, %v5560_v39  ;;  %v8763_v59 = vmax.f32 %v8762_v16, %v6237_v26  ;;  %v5562_v48 = vadd.f32 %v5561_v34, %v13070_v30  ;;  %v6239_v32 = vadd.f32 %v6238_v18, %v13056_v41 }
 0x78e   : > { %v5563_v60 = vpop.f32.mrf.mxu1  ;;  %v6242_v35 = vpop.f32.mrf.mxu0  ;;  %7187 = vmatmul.mubr.bf16.gmra.mxu0 %v15591_v57 }
 0x78f   : > { %v8741_v47 = vmax.f32 %v8740_v45, %v5562_v48  ;;  %v8784_v8 = vmax.f32 %v8783_v53, %v6239_v32  ;;  %v5564_v29 = vadd.f32 %v5563_v60, %v13058_v21  ;;  %v6243_v1 = vadd.f32 %v6242_v35, %v13051_v19  ;;  %7196 = vmatprep.mubr.bf16.mxu0 %v15192_v44 }
 0x790   : > { %v5565_v43 = vpop.f32.mrf.mxu1  ;;  %v6244_v23 = vpop.f32.mrf.mxu0 }
 0x791   : > { %v8721_v12 = vmax.f32 %v8720_v7, %v5564_v29  ;;  %v8764_v17 = vmax.f32 %v8763_v59, %v6243_v1  ;;  %v5566_v9 = vadd.f32 %v5565_v43, %v13070_v30  ;;  %v6245_v6 = vadd.f32 %v6244_v23, %v13056_v41  ;;  %v15592_v59 = vld [vmem:[#allocation96_spill] sm:$0xff] }
 0x792   : > { %v5569_v3 = vpop.f32.mrf.mxu1  ;;  %v6246_v36 = vpop.f32.mrf.mxu0  ;;  %6514 = vmatmul.mubr.bf16.gmra.mxu1 %v15591_v57 }
 0x793   : > { %v8742_v16 = vmax.f32 %v8741_v47, %v5566_v9  ;;  %v8785_v51 = vmax.f32 %v8784_v8, %v6245_v6  ;;  %v5570_v25 = vadd.f32 %v5569_v3, %v13058_v21  ;;  %v6247_v38 = vadd.f32 %v6246_v36, %v13051_v19  ;;  %6523 = vmatprep.mubr.bf16.mxu1 %v15192_v44 }
 0x794   : > { %v5571_v46 = vpop.f32.mrf.mxu1  ;;  %v6248_v45 = vpop.f32.mrf.mxu0 }
 0x795   : > { %v8722_v53 = vmax.f32 %v8721_v12, %v5570_v25  ;;  %v8765_v39 = vmax.f32 %v8764_v17, %v6247_v38  ;;  %v5572_v26 = vadd.f32 %v5571_v46, %v13070_v30  ;;  %v6249_v34 = vadd.f32 %v6248_v45, %v13056_v41 }
 0x796   : > { %v5573_v18 = vpop.f32.mrf.mxu1  ;;  %v6252_v7 = vpop.f32.mrf.mxu0  ;;  %7197 = vmatmul.mubr.bf16.gmra.mxu0 %v15592_v59 }
 0x797   : > { %v8743_v48 = vmax.f32 %v8742_v16, %v5572_v26  ;;  %v8786_v32 = vmax.f32 %v8785_v51, %v6249_v34  ;;  %v5574_v60 = vadd.f32 %v5573_v18, %v13058_v21  ;;  %v6253_v35 = vadd.f32 %v6252_v7, %v13051_v19  ;;  %7206 = vmatprep.mubr.bf16.mxu0 %v15192_v44 }
 0x798   : > { %v5575_v57 = vpop.f32.mrf.mxu1  ;;  %v6254_v47 = vpop.f32.mrf.mxu0 }
 0x799   : > { %v8723_v8 = vmax.f32 %v8722_v53, %v5574_v60  ;;  %v8766_v29 = vmax.f32 %v8765_v39, %v6253_v35  ;;  %v5576_v1 = vadd.f32 %v5575_v57, %v13070_v30  ;;  %v6255_v43 = vadd.f32 %v6254_v47, %v13056_v41  ;;  %v15593_v39 = vld [vmem:[#allocation87_spill] sm:$0xff] }
 0x79a   : > { %v5579_v23 = vpop.f32.mrf.mxu1  ;;  %v6256_v12 = vpop.f32.mrf.mxu0  ;;  %6524 = vmatmul.mubr.bf16.gmra.mxu1 %v15592_v59 }
 0x79b   : > { %v8744_v17 = vmax.f32 %v8743_v48, %v5576_v1  ;;  %v8787_v9 = vmax.f32 %v8786_v32, %v6255_v43  ;;  %v5580_v6 = vadd.f32 %v5579_v23, %v13058_v21  ;;  %v6257_v3 = vadd.f32 %v6256_v12, %v13051_v19  ;;  %6533 = vmatprep.mubr.bf16.mxu1 %v15192_v44 }
 0x79c   : > { %v5581_v36 = vpop.f32.mrf.mxu1  ;;  %v6258_v16 = vpop.f32.mrf.mxu0 }
 0x79d   : > { %v8724_v51 = vmax.f32 %v8723_v8, %v5580_v6  ;;  %v8767_v25 = vmax.f32 %v8766_v29, %v6257_v3  ;;  %v5582_v38 = vadd.f32 %v5581_v36, %v13070_v30  ;;  %v6259_v46 = vadd.f32 %v6258_v16, %v13056_v41 }
 0x79e   : > { %v5583_v45 = vpop.f32.mrf.mxu1  ;;  %v6262_v53 = vpop.f32.mrf.mxu0  ;;  %7207 = vmatmul.mubr.bf16.gmra.mxu0 %v15593_v39 }
 0x79f   : > { %v8745_v26 = vmax.f32 %v8744_v17, %v5582_v38  ;;  %v8788_v34 = vmax.f32 %v8787_v9, %v6259_v46  ;;  %v5584_v18 = vadd.f32 %v5583_v45, %v13058_v21  ;;  %v6263_v7 = vadd.f32 %v6262_v53, %v13051_v19  ;;  %7216 = vmatprep.mubr.bf16.mxu0 %v15192_v44 }
 0x7a0   : > { %v5585_v59 = vpop.f32.mrf.mxu1  ;;  %v6264_v48 = vpop.f32.mrf.mxu0 }
 0x7a1   : > { %v8725_v32 = vmax.f32 %v8724_v51, %v5584_v18  ;;  %v8768_v60 = vmax.f32 %v8767_v25, %v6263_v7  ;;  %v5586_v35 = vadd.f32 %v5585_v59, %v13070_v30  ;;  %v6265_v57 = vadd.f32 %v6264_v48, %v13056_v41  ;;  %v15594_v25 = vld [vmem:[#allocation94_spill] sm:$0xff] }
 0x7a2   : > { %v5589_v47 = vpop.f32.mrf.mxu1  ;;  %v6266_v8 = vpop.f32.mrf.mxu0  ;;  %6534 = vmatmul.mubr.bf16.gmra.mxu1 %v15593_v39 }
 0x7a3   : > { %v8746_v29 = vmax.f32 %v8745_v26, %v5586_v35  ;;  %v8789_v1 = vmax.f32 %v8788_v34, %v6265_v57  ;;  %v5590_v43 = vadd.f32 %v5589_v47, %v13058_v21  ;;  %v6267_v23 = vadd.f32 %v6266_v8, %v13051_v19  ;;  %6543 = vmatprep.mubr.bf16.mxu1 %v15192_v44 }
 0x7a4   : > { %v5591_v12 = vpop.f32.mrf.mxu1  ;;  %v6268_v17 = vpop.f32.mrf.mxu0 }
 0x7a5   : > { %v8726_v9 = vmax.f32 %v8725_v32, %v5590_v43  ;;  %v8769_v6 = vmax.f32 %v8768_v60, %v6267_v23  ;;  %v5592_v3 = vadd.f32 %v5591_v12, %v13070_v30  ;;  %v6269_v36 = vadd.f32 %v6268_v17, %v13056_v41 }
 0x7a6   : > { %v5593_v16 = vpop.f32.mrf.mxu1  ;;  %v6272_v51 = vpop.f32.mrf.mxu0  ;;  %7217 = vmatmul.mubr.bf16.gmra.mxu0 %v15594_v25 }
 0x7a7   : > { %v8747_v38 = vmax.f32 %v8746_v29, %v5592_v3  ;;  %v8790_v46 = vmax.f32 %v8789_v1, %v6269_v36  ;;  %v5594_v45 = vadd.f32 %v5593_v16, %v13058_v21  ;;  %v6273_v53 = vadd.f32 %v6272_v51, %v13051_v19  ;;  %7226 = vmatprep.mubr.bf16.mxu0 %v15192_v44 }
 0x7a8   : > { %v5595_v39 = vpop.f32.mrf.mxu1  ;;  %v6274_v26 = vpop.f32.mrf.mxu0 }
 0x7a9   : > { %v8727_v34 = vmax.f32 %v8726_v9, %v5594_v45  ;;  %v8770_v18 = vmax.f32 %v8769_v6, %v6273_v53  ;;  %v5596_v7 = vadd.f32 %v5595_v39, %v13070_v30  ;;  %v6275_v59 = vadd.f32 %v6274_v26, %v13056_v41  ;;  %v15595_v6 = vld [vmem:[#allocation86_spill] sm:$0xff] }
 0x7aa   : > { %v5599_v48 = vpop.f32.mrf.mxu1  ;;  %v6276_v32 = vpop.f32.mrf.mxu0  ;;  %6544 = vmatmul.mubr.bf16.gmra.mxu1 %v15594_v25 }
 0x7ab   : > { %v8748_v60 = vmax.f32 %v8747_v38, %v5596_v7  ;;  %v8791_v35 = vmax.f32 %v8790_v46, %v6275_v59  ;;  %v5600_v57 = vadd.f32 %v5599_v48, %v13058_v21  ;;  %v6277_v47 = vadd.f32 %v6276_v32, %v13051_v19  ;;  %6553 = vmatprep.mubr.bf16.mxu1 %v15192_v44 }
 0x7ac   : > { %v5601_v8 = vpop.f32.mrf.mxu1  ;;  %v6278_v29 = vpop.f32.mrf.mxu0 }
 0x7ad   : > { %v8728_v1 = vmax.f32 %v8727_v34, %v5600_v57  ;;  %v8771_v43 = vmax.f32 %v8770_v18, %v6277_v47  ;;  %v5602_v23 = vadd.f32 %v5601_v8, %v13070_v30  ;;  %v6279_v12 = vadd.f32 %v6278_v29, %v13056_v41 }
 0x7ae   : > { %v5603_v17 = vpop.f32.mrf.mxu1  ;;  %v14004_v9 = vpop.f32.mrf.mxu0  ;;  %7227 = vmatmul.mubr.bf16.gmra.mxu0 %v15595_v6 }
 0x7af   : > { %v8772_v3 = vrot.slane %v8771_v43, 4  ;;  %v8749_v36 = vmax.f32 %v8748_v60, %v5602_v23  ;;  %v8792_v16 = vmax.f32 %v8791_v35, %v6279_v12  ;;  %v5604_v51 = vadd.f32 %v5603_v17, %v13058_v21  ;;  %7236 = vmatprep.mubr.bf16.mxu0 %v15192_v44 }
 0x7b0   : > { %v5605_v25 = vpop.f32.mrf.mxu1  ;;  %v14009_v38 = vpop.f32.mrf.mxu0  ;;  %v6283_v31 = vadd.f32 %v14004_v9, %v13051_v19 }
 0x7b1   : > { %v8773_v46 = vmax.f32 %v8771_v43, %v8772_v3  ;;  %v8793_v45 = vrot.slane %v8792_v16, 4  ;;  %v8729_v53 = vmax.f32 %v8728_v1, %v5604_v51  ;;  %v5606_v39 = vadd.f32 %v5605_v25, %v13070_v30  ;;  %v15596_v43 = vld [vmem:[#allocation91_spill] sm:$0xff] }
 0x7b2   : > { %v14012_v26 = vpop.f32.mrf.mxu1  ;;  %v14014_v34 = vpop.f32.mrf.mxu0  ;;  %6554 = vmatmul.mubr.bf16.gmra.mxu1 %v15595_v6  ;;  %v6285_v22 = vadd.f32 %v14009_v38, %v13056_v41 }
 0x7b3   : > { %v8774_v18 = vrot.slane %v8773_v46, 2  ;;  %v8794_v7 = vmax.f32 %v8792_v16, %v8793_v45  ;;  %v8730_v59 = vrot.slane %v8729_v53, 4  ;;  %v8750_v48 = vmax.f32 %v8749_v36, %v5606_v39  ;;  %6563 = vmatprep.mubr.bf16.mxu1 %v15192_v44 }
 0x7b4   : > { %v14018_v32 = vpop.f32.mrf.mxu1  ;;  %v14020_v60 = vpop.f32.mrf.mxu0  ;;  %v6287_v61 = vadd.f32 %v14014_v34, %v13051_v19 }
 0x7b5   : > { %v8775_v35 = vmax.f32 %v8773_v46, %v8774_v18  ;;  %v8795_v57 = vrot.slane %v8794_v7, 2  ;;  %v8731_v47 = vmax.f32 %v8729_v53, %v8730_v59  ;;  %v8751_v8 = vrot.slane %v8750_v48, 4 }
 0x7b6   : > { %v14022_v29 = vpop.f32.mrf.mxu1  ;;  %v6292_v1 = vpop.f32.mrf.mxu0  ;;  %7237 = vmatmul.mubr.bf16.gmra.mxu0 %v15596_v43  ;;  %v8925_v20 = vmax.f32 %v6283_v31, %v6287_v61  ;;  %v5612_v38 = vadd.f32 %v14018_v32, %v13070_v30 }
 0x7b7   : > { %v8776_v23 = vrot.slane %v8775_v35, 1  ;;  %v8796_v12 = vmax.f32 %v8794_v7, %v8795_v57  ;;  %v8732_v17 = vrot.slane %v8731_v47, 2  ;;  %v8752_v6 = vmax.f32 %v8750_v48, %v8751_v8  ;;  %7246 = vmatprep.mubr.bf16.mxu0 %v15192_v44 }
 0x7b8   : > { %v5615_v3 = vpop.f32.mrf.mxu1  ;;  %v6294_v36 = vpop.f32.mrf.mxu0  ;;  %v6293_v56 = vadd.f32 %v6292_v1, %v13051_v19  ;;  %v5614_v50 = vadd.f32 %v14022_v29, %v13058_v21 }
 0x7b9   : > { %v8777_v16 = vmax.f32 %v8775_v35, %v8776_v23  ;;  %v8797_v51 = vrot.slane %v8796_v12, 1  ;;  %v8733_v25 = vmax.f32 %v8731_v47, %v8732_v17  ;;  %v8753_v46 = vrot.slane %v8752_v6, 2 }
 0x7ba   : > { %v5619_v45 = vpop.f32.mrf.mxu1  ;;  %v6296_v53 = vpop.f32.mrf.mxu0  ;;  %6564 = vmatmul.mubr.bf16.gmra.mxu1 %v15596_v43  ;;  %v15597_v43 = vld [vmem:[#allocation93_spill] sm:$0xff]  ;;  %v6295_v9 = vadd.f32 %v6294_v36, %v13056_v41  ;;  %v5616_v1 = vadd.f32 %v5615_v3, %v13070_v30  ;;  %v8926_v54 = vmax.f32 %v8925_v20, %v6293_v56 }
 0x7bb   : > { %v14029_v39 = vsel %vm9133_vm6, %v8777_v16, %v13913_v37  ;;  %v8798_v18 = vmax.f32 %v8796_v12, %v8797_v51  ;;  %v8734_v7 = vrot.slane %v8733_v25, 1  ;;  %v8754_v59 = vmax.f32 %v8752_v6, %v8753_v46  ;;  %6573 = vmatprep.mubr.bf16.mxu1 %v15192_v44 }
 0x7bc   : > { %v5621_v48 = vpop.f32.mrf.mxu1  ;;  %v6298_v57 = vpop.f32.mrf.mxu0  ;;  %v6297_v52 = vadd.f32 %v6296_v53, %v13051_v19  ;;  %v5620_v15 = vadd.f32 %v5619_v45, %v13058_v21 }
 0x7bd   : > { %v14034_v35 = vsel %vm9133_vm6, %v8798_v18, %v13920_v24  ;;  %v8735_v47 = vmax.f32 %v8733_v25, %v8734_v7  ;;  %v8755_v8 = vrot.slane %v8754_v59, 1  ;;  %v6299_v31 = vadd.f32 %v6298_v57, %v13056_v41 }
 0x7be   : > { %v5623_v23 = vpop.f32.mrf.mxu1  ;;  %v6302_v17 = vpop.f32.mrf.mxu0  ;;  %7247 = vmatmul.mubr.bf16.gmra.mxu0 %v15597_v43  ;;  %v5622_v3 = vadd.f32 %v5621_v48, %v13070_v30  ;;  %v8904_v57 = vmax.f32 %v5612_v38, %v5616_v1  ;;  %v15600_v48 = vld [vmem:[#allocation97_spill] sm:$0xff] }
 0x7bf   : > { %v14039_v37 = vsel %vm9133_vm6, %v8735_v47, %v13927_v62  ;;  %v8756_v12 = vmax.f32 %v8754_v59, %v8755_v8  ;;  %7256 = vmatprep.mubr.bf16.mxu0 %v15192_v44  ;;  %v15598_v59 = vld [vmem:[#allocation75_spill] sm:$0xff]  ;;  %v6303_v61 = vadd.f32 %v6302_v17, %v13051_v19  ;;  %v5624_v36 = vadd.f32 %v5623_v23, %v13058_v21 }
 0x7c0   : > { %v5625_v6 = vpop.f32.mrf.mxu1  ;;  %v6304_v16 = vpop.f32.mrf.mxu0 }
 0x7c1   : > { %v14044_v51 = vsel %vm9133_vm6, %v8756_v12, %v13934_v63  ;;  %v6305_v20 = vadd.f32 %v6304_v16, %v13056_v41 }
 0x7c2   : > { %v5629_v24 = vpop.f32.mrf.mxu1  ;;  %v6306_v25 = vpop.f32.mrf.mxu0  ;;  %6574 = vmatmul.mubr.bf16.gmra.mxu1 %v15597_v43 }
 0x7c3   : > { %6583 = vmatprep.mubr.bf16.mxu1 %v15192_v44  ;;  %v6307_v56 = vadd.f32 %v6306_v25, %v13051_v19  ;;  %v5630_v32 = vadd.f32 %v5629_v24, %v13058_v21 }
 0x7c4   : > { %v14048_v46 = vpop.f32.mrf.mxu1  ;;  %v6308_v18 = vpop.f32.mrf.mxu0 }
 0x7c5   : > { %v6309_v10 = vadd.f32 %v6308_v18, %v13056_v41 }
 0x7c6   : > { %v14050_v62 = vpop.f32.mrf.mxu1  ;;  %v6312_v7 = vpop.f32.mrf.mxu0  ;;  %7257 = vmatmul.mubr.bf16.gmra.mxu0 %v15598_v59 }
 0x7c7   : > { %7266 = vmatprep.mubr.bf16.mxu0 %v15192_v44 }
 0x7c8   : > { %v14054_v47 = vpop.f32.mrf.mxu1  ;;  %v14056_v63 = vpop.f32.mrf.mxu0 }
 0x7c9   : > { %v6315_v1 = vadd.f32 %v14056_v63, %v13056_v41 }
 0x7ca   : > { %v14058_v8 = vpop.f32.mrf.mxu1  ;;  %v6316_v12 = vpop.f32.mrf.mxu0  ;;  %6584 = vmatmul.mubr.bf16.gmra.mxu1 %v15598_v59  ;;  %v6289_v59 = vadd.f32 %v14020_v60, %v13056_v41  ;;  %v5610_v60 = vadd.f32 %v14012_v26, %v13058_v21 }
 0x7cb   : > { %6593 = vmatprep.mubr.bf16.mxu1 %v15192_v44  ;;  %v6317_v18 = vadd.f32 %v6316_v12, %v13051_v19 }
 0x7cc   : > { %v14062_v43 = vpop.f32.mrf.mxu1  ;;  %v14064_v40 = vpop.f32.mrf.mxu0  ;;  %v8946_v4 = vmax.f32 %v6285_v22, %v6289_v59  ;;  %v8883_v26 = vmax.f32 %v5610_v60, %v5614_v50  ;;  %v8927_v22 = vmax.f32 %v8926_v54, %v6297_v52  ;;  %v5626_v59 = vadd.f32 %v5625_v6, %v13070_v30 }
 0x7cd   : > { %v8905_v54 = vmax.f32 %v8904_v57, %v5622_v3  ;;  %v5634_v6 = vadd.f32 %v14050_v62, %v13058_v21 }
 0x7ce   : > { %v14068_v14 = vpop.f32.mrf.mxu1  ;;  %v14070_v0 = vpop.f32.mrf.mxu0  ;;  %7267 = vmatmul.mubr.bf16.gmra.mxu0 %v15599_v49  ;;  %v8884_v17 = vmax.f32 %v8883_v26, %v5620_v15  ;;  %v8928_v58 = vmax.f32 %v8927_v22, %v6303_v61  ;;  %v5632_v15 = vadd.f32 %v14048_v46, %v13070_v30  ;;  %v5636_v61 = vadd.f32 %v14054_v47, %v13070_v30 }
 0x7cf   : > { %7276 = vmatprep.mubr.bf16.mxu0 %v15192_v44  ;;  %v5640_v46 = vadd.f32 %v14058_v8, %v13058_v21  ;;  %v6323_v63 = vadd.f32 %v14070_v0, %v13051_v19  ;;  %v5642_v47 = vadd.f32 %v14062_v43, %v13070_v30  ;;  %v5644_v8 = vadd.f32 %v14068_v14, %v13058_v21  ;;  %v15601_v14 = vld [vmem:[#allocation98_spill] sm:$0xff] }
 0x7d0   : > { %v14081_v34 = vpop.f32.mrf.mxu1  ;;  %v14083_v27 = vpop.f32.mrf.mxu0  ;;  %v8885_v52 = vmax.f32 %v8884_v17, %v5624_v36 }
 0x7d1   : > { %v5646_v17 = vadd.f32 %v14081_v34, %v13070_v30 }
 0x7d2   : > { %v14093_v29 = vpop.f32.mrf.mxu1  ;;  %v6326_v28 = vpop.f32.mrf.mxu0  ;;  %6594 = vmatmul.mubr.bf16.gmra.mxu1 %v15599_v49  ;;  %v8947_v49 = vmax.f32 %v8946_v4, %v6295_v9  ;;  %v6313_v4 = vadd.f32 %v6312_v7, %v13051_v19  ;;  %v8929_v9 = vmax.f32 %v8928_v58, %v6307_v56  ;;  %v8906_v7 = vmax.f32 %v8905_v54, %v5626_v59 }
 0x7d3   : > { %6603 = vmatprep.mubr.bf16.mxu1 %v15192_v44  ;;  %v6319_v58 = vadd.f32 %v14064_v40, %v13056_v41  ;;  %v6325_v40 = vadd.f32 %v14083_v27, %v13056_v41  ;;  %v6327_v56 = vadd.f32 %v6326_v28, %v13051_v19  ;;  %v5650_v43 = vadd.f32 %v14093_v29, %v13058_v21 }
 0x7d4   : > { %v14103_v45 = vpop.f32.mrf.mxu1  ;;  %v6328_v53 = vpop.f32.mrf.mxu0  ;;  %v8948_v23 = vmax.f32 %v8947_v49, %v6299_v31  ;;  %v8886_v31 = vmax.f32 %v8885_v52, %v5630_v32  ;;  %v8930_v3 = vmax.f32 %v8929_v9, %v6313_v4  ;;  %v8907_v12 = vmax.f32 %v8906_v7, %v5632_v15 }
 0x7d5   : > { %v6329_v4 = vadd.f32 %v6328_v53, %v13056_v41  ;;  %v5652_v34 = vadd.f32 %v14103_v45, %v13070_v30 }
 0x7d6   : > { %v5653_v50 = vpop.f32.mrf.mxu1  ;;  %v6332_v60 = vpop.f32.mrf.mxu0  ;;  %7277 = vmatmul.mubr.bf16.gmra.mxu0 %v15600_v48  ;;  %v8949_v25 = vmax.f32 %v8948_v23, %v6305_v20  ;;  %v8887_v36 = vmax.f32 %v8886_v31, %v5634_v6  ;;  %v8931_v20 = vmax.f32 %v8930_v3, %v6317_v18  ;;  %v8908_v0 = vmax.f32 %v8907_v12, %v5636_v61 }
 0x7d7   : > { %7286 = vmatprep.mubr.bf16.mxu0 %v15192_v44  ;;  %v6333_v27 = vadd.f32 %v6332_v60, %v13051_v19  ;;  %v5654_v52 = vadd.f32 %v5653_v50, %v13058_v21 }
 0x7d8   : > { %v5655_v16 = vpop.f32.mrf.mxu1  ;;  %v6334_v24 = vpop.f32.mrf.mxu0  ;;  %v8950_v62 = vmax.f32 %v8949_v25, %v6309_v10  ;;  %v8888_v57 = vmax.f32 %v8887_v36, %v5640_v46  ;;  %v8932_v23 = vmax.f32 %v8931_v20, %v6323_v63  ;;  %v8909_v28 = vmax.f32 %v8908_v0, %v5642_v47  ;;  %v15602_v0 = vld [vmem:[#allocation70_spill] sm:$0xff] }
 0x7d9   : > { %v6335_v9 = vadd.f32 %v6334_v24, %v13056_v41  ;;  %v5656_v60 = vadd.f32 %v5655_v16, %v13070_v30 }
 0x7da   : > { %v5659_v38 = vpop.f32.mrf.mxu1  ;;  %v6336_v26 = vpop.f32.mrf.mxu0  ;;  %6604 = vmatmul.mubr.bf16.gmra.mxu1 %v15600_v48  ;;  %v8951_v10 = vmax.f32 %v8950_v62, %v6315_v1  ;;  %v8889_v54 = vmax.f32 %v8888_v57, %v5644_v8  ;;  %v8933_v25 = vmax.f32 %v8932_v23, %v6327_v56  ;;  %v8910_v53 = vmax.f32 %v8909_v28, %v5646_v17 }
 0x7db   : > { %6613 = vmatprep.mubr.bf16.mxu1 %v15192_v44  ;;  %v6337_v1 = vadd.f32 %v6336_v26, %v13051_v19  ;;  %v5660_v7 = vadd.f32 %v5659_v38, %v13058_v21 }
 0x7dc   : > { %v5661_v49 = vpop.f32.mrf.mxu1  ;;  %v6338_v22 = vpop.f32.mrf.mxu0  ;;  %v8952_v48 = vmax.f32 %v8951_v10, %v6319_v58  ;;  %v8890_v18 = vmax.f32 %v8889_v54, %v5650_v43  ;;  %v8934_v50 = vmax.f32 %v8933_v25, %v6333_v27  ;;  %v8911_v24 = vmax.f32 %v8910_v53, %v5652_v34 }
 0x7dd   : > { %v6339_v46 = vadd.f32 %v6338_v22, %v13056_v41  ;;  %v5662_v3 = vadd.f32 %v5661_v49, %v13070_v30 }
 0x7de   : > { %v5663_v59 = vpop.f32.mrf.mxu1  ;;  %v6342_v32 = vpop.f32.mrf.mxu0  ;;  %7287 = vmatmul.mubr.bf16.gmra.mxu0 %v15601_v14  ;;  %v8953_v6 = vmax.f32 %v8952_v48, %v6325_v40  ;;  %v8891_v26 = vmax.f32 %v8890_v18, %v5654_v52  ;;  %v8935_v12 = vmax.f32 %v8934_v50, %v6337_v1  ;;  %v8912_v8 = vmax.f32 %v8911_v24, %v5656_v60 }
 0x7df   : > { %7296 = vmatprep.mubr.bf16.mxu0 %v15192_v44  ;;  %v6343_v62 = vadd.f32 %v6342_v32, %v13051_v19  ;;  %v5664_v16 = vadd.f32 %v5663_v59, %v13058_v21 }
 0x7e0   : > { %v5665_v29 = vpop.f32.mrf.mxu1  ;;  %v6344_v15 = vpop.f32.mrf.mxu0  ;;  %v8954_v45 = vmax.f32 %v8953_v6, %v6329_v4  ;;  %v8892_v22 = vmax.f32 %v8891_v26, %v5660_v7  ;;  %v8913_v59 = vmax.f32 %v8912_v8, %v5662_v3 }
 0x7e1   : > { %v6345_v36 = vadd.f32 %v6344_v15, %v13056_v41  ;;  %v5666_v10 = vadd.f32 %v5665_v29, %v13070_v30  ;;  %v8936_v57 = vmax.f32 %v8935_v12, %v6343_v62 }
 0x7e2   : > { %v5669_v31 = vpop.f32.mrf.mxu1  ;;  %v6346_v61 = vpop.f32.mrf.mxu0  ;;  %6614 = vmatmul.mubr.bf16.gmra.mxu1 %v15601_v14  ;;  %v8955_v63 = vmax.f32 %v8954_v45, %v6335_v9  ;;  %v8893_v32 = vmax.f32 %v8892_v22, %v5664_v16 }
 0x7e3   : > { %6623 = vmatprep.mubr.bf16.mxu1 %v15192_v44  ;;  %v6347_v47 = vadd.f32 %v6346_v61, %v13051_v19  ;;  %v5670_v20 = vadd.f32 %v5669_v31, %v13058_v21  ;;  %v8914_v34 = vmax.f32 %v8913_v59, %v5666_v10  ;;  %v15603_v61 = vld [vmem:[#allocation99_spill] sm:$0xff] }
 0x7e4   : > { %v5671_v58 = vpop.f32.mrf.mxu1  ;;  %v6348_v38 = vpop.f32.mrf.mxu0  ;;  %v8956_v49 = vmax.f32 %v8955_v63, %v6339_v46  ;;  %v4681_v45 = vsub.s32 6, %v15603_v61 }
 0x7e5   : > { %v6349_v17 = vadd.f32 %v6348_v38, %v13056_v41  ;;  %v5672_v14 = vadd.f32 %v5671_v58, %v13070_v30  ;;  %v8937_v28 = vmax.f32 %v8936_v57, %v6347_v47  ;;  %v8894_v52 = vmax.f32 %v8893_v32, %v5670_v20  ;;  %v15604_v58 = vld [vmem:[#allocation117_spill] sm:$0xff] }
 0x7e6   : > { %v5673_v40 = vpop.f32.mrf.mxu1  ;;  %v6352_v56 = vpop.f32.mrf.mxu0  ;;  %7297 = vmatmul.mubr.bf16.gmra.mxu0 %v15602_v0  ;;  %v8957_v27 = vmax.f32 %v8956_v49, %v6345_v36  ;;  %v4673_v38 = vsub.s32 4, %v15603_v61 }
 0x7e7   : > { %v6353_v43 = vadd.f32 %v6352_v56, %v13051_v19  ;;  %7306 = vmatprep.mubr.bf16.mxu0 %v15192_v44  ;;  %v5674_v48 = vadd.f32 %v5673_v40, %v13058_v21  ;;  %v8915_v18 = vmax.f32 %v8914_v34, %v5672_v14  ;;  %v4677_v40 = vsub.s32 5, %v15603_v61 }
 0x7e8   : > { %v5675_v23 = vpop.f32.mrf.mxu1  ;;  %v6354_v4 = vpop.f32.mrf.mxu0  ;;  %v8958_v25 = vmax.f32 %v8957_v27, %v6349_v17 }
 0x7e9   : > { %v6355_v54 = vadd.f32 %v6354_v4, %v13056_v41  ;;  %v5676_v29 = vadd.f32 %v5675_v23, %v13070_v30  ;;  %v8938_v9 = vmax.f32 %v8937_v28, %v6353_v43  ;;  %v8895_v60 = vmax.f32 %v8894_v52, %v5674_v48 }
 0x7ea   : > { %v5679_v15 = vpop.f32.mrf.mxu1  ;;  %v6356_v6 = vpop.f32.mrf.mxu0  ;;  %6624 = vmatmul.mubr.bf16.gmra.mxu1 %v15602_v0 }
 0x7eb   : > { %v5680_v1 = vadd.f32 %v5679_v15, %v13058_v21  ;;  %v6357_v53 = vadd.f32 %v6356_v6, %v13051_v19  ;;  %6633 = vmatprep.mubr.bf16.mxu1 %v15192_v44  ;;  %v8959_v50 = vmax.f32 %v8958_v25, %v6355_v54  ;;  %v8916_v26 = vmax.f32 %v8915_v18, %v5676_v29 }
 0x7ec   : > { %v5681_v7 = vpop.f32.mrf.mxu1  ;;  %v6358_v31 = vpop.f32.mrf.mxu0  ;;  %v4685_v19 = vsub.s32 7, %v15603_v61 }
 0x7ed   : > { %v8939_v46 = vmax.f32 %v8938_v9, %v6357_v53  ;;  %v5682_v62 = vadd.f32 %v5681_v7, %v13070_v30  ;;  %v6359_v24 = vadd.f32 %v6358_v31, %v13056_v41  ;;  %v8896_v63 = vmax.f32 %v8895_v60, %v5680_v1  ;;  %v9905_v41 = vld [vmem:[%s15050_s6] sm:$0xff]  ;;  %v15605_v60 = vld [vmem:[#allocation13_spill] sm:$0xff] }
 0x7ee   : > { %v5683_v3 = vpop.f32.mrf.mxu1  ;;  %v7068_v16 = vpop.f32.mrf.mxu0  ;;  %7307 = vmatmul.mubr.bf16.gmra.mxu0 %v15604_v58  ;;  %v14185_v22 = vrot.slane %v9905_v41, %v4681_v45  ;;  %v14189_v17 = vrot.slane %v9905_v41, %v4685_v19 }
 0x7ef   : > { %v8940_v12 = vrot.slane %v8939_v46, 4  ;;  %v8960_v36 = vmax.f32 %v8959_v50, %v6359_v24  ;;  %v5684_v47 = vadd.f32 %v5683_v3, %v13058_v21  ;;  %7316 = vmatprep.mubr.bf16.mxu0 %v15192_v44  ;;  %v8917_v8 = vmax.f32 %v8916_v26, %v5682_v62 }
 0x7f0   : > { %v5685_v10 = vpop.f32.mrf.mxu1  ;;  %v7070_v20 = vpop.f32.mrf.mxu0  ;;  %v14191_v21 = vrot.slane %v9905_v41, %v4673_v38  ;;  %v7069_v4 = vadd.f32 %v7068_v16, %v14185_v22 }
 0x7f1   : > { %v8941_v56 = vmax.f32 %v8939_v46, %v8940_v12  ;;  %v8961_v0 = vrot.slane %v8960_v36, 4  ;;  %v8897_v49 = vmax.f32 %v8896_v63, %v5684_v47  ;;  %v5686_v57 = vadd.f32 %v5685_v10, %v13070_v30 }
 0x7f2   : > { %v6395_v43 = vpop.f32.mrf.mxu1  ;;  %6634 = vmatmul.mubr.bf16.gmra.mxu1 %v15604_v58  ;;  %v7072_v59 = vpop.f32.mrf.mxu0  ;;  %v14197_v30 = vrot.slane %v9905_v41, %v4677_v40  ;;  %v7071_v6 = vadd.f32 %v7070_v20, %v14189_v17  ;;  %v9053_v58 = vld [vmem:[#allocation3 + $0x10] sm:$0xff] }
 0x7f3   : > { %v8942_v32 = vrot.slane %v8941_v56, 2  ;;  %v8962_v14 = vmax.f32 %v8960_v36, %v8961_v0  ;;  %v8898_v48 = vrot.slane %v8897_v49, 4  ;;  %v8918_v23 = vmax.f32 %v8917_v8, %v5686_v57  ;;  %6643 = vmatprep.mubr.bf16.mxu1 %v15192_v44 }
 0x7f4   : > { %v7073_v27 = vadd.f32 %v7072_v59, %v14185_v22  ;;  %v6397_v28 = vpop.f32.mrf.mxu1  ;;  %v7074_v54 = vpop.f32.mrf.mxu0  ;;  %v6396_v25 = vadd.f32 %v6395_v43, %v14191_v21 }
 0x7f5   : > { %v8943_v34 = vmax.f32 %v8941_v56, %v8942_v32  ;;  %v8963_v52 = vrot.slane %v8962_v14, 2  ;;  %v8899_v29 = vmax.f32 %v8897_v49, %v8898_v48  ;;  %v8919_v15 = vrot.slane %v8918_v23, 4  ;;  %v9054_v56 = vld [vmem:[#allocation3 + $0x18] sm:$0xff] }
 0x7f6   : > { %v7833_v9 = vmax.f32 %v7069_v4, %v7073_v27  ;;  %v7075_v1 = vadd.f32 %v7074_v54, %v14189_v17  ;;  %v6399_v53 = vpop.f32.mrf.mxu1  ;;  %v7078_v18 = vpop.f32.mrf.mxu0  ;;  %7317 = vmatmul.mubr.bf16.gmra.mxu0 %v15605_v60  ;;  %v6398_v50 = vadd.f32 %v6397_v28, %v14197_v30  ;;  %v9051_v27 = vld [vmem:[#allocation3] sm:$0xff] }
 0x7f7   : > { %v8944_v7 = vrot.slane %v8943_v34, 1  ;;  %v8964_v31 = vmax.f32 %v8962_v14, %v8963_v52  ;;  %v8900_v61 = vrot.slane %v8899_v29, 2  ;;  %v8920_v45 = vmax.f32 %v8918_v23, %v8919_v15  ;;  %7326 = vmatprep.mubr.bf16.mxu0 %v15192_v44 }
 0x7f8   : > { %v7854_v46 = vmax.f32 %v7071_v6, %v7075_v1  ;;  %v6400_v62 = vadd.f32 %v6399_v53, %v14191_v21  ;;  %v7079_v24 = vadd.f32 %v7078_v18, %v14185_v22  ;;  %v6401_v26 = vpop.f32.mrf.mxu1  ;;  %v7080_v3 = vpop.f32.mrf.mxu0  ;;  %v9052_v1 = vld [vmem:[#allocation3 + $0x8] sm:$0xff] }
 0x7f9   : > { %v8945_v16 = vmax.f32 %v8943_v34, %v8944_v7  ;;  %v8965_v19 = vrot.slane %v8964_v31, 1  ;;  %v8901_v38 = vmax.f32 %v8899_v29, %v8900_v61  ;;  %v8921_v63 = vrot.slane %v8920_v45, 2 }
 0x7fa   : > { %v7791_v12 = vmax.f32 %v6396_v25, %v6400_v62  ;;  %v7834_v36 = vmax.f32 %v7833_v9, %v7079_v24  ;;  %v6402_v47 = vadd.f32 %v6401_v26, %v14197_v30  ;;  %v7081_v8 = vadd.f32 %v7080_v3, %v14189_v17  ;;  %v6405_v41 = vpop.f32.mrf.mxu1  ;;  %6644 = vmatmul.mubr.bf16.gmra.mxu1 %v15605_v60  ;;  %v7082_v10 = vpop.f32.mrf.mxu0  ;;  %v15606_v25 = vld [vmem:[#allocation115_spill] sm:$0xff] }
 0x7fb   : > { %v9150_v20 = vsel %vm9135_vm7, %v8945_v16, %v14029_v39  ;;  %v8966_v40 = vmax.f32 %v8964_v31, %v8965_v19  ;;  %v8902_v0 = vrot.slane %v8901_v38, 1  ;;  %v8922_v49 = vmax.f32 %v8920_v45, %v8921_v63  ;;  %6653 = vmatprep.mubr.bf16.mxu1 %v15192_v44 }
 0x7fc   : > { %v9196_v57 = vmax.f32 %v9053_v58, %v9150_v20  ;;  %v7812_v43 = vmax.f32 %v6398_v50, %v6402_v47  ;;  %v7855_v59 = vmax.f32 %v7854_v46, %v7081_v8  ;;  %v6406_v32 = vadd.f32 %v6405_v41, %v14191_v21  ;;  %v6407_v14 = vpop.f32.mrf.mxu1  ;;  %v7084_v48 = vpop.f32.mrf.mxu0 }
 0x7fd   : > { %v9157_v23 = vsel %vm9135_vm7, %v8966_v40, %v14034_v35  ;;  %v8903_v4 = vmax.f32 %v8901_v38, %v8902_v0  ;;  %v8923_v28 = vrot.slane %v8922_v49, 1  ;;  %v7083_v39 = vadd.f32 %v7082_v10, %v14185_v22 }
 0x7fe   : > { %9204 = vst [vmem:[#allocation3 + $0x10] sm:$0xff] %v9196_v57  ;;  %v9197_v54 = vmax.f32 %v9054_v56, %v9157_v23  ;;  %v7792_v34 = vmax.f32 %v7791_v12, %v6406_v32  ;;  %v6408_v52 = vadd.f32 %v6407_v14, %v14197_v30  ;;  %v7085_v29 = vadd.f32 %v7084_v48, %v14189_v17  ;;  %v6409_v15 = vpop.f32.mrf.mxu1  ;;  %v7088_v6 = vpop.f32.mrf.mxu0 }
 0x7ff   : > { %7327 = vmatmul.mubr.bf16.gmra.mxu0 %v15606_v25  ;;  %v9136_v9 = vsel %vm9135_vm7, %v8903_v4, %v14039_v37  ;;  %v8924_v35 = vmax.f32 %v8922_v49, %v8923_v28  ;;  %v7835_v53 = vmax.f32 %v7834_v36, %v7083_v39  ;;  %v6410_v18 = vadd.f32 %v6409_v15, %v14191_v21 }
 0x800   : > { %7336 = vmatprep.mubr.bf16.mxu0 %v15192_v44  ;;  %9205 = vst [vmem:[#allocation3 + $0x18] sm:$0xff] %v9197_v54  ;;  %v9194_v60 = vmax.f32 %v9051_v27, %v9136_v9  ;;  %v7813_v7 = vmax.f32 %v7812_v43, %v6408_v52  ;;  %v7856_v31 = vmax.f32 %v7855_v59, %v7085_v29  ;;  %v6411_v45 = vpop.f32.mrf.mxu1  ;;  %v7090_v50 = vpop.f32.mrf.mxu0 }
 0x801   : > { %v7089_v61 = vadd.f32 %v7088_v6, %v14185_v22  ;;  %v9143_v46 = vsel %vm9135_vm7, %v8924_v35, %v14044_v51  ;;  %v7793_v62 = vmax.f32 %v7792_v34, %v6410_v18  ;;  %v6412_v37 = vadd.f32 %v6411_v45, %v14197_v30 }
 0x802   : > { %v7091_v24 = vadd.f32 %v7090_v50, %v14189_v17  ;;  %9202 = vst [vmem:[#allocation3] sm:$0xff] %v9194_v60  ;;  %v9195_v26 = vmax.f32 %v9052_v1, %v9143_v46  ;;  %v6415_v16 = vpop.f32.mrf.mxu1  ;;  %6654 = vmatmul.mubr.bf16.gmra.mxu1 %v15606_v25  ;;  %v7092_v58 = vpop.f32.mrf.mxu0 }
 0x803   : > { %v7836_v3 = vmax.f32 %v7835_v53, %v7089_v61  ;;  %v7814_v19 = vmax.f32 %v7813_v7, %v6412_v37  ;;  %v6416_v63 = vadd.f32 %v6415_v16, %v14191_v21  ;;  %v7093_v12 = vadd.f32 %v7092_v58, %v14185_v22  ;;  %6663 = vmatprep.mubr.bf16.mxu1 %v15192_v44 }
 0x804   : > { %v7857_v38 = vmax.f32 %v7856_v31, %v7091_v24  ;;  %9203 = vst [vmem:[#allocation3 + $0x8] sm:$0xff] %v9195_v26  ;;  %v6417_v51 = vpop.f32.mrf.mxu1  ;;  %v7094_v36 = vpop.f32.mrf.mxu0 }
 0x805   : > { %v7794_v47 = vmax.f32 %v7793_v62, %v6416_v63  ;;  %v7837_v8 = vmax.f32 %v7836_v3, %v7093_v12  ;;  %v6418_v41 = vadd.f32 %v6417_v51, %v14197_v30  ;;  %v7095_v10 = vadd.f32 %v7094_v36, %v14189_v17 }
 0x806   : > { %v6419_v20 = vpop.f32.mrf.mxu1  ;;  %v7098_v40 = vpop.f32.mrf.mxu0 }
 0x807   : > { %7337 = vmatmul.mubr.bf16.gmra.mxu0 %v13120_v5  ;;  %v7815_v56 = vmax.f32 %v7814_v19, %v6418_v41  ;;  %v7858_v0 = vmax.f32 %v7857_v38, %v7095_v10  ;;  %v6420_v49 = vadd.f32 %v6419_v20, %v14191_v21  ;;  %v7099_v57 = vadd.f32 %v7098_v40, %v14185_v22 }
 0x808   : > { %7346 = vmatprep.mubr.bf16.mxu0 %v15192_v44  ;;  %v6421_v43 = vpop.f32.mrf.mxu1  ;;  %v7100_v59 = vpop.f32.mrf.mxu0 }
 0x809   : > { %v7795_v32 = vmax.f32 %v7794_v47, %v6420_v49  ;;  %v7838_v14 = vmax.f32 %v7837_v8, %v7099_v57  ;;  %v6422_v48 = vadd.f32 %v6421_v43, %v14197_v30  ;;  %v7101_v23 = vadd.f32 %v7100_v59, %v14189_v17 }
 0x80a   : > { %v6425_v4 = vpop.f32.mrf.mxu1  ;;  %6664 = vmatmul.mubr.bf16.gmra.mxu1 %v13120_v5  ;;  %v7102_v27 = vpop.f32.mrf.mxu0 }
 0x80b   : > { %v7816_v28 = vmax.f32 %v7815_v56, %v6422_v48  ;;  %v7859_v39 = vmax.f32 %v7858_v0, %v7101_v23  ;;  %v6426_v54 = vadd.f32 %v6425_v4, %v14191_v21  ;;  %v7103_v34 = vadd.f32 %v7102_v27, %v14185_v22  ;;  %6673 = vmatprep.mubr.bf16.mxu1 %v15192_v44 }
 0x80c   : > { %v6427_v52 = vpop.f32.mrf.mxu1  ;;  %v7104_v29 = vpop.f32.mrf.mxu0 }
 0x80d   : > { %v7796_v15 = vmax.f32 %v7795_v32, %v6426_v54  ;;  %v7839_v6 = vmax.f32 %v7838_v14, %v7103_v34  ;;  %v6428_v25 = vadd.f32 %v6427_v52, %v14197_v30  ;;  %v7105_v9 = vadd.f32 %v7104_v29, %v14189_v17 }
 0x80e   : > { %v6429_v35 = vpop.f32.mrf.mxu1  ;;  %v7108_v1 = vpop.f32.mrf.mxu0 }
 0x80f   : > { %7347 = vmatmul.mubr.bf16.gmra.mxu0 %v13140_v55  ;;  %v7817_v5 = vmax.f32 %v7816_v28, %v6428_v25  ;;  %v7860_v53 = vmax.f32 %v7859_v39, %v7105_v9  ;;  %v6430_v18 = vadd.f32 %v6429_v35, %v14191_v21  ;;  %v7109_v60 = vadd.f32 %v7108_v1, %v14185_v22 }
 0x810   : > { %7356 = vmatprep.mubr.bf16.mxu0 %v15192_v44  ;;  %v6431_v7 = vpop.f32.mrf.mxu1  ;;  %v7110_v31 = vpop.f32.mrf.mxu0 }
 0x811   : > { %v7797_v61 = vmax.f32 %v7796_v15, %v6430_v18  ;;  %v7840_v45 = vmax.f32 %v7839_v6, %v7109_v60  ;;  %v6432_v50 = vadd.f32 %v6431_v7, %v14197_v30  ;;  %v7111_v46 = vadd.f32 %v7110_v31, %v14189_v17 }
 0x812   : > { %v6435_v62 = vpop.f32.mrf.mxu1  ;;  %6674 = vmatmul.mubr.bf16.gmra.mxu1 %v13140_v55  ;;  %v7112_v37 = vpop.f32.mrf.mxu0 }
 0x813   : > { %v7818_v24 = vmax.f32 %v7817_v5, %v6432_v50  ;;  %v7861_v26 = vmax.f32 %v7860_v53, %v7111_v46  ;;  %v6436_v3 = vadd.f32 %v6435_v62, %v14191_v21  ;;  %v7113_v16 = vadd.f32 %v7112_v37, %v14185_v22  ;;  %6683 = vmatprep.mubr.bf16.mxu1 %v15192_v44 }
 0x814   : > { %v6437_v58 = vpop.f32.mrf.mxu1  ;;  %v7114_v19 = vpop.f32.mrf.mxu0 }
 0x815   : > { %v7798_v38 = vmax.f32 %v7797_v61, %v6436_v3  ;;  %v7841_v63 = vmax.f32 %v7840_v45, %v7113_v16  ;;  %v6438_v12 = vadd.f32 %v6437_v58, %v14197_v30  ;;  %v7115_v51 = vadd.f32 %v7114_v19, %v14189_v17 }
 0x816   : > { %v6439_v36 = vpop.f32.mrf.mxu1  ;;  %v7118_v47 = vpop.f32.mrf.mxu0 }
 0x817   : > { %7357 = vmatmul.mubr.bf16.gmra.mxu0 %v13156_v2  ;;  %v7819_v55 = vmax.f32 %v7818_v24, %v6438_v12  ;;  %v7862_v8 = vmax.f32 %v7861_v26, %v7115_v51  ;;  %v6440_v41 = vadd.f32 %v6439_v36, %v14191_v21  ;;  %v7119_v10 = vadd.f32 %v7118_v47, %v14185_v22 }
 0x818   : > { %7366 = vmatprep.mubr.bf16.mxu0 %v15192_v44  ;;  %v6441_v20 = vpop.f32.mrf.mxu1  ;;  %v7120_v40 = vpop.f32.mrf.mxu0 }
 0x819   : > { %v7799_v56 = vmax.f32 %v7798_v38, %v6440_v41  ;;  %v7842_v0 = vmax.f32 %v7841_v63, %v7119_v10  ;;  %v6442_v49 = vadd.f32 %v6441_v20, %v14197_v30  ;;  %v7121_v57 = vadd.f32 %v7120_v40, %v14189_v17 }
 0x81a   : > { %v6445_v43 = vpop.f32.mrf.mxu1  ;;  %6684 = vmatmul.mubr.bf16.gmra.mxu1 %v13156_v2  ;;  %v7122_v59 = vpop.f32.mrf.mxu0 }
 0x81b   : > { %v7820_v32 = vmax.f32 %v7819_v55, %v6442_v49  ;;  %v7863_v14 = vmax.f32 %v7862_v8, %v7121_v57  ;;  %v6446_v48 = vadd.f32 %v6445_v43, %v14191_v21  ;;  %v7123_v23 = vadd.f32 %v7122_v59, %v14185_v22  ;;  %6693 = vmatprep.mubr.bf16.mxu1 %v15192_v44 }
 0x81c   : > { %v6447_v4 = vpop.f32.mrf.mxu1  ;;  %v7124_v27 = vpop.f32.mrf.mxu0 }
 0x81d   : > { %v7800_v28 = vmax.f32 %v7799_v56, %v6446_v48  ;;  %v7843_v39 = vmax.f32 %v7842_v0, %v7123_v23  ;;  %v6448_v54 = vadd.f32 %v6447_v4, %v14197_v30  ;;  %v7125_v34 = vadd.f32 %v7124_v27, %v14189_v17 }
 0x81e   : > { %v6449_v52 = vpop.f32.mrf.mxu1  ;;  %v7128_v29 = vpop.f32.mrf.mxu0 }
 0x81f   : > { %7367 = vmatmul.mubr.bf16.gmra.mxu0 %v13176_v11  ;;  %v7821_v2 = vmax.f32 %v7820_v32, %v6448_v54  ;;  %v7864_v15 = vmax.f32 %v7863_v14, %v7125_v34  ;;  %v6450_v6 = vadd.f32 %v6449_v52, %v14191_v21  ;;  %v7129_v25 = vadd.f32 %v7128_v29, %v14185_v22 }
 0x820   : > { %7376 = vmatprep.mubr.bf16.mxu0 %v15192_v44  ;;  %v6451_v9 = vpop.f32.mrf.mxu1  ;;  %v7130_v35 = vpop.f32.mrf.mxu0 }
 0x821   : > { %v7801_v1 = vmax.f32 %v7800_v28, %v6450_v6  ;;  %v7844_v5 = vmax.f32 %v7843_v39, %v7129_v25  ;;  %v6452_v53 = vadd.f32 %v6451_v9, %v14197_v30  ;;  %v7131_v18 = vadd.f32 %v7130_v35, %v14189_v17 }
 0x822   : > { %v6455_v60 = vpop.f32.mrf.mxu1  ;;  %6694 = vmatmul.mubr.bf16.gmra.mxu1 %v13176_v11  ;;  %v7132_v7 = vpop.f32.mrf.mxu0 }
 0x823   : > { %v7822_v31 = vmax.f32 %v7821_v2, %v6452_v53  ;;  %v7865_v61 = vmax.f32 %v7864_v15, %v7131_v18  ;;  %v6456_v45 = vadd.f32 %v6455_v60, %v14191_v21  ;;  %v7133_v50 = vadd.f32 %v7132_v7, %v14185_v22  ;;  %6703 = vmatprep.mubr.bf16.mxu1 %v15192_v44 }
 0x824   : > { %v6457_v46 = vpop.f32.mrf.mxu1  ;;  %v7134_v62 = vpop.f32.mrf.mxu0 }
 0x825   : > { %v7802_v37 = vmax.f32 %v7801_v1, %v6456_v45  ;;  %v7845_v24 = vmax.f32 %v7844_v5, %v7133_v50  ;;  %v6458_v26 = vadd.f32 %v6457_v46, %v14197_v30  ;;  %v7135_v3 = vadd.f32 %v7134_v62, %v14189_v17 }
 0x826   : > { %v6459_v16 = vpop.f32.mrf.mxu1  ;;  %v7138_v58 = vpop.f32.mrf.mxu0 }
 0x827   : > { %7377 = vmatmul.mubr.bf16.gmra.mxu0 %v13194_v13  ;;  %v7823_v11 = vmax.f32 %v7822_v31, %v6458_v26  ;;  %v7866_v19 = vmax.f32 %v7865_v61, %v7135_v3  ;;  %v6460_v38 = vadd.f32 %v6459_v16, %v14191_v21  ;;  %v7139_v63 = vadd.f32 %v7138_v58, %v14185_v22 }
 0x828   : > { %7386 = vmatprep.mubr.bf16.mxu0 %v15192_v44  ;;  %v6461_v12 = vpop.f32.mrf.mxu1  ;;  %v7140_v51 = vpop.f32.mrf.mxu0 }
 0x829   : > { %v7803_v36 = vmax.f32 %v7802_v37, %v6460_v38  ;;  %v7846_v47 = vmax.f32 %v7845_v24, %v7139_v63  ;;  %v6462_v55 = vadd.f32 %v6461_v12, %v14197_v30  ;;  %v7141_v8 = vadd.f32 %v7140_v51, %v14189_v17 }
 0x82a   : > { %v6465_v41 = vpop.f32.mrf.mxu1  ;;  %6704 = vmatmul.mubr.bf16.gmra.mxu1 %v13194_v13  ;;  %v7142_v10 = vpop.f32.mrf.mxu0 }
 0x82b   : > { %v7824_v20 = vmax.f32 %v7823_v11, %v6462_v55  ;;  %v7867_v40 = vmax.f32 %v7866_v19, %v7141_v8  ;;  %v6466_v56 = vadd.f32 %v6465_v41, %v14191_v21  ;;  %v7143_v0 = vadd.f32 %v7142_v10, %v14185_v22  ;;  %6713 = vmatprep.mubr.bf16.mxu1 %v15192_v44 }
 0x82c   : > { %v6467_v49 = vpop.f32.mrf.mxu1  ;;  %v7144_v57 = vpop.f32.mrf.mxu0 }
 0x82d   : > { %v7804_v43 = vmax.f32 %v7803_v36, %v6466_v56  ;;  %v14293_v59 = vmax.f32 %v7846_v47, %v7143_v0  ;;  %v6468_v32 = vadd.f32 %v6467_v49, %v14197_v30  ;;  %v7145_v14 = vadd.f32 %v7144_v57, %v14189_v17 }
 0x82e   : > { %v6469_v48 = vpop.f32.mrf.mxu1  ;;  %v7148_v13 = vpop.f32.mrf.mxu0 }
 0x82f   : > { %7387 = vmatmul.mubr.bf16.gmra.mxu0 %v13210_v42  ;;  %v7825_v23 = vmax.f32 %v7824_v20, %v6468_v32  ;;  %v14298_v4 = vmax.f32 %v7867_v40, %v7145_v14  ;;  %v6470_v27 = vadd.f32 %v6469_v48, %v14191_v21  ;;  %v7149_v15 = vadd.f32 %v7148_v13, %v14185_v22 }
 0x830   : > { %7396 = vmatprep.mubr.bf16.mxu0 %v15192_v44  ;;  %v6471_v28 = vpop.f32.mrf.mxu1  ;;  %v7150_v39 = vpop.f32.mrf.mxu0 }
 0x831   : > { %v14302_v54 = vmax.f32 %v7804_v43, %v6470_v27  ;;  %v6472_v34 = vadd.f32 %v6471_v28, %v14197_v30  ;;  %v7151_v35 = vadd.f32 %v7150_v39, %v14189_v17 }
 0x832   : > { %v6475_v52 = vpop.f32.mrf.mxu1  ;;  %6714 = vmatmul.mubr.bf16.gmra.mxu1 %v13210_v42  ;;  %v7152_v29 = vpop.f32.mrf.mxu0 }
 0x833   : > { %v14306_v2 = vmax.f32 %v7825_v23, %v6472_v34  ;;  %6723 = vmatprep.mubr.bf16.mxu1 %v15192_v44  ;;  %v7153_v6 = vadd.f32 %v7152_v29, %v14185_v22  ;;  %v6476_v42 = vadd.f32 %v6475_v52, %v14191_v21 }
 0x834   : > { %v6477_v25 = vpop.f32.mrf.mxu1  ;;  %v7154_v9 = vpop.f32.mrf.mxu0 }
 0x835   : > { %v8001_v1 = vmax.f32 %v7149_v15, %v7153_v6  ;;  %v7155_v5 = vadd.f32 %v7154_v9, %v14189_v17  ;;  %v6478_v50 = vadd.f32 %v6477_v25, %v14197_v30 }
 0x836   : > { %v6479_v53 = vpop.f32.mrf.mxu1  ;;  %v7158_v18 = vpop.f32.mrf.mxu0 }
 0x837   : > { %7397 = vmatmul.mubr.bf16.gmra.mxu0 %v11905_v33  ;;  %v8022_v60 = vmax.f32 %v7151_v35, %v7155_v5  ;;  %v6480_v7 = vadd.f32 %v6479_v53, %v14191_v21  ;;  %v7159_v31 = vadd.f32 %v7158_v18, %v14185_v22  ;;  %v15608_v35 = vld [vmem:[#allocation15_spill] sm:$0xff] }
 0x838   : > { %7406 = vmatprep.mubr.bf16.mxu0 %v15192_v44  ;;  %v6481_v61 = vpop.f32.mrf.mxu1  ;;  %v7160_v45 = vpop.f32.mrf.mxu0 }
 0x839   : > { %v7959_v46 = vmax.f32 %v6476_v42, %v6480_v7  ;;  %v8002_v62 = vmax.f32 %v8001_v1, %v7159_v31  ;;  %v6482_v37 = vadd.f32 %v6481_v61, %v14197_v30  ;;  %v7161_v24 = vadd.f32 %v7160_v45, %v14189_v17 }
 0x83a   : > { %v6485_v26 = vpop.f32.mrf.mxu1  ;;  %6724 = vmatmul.mubr.bf16.gmra.mxu1 %v11905_v33  ;;  %v7162_v3 = vpop.f32.mrf.mxu0  ;;  %v15607_v33 = vld [vmem:[#allocation123_spill] sm:$0xff] }
 0x83b   : > { %v6486_v16 = vadd.f32 %v6485_v26, %v14191_v21  ;;  %6733 = vmatprep.mubr.bf16.mxu1 %v15192_v44  ;;  %v7980_v58 = vmax.f32 %v6478_v50, %v6482_v37  ;;  %v8023_v11 = vmax.f32 %v8022_v60, %v7161_v24  ;;  %v7163_v19 = vadd.f32 %v7162_v3, %v14185_v22 }
 0x83c   : > { %v6487_v38 = vpop.f32.mrf.mxu1  ;;  %v7164_v63 = vpop.f32.mrf.mxu0 }
 0x83d   : > { %v7960_v12 = vmax.f32 %v7959_v46, %v6486_v16  ;;  %v6488_v51 = vadd.f32 %v6487_v38, %v14197_v30  ;;  %v8003_v36 = vmax.f32 %v8002_v62, %v7163_v19  ;;  %v7165_v47 = vadd.f32 %v7164_v63, %v14189_v17 }
 0x83e   : > { %v6489_v55 = vpop.f32.mrf.mxu1  ;;  %v7168_v8 = vpop.f32.mrf.mxu0 }
 0x83f   : > { %7407 = vmatmul.mubr.bf16.gmra.mxu0 %v15607_v33  ;;  %v7981_v41 = vmax.f32 %v7980_v58, %v6488_v51  ;;  %v6490_v10 = vadd.f32 %v6489_v55, %v14191_v21  ;;  %v7169_v20 = vadd.f32 %v7168_v8, %v14185_v22  ;;  %v8024_v40 = vmax.f32 %v8023_v11, %v7165_v47  ;;  %v15609_v51 = vld [vmem:[#allocation112_spill] sm:$0xff] }
 0x840   : > { %7416 = vmatprep.mubr.bf16.mxu0 %v15192_v44  ;;  %v6491_v56 = vpop.f32.mrf.mxu1  ;;  %v7170_v0 = vpop.f32.mrf.mxu0 }
 0x841   : > { %v7961_v49 = vmax.f32 %v7960_v12, %v6490_v10  ;;  %v8004_v57 = vmax.f32 %v8003_v36, %v7169_v20  ;;  %v6492_v43 = vadd.f32 %v6491_v56, %v14197_v30  ;;  %v7171_v32 = vadd.f32 %v7170_v0, %v14189_v17 }
 0x842   : > { %v6495_v14 = vpop.f32.mrf.mxu1  ;;  %6734 = vmatmul.mubr.bf16.gmra.mxu1 %v15607_v33  ;;  %v7172_v48 = vpop.f32.mrf.mxu0 }
 0x843   : > { %v7982_v13 = vmax.f32 %v7981_v41, %v6492_v43  ;;  %v8025_v23 = vmax.f32 %v8024_v40, %v7171_v32  ;;  %v6496_v27 = vadd.f32 %v6495_v14, %v14191_v21  ;;  %v7173_v28 = vadd.f32 %v7172_v48, %v14185_v22  ;;  %6743 = vmatprep.mubr.bf16.mxu1 %v15192_v44 }
 0x844   : > { %v6497_v39 = vpop.f32.mrf.mxu1  ;;  %v7174_v34 = vpop.f32.mrf.mxu0 }
 0x845   : > { %v7962_v52 = vmax.f32 %v7961_v49, %v6496_v27  ;;  %v8005_v29 = vmax.f32 %v8004_v57, %v7173_v28  ;;  %v6498_v15 = vadd.f32 %v6497_v39, %v14197_v30  ;;  %v7175_v6 = vadd.f32 %v7174_v34, %v14189_v17 }
 0x846   : > { %v6499_v25 = vpop.f32.mrf.mxu1  ;;  %v7178_v9 = vpop.f32.mrf.mxu0 }
 0x847   : > { %7417 = vmatmul.mubr.bf16.gmra.mxu0 %v15608_v35  ;;  %v7983_v1 = vmax.f32 %v7982_v13, %v6498_v15  ;;  %v8026_v5 = vmax.f32 %v8025_v23, %v7175_v6  ;;  %v6500_v53 = vadd.f32 %v6499_v25, %v14191_v21  ;;  %v7179_v18 = vadd.f32 %v7178_v9, %v14185_v22 }
 0x848   : > { %7426 = vmatprep.mubr.bf16.mxu0 %v15192_v44  ;;  %v6501_v42 = vpop.f32.mrf.mxu1  ;;  %v7180_v60 = vpop.f32.mrf.mxu0 }
 0x849   : > { %v7963_v7 = vmax.f32 %v7962_v52, %v6500_v53  ;;  %v8006_v31 = vmax.f32 %v8005_v29, %v7179_v18  ;;  %v6502_v61 = vadd.f32 %v6501_v42, %v14197_v30  ;;  %v7181_v45 = vadd.f32 %v7180_v60, %v14189_v17  ;;  %v15610_v29 = vld [vmem:[#allocation16_spill] sm:$0xff] }
 0x84a   : > { %v6505_v50 = vpop.f32.mrf.mxu1  ;;  %6744 = vmatmul.mubr.bf16.gmra.mxu1 %v15608_v35  ;;  %v7182_v46 = vpop.f32.mrf.mxu0 }
 0x84b   : > { %v7984_v62 = vmax.f32 %v7983_v1, %v6502_v61  ;;  %v8027_v37 = vmax.f32 %v8026_v5, %v7181_v45  ;;  %v6506_v24 = vadd.f32 %v6505_v50, %v14191_v21  ;;  %v7183_v26 = vadd.f32 %v7182_v46, %v14185_v22  ;;  %6753 = vmatprep.mubr.bf16.mxu1 %v15192_v44 }
 0x84c   : > { %v6507_v3 = vpop.f32.mrf.mxu1  ;;  %v7184_v16 = vpop.f32.mrf.mxu0 }
 0x84d   : > { %v7964_v58 = vmax.f32 %v7963_v7, %v6506_v24  ;;  %v8007_v11 = vmax.f32 %v8006_v31, %v7183_v26  ;;  %v6508_v19 = vadd.f32 %v6507_v3, %v14197_v30  ;;  %v7185_v38 = vadd.f32 %v7184_v16, %v14189_v17 }
 0x84e   : > { %v6509_v63 = vpop.f32.mrf.mxu1  ;;  %v7188_v12 = vpop.f32.mrf.mxu0  ;;  %v7848_v16 = vrot.slane %v14293_v59, 4 }
 0x84f   : > { %7427 = vmatmul.mubr.bf16.gmra.mxu0 %v15609_v51  ;;  %v7985_v36 = vmax.f32 %v7984_v62, %v6508_v19  ;;  %v8028_v47 = vmax.f32 %v8027_v37, %v7185_v38  ;;  %v6510_v55 = vadd.f32 %v6509_v63, %v14191_v21  ;;  %v7189_v8 = vadd.f32 %v7188_v12, %v14185_v22  ;;  %v15611_v38 = vld [vmem:[#allocation126_spill] sm:$0xff] }
 0x850   : > { %7436 = vmatprep.mubr.bf16.mxu0 %v15192_v44  ;;  %v6511_v33 = vpop.f32.mrf.mxu1  ;;  %v7190_v41 = vpop.f32.mrf.mxu0 }
 0x851   : > { %v7965_v10 = vmax.f32 %v7964_v58, %v6510_v55  ;;  %v8008_v20 = vmax.f32 %v8007_v11, %v7189_v8  ;;  %v6512_v40 = vadd.f32 %v6511_v33, %v14197_v30  ;;  %v7191_v56 = vadd.f32 %v7190_v41, %v14189_v17 }
 0x852   : > { %v6515_v0 = vpop.f32.mrf.mxu1  ;;  %6754 = vmatmul.mubr.bf16.gmra.mxu1 %v15609_v51  ;;  %v7192_v49 = vpop.f32.mrf.mxu0  ;;  %v7869_v58 = vrot.slane %v14298_v4, 4 }
 0x853   : > { %v7986_v57 = vmax.f32 %v7985_v36, %v6512_v40  ;;  %v8029_v43 = vmax.f32 %v8028_v47, %v7191_v56  ;;  %v6516_v32 = vadd.f32 %v6515_v0, %v14191_v21  ;;  %v7193_v14 = vadd.f32 %v7192_v49, %v14185_v22  ;;  %6763 = vmatprep.mubr.bf16.mxu1 %v15192_v44 }
 0x854   : > { %v6517_v48 = vpop.f32.mrf.mxu1  ;;  %v7194_v13 = vpop.f32.mrf.mxu0  ;;  %v7806_v47 = vrot.slane %v14302_v54, 4  ;;  %v7849_v40 = vmax.f32 %v14293_v59, %v7848_v16  ;;  %v7870_v56 = vmax.f32 %v14298_v4, %v7869_v58 }
 0x855   : > { %v7966_v23 = vmax.f32 %v7965_v10, %v6516_v32  ;;  %v8009_v27 = vmax.f32 %v8008_v20, %v7193_v14  ;;  %v6518_v28 = vadd.f32 %v6517_v48, %v14197_v30  ;;  %v7195_v39 = vadd.f32 %v7194_v13, %v14189_v17 }
 0x856   : > { %v6519_v34 = vpop.f32.mrf.mxu1  ;;  %v7198_v52 = vpop.f32.mrf.mxu0  ;;  %v7807_v48 = vmax.f32 %v14302_v54, %v7806_v47  ;;  %v7827_v13 = vrot.slane %v14306_v2, 4 }
 0x857   : > { %7437 = vmatmul.mubr.bf16.gmra.mxu0 %v15610_v29  ;;  %v7987_v15 = vmax.f32 %v7986_v57, %v6518_v28  ;;  %v8030_v6 = vmax.f32 %v8029_v43, %v7195_v39  ;;  %v6520_v25 = vadd.f32 %v6519_v34, %v14191_v21  ;;  %v7199_v9 = vadd.f32 %v7198_v52, %v14185_v22 }
 0x858   : > { %7446 = vmatprep.mubr.bf16.mxu0 %v15192_v44  ;;  %v6521_v35 = vpop.f32.mrf.mxu1  ;;  %v7200_v1 = vpop.f32.mrf.mxu0  ;;  %v7850_v34 = vrot.slane %v7849_v40, 2  ;;  %v7871_v52 = vrot.slane %v7870_v56, 2 }
 0x859   : > { %v7967_v5 = vmax.f32 %v7966_v23, %v6520_v25  ;;  %v8010_v53 = vmax.f32 %v8009_v27, %v7199_v9  ;;  %v6522_v18 = vadd.f32 %v6521_v35, %v14197_v30  ;;  %v7201_v42 = vadd.f32 %v7200_v1, %v14189_v17 }
 0x85a   : > { %v6525_v60 = vpop.f32.mrf.mxu1  ;;  %6764 = vmatmul.mubr.bf16.gmra.mxu1 %v15610_v29  ;;  %v7202_v7 = vpop.f32.mrf.mxu0  ;;  %v7808_v1 = vrot.slane %v7807_v48, 2 }
 0x85b   : > { %v7988_v31 = vmax.f32 %v7987_v15, %v6522_v18  ;;  %v8031_v61 = vmax.f32 %v8030_v6, %v7201_v42  ;;  %v6526_v45 = vadd.f32 %v6525_v60, %v14191_v21  ;;  %v7203_v50 = vadd.f32 %v7202_v7, %v14185_v22  ;;  %6773 = vmatprep.mubr.bf16.mxu1 %v15192_v44  ;;  %v15612_v6 = vld [vmem:[#allocation33_spill] sm:$0xff] }
 0x85c   : > { %v6527_v46 = vpop.f32.mrf.mxu1  ;;  %v7204_v62 = vpop.f32.mrf.mxu0 }
 0x85d   : > { %v7968_v37 = vmax.f32 %v7967_v5, %v6526_v45  ;;  %v8011_v24 = vmax.f32 %v8010_v53, %v7203_v50  ;;  %v6528_v26 = vadd.f32 %v6527_v46, %v14197_v30  ;;  %v7205_v3 = vadd.f32 %v7204_v62, %v14189_v17 }
 0x85e   : > { %v6529_v11 = vpop.f32.mrf.mxu1  ;;  %v7208_v19 = vpop.f32.mrf.mxu0  ;;  %v7828_v5 = vmax.f32 %v14306_v2, %v7827_v13  ;;  %v7872_v45 = vmax.f32 %v7870_v56, %v7871_v52 }
 0x85f   : > { %7447 = vmatmul.mubr.bf16.gmra.mxu0 %v15611_v38  ;;  %v7989_v63 = vmax.f32 %v7988_v31, %v6528_v26  ;;  %v8032_v12 = vmax.f32 %v8031_v61, %v7205_v3  ;;  %v6530_v51 = vadd.f32 %v6529_v11, %v14191_v21  ;;  %v7209_v36 = vadd.f32 %v7208_v19, %v14185_v22 }
 0x860   : > { %7456 = vmatprep.mubr.bf16.mxu0 %v15192_v44  ;;  %v6531_v55 = vpop.f32.mrf.mxu1  ;;  %v7210_v8 = vpop.f32.mrf.mxu0  ;;  %v7851_v61 = vmax.f32 %v7849_v40, %v7850_v34  ;;  %v7809_v26 = vmax.f32 %v7807_v48, %v7808_v1  ;;  %v7829_v3 = vrot.slane %v7828_v5, 2 }
 0x861   : > { %v7969_v33 = vmax.f32 %v7968_v37, %v6530_v51  ;;  %v8012_v41 = vmax.f32 %v8011_v24, %v7209_v36  ;;  %v6532_v10 = vadd.f32 %v6531_v55, %v14197_v30  ;;  %v7211_v20 = vadd.f32 %v7210_v8, %v14189_v17  ;;  %v15613_v55 = vld [vmem:[#allocation9_spill] sm:$0xff] }
 0x862   : > { %v6535_v0 = vpop.f32.mrf.mxu1  ;;  %6774 = vmatmul.mubr.bf16.gmra.mxu1 %v15611_v38  ;;  %v7212_v49 = vpop.f32.mrf.mxu0  ;;  %v7873_v51 = vrot.slane %v7872_v45, 1  ;;  %v14410_v40 = vmax.f32 %v7828_v5, %v7829_v3 }
 0x863   : > { %v7990_v57 = vmax.f32 %v7989_v63, %v6532_v10  ;;  %v8033_v43 = vmax.f32 %v8032_v12, %v7211_v20  ;;  %v6536_v32 = vadd.f32 %v6535_v0, %v14191_v21  ;;  %v7213_v14 = vadd.f32 %v7212_v49, %v14185_v22  ;;  %6783 = vmatprep.mubr.bf16.mxu1 %v15192_v44 }
 0x864   : > { %v6537_v23 = vpop.f32.mrf.mxu1  ;;  %v7214_v59 = vpop.f32.mrf.mxu0  ;;  %v7852_v12 = vrot.slane %v7851_v61, 1  ;;  %v7810_v20 = vrot.slane %v7809_v26, 1  ;;  %v7874_v48 = vmax.f32 %v7872_v45, %v7873_v51  ;;  %v7831_v34 = vrot.slane %v14410_v40, 1 }
 0x865   : > { %v7970_v27 = vmax.f32 %v7969_v33, %v6536_v32  ;;  %v8013_v4 = vmax.f32 %v8012_v41, %v7213_v14  ;;  %v6538_v28 = vadd.f32 %v6537_v23, %v14197_v30  ;;  %v7215_v39 = vadd.f32 %v7214_v59, %v14189_v17 }
 0x866   : > { %v6539_v29 = vpop.f32.mrf.mxu1  ;;  %v7218_v15 = vpop.f32.mrf.mxu0  ;;  %v7853_v14 = vmax.f32 %v7851_v61, %v7852_v12 }
 0x867   : > { %7457 = vmatmul.mubr.bf16.gmra.mxu0 %v15612_v6  ;;  %v7991_v25 = vmax.f32 %v7990_v57, %v6538_v28  ;;  %v8034_v9 = vmax.f32 %v8033_v43, %v7215_v39  ;;  %v6540_v54 = vadd.f32 %v6539_v29, %v14191_v21  ;;  %v7219_v35 = vadd.f32 %v7218_v15, %v14185_v22 }
 0x868   : > { %7466 = vmatprep.mubr.bf16.mxu0 %v15192_v44  ;;  %v6541_v53 = vpop.f32.mrf.mxu1  ;;  %v7220_v18 = vpop.f32.mrf.mxu0  ;;  %v7811_v39 = vmax.f32 %v7809_v26, %v7810_v20 }
 0x869   : > { %v7971_v42 = vmax.f32 %v7970_v27, %v6540_v54  ;;  %v8014_v60 = vmax.f32 %v8013_v4, %v7219_v35  ;;  %v6542_v7 = vadd.f32 %v6541_v53, %v14197_v30  ;;  %v7221_v31 = vadd.f32 %v7220_v18, %v14189_v17 }
 0x86a   : > { %v6545_v50 = vpop.f32.mrf.mxu1  ;;  %6784 = vmatmul.mubr.bf16.gmra.mxu1 %v15612_v6  ;;  %v7222_v46 = vpop.f32.mrf.mxu0 }
 0x86b   : > { %v7992_v62 = vmax.f32 %v7991_v25, %v6542_v7  ;;  %v8035_v37 = vmax.f32 %v8034_v9, %v7221_v31  ;;  %v6546_v24 = vadd.f32 %v6545_v50, %v14191_v21  ;;  %v7223_v2 = vadd.f32 %v7222_v46, %v14185_v22  ;;  %6793 = vmatprep.mubr.bf16.mxu1 %v15192_v44  ;;  %v15614_v7 = vld [vmem:[#allocation18_spill] sm:$0xff] }
 0x86c   : > { %v6547_v16 = vpop.f32.mrf.mxu1  ;;  %v7224_v58 = vpop.f32.mrf.mxu0 }
 0x86d   : > { %v7972_v11 = vmax.f32 %v7971_v42, %v6546_v24  ;;  %v8015_v19 = vmax.f32 %v8014_v60, %v7223_v2  ;;  %v6548_v38 = vadd.f32 %v6547_v16, %v14197_v30  ;;  %v7225_v63 = vadd.f32 %v7224_v58, %v14189_v17 }
 0x86e   : > { %v6549_v36 = vpop.f32.mrf.mxu1  ;;  %v7228_v47 = vpop.f32.mrf.mxu0 }
 0x86f   : > { %7467 = vmatmul.mubr.bf16.gmra.mxu0 %v15613_v55  ;;  %v8016_v8 = vrot.slane %v8015_v19, 4  ;;  %v7993_v33 = vmax.f32 %v7992_v62, %v6548_v38  ;;  %v8036_v41 = vmax.f32 %v8035_v37, %v7225_v63  ;;  %v6550_v10 = vadd.f32 %v6549_v36, %v14191_v21 }
 0x870   : > { %7476 = vmatprep.mubr.bf16.mxu0 %v15192_v44  ;;  %v6551_v56 = vpop.f32.mrf.mxu1  ;;  %v7230_v0 = vpop.f32.mrf.mxu0  ;;  %v7229_v52 = vadd.f32 %v7228_v47, %v14185_v22 }
 0x871   : > { %v8017_v49 = vmax.f32 %v8015_v19, %v8016_v8  ;;  %v8037_v57 = vrot.slane %v8036_v41, 4  ;;  %v7973_v43 = vmax.f32 %v7972_v11, %v6550_v10  ;;  %v6552_v32 = vadd.f32 %v6551_v56, %v14197_v30 }
 0x872   : > { %v6555_v13 = vpop.f32.mrf.mxu1  ;;  %6794 = vmatmul.mubr.bf16.gmra.mxu1 %v15613_v55  ;;  %v7232_v23 = vpop.f32.mrf.mxu0  ;;  %v7231_v1 = vadd.f32 %v7230_v0, %v14189_v17 }
 0x873   : > { %v8018_v59 = vrot.slane %v8017_v49, 2  ;;  %v8038_v27 = vmax.f32 %v8036_v41, %v8037_v57  ;;  %v7974_v4 = vrot.slane %v7973_v43, 4  ;;  %v7994_v28 = vmax.f32 %v7993_v33, %v6552_v32  ;;  %6803 = vmatprep.mubr.bf16.mxu1 %v15192_v44 }
 0x874   : > { %v7233_v29 = vadd.f32 %v7232_v23, %v14185_v22  ;;  %v6557_v15 = vpop.f32.mrf.mxu1  ;;  %v7234_v6 = vpop.f32.mrf.mxu0  ;;  %v6556_v5 = vadd.f32 %v6555_v13, %v14191_v21  ;;  %v7832_v13 = vmax.f32 %v14410_v40, %v7831_v34 }
 0x875   : > { %v8019_v25 = vmax.f32 %v8017_v49, %v8018_v59  ;;  %v8039_v9 = vrot.slane %v8038_v27, 2  ;;  %v7975_v54 = vmax.f32 %v7973_v43, %v7974_v4  ;;  %v7995_v35 = vrot.slane %v7994_v28, 4 }
 0x876   : > { %v8169_v53 = vmax.f32 %v7229_v52, %v7233_v29  ;;  %v7235_v18 = vadd.f32 %v7234_v6, %v14189_v17  ;;  %v6559_v42 = vpop.f32.mrf.mxu1  ;;  %v7238_v60 = vpop.f32.mrf.mxu0  ;;  %v6558_v46 = vadd.f32 %v6557_v15, %v14197_v30  ;;  %v15615_v52 = vld [vmem:[#allocation110_spill] sm:$0xff] }
 0x877   : > { %7477 = vmatmul.mubr.bf16.gmra.mxu0 %v15614_v7  ;;  %v8020_v31 = vrot.slane %v8019_v25, 1  ;;  %v8040_v61 = vmax.f32 %v8038_v27, %v8039_v9  ;;  %v7976_v45 = vrot.slane %v7975_v54, 2  ;;  %v7996_v50 = vmax.f32 %v7994_v28, %v7995_v35 }
 0x878   : > { %7486 = vmatprep.mubr.bf16.mxu0 %v15192_v44  ;;  %v8190_v62 = vmax.f32 %v7231_v1, %v7235_v18  ;;  %v6560_v37 = vadd.f32 %v6559_v42, %v14191_v21  ;;  %v7239_v24 = vadd.f32 %v7238_v60, %v14185_v22  ;;  %v6561_v2 = vpop.f32.mrf.mxu1  ;;  %v7240_v26 = vpop.f32.mrf.mxu0 }
 0x879   : > { %v8021_v3 = vmax.f32 %v8019_v25, %v8020_v31  ;;  %v8041_v16 = vrot.slane %v8040_v61, 1  ;;  %v7977_v58 = vmax.f32 %v7975_v54, %v7976_v45  ;;  %v7997_v11 = vrot.slane %v7996_v50, 2 }
 0x87a   : > { %v8127_v19 = vmax.f32 %v6556_v5, %v6560_v37  ;;  %v8170_v38 = vmax.f32 %v8169_v53, %v7239_v24  ;;  %v6562_v63 = vadd.f32 %v6561_v2, %v14197_v30  ;;  %v7241_v12 = vadd.f32 %v7240_v26, %v14189_v17  ;;  %v6565_v51 = vpop.f32.mrf.mxu1  ;;  %6804 = vmatmul.mubr.bf16.gmra.mxu1 %v15614_v7  ;;  %v7242_v36 = vpop.f32.mrf.mxu0  ;;  %v15616_v26 = vld [vmem:[#allocation26_spill] sm:$0xff] }
 0x87b   : > { %v14430_v47 = vsel %vm9123_vm1, %v8021_v3, %v7853_v14  ;;  %v8042_v55 = vmax.f32 %v8040_v61, %v8041_v16  ;;  %v7978_v8 = vrot.slane %v7977_v58, 1  ;;  %v7998_v33 = vmax.f32 %v7996_v50, %v7997_v11  ;;  %6813 = vmatprep.mubr.bf16.mxu1 %v15192_v44 }
 0x87c   : > { %v8148_v41 = vmax.f32 %v6558_v46, %v6562_v63  ;;  %v8191_v10 = vmax.f32 %v8190_v62, %v7241_v12  ;;  %v6566_v20 = vadd.f32 %v6565_v51, %v14191_v21  ;;  %v7243_v56 = vadd.f32 %v7242_v36, %v14185_v22  ;;  %v6567_v0 = vpop.f32.mrf.mxu1  ;;  %v7244_v49 = vpop.f32.mrf.mxu0 }
 0x87d   : > { %v14436_v57 = vsel %vm9123_vm1, %v8042_v55, %v7874_v48  ;;  %v7979_v43 = vmax.f32 %v7977_v58, %v7978_v8  ;;  %v7999_v32 = vrot.slane %v7998_v33, 1  ;;  %v6568_v14 = vadd.f32 %v6567_v0, %v14197_v30 }
 0x87e   : > { %v8128_v23 = vmax.f32 %v8127_v19, %v6566_v20  ;;  %v8171_v59 = vmax.f32 %v8170_v38, %v7243_v56  ;;  %v7245_v27 = vadd.f32 %v7244_v49, %v14189_v17  ;;  %v6569_v4 = vpop.f32.mrf.mxu1  ;;  %v7248_v28 = vpop.f32.mrf.mxu0 }
 0x87f   : > { %7487 = vmatmul.mubr.bf16.gmra.mxu0 %v15615_v52  ;;  %v14443_v29 = vsel %vm9123_vm1, %v7979_v43, %v7811_v39  ;;  %v8000_v15 = vmax.f32 %v7998_v33, %v7999_v32  ;;  %v8149_v48 = vmax.f32 %v8148_v41, %v6568_v14  ;;  %v6570_v6 = vadd.f32 %v6569_v4, %v14191_v21 }
 0x880   : > { %7496 = vmatprep.mubr.bf16.mxu0 %v15192_v44  ;;  %v8192_v25 = vmax.f32 %v8191_v10, %v7245_v27  ;;  %v7249_v40 = vadd.f32 %v7248_v28, %v14185_v22  ;;  %v6571_v34 = vpop.f32.mrf.mxu1  ;;  %v7250_v9 = vpop.f32.mrf.mxu0 }
 0x881   : > { %v14449_v54 = vsel %vm9123_vm1, %v8000_v15, %v7832_v13  ;;  %v8129_v35 = vmax.f32 %v8128_v23, %v6570_v6  ;;  %v6572_v1 = vadd.f32 %v6571_v34, %v14197_v30  ;;  %v7251_v39 = vadd.f32 %v7250_v9, %v14189_v17 }
 0x882   : > { %v8172_v5 = vmax.f32 %v8171_v59, %v7249_v40  ;;  %v6575_v53 = vpop.f32.mrf.mxu1  ;;  %6814 = vmatmul.mubr.bf16.gmra.mxu1 %v15615_v52  ;;  %v7252_v18 = vpop.f32.mrf.mxu0  ;;  %v15617_v59 = vld [vmem:[#allocation134_spill] sm:$0xff] }
 0x883   : > { %v8150_v42 = vmax.f32 %v8149_v48, %v6572_v1  ;;  %v8193_v60 = vmax.f32 %v8192_v25, %v7251_v39  ;;  %v6576_v7 = vadd.f32 %v6575_v53, %v14191_v21  ;;  %v7253_v31 = vadd.f32 %v7252_v18, %v14185_v22  ;;  %6823 = vmatprep.mubr.bf16.mxu1 %v15192_v44 }
 0x884   : > { %v6577_v61 = vpop.f32.mrf.mxu1  ;;  %v7254_v45 = vpop.f32.mrf.mxu0 }
 0x885   : > { %v8130_v50 = vmax.f32 %v8129_v35, %v6576_v7  ;;  %v8173_v46 = vmax.f32 %v8172_v5, %v7253_v31  ;;  %v6578_v62 = vadd.f32 %v6577_v61, %v14197_v30  ;;  %v7255_v37 = vadd.f32 %v7254_v45, %v14189_v17 }
 0x886   : > { %v6579_v24 = vpop.f32.mrf.mxu1  ;;  %v7258_v2 = vpop.f32.mrf.mxu0 }
 0x887   : > { %7497 = vmatmul.mubr.bf16.gmra.mxu0 %v15616_v26  ;;  %v8151_v3 = vmax.f32 %v8150_v42, %v6578_v62  ;;  %v8194_v16 = vmax.f32 %v8193_v60, %v7255_v37  ;;  %v6580_v58 = vadd.f32 %v6579_v24, %v14191_v21  ;;  %v7259_v11 = vadd.f32 %v7258_v2, %v14185_v22 }
 0x888   : > { %7506 = vmatprep.mubr.bf16.mxu0 %v15192_v44  ;;  %v6581_v19 = vpop.f32.mrf.mxu1  ;;  %v7260_v38 = vpop.f32.mrf.mxu0 }
 0x889   : > { %v8131_v63 = vmax.f32 %v8130_v50, %v6580_v58  ;;  %v8174_v12 = vmax.f32 %v8173_v46, %v7259_v11  ;;  %v6582_v51 = vadd.f32 %v6581_v19, %v14197_v30  ;;  %v7261_v36 = vadd.f32 %v7260_v38, %v14189_v17  ;;  %v15618_v46 = vld [vmem:[#allocation19_spill] sm:$0xff] }
 0x88a   : > { %v6585_v55 = vpop.f32.mrf.mxu1  ;;  %6824 = vmatmul.mubr.bf16.gmra.mxu1 %v15616_v26  ;;  %v7262_v8 = vpop.f32.mrf.mxu0 }
 0x88b   : > { %v8152_v33 = vmax.f32 %v8151_v3, %v6582_v51  ;;  %v8195_v41 = vmax.f32 %v8194_v16, %v7261_v36  ;;  %v6586_v10 = vadd.f32 %v6585_v55, %v14191_v21  ;;  %v7263_v20 = vadd.f32 %v7262_v8, %v14185_v22  ;;  %6833 = vmatprep.mubr.bf16.mxu1 %v15192_v44 }
 0x88c   : > { %v6587_v56 = vpop.f32.mrf.mxu1  ;;  %v7264_v0 = vpop.f32.mrf.mxu0 }
 0x88d   : > { %v8132_v49 = vmax.f32 %v8131_v63, %v6586_v10  ;;  %v8175_v43 = vmax.f32 %v8174_v12, %v7263_v20  ;;  %v6588_v32 = vadd.f32 %v6587_v56, %v14197_v30  ;;  %v7265_v14 = vadd.f32 %v7264_v0, %v14189_v17 }
 0x88e   : > { %v6589_v13 = vpop.f32.mrf.mxu1  ;;  %v7268_v23 = vpop.f32.mrf.mxu0 }
 0x88f   : > { %7507 = vmatmul.mubr.bf16.gmra.mxu0 %v15617_v59  ;;  %v8153_v27 = vmax.f32 %v8152_v33, %v6588_v32  ;;  %v8196_v4 = vmax.f32 %v8195_v41, %v7265_v14  ;;  %v6590_v28 = vadd.f32 %v6589_v13, %v14191_v21  ;;  %v7269_v52 = vadd.f32 %v7268_v23, %v14185_v22 }
 0x890   : > { %7516 = vmatprep.mubr.bf16.mxu0 %v15192_v44  ;;  %v6591_v15 = vpop.f32.mrf.mxu1  ;;  %v7270_v48 = vpop.f32.mrf.mxu0 }
 0x891   : > { %v8133_v6 = vmax.f32 %v8132_v49, %v6590_v28  ;;  %v8176_v25 = vmax.f32 %v8175_v43, %v7269_v52  ;;  %v6592_v40 = vadd.f32 %v6591_v15, %v14197_v30  ;;  %v7271_v34 = vadd.f32 %v7270_v48, %v14189_v17  ;;  %v15619_v43 = vld [vmem:[#allocation121_spill] sm:$0xff] }
 0x892   : > { %v6595_v9 = vpop.f32.mrf.mxu1  ;;  %6834 = vmatmul.mubr.bf16.gmra.mxu1 %v15617_v59  ;;  %v7272_v35 = vpop.f32.mrf.mxu0 }
 0x893   : > { %v8154_v1 = vmax.f32 %v8153_v27, %v6592_v40  ;;  %v8197_v39 = vmax.f32 %v8196_v4, %v7271_v34  ;;  %v6596_v5 = vadd.f32 %v6595_v9, %v14191_v21  ;;  %v7273_v53 = vadd.f32 %v7272_v35, %v14185_v22  ;;  %6843 = vmatprep.mubr.bf16.mxu1 %v15192_v44 }
 0x894   : > { %v6597_v18 = vpop.f32.mrf.mxu1  ;;  %v7274_v42 = vpop.f32.mrf.mxu0 }
 0x895   : > { %v8134_v60 = vmax.f32 %v8133_v6, %v6596_v5  ;;  %v8177_v7 = vmax.f32 %v8176_v25, %v7273_v53  ;;  %v6598_v31 = vadd.f32 %v6597_v18, %v14197_v30  ;;  %v7275_v61 = vadd.f32 %v7274_v42, %v14189_v17 }
 0x896   : > { %v6599_v45 = vpop.f32.mrf.mxu1  ;;  %v7278_v50 = vpop.f32.mrf.mxu0 }
 0x897   : > { %7517 = vmatmul.mubr.bf16.gmra.mxu0 %v15618_v46  ;;  %v8155_v62 = vmax.f32 %v8154_v1, %v6598_v31  ;;  %v8198_v37 = vmax.f32 %v8197_v39, %v7275_v61  ;;  %v6600_v24 = vadd.f32 %v6599_v45, %v14191_v21  ;;  %v7279_v2 = vadd.f32 %v7278_v50, %v14185_v22 }
 0x898   : > { %7526 = vmatprep.mubr.bf16.mxu0 %v15192_v44  ;;  %v6601_v26 = vpop.f32.mrf.mxu1  ;;  %v7280_v3 = vpop.f32.mrf.mxu0 }
 0x899   : > { %v8135_v16 = vmax.f32 %v8134_v60, %v6600_v24  ;;  %v8178_v58 = vmax.f32 %v8177_v7, %v7279_v2  ;;  %v6602_v11 = vadd.f32 %v6601_v26, %v14197_v30  ;;  %v7281_v19 = vadd.f32 %v7280_v3, %v14189_v17  ;;  %v15620_v7 = vld [vmem:[#allocation20_spill] sm:$0xff] }
 0x89a   : > { %v6605_v38 = vpop.f32.mrf.mxu1  ;;  %6844 = vmatmul.mubr.bf16.gmra.mxu1 %v15618_v46  ;;  %v7282_v63 = vpop.f32.mrf.mxu0 }
 0x89b   : > { %v8156_v12 = vmax.f32 %v8155_v62, %v6602_v11  ;;  %v8199_v51 = vmax.f32 %v8198_v37, %v7281_v19  ;;  %v6606_v36 = vadd.f32 %v6605_v38, %v14191_v21  ;;  %v7283_v55 = vadd.f32 %v7282_v63, %v14185_v22  ;;  %6853 = vmatprep.mubr.bf16.mxu1 %v15192_v44 }
 0x89c   : > { %v6607_v8 = vpop.f32.mrf.mxu1  ;;  %v7284_v33 = vpop.f32.mrf.mxu0 }
 0x89d   : > { %v8136_v41 = vmax.f32 %v8135_v16, %v6606_v36  ;;  %v8179_v10 = vmax.f32 %v8178_v58, %v7283_v55  ;;  %v6608_v20 = vadd.f32 %v6607_v8, %v14197_v30  ;;  %v7285_v56 = vadd.f32 %v7284_v33, %v14189_v17 }
 0x89e   : > { %v6609_v0 = vpop.f32.mrf.mxu1  ;;  %v7288_v49 = vpop.f32.mrf.mxu0 }
 0x89f   : > { %7527 = vmatmul.mubr.bf16.gmra.mxu0 %v15619_v43  ;;  %v8157_v32 = vmax.f32 %v8156_v12, %v6608_v20  ;;  %v8200_v14 = vmax.f32 %v8199_v51, %v7285_v56  ;;  %v6610_v13 = vadd.f32 %v6609_v0, %v14191_v21  ;;  %v7289_v23 = vadd.f32 %v7288_v49, %v14185_v22 }
 0x8a0   : > { %7536 = vmatprep.mubr.bf16.mxu0 %v15192_v44  ;;  %v6611_v59 = vpop.f32.mrf.mxu1  ;;  %v7290_v27 = vpop.f32.mrf.mxu0 }
 0x8a1   : > { %v8137_v4 = vmax.f32 %v8136_v41, %v6610_v13  ;;  %v8180_v28 = vmax.f32 %v8179_v10, %v7289_v23  ;;  %v6612_v52 = vadd.f32 %v6611_v59, %v14197_v30  ;;  %v7291_v15 = vadd.f32 %v7290_v27, %v14189_v17  ;;  %v15621_v10 = vld [vmem:[#allocation10_spill] sm:$0xff] }
 0x8a2   : > { %v6615_v48 = vpop.f32.mrf.mxu1  ;;  %6854 = vmatmul.mubr.bf16.gmra.mxu1 %v15619_v43  ;;  %v7292_v6 = vpop.f32.mrf.mxu0 }
 0x8a3   : > { %v8158_v25 = vmax.f32 %v8157_v32, %v6612_v52  ;;  %v8201_v40 = vmax.f32 %v8200_v14, %v7291_v15  ;;  %v6616_v34 = vadd.f32 %v6615_v48, %v14191_v21  ;;  %v7293_v9 = vadd.f32 %v7292_v6, %v14185_v22  ;;  %6863 = vmatprep.mubr.bf16.mxu1 %v15192_v44 }
 0x8a4   : > { %v6617_v35 = vpop.f32.mrf.mxu1  ;;  %v7294_v1 = vpop.f32.mrf.mxu0 }
 0x8a5   : > { %v8138_v39 = vmax.f32 %v8137_v4, %v6616_v34  ;;  %v8181_v5 = vmax.f32 %v8180_v28, %v7293_v9  ;;  %v6618_v53 = vadd.f32 %v6617_v35, %v14197_v30  ;;  %v7295_v18 = vadd.f32 %v7294_v1, %v14189_v17 }
 0x8a6   : > { %v6619_v42 = vpop.f32.mrf.mxu1  ;;  %v7298_v60 = vpop.f32.mrf.mxu0 }
 0x8a7   : > { %7537 = vmatmul.mubr.bf16.gmra.mxu0 %v15620_v7  ;;  %v8159_v31 = vmax.f32 %v8158_v25, %v6618_v53  ;;  %v8202_v61 = vmax.f32 %v8201_v40, %v7295_v18  ;;  %v6620_v45 = vadd.f32 %v6619_v42, %v14191_v21  ;;  %v7299_v50 = vadd.f32 %v7298_v60, %v14185_v22 }
 0x8a8   : > { %7546 = vmatprep.mubr.bf16.mxu0 %v15192_v44  ;;  %v6621_v46 = vpop.f32.mrf.mxu1  ;;  %v7300_v62 = vpop.f32.mrf.mxu0 }
 0x8a9   : > { %v8139_v37 = vmax.f32 %v8138_v39, %v6620_v45  ;;  %v8182_v24 = vmax.f32 %v8181_v5, %v7299_v50  ;;  %v6622_v2 = vadd.f32 %v6621_v46, %v14197_v30  ;;  %v7301_v26 = vadd.f32 %v7300_v62, %v14189_v17 }
 0x8aa   : > { %v6625_v3 = vpop.f32.mrf.mxu1  ;;  %6864 = vmatmul.mubr.bf16.gmra.mxu1 %v15620_v7  ;;  %v7302_v16 = vpop.f32.mrf.mxu0 }
 0x8ab   : > { %v8160_v58 = vmax.f32 %v8159_v31, %v6622_v2  ;;  %v8203_v11 = vmax.f32 %v8202_v61, %v7301_v26  ;;  %v6626_v19 = vadd.f32 %v6625_v3, %v14191_v21  ;;  %v7303_v38 = vadd.f32 %v7302_v16, %v14185_v22  ;;  %6873 = vmatprep.mubr.bf16.mxu1 %v15192_v44  ;;  %v15622_v31 = vld [vmem:[#allocation88_spill] sm:$0xff] }
 0x8ac   : > { %v6627_v63 = vpop.f32.mrf.mxu1  ;;  %v7304_v12 = vpop.f32.mrf.mxu0 }
 0x8ad   : > { %v8140_v51 = vmax.f32 %v8139_v37, %v6626_v19  ;;  %v8183_v36 = vmax.f32 %v8182_v24, %v7303_v38  ;;  %v6628_v55 = vadd.f32 %v6627_v63, %v14197_v30  ;;  %v7305_v8 = vadd.f32 %v7304_v12, %v14189_v17 }
 0x8ae   : > { %v6629_v33 = vpop.f32.mrf.mxu1  ;;  %v7308_v41 = vpop.f32.mrf.mxu0 }
 0x8af   : > { %7547 = vmatmul.mubr.bf16.gmra.mxu0 %v15621_v10  ;;  %v8184_v20 = vrot.slane %v8183_v36, 4  ;;  %v8161_v56 = vmax.f32 %v8160_v58, %v6628_v55  ;;  %v8204_v0 = vmax.f32 %v8203_v11, %v7305_v8  ;;  %v6630_v49 = vadd.f32 %v6629_v33, %v14191_v21 }
 0x8b0   : > { %7556 = vmatprep.mubr.bf16.mxu0 %v15192_v44  ;;  %v6631_v43 = vpop.f32.mrf.mxu1  ;;  %v7310_v32 = vpop.f32.mrf.mxu0  ;;  %v7309_v6 = vadd.f32 %v7308_v41, %v14185_v22 }
 0x8b1   : > { %v8185_v14 = vmax.f32 %v8183_v36, %v8184_v20  ;;  %v8205_v13 = vrot.slane %v8204_v0, 4  ;;  %v8141_v23 = vmax.f32 %v8140_v51, %v6630_v49  ;;  %v6632_v59 = vadd.f32 %v6631_v43, %v14197_v30 }
 0x8b2   : > { %v6635_v27 = vpop.f32.mrf.mxu1  ;;  %6874 = vmatmul.mubr.bf16.gmra.mxu1 %v15621_v10  ;;  %v7312_v4 = vpop.f32.mrf.mxu0  ;;  %v7311_v5 = vadd.f32 %v7310_v32, %v14189_v17 }
 0x8b3   : > { %v8186_v28 = vrot.slane %v8185_v14, 2  ;;  %v8206_v52 = vmax.f32 %v8204_v0, %v8205_v13  ;;  %v8142_v15 = vrot.slane %v8141_v23, 4  ;;  %v8162_v48 = vmax.f32 %v8161_v56, %v6632_v59  ;;  %6883 = vmatprep.mubr.bf16.mxu1 %v15192_v44 }
 0x8b4   : > { %v7313_v25 = vadd.f32 %v7312_v4, %v14185_v22  ;;  %v6637_v40 = vpop.f32.mrf.mxu1  ;;  %v7314_v34 = vpop.f32.mrf.mxu0  ;;  %v6636_v53 = vadd.f32 %v6635_v27, %v14191_v21 }
 0x8b5   : > { %v8187_v9 = vmax.f32 %v8185_v14, %v8186_v28  ;;  %v8207_v35 = vrot.slane %v8206_v52, 2  ;;  %v8143_v1 = vmax.f32 %v8141_v23, %v8142_v15  ;;  %v8163_v39 = vrot.slane %v8162_v48, 4  ;;  %v15623_v15 = vld [vmem:[#allocation130_spill] sm:$0xff] }
 0x8b6   : > { %v8337_v18 = vmax.f32 %v7309_v6, %v7313_v25  ;;  %v7315_v42 = vadd.f32 %v7314_v34, %v14189_v17  ;;  %v6639_v60 = vpop.f32.mrf.mxu1  ;;  %v7318_v7 = vpop.f32.mrf.mxu0  ;;  %v6638_v62 = vadd.f32 %v6637_v40, %v14197_v30 }
 0x8b7   : > { %7557 = vmatmul.mubr.bf16.gmra.mxu0 %v15622_v31  ;;  %v8188_v61 = vrot.slane %v8187_v9, 1  ;;  %v8208_v45 = vmax.f32 %v8206_v52, %v8207_v35  ;;  %v8144_v50 = vrot.slane %v8143_v1, 2  ;;  %v8164_v46 = vmax.f32 %v8162_v48, %v8163_v39 }
 0x8b8   : > { %7566 = vmatprep.mubr.bf16.mxu0 %v15192_v44  ;;  %v8358_v37 = vmax.f32 %v7311_v5, %v7315_v42  ;;  %v6640_v24 = vadd.f32 %v6639_v60, %v14191_v21  ;;  %v7319_v2 = vadd.f32 %v7318_v7, %v14185_v22  ;;  %v6641_v26 = vpop.f32.mrf.mxu1  ;;  %v7320_v3 = vpop.f32.mrf.mxu0 }
 0x8b9   : > { %v8189_v16 = vmax.f32 %v8187_v9, %v8188_v61  ;;  %v8209_v58 = vrot.slane %v8208_v45, 1  ;;  %v8145_v11 = vmax.f32 %v8143_v1, %v8144_v50  ;;  %v8165_v19 = vrot.slane %v8164_v46, 2 }
 0x8ba   : > { %v8295_v38 = vmax.f32 %v6636_v53, %v6640_v24  ;;  %v8338_v63 = vmax.f32 %v8337_v18, %v7319_v2  ;;  %v6642_v12 = vadd.f32 %v6641_v26, %v14197_v30  ;;  %v7321_v51 = vadd.f32 %v7320_v3, %v14189_v17  ;;  %v6645_v36 = vpop.f32.mrf.mxu1  ;;  %6884 = vmatmul.mubr.bf16.gmra.mxu1 %v15622_v31  ;;  %v7322_v55 = vpop.f32.mrf.mxu0  ;;  %v15624_v26 = vld [vmem:[#allocation23_spill] sm:$0xff] }
 0x8bb   : > { %v14540_v8 = vsel %vm9125_vm2, %v8189_v16, %v14430_v47  ;;  %v8210_v33 = vmax.f32 %v8208_v45, %v8209_v58  ;;  %v8146_v41 = vrot.slane %v8145_v11, 1  ;;  %v8166_v10 = vmax.f32 %v8164_v46, %v8165_v19  ;;  %6893 = vmatprep.mubr.bf16.mxu1 %v15192_v44 }
 0x8bc   : > { %v8316_v20 = vmax.f32 %v6638_v62, %v6642_v12  ;;  %v8359_v56 = vmax.f32 %v8358_v37, %v7321_v51  ;;  %v6646_v0 = vadd.f32 %v6645_v36, %v14191_v21  ;;  %v7323_v49 = vadd.f32 %v7322_v55, %v14185_v22  ;;  %v6647_v43 = vpop.f32.mrf.mxu1  ;;  %v7324_v32 = vpop.f32.mrf.mxu0 }
 0x8bd   : > { %v14547_v14 = vsel %vm9125_vm2, %v8210_v33, %v14436_v57  ;;  %v8147_v13 = vmax.f32 %v8145_v11, %v8146_v41  ;;  %v8167_v47 = vrot.slane %v8166_v10, 1  ;;  %v6648_v23 = vadd.f32 %v6647_v43, %v14197_v30 }
 0x8be   : > { %v8296_v59 = vmax.f32 %v8295_v38, %v6646_v0  ;;  %v8339_v27 = vmax.f32 %v8338_v63, %v7323_v49  ;;  %v7325_v4 = vadd.f32 %v7324_v32, %v14189_v17  ;;  %v6649_v28 = vpop.f32.mrf.mxu1 }
 0x8bf   : > { %v7328_v52 = vpop.f32.mrf.mxu0  ;;  %7567 = vmatmul.mubr.bf16.gmra.mxu0 %v15623_v15  ;;  %v14554_v48 = vsel %vm9125_vm2, %v8147_v13, %v14443_v29  ;;  %v8168_v6 = vmax.f32 %v8166_v10, %v8167_v47  ;;  %v8317_v25 = vmax.f32 %v8316_v20, %v6648_v23  ;;  %v6650_v57 = vadd.f32 %v6649_v28, %v14191_v21 }
 0x8c0   : > { %7576 = vmatprep.mubr.bf16.mxu0 %v15192_v44  ;;  %v8360_v40 = vmax.f32 %v8359_v56, %v7325_v4  ;;  %v7329_v34 = vadd.f32 %v7328_v52, %v14185_v22  ;;  %v6651_v9 = vpop.f32.mrf.mxu1 }
 0x8c1   : > { %v7330_v35 = vpop.f32.mrf.mxu0  ;;  %v14561_v1 = vsel %vm9125_vm2, %v8168_v6, %v14449_v54  ;;  %v8297_v39 = vmax.f32 %v8296_v59, %v6650_v57  ;;  %v6652_v5 = vadd.f32 %v6651_v9, %v14197_v30 }
 0x8c2   : > { %v7331_v29 = vadd.f32 %v7330_v35, %v14189_v17  ;;  %v8340_v53 = vmax.f32 %v8339_v27, %v7329_v34  ;;  %v6655_v18 = vpop.f32.mrf.mxu1  ;;  %6894 = vmatmul.mubr.bf16.gmra.mxu1 %v15623_v15  ;;  %v15625_v27 = vld [vmem:[#allocation119_spill] sm:$0xff] }
 0x8c3   : > { %v7332_v42 = vpop.f32.mrf.mxu0  ;;  %v8318_v60 = vmax.f32 %v8317_v25, %v6652_v5  ;;  %v6656_v31 = vadd.f32 %v6655_v18, %v14191_v21  ;;  %6903 = vmatprep.mubr.bf16.mxu1 %v15192_v44 }
 0x8c4   : > { %v8361_v7 = vmax.f32 %v8360_v40, %v7331_v29  ;;  %v7333_v61 = vadd.f32 %v7332_v42, %v14185_v22  ;;  %v6657_v54 = vpop.f32.mrf.mxu1 }
 0x8c5   : > { %v7334_v45 = vpop.f32.mrf.mxu0  ;;  %v8298_v50 = vmax.f32 %v8297_v39, %v6656_v31  ;;  %v6658_v62 = vadd.f32 %v6657_v54, %v14197_v30 }
 0x8c6   : > { %v8341_v46 = vmax.f32 %v8340_v53, %v7333_v61  ;;  %v7335_v37 = vadd.f32 %v7334_v45, %v14189_v17  ;;  %v6659_v24 = vpop.f32.mrf.mxu1 }
 0x8c7   : > { %v7338_v2 = vpop.f32.mrf.mxu0  ;;  %7577 = vmatmul.mubr.bf16.gmra.mxu0 %v15624_v26  ;;  %v8319_v3 = vmax.f32 %v8318_v60, %v6658_v62  ;;  %v6660_v58 = vadd.f32 %v6659_v24, %v14191_v21 }
 0x8c8   : > { %v8362_v16 = vmax.f32 %v8361_v7, %v7335_v37  ;;  %v7339_v11 = vadd.f32 %v7338_v2, %v14185_v22  ;;  %7586 = vmatprep.mubr.bf16.mxu0 %v15192_v44  ;;  %v6661_v19 = vpop.f32.mrf.mxu1 }
 0x8c9   : > { %v7340_v38 = vpop.f32.mrf.mxu0  ;;  %v8299_v63 = vmax.f32 %v8298_v50, %v6660_v58  ;;  %v6662_v51 = vadd.f32 %v6661_v19, %v14197_v30 }
 0x8ca   : > { %v8342_v12 = vmax.f32 %v8341_v46, %v7339_v11  ;;  %v7341_v36 = vadd.f32 %v7340_v38, %v14189_v17  ;;  %v6665_v55 = vpop.f32.mrf.mxu1  ;;  %6904 = vmatmul.mubr.bf16.gmra.mxu1 %v15624_v26  ;;  %v15626_v46 = vld [vmem:[#allocation31_spill] sm:$0xff] }
 0x8cb   : > { %v7342_v33 = vpop.f32.mrf.mxu0  ;;  %v8320_v41 = vmax.f32 %v8319_v3, %v6662_v51  ;;  %v6666_v20 = vadd.f32 %v6665_v55, %v14191_v21  ;;  %6913 = vmatprep.mubr.bf16.mxu1 %v15192_v44 }
 0x8cc   : > { %v8363_v10 = vmax.f32 %v8362_v16, %v7341_v36  ;;  %v7343_v56 = vadd.f32 %v7342_v33, %v14185_v22  ;;  %v6667_v0 = vpop.f32.mrf.mxu1 }
 0x8cd   : > { %v7344_v49 = vpop.f32.mrf.mxu0  ;;  %v8300_v43 = vmax.f32 %v8299_v63, %v6666_v20  ;;  %v6668_v13 = vadd.f32 %v6667_v0, %v14197_v30 }
 0x8ce   : > { %v8343_v32 = vmax.f32 %v8342_v12, %v7343_v56  ;;  %v7345_v47 = vadd.f32 %v7344_v49, %v14189_v17  ;;  %v6669_v23 = vpop.f32.mrf.mxu1 }
 0x8cf   : > { %v7348_v59 = vpop.f32.mrf.mxu0  ;;  %7587 = vmatmul.mubr.bf16.gmra.mxu0 %v15625_v27  ;;  %v8321_v4 = vmax.f32 %v8320_v41, %v6668_v13  ;;  %v6670_v52 = vadd.f32 %v6669_v23, %v14191_v21 }
 0x8d0   : > { %v8364_v28 = vmax.f32 %v8363_v10, %v7345_v47  ;;  %v7349_v15 = vadd.f32 %v7348_v59, %v14185_v22  ;;  %7596 = vmatprep.mubr.bf16.mxu0 %v15192_v44  ;;  %v6671_v6 = vpop.f32.mrf.mxu1 }
 0x8d1   : > { %v7350_v25 = vpop.f32.mrf.mxu0  ;;  %v8301_v57 = vmax.f32 %v8300_v43, %v6670_v52  ;;  %v6672_v34 = vadd.f32 %v6671_v6, %v14197_v30 }
 0x8d2   : > { %v8344_v40 = vmax.f32 %v8343_v32, %v7349_v15  ;;  %v7351_v9 = vadd.f32 %v7350_v25, %v14189_v17  ;;  %v6675_v35 = vpop.f32.mrf.mxu1  ;;  %6914 = vmatmul.mubr.bf16.gmra.mxu1 %v15625_v27  ;;  %v15627_v32 = vld [vmem:[#allocation128_spill] sm:$0xff] }
 0x8d3   : > { %v7352_v39 = vpop.f32.mrf.mxu0  ;;  %v8322_v5 = vmax.f32 %v8321_v4, %v6672_v34  ;;  %v6676_v53 = vadd.f32 %v6675_v35, %v14191_v21  ;;  %6923 = vmatprep.mubr.bf16.mxu1 %v15192_v44 }
 0x8d4   : > { %v8365_v29 = vmax.f32 %v8364_v28, %v7351_v9  ;;  %v7353_v18 = vadd.f32 %v7352_v39, %v14185_v22  ;;  %v6677_v42 = vpop.f32.mrf.mxu1 }
 0x8d5   : > { %v7354_v60 = vpop.f32.mrf.mxu0  ;;  %v8302_v7 = vmax.f32 %v8301_v57, %v6676_v53  ;;  %v6678_v61 = vadd.f32 %v6677_v42, %v14197_v30 }
 0x8d6   : > { %v8345_v31 = vmax.f32 %v8344_v40, %v7353_v18  ;;  %v7355_v54 = vadd.f32 %v7354_v60, %v14189_v17  ;;  %v6679_v45 = vpop.f32.mrf.mxu1 }
 0x8d7   : > { %v7358_v50 = vpop.f32.mrf.mxu0  ;;  %7597 = vmatmul.mubr.bf16.gmra.mxu0 %v15626_v46  ;;  %v8323_v62 = vmax.f32 %v8322_v5, %v6678_v61  ;;  %v6680_v24 = vadd.f32 %v6679_v45, %v14191_v21 }
 0x8d8   : > { %v8366_v37 = vmax.f32 %v8365_v29, %v7355_v54  ;;  %v7359_v2 = vadd.f32 %v7358_v50, %v14185_v22  ;;  %7606 = vmatprep.mubr.bf16.mxu0 %v15192_v44  ;;  %v6681_v26 = vpop.f32.mrf.mxu1 }
 0x8d9   : > { %v7360_v3 = vpop.f32.mrf.mxu0  ;;  %v8303_v16 = vmax.f32 %v8302_v7, %v6680_v24  ;;  %v6682_v11 = vadd.f32 %v6681_v26, %v14197_v30 }
 0x8da   : > { %v8346_v58 = vmax.f32 %v8345_v31, %v7359_v2  ;;  %v7361_v19 = vadd.f32 %v7360_v3, %v14189_v17  ;;  %v6685_v38 = vpop.f32.mrf.mxu1  ;;  %6924 = vmatmul.mubr.bf16.gmra.mxu1 %v15626_v46  ;;  %v15628_v31 = vld [vmem:[#allocation38_spill] sm:$0xff] }
 0x8db   : > { %v7362_v63 = vpop.f32.mrf.mxu0  ;;  %v8324_v12 = vmax.f32 %v8323_v62, %v6682_v11  ;;  %v6686_v36 = vadd.f32 %v6685_v38, %v14191_v21  ;;  %6933 = vmatprep.mubr.bf16.mxu1 %v15192_v44 }
 0x8dc   : > { %v8367_v51 = vmax.f32 %v8366_v37, %v7361_v19  ;;  %v7363_v55 = vadd.f32 %v7362_v63, %v14185_v22  ;;  %v6687_v33 = vpop.f32.mrf.mxu1 }
 0x8dd   : > { %v7364_v41 = vpop.f32.mrf.mxu0  ;;  %v8304_v10 = vmax.f32 %v8303_v16, %v6686_v36  ;;  %v6688_v56 = vadd.f32 %v6687_v33, %v14197_v30 }
 0x8de   : > { %v8347_v20 = vmax.f32 %v8346_v58, %v7363_v55  ;;  %v7365_v0 = vadd.f32 %v7364_v41, %v14189_v17  ;;  %v6689_v49 = vpop.f32.mrf.mxu1 }
 0x8df   : > { %v7368_v43 = vpop.f32.mrf.mxu0  ;;  %7607 = vmatmul.mubr.bf16.gmra.mxu0 %v15627_v32  ;;  %v8325_v13 = vmax.f32 %v8324_v12, %v6688_v56  ;;  %v6690_v23 = vadd.f32 %v6689_v49, %v14191_v21 }
 0x8e0   : > { %v8368_v47 = vmax.f32 %v8367_v51, %v7365_v0  ;;  %v7369_v59 = vadd.f32 %v7368_v43, %v14185_v22  ;;  %7616 = vmatprep.mubr.bf16.mxu0 %v15192_v44  ;;  %v6691_v27 = vpop.f32.mrf.mxu1 }
 0x8e1   : > { %v7370_v4 = vpop.f32.mrf.mxu0  ;;  %v8305_v28 = vmax.f32 %v8304_v10, %v6690_v23  ;;  %v6692_v15 = vadd.f32 %v6691_v27, %v14197_v30 }
 0x8e2   : > { %v8348_v52 = vmax.f32 %v8347_v20, %v7369_v59  ;;  %v7371_v6 = vadd.f32 %v7370_v4, %v14189_v17  ;;  %v6695_v25 = vpop.f32.mrf.mxu1  ;;  %6934 = vmatmul.mubr.bf16.gmra.mxu1 %v15627_v32  ;;  %v15629_v20 = vld [vmem:[#allocation136_spill] sm:$0xff] }
 0x8e3   : > { %v7372_v57 = vpop.f32.mrf.mxu0  ;;  %v8326_v40 = vmax.f32 %v8325_v13, %v6692_v15  ;;  %v6696_v9 = vadd.f32 %v6695_v25, %v14191_v21  ;;  %6943 = vmatprep.mubr.bf16.mxu1 %v15192_v44 }
 0x8e4   : > { %v8369_v34 = vmax.f32 %v8368_v47, %v7371_v6  ;;  %v7373_v35 = vadd.f32 %v7372_v57, %v14185_v22  ;;  %v6697_v39 = vpop.f32.mrf.mxu1 }
 0x8e5   : > { %v7374_v5 = vpop.f32.mrf.mxu0  ;;  %v8306_v29 = vmax.f32 %v8305_v28, %v6696_v9  ;;  %v6698_v18 = vadd.f32 %v6697_v39, %v14197_v30 }
 0x8e6   : > { %v8349_v53 = vmax.f32 %v8348_v52, %v7373_v35  ;;  %v7375_v42 = vadd.f32 %v7374_v5, %v14189_v17  ;;  %v6699_v60 = vpop.f32.mrf.mxu1 }
 0x8e7   : > { %v7378_v7 = vpop.f32.mrf.mxu0  ;;  %7617 = vmatmul.mubr.bf16.gmra.mxu0 %v15628_v31  ;;  %v8327_v61 = vmax.f32 %v8326_v40, %v6698_v18  ;;  %v6700_v45 = vadd.f32 %v6699_v60, %v14191_v21 }
 0x8e8   : > { %v8370_v54 = vmax.f32 %v8369_v34, %v7375_v42  ;;  %v7379_v50 = vadd.f32 %v7378_v7, %v14185_v22  ;;  %7626 = vmatprep.mubr.bf16.mxu0 %v15192_v44  ;;  %v6701_v46 = vpop.f32.mrf.mxu1 }
 0x8e9   : > { %v7380_v62 = vpop.f32.mrf.mxu0  ;;  %v8307_v37 = vmax.f32 %v8306_v29, %v6700_v45  ;;  %v6702_v2 = vadd.f32 %v6701_v46, %v14197_v30 }
 0x8ea   : > { %v8350_v24 = vmax.f32 %v8349_v53, %v7379_v50  ;;  %v7381_v26 = vadd.f32 %v7380_v62, %v14189_v17  ;;  %v6705_v3 = vpop.f32.mrf.mxu1  ;;  %6944 = vmatmul.mubr.bf16.gmra.mxu1 %v15628_v31 }
 0x8eb   : > { %v7382_v16 = vpop.f32.mrf.mxu0  ;;  %v8328_v58 = vmax.f32 %v8327_v61, %v6702_v2  ;;  %v6706_v19 = vadd.f32 %v6705_v3, %v14191_v21  ;;  %6953 = vmatprep.mubr.bf16.mxu1 %v15192_v44  ;;  %v15630_v61 = vld [vmem:[#allocation61_spill] sm:$0xff] }
 0x8ec   : > { %v8371_v11 = vmax.f32 %v8370_v54, %v7381_v26  ;;  %v7383_v38 = vadd.f32 %v7382_v16, %v14185_v22  ;;  %v6707_v63 = vpop.f32.mrf.mxu1 }
 0x8ed   : > { %v7384_v12 = vpop.f32.mrf.mxu0  ;;  %v8308_v51 = vmax.f32 %v8307_v37, %v6706_v19  ;;  %v6708_v55 = vadd.f32 %v6707_v63, %v14197_v30 }
 0x8ee   : > { %v8351_v36 = vmax.f32 %v8350_v24, %v7383_v38  ;;  %v7385_v33 = vadd.f32 %v7384_v12, %v14189_v17  ;;  %v6709_v41 = vpop.f32.mrf.mxu1 }
 0x8ef   : > { %v7388_v10 = vpop.f32.mrf.mxu0  ;;  %7627 = vmatmul.mubr.bf16.gmra.mxu0 %v15629_v20  ;;  %v8329_v0 = vmax.f32 %v8328_v58, %v6708_v55  ;;  %v6710_v43 = vadd.f32 %v6709_v41, %v14191_v21 }
 0x8f0   : > { %v8352_v56 = vrot.slane %v8351_v36, 4  ;;  %v8372_v49 = vmax.f32 %v8371_v11, %v7385_v33  ;;  %7636 = vmatprep.mubr.bf16.mxu0 %v15192_v44  ;;  %v6711_v32 = vpop.f32.mrf.mxu1  ;;  %v7389_v57 = vadd.f32 %v7388_v10, %v14185_v22 }
 0x8f1   : > { %v7390_v13 = vpop.f32.mrf.mxu0  ;;  %v8309_v59 = vmax.f32 %v8308_v51, %v6710_v43  ;;  %v6712_v27 = vadd.f32 %v6711_v32, %v14197_v30 }
 0x8f2   : > { %v8353_v47 = vmax.f32 %v8351_v36, %v8352_v56  ;;  %v8373_v23 = vrot.slane %v8372_v49, 4  ;;  %v6715_v4 = vpop.f32.mrf.mxu1  ;;  %6954 = vmatmul.mubr.bf16.gmra.mxu1 %v15629_v20  ;;  %v7391_v53 = vadd.f32 %v7390_v13, %v14189_v17 }
 0x8f3   : > { %v7392_v28 = vpop.f32.mrf.mxu0  ;;  %v8310_v6 = vrot.slane %v8309_v59, 4  ;;  %v8330_v25 = vmax.f32 %v8329_v0, %v6712_v27  ;;  %6963 = vmatprep.mubr.bf16.mxu1 %v15192_v44  ;;  %v6716_v18 = vadd.f32 %v6715_v4, %v14191_v21 }
 0x8f4   : > { %v8354_v52 = vrot.slane %v8353_v47, 2  ;;  %v8374_v15 = vmax.f32 %v8372_v49, %v8373_v23  ;;  %v7393_v40 = vadd.f32 %v7392_v28, %v14185_v22  ;;  %v6717_v34 = vpop.f32.mrf.mxu1 }
 0x8f5   : > { %v7394_v9 = vpop.f32.mrf.mxu0  ;;  %v8311_v5 = vmax.f32 %v8309_v59, %v8310_v6  ;;  %v8331_v29 = vrot.slane %v8330_v25, 4  ;;  %v6718_v62 = vadd.f32 %v6717_v34, %v14197_v30  ;;  %v15631_v6 = vld [vmem:[#allocation101_spill] sm:$0xff] }
 0x8f6   : > { %v8355_v35 = vmax.f32 %v8353_v47, %v8354_v52  ;;  %v8375_v39 = vrot.slane %v8374_v15, 2  ;;  %v8505_v42 = vmax.f32 %v7389_v57, %v7393_v40  ;;  %v7395_v60 = vadd.f32 %v7394_v9, %v14189_v17  ;;  %v6719_v7 = vpop.f32.mrf.mxu1 }
 0x8f7   : > { %v7398_v31 = vpop.f32.mrf.mxu0  ;;  %7637 = vmatmul.mubr.bf16.gmra.mxu0 %v15630_v61  ;;  %v8312_v50 = vrot.slane %v8311_v5, 2  ;;  %v8332_v46 = vmax.f32 %v8330_v25, %v8331_v29  ;;  %v6720_v24 = vadd.f32 %v6719_v7, %v14191_v21 }
 0x8f8   : > { %v8356_v54 = vrot.slane %v8355_v35, 1  ;;  %v8376_v45 = vmax.f32 %v8374_v15, %v8375_v39  ;;  %7646 = vmatprep.mubr.bf16.mxu0 %v15192_v44  ;;  %v8526_v37 = vmax.f32 %v7391_v53, %v7395_v60  ;;  %v7399_v2 = vadd.f32 %v7398_v31, %v14185_v22  ;;  %v6721_v26 = vpop.f32.mrf.mxu1 }
 0x8f9   : > { %v7400_v3 = vpop.f32.mrf.mxu0  ;;  %v8313_v11 = vmax.f32 %v8311_v5, %v8312_v50  ;;  %v8333_v19 = vrot.slane %v8332_v46, 2  ;;  %v8463_v38 = vmax.f32 %v6716_v18, %v6720_v24  ;;  %v6722_v12 = vadd.f32 %v6721_v26, %v14197_v30  ;;  %v15632_v26 = vld [vmem:[#allocation77_spill] sm:$0xff] }
 0x8fa   : > { %v8357_v16 = vmax.f32 %v8355_v35, %v8356_v54  ;;  %v8377_v58 = vrot.slane %v8376_v45, 1  ;;  %v8506_v63 = vmax.f32 %v8505_v42, %v7399_v2  ;;  %v7401_v51 = vadd.f32 %v7400_v3, %v14189_v17  ;;  %v6725_v36 = vpop.f32.mrf.mxu1  ;;  %6964 = vmatmul.mubr.bf16.gmra.mxu1 %v15630_v61 }
 0x8fb   : > { %v7402_v55 = vpop.f32.mrf.mxu0  ;;  %v8314_v10 = vrot.slane %v8313_v11, 1  ;;  %v8334_v20 = vmax.f32 %v8332_v46, %v8333_v19  ;;  %6973 = vmatprep.mubr.bf16.mxu1 %v15192_v44  ;;  %v8484_v56 = vmax.f32 %v6718_v62, %v6722_v12  ;;  %v6726_v49 = vadd.f32 %v6725_v36, %v14191_v21 }
 0x8fc   : > { %v14652_v33 = vsel %vm9127_vm3, %v8357_v16, %v14540_v8  ;;  %v8378_v41 = vmax.f32 %v8376_v45, %v8377_v58  ;;  %v8527_v0 = vmax.f32 %v8526_v37, %v7401_v51  ;;  %v7403_v43 = vadd.f32 %v7402_v55, %v14185_v22  ;;  %v6727_v32 = vpop.f32.mrf.mxu1 }
 0x8fd   : > { %v7404_v13 = vpop.f32.mrf.mxu0  ;;  %v8315_v23 = vmax.f32 %v8313_v11, %v8314_v10  ;;  %v8335_v8 = vrot.slane %v8334_v20, 1  ;;  %v6728_v59 = vadd.f32 %v6727_v32, %v14197_v30  ;;  %v8464_v27 = vmax.f32 %v8463_v38, %v6726_v49 }
 0x8fe   : > { %v14659_v47 = vsel %vm9127_vm3, %v8378_v41, %v14547_v14  ;;  %v8507_v4 = vmax.f32 %v8506_v63, %v7403_v43  ;;  %v7405_v28 = vadd.f32 %v7404_v13, %v14189_v17  ;;  %v6729_v52 = vpop.f32.mrf.mxu1 }
 0x8ff   : > { %v7408_v15 = vpop.f32.mrf.mxu0  ;;  %7647 = vmatmul.mubr.bf16.gmra.mxu0 %v15631_v6  ;;  %v14666_v25 = vsel %vm9127_vm3, %v8315_v23, %v14554_v48  ;;  %v8336_v57 = vmax.f32 %v8334_v20, %v8335_v8  ;;  %v8485_v40 = vmax.f32 %v8484_v56, %v6728_v59  ;;  %v6730_v14 = vadd.f32 %v6729_v52, %v14191_v21 }
 0x900   : > { %7656 = vmatprep.mubr.bf16.mxu0 %v15192_v44  ;;  %v8528_v34 = vmax.f32 %v8527_v0, %v7405_v28  ;;  %v7409_v9 = vadd.f32 %v7408_v15, %v14185_v22  ;;  %v6731_v35 = vpop.f32.mrf.mxu1 }
 0x901   : > { %v7410_v39 = vpop.f32.mrf.mxu0  ;;  %v14673_v5 = vsel %vm9127_vm3, %v8336_v57, %v14561_v1  ;;  %v8465_v29 = vmax.f32 %v8464_v27, %v6730_v14  ;;  %v6732_v53 = vadd.f32 %v6731_v35, %v14197_v30 }
 0x902   : > { %v7411_v48 = vadd.f32 %v7410_v39, %v14189_v17  ;;  %v8508_v18 = vmax.f32 %v8507_v4, %v7409_v9  ;;  %v6735_v42 = vpop.f32.mrf.mxu1  ;;  %6974 = vmatmul.mubr.bf16.gmra.mxu1 %v15631_v6  ;;  %v15633_v4 = vld [vmem:[#allocation132_spill] sm:$0xff] }
 0x903   : > { %v7412_v60 = vpop.f32.mrf.mxu0  ;;  %v8486_v7 = vmax.f32 %v8485_v40, %v6732_v53  ;;  %v6736_v61 = vadd.f32 %v6735_v42, %v14191_v21  ;;  %6983 = vmatprep.mubr.bf16.mxu1 %v15192_v44 }
 0x904   : > { %v8529_v31 = vmax.f32 %v8528_v34, %v7411_v48  ;;  %v7413_v54 = vadd.f32 %v7412_v60, %v14185_v22  ;;  %v6737_v1 = vpop.f32.mrf.mxu1 }
 0x905   : > { %v7414_v45 = vpop.f32.mrf.mxu0  ;;  %v8466_v50 = vmax.f32 %v8465_v29, %v6736_v61  ;;  %v6738_v62 = vadd.f32 %v6737_v1, %v14197_v30 }
 0x906   : > { %v8509_v46 = vmax.f32 %v8508_v18, %v7413_v54  ;;  %v7415_v37 = vadd.f32 %v7414_v45, %v14189_v17  ;;  %v6739_v24 = vpop.f32.mrf.mxu1 }
 0x907   : > { %v7418_v2 = vpop.f32.mrf.mxu0  ;;  %7657 = vmatmul.mubr.bf16.gmra.mxu0 %v15632_v26  ;;  %v8487_v3 = vmax.f32 %v8486_v7, %v6738_v62  ;;  %v6740_v58 = vadd.f32 %v6739_v24, %v14191_v21 }
 0x908   : > { %v8530_v16 = vmax.f32 %v8529_v31, %v7415_v37  ;;  %v7419_v11 = vadd.f32 %v7418_v2, %v14185_v22  ;;  %7666 = vmatprep.mubr.bf16.mxu0 %v15192_v44  ;;  %v6741_v19 = vpop.f32.mrf.mxu1 }
 0x909   : > { %v7420_v38 = vpop.f32.mrf.mxu0  ;;  %v8467_v63 = vmax.f32 %v8466_v50, %v6740_v58  ;;  %v6742_v51 = vadd.f32 %v6741_v19, %v14197_v30 }
 0x90a   : > { %v8510_v12 = vmax.f32 %v8509_v46, %v7419_v11  ;;  %v7421_v36 = vadd.f32 %v7420_v38, %v14189_v17  ;;  %v6745_v55 = vpop.f32.mrf.mxu1  ;;  %6984 = vmatmul.mubr.bf16.gmra.mxu1 %v15632_v26  ;;  %v15634_v46 = vld [vmem:[#allocation95_spill] sm:$0xff] }
 0x90b   : > { %v7422_v41 = vpop.f32.mrf.mxu0  ;;  %v8488_v10 = vmax.f32 %v8487_v3, %v6742_v51  ;;  %v6746_v56 = vadd.f32 %v6745_v55, %v14191_v21  ;;  %6993 = vmatprep.mubr.bf16.mxu1 %v15192_v44 }
 0x90c   : > { %v8531_v20 = vmax.f32 %v8530_v16, %v7421_v36  ;;  %v7423_v0 = vadd.f32 %v7422_v41, %v14185_v22  ;;  %v6747_v49 = vpop.f32.mrf.mxu1 }
 0x90d   : > { %v7424_v43 = vpop.f32.mrf.mxu0  ;;  %v8468_v32 = vmax.f32 %v8467_v63, %v6746_v56  ;;  %v6748_v23 = vadd.f32 %v6747_v49, %v14197_v30 }
 0x90e   : > { %v8511_v13 = vmax.f32 %v8510_v12, %v7423_v0  ;;  %v7425_v8 = vadd.f32 %v7424_v43, %v14189_v17  ;;  %v6749_v59 = vpop.f32.mrf.mxu1 }
 0x90f   : > { %v7428_v27 = vpop.f32.mrf.mxu0  ;;  %7667 = vmatmul.mubr.bf16.gmra.mxu0 %v15633_v4  ;;  %v8489_v28 = vmax.f32 %v8488_v10, %v6748_v23  ;;  %v6750_v15 = vadd.f32 %v6749_v59, %v14191_v21 }
 0x910   : > { %v8532_v52 = vmax.f32 %v8531_v20, %v7425_v8  ;;  %v7429_v6 = vadd.f32 %v7428_v27, %v14185_v22  ;;  %7676 = vmatprep.mubr.bf16.mxu0 %v15192_v44  ;;  %v6751_v57 = vpop.f32.mrf.mxu1 }
 0x911   : > { %v7430_v40 = vpop.f32.mrf.mxu0  ;;  %v8469_v14 = vmax.f32 %v8468_v32, %v6750_v15  ;;  %v6752_v9 = vadd.f32 %v6751_v57, %v14197_v30 }
 0x912   : > { %v8512_v34 = vmax.f32 %v8511_v13, %v7429_v6  ;;  %v7431_v35 = vadd.f32 %v7430_v40, %v14189_v17  ;;  %v6755_v39 = vpop.f32.mrf.mxu1  ;;  %6994 = vmatmul.mubr.bf16.gmra.mxu1 %v15633_v4  ;;  %v15635_v13 = vld [vmem:[#allocation108_spill] sm:$0xff] }
 0x913   : > { %v7432_v29 = vpop.f32.mrf.mxu0  ;;  %v8490_v53 = vmax.f32 %v8489_v28, %v6752_v9  ;;  %v6756_v18 = vadd.f32 %v6755_v39, %v14191_v21  ;;  %7003 = vmatprep.mubr.bf16.mxu1 %v15192_v44 }
 0x914   : > { %v8533_v48 = vmax.f32 %v8532_v52, %v7431_v35  ;;  %v7433_v42 = vadd.f32 %v7432_v29, %v14185_v22  ;;  %v6757_v60 = vpop.f32.mrf.mxu1 }
 0x915   : > { %v7434_v7 = vpop.f32.mrf.mxu0  ;;  %v8470_v31 = vmax.f32 %v8469_v14, %v6756_v18  ;;  %v6758_v54 = vadd.f32 %v6757_v60, %v14197_v30 }
 0x916   : > { %v8513_v61 = vmax.f32 %v8512_v34, %v7433_v42  ;;  %v7435_v1 = vadd.f32 %v7434_v7, %v14189_v17  ;;  %v6759_v45 = vpop.f32.mrf.mxu1 }
 0x917   : > { %v7438_v50 = vpop.f32.mrf.mxu0  ;;  %7677 = vmatmul.mubr.bf16.gmra.mxu0 %v15634_v46  ;;  %v8491_v62 = vmax.f32 %v8490_v53, %v6758_v54  ;;  %v6760_v24 = vadd.f32 %v6759_v45, %v14191_v21 }
 0x918   : > { %v8534_v37 = vmax.f32 %v8533_v48, %v7435_v1  ;;  %v7439_v2 = vadd.f32 %v7438_v50, %v14185_v22  ;;  %7686 = vmatprep.mubr.bf16.mxu0 %v15192_v44  ;;  %v6761_v26 = vpop.f32.mrf.mxu1 }
 0x919   : > { %v7440_v3 = vpop.f32.mrf.mxu0  ;;  %v8471_v16 = vmax.f32 %v8470_v31, %v6760_v24  ;;  %v6762_v11 = vadd.f32 %v6761_v26, %v14197_v30 }
 0x91a   : > { %v8514_v58 = vmax.f32 %v8513_v61, %v7439_v2  ;;  %v7441_v19 = vadd.f32 %v7440_v3, %v14189_v17  ;;  %v6765_v38 = vpop.f32.mrf.mxu1  ;;  %7004 = vmatmul.mubr.bf16.gmra.mxu1 %v15634_v46  ;;  %v15636_v61 = vld [vmem:[#allocation8_spill] sm:$0xff] }
 0x91b   : > { %v7442_v63 = vpop.f32.mrf.mxu0  ;;  %v8492_v12 = vmax.f32 %v8491_v62, %v6762_v11  ;;  %v6766_v36 = vadd.f32 %v6765_v38, %v14191_v21  ;;  %7013 = vmatprep.mubr.bf16.mxu1 %v15192_v44 }
 0x91c   : > { %v8535_v51 = vmax.f32 %v8534_v37, %v7441_v19  ;;  %v7443_v55 = vadd.f32 %v7442_v63, %v14185_v22  ;;  %v6767_v41 = vpop.f32.mrf.mxu1 }
 0x91d   : > { %v7444_v10 = vpop.f32.mrf.mxu0  ;;  %v8472_v20 = vmax.f32 %v8471_v16, %v6766_v36  ;;  %v6768_v0 = vadd.f32 %v6767_v41, %v14197_v30 }
 0x91e   : > { %v8515_v56 = vmax.f32 %v8514_v58, %v7443_v55  ;;  %v7445_v49 = vadd.f32 %v7444_v10, %v14189_v17  ;;  %v6769_v43 = vpop.f32.mrf.mxu1 }
 0x91f   : > { %v7448_v32 = vpop.f32.mrf.mxu0  ;;  %7687 = vmatmul.mubr.bf16.gmra.mxu0 %v15635_v13  ;;  %v8493_v23 = vmax.f32 %v8492_v12, %v6768_v0  ;;  %v6770_v59 = vadd.f32 %v6769_v43, %v14191_v21 }
 0x920   : > { %v8536_v8 = vmax.f32 %v8535_v51, %v7445_v49  ;;  %v7449_v27 = vadd.f32 %v7448_v32, %v14185_v22  ;;  %7696 = vmatprep.mubr.bf16.mxu0 %v15192_v44  ;;  %v6771_v4 = vpop.f32.mrf.mxu1 }
 0x921   : > { %v7450_v28 = vpop.f32.mrf.mxu0  ;;  %v8473_v52 = vmax.f32 %v8472_v20, %v6770_v59  ;;  %v6772_v6 = vadd.f32 %v6771_v4, %v14197_v30 }
 0x922   : > { %v8516_v15 = vmax.f32 %v8515_v56, %v7449_v27  ;;  %v7451_v57 = vadd.f32 %v7450_v28, %v14189_v17  ;;  %v6775_v40 = vpop.f32.mrf.mxu1  ;;  %7014 = vmatmul.mubr.bf16.gmra.mxu1 %v15635_v13 }
 0x923   : > { %v7452_v14 = vpop.f32.mrf.mxu0  ;;  %v8494_v34 = vmax.f32 %v8493_v23, %v6772_v6  ;;  %v6776_v35 = vadd.f32 %v6775_v40, %v14191_v21  ;;  %7023 = vmatprep.mubr.bf16.mxu1 %v15192_v44 }
 0x924   : > { %v8537_v9 = vmax.f32 %v8536_v8, %v7451_v57  ;;  %v7453_v39 = vadd.f32 %v7452_v14, %v14185_v22  ;;  %v6777_v29 = vpop.f32.mrf.mxu1 }
 0x925   : > { %v7454_v53 = vpop.f32.mrf.mxu0  ;;  %v8474_v48 = vmax.f32 %v8473_v52, %v6776_v35  ;;  %v6778_v42 = vadd.f32 %v6777_v29, %v14197_v30 }
 0x926   : > { %v8517_v18 = vmax.f32 %v8516_v15, %v7453_v39  ;;  %v7455_v60 = vadd.f32 %v7454_v53, %v14189_v17  ;;  %v6779_v7 = vpop.f32.mrf.mxu1 }
 0x927   : > { %v7458_v31 = vpop.f32.mrf.mxu0  ;;  %7697 = vmatmul.mubr.bf16.gmra.mxu0 %v15636_v61  ;;  %v8495_v54 = vmax.f32 %v8494_v34, %v6778_v42  ;;  %v6780_v45 = vadd.f32 %v6779_v7, %v14191_v21 }
 0x928   : > { %v8538_v1 = vmax.f32 %v8537_v9, %v7455_v60  ;;  %v7459_v50 = vadd.f32 %v7458_v31, %v14185_v22  ;;  %v6781_v46 = vpop.f32.mrf.mxu1 }
 0x929   : > { %v7460_v44 = vpop.f32.mrf.mxu0  ;;  %v8475_v62 = vmax.f32 %v8474_v48, %v6780_v45  ;;  %v6782_v24 = vadd.f32 %v6781_v46, %v14197_v30 }
 0x92a   : > { %v8518_v37 = vmax.f32 %v8517_v18, %v7459_v50  ;;  %v7461_v2 = vadd.f32 %v7460_v44, %v14189_v17  ;;  %v6785_v26 = vpop.f32.mrf.mxu1  ;;  %7024 = vmatmul.mubr.bf16.gmra.mxu1 %v15636_v61 }
 0x92b   : > { %v7462_v3 = vpop.f32.mrf.mxu0  ;;  %v8496_v16 = vmax.f32 %v8495_v54, %v6782_v24  ;;  %v6786_v11 = vadd.f32 %v6785_v26, %v14191_v21 }
 0x92c   : > { %v8539_v58 = vmax.f32 %v8538_v1, %v7461_v2  ;;  %v7463_v19 = vadd.f32 %v7462_v3, %v14185_v22  ;;  %v6787_v38 = vpop.f32.mrf.mxu1 }
 0x92d   : > { %v7464_v63 = vpop.f32.mrf.mxu0  ;;  %v8476_v12 = vmax.f32 %v8475_v62, %v6786_v11  ;;  %v6788_v36 = vadd.f32 %v6787_v38, %v14197_v30 }
 0x92e   : > { %v8519_v51 = vmax.f32 %v8518_v37, %v7463_v19  ;;  %v7465_v55 = vadd.f32 %v7464_v63, %v14189_v17  ;;  %v6789_v41 = vpop.f32.mrf.mxu1 }
 0x92f   : > { %v7468_v10 = vpop.f32.mrf.mxu0  ;;  %v8497_v56 = vmax.f32 %v8496_v16, %v6788_v36  ;;  %v6790_v49 = vadd.f32 %v6789_v41, %v14191_v21 }
 0x930   : > { %v8520_v20 = vrot.slane %v8519_v51, 4  ;;  %v8540_v0 = vmax.f32 %v8539_v58, %v7465_v55  ;;  %v6791_v43 = vpop.f32.mrf.mxu1  ;;  %v7469_v57 = vadd.f32 %v7468_v10, %v14185_v22 }
 0x931   : > { %v7470_v32 = vpop.f32.mrf.mxu0  ;;  %v8477_v8 = vmax.f32 %v8476_v12, %v6790_v49  ;;  %v6792_v59 = vadd.f32 %v6791_v43, %v14197_v30 }
 0x932   : > { %v8521_v13 = vmax.f32 %v8519_v51, %v8520_v20  ;;  %v8541_v23 = vrot.slane %v8540_v0, 4  ;;  %v6795_v27 = vpop.f32.mrf.mxu1  ;;  %v7471_v53 = vadd.f32 %v7470_v32, %v14189_v17 }
 0x933   : > { %v7472_v4 = vpop.f32.mrf.mxu0  ;;  %v8478_v15 = vrot.slane %v8477_v8, 4  ;;  %v8498_v6 = vmax.f32 %v8497_v56, %v6792_v59  ;;  %v6796_v48 = vadd.f32 %v6795_v27, %v14191_v21 }
 0x934   : > { %v8522_v28 = vrot.slane %v8521_v13, 2  ;;  %v8542_v52 = vmax.f32 %v8540_v0, %v8541_v23  ;;  %v7473_v40 = vadd.f32 %v7472_v4, %v14185_v22  ;;  %v6797_v14 = vpop.f32.mrf.mxu1 }
 0x935   : > { %v7474_v34 = vpop.f32.mrf.mxu0  ;;  %v8479_v39 = vmax.f32 %v8477_v8, %v8478_v15  ;;  %v8499_v29 = vrot.slane %v8498_v6, 4  ;;  %v6798_v45 = vadd.f32 %v6797_v14, %v14197_v30 }
 0x936   : > { %v8523_v9 = vmax.f32 %v8521_v13, %v8522_v28  ;;  %v8543_v35 = vrot.slane %v8542_v52, 2  ;;  %v8673_v18 = vmax.f32 %v7469_v57, %v7473_v40  ;;  %v7475_v42 = vadd.f32 %v7474_v34, %v14189_v17  ;;  %v6799_v60 = vpop.f32.mrf.mxu1 }
 0x937   : > { %v7478_v7 = vpop.f32.mrf.mxu0  ;;  %v8480_v54 = vrot.slane %v8479_v39, 2  ;;  %v8500_v1 = vmax.f32 %v8498_v6, %v8499_v29  ;;  %v6800_v46 = vadd.f32 %v6799_v60, %v14191_v21 }
 0x938   : > { %v8524_v31 = vrot.slane %v8523_v9, 1  ;;  %v8544_v61 = vmax.f32 %v8542_v52, %v8543_v35  ;;  %v8694_v50 = vmax.f32 %v7471_v53, %v7475_v42  ;;  %v7479_v44 = vadd.f32 %v7478_v7, %v14185_v22  ;;  %v6801_v62 = vpop.f32.mrf.mxu1 }
 0x939   : > { %v7480_v37 = vpop.f32.mrf.mxu0  ;;  %v8481_v26 = vmax.f32 %v8479_v39, %v8480_v54  ;;  %v8501_v3 = vrot.slane %v8500_v1, 2  ;;  %v8631_v16 = vmax.f32 %v6796_v48, %v6800_v46  ;;  %v6802_v11 = vadd.f32 %v6801_v62, %v14197_v30 }
 0x93a   : > { %v8525_v24 = vmax.f32 %v8523_v9, %v8524_v31  ;;  %v8545_v2 = vrot.slane %v8544_v61, 1  ;;  %v8674_v58 = vmax.f32 %v8673_v18, %v7479_v44  ;;  %v7481_v19 = vadd.f32 %v7480_v37, %v14189_v17  ;;  %v6805_v38 = vpop.f32.mrf.mxu1 }
 0x93b   : > { %v7482_v63 = vpop.f32.mrf.mxu0  ;;  %v8482_v36 = vrot.slane %v8481_v26, 1  ;;  %v8502_v55 = vmax.f32 %v8500_v1, %v8501_v3  ;;  %v8652_v41 = vmax.f32 %v6798_v45, %v6802_v11  ;;  %v6806_v20 = vadd.f32 %v6805_v38, %v14191_v21 }
 0x93c   : > { %v14755_v12 = vsel %vm9129_vm4, %v8525_v24, %v14652_v33  ;;  %v8546_v51 = vmax.f32 %v8544_v61, %v8545_v2  ;;  %v8695_v10 = vmax.f32 %v8694_v50, %v7481_v19  ;;  %v7483_v56 = vadd.f32 %v7482_v63, %v14185_v22  ;;  %v6807_v0 = vpop.f32.mrf.mxu1 }
 0x93d   : > { %v7484_v49 = vpop.f32.mrf.mxu0  ;;  %v8483_v32 = vmax.f32 %v8481_v26, %v8482_v36  ;;  %v8503_v13 = vrot.slane %v8502_v55, 1  ;;  %v6808_v33 = vadd.f32 %v6807_v0, %v14197_v30  ;;  %v8632_v23 = vmax.f32 %v8631_v16, %v6806_v20 }
 0x93e   : > { %v14761_v43 = vsel %vm9129_vm4, %v8546_v51, %v14659_v47  ;;  %v8675_v8 = vmax.f32 %v8674_v58, %v7483_v56  ;;  %v7485_v59 = vadd.f32 %v7484_v49, %v14189_v17  ;;  %v6809_v27 = vpop.f32.mrf.mxu1 }
 0x93f   : > { %v7488_v4 = vpop.f32.mrf.mxu0  ;;  %v14767_v28 = vsel %vm9129_vm4, %v8483_v32, %v14666_v25  ;;  %v8504_v52 = vmax.f32 %v8502_v55, %v8503_v13  ;;  %v8653_v15 = vmax.f32 %v8652_v41, %v6808_v33  ;;  %v6810_v6 = vadd.f32 %v6809_v27, %v14191_v21 }
 0x940   : > { %v8696_v47 = vmax.f32 %v8695_v10, %v7485_v59  ;;  %v7489_v57 = vadd.f32 %v7488_v4, %v14185_v22  ;;  %v6811_v40 = vpop.f32.mrf.mxu1 }
 0x941   : > { %v7490_v14 = vpop.f32.mrf.mxu0  ;;  %v14773_v34 = vsel %vm9129_vm4, %v8504_v52, %v14673_v5  ;;  %v8633_v9 = vmax.f32 %v8632_v23, %v6810_v6  ;;  %v6812_v35 = vadd.f32 %v6811_v40, %v14197_v30 }
 0x942   : > { %v7491_v39 = vadd.f32 %v7490_v14, %v14189_v17  ;;  %v8676_v25 = vmax.f32 %v8675_v8, %v7489_v57  ;;  %v6815_v29 = vpop.f32.mrf.mxu1 }
 0x943   : > { %v7492_v53 = vpop.f32.mrf.mxu0  ;;  %v8654_v48 = vmax.f32 %v8653_v15, %v6812_v35  ;;  %v6816_v42 = vadd.f32 %v6815_v29, %v14191_v21 }
 0x944   : > { %v8697_v18 = vmax.f32 %v8696_v47, %v7491_v39  ;;  %v7493_v60 = vadd.f32 %v7492_v53, %v14185_v22  ;;  %v6817_v7 = vpop.f32.mrf.mxu1 }
 0x945   : > { %v7494_v31 = vpop.f32.mrf.mxu0  ;;  %v8634_v61 = vmax.f32 %v8633_v9, %v6816_v42  ;;  %v6818_v5 = vadd.f32 %v6817_v7, %v14197_v30 }
 0x946   : > { %v8677_v54 = vmax.f32 %v8676_v25, %v7493_v60  ;;  %v7495_v1 = vadd.f32 %v7494_v31, %v14189_v17  ;;  %v6819_v45 = vpop.f32.mrf.mxu1 }
 0x947   : > { %v7498_v50 = vpop.f32.mrf.mxu0  ;;  %v8655_v46 = vmax.f32 %v8654_v48, %v6818_v5  ;;  %v6820_v62 = vadd.f32 %v6819_v45, %v14191_v21 }
 0x948   : > { %v8698_v44 = vmax.f32 %v8697_v18, %v7495_v1  ;;  %v7499_v37 = vadd.f32 %v7498_v50, %v14185_v22  ;;  %v6821_v24 = vpop.f32.mrf.mxu1 }
 0x949   : > { %v7500_v2 = vpop.f32.mrf.mxu0  ;;  %v8635_v26 = vmax.f32 %v8634_v61, %v6820_v62  ;;  %v6822_v16 = vadd.f32 %v6821_v24, %v14197_v30 }
 0x94a   : > { %v8678_v3 = vmax.f32 %v8677_v54, %v7499_v37  ;;  %v7501_v58 = vadd.f32 %v7500_v2, %v14189_v17  ;;  %v6825_v11 = vpop.f32.mrf.mxu1 }
 0x94b   : > { %v7502_v19 = vpop.f32.mrf.mxu0  ;;  %v8656_v38 = vmax.f32 %v8655_v46, %v6822_v16  ;;  %v6826_v51 = vadd.f32 %v6825_v11, %v14191_v21 }
 0x94c   : > { %v8699_v63 = vmax.f32 %v8698_v44, %v7501_v58  ;;  %v7503_v36 = vadd.f32 %v7502_v19, %v14185_v22  ;;  %v6827_v55 = vpop.f32.mrf.mxu1 }
 0x94d   : > { %v7504_v41 = vpop.f32.mrf.mxu0  ;;  %v8636_v10 = vmax.f32 %v8635_v26, %v6826_v51  ;;  %v6828_v56 = vadd.f32 %v6827_v55, %v14197_v30 }
 0x94e   : > { %v8679_v20 = vmax.f32 %v8678_v3, %v7503_v36  ;;  %v7505_v0 = vadd.f32 %v7504_v41, %v14189_v17  ;;  %v6829_v49 = vpop.f32.mrf.mxu1 }
 0x94f   : > { %v7508_v32 = vpop.f32.mrf.mxu0  ;;  %v8657_v13 = vmax.f32 %v8656_v38, %v6828_v56  ;;  %v6830_v23 = vadd.f32 %v6829_v49, %v14191_v21 }
 0x950   : > { %v8700_v33 = vmax.f32 %v8699_v63, %v7505_v0  ;;  %v7509_v8 = vadd.f32 %v7508_v32, %v14185_v22  ;;  %v6831_v59 = vpop.f32.mrf.mxu1 }
 0x951   : > { %v7510_v27 = vpop.f32.mrf.mxu0  ;;  %v8637_v4 = vmax.f32 %v8636_v10, %v6830_v23  ;;  %v6832_v15 = vadd.f32 %v6831_v59, %v14197_v30 }
 0x952   : > { %v8680_v52 = vmax.f32 %v8679_v20, %v7509_v8  ;;  %v7511_v6 = vadd.f32 %v7510_v27, %v14189_v17  ;;  %v6835_v47 = vpop.f32.mrf.mxu1 }
 0x953   : > { %v7512_v57 = vpop.f32.mrf.mxu0  ;;  %v8658_v40 = vmax.f32 %v8657_v13, %v6832_v15  ;;  %v6836_v9 = vadd.f32 %v6835_v47, %v14191_v21 }
 0x954   : > { %v8701_v14 = vmax.f32 %v8700_v33, %v7511_v6  ;;  %v7513_v35 = vadd.f32 %v7512_v57, %v14185_v22  ;;  %v6837_v39 = vpop.f32.mrf.mxu1 }
 0x955   : > { %v7514_v25 = vpop.f32.mrf.mxu0  ;;  %v8638_v29 = vmax.f32 %v8637_v4, %v6836_v9  ;;  %v6838_v48 = vadd.f32 %v6837_v39, %v14197_v30 }
 0x956   : > { %v8681_v53 = vmax.f32 %v8680_v52, %v7513_v35  ;;  %v7515_v18 = vadd.f32 %v7514_v25, %v14189_v17  ;;  %v6839_v42 = vpop.f32.mrf.mxu1 }
 0x957   : > { %v7518_v60 = vpop.f32.mrf.mxu0  ;;  %v8659_v7 = vmax.f32 %v8658_v40, %v6838_v48  ;;  %v6840_v61 = vadd.f32 %v6839_v42, %v14191_v21 }
 0x958   : > { %v8702_v31 = vmax.f32 %v8701_v14, %v7515_v18  ;;  %v7519_v54 = vadd.f32 %v7518_v60, %v14185_v22  ;;  %v6841_v5 = vpop.f32.mrf.mxu1 }
 0x959   : > { %v7520_v1 = vpop.f32.mrf.mxu0  ;;  %v8639_v45 = vmax.f32 %v8638_v29, %v6840_v61  ;;  %v6842_v46 = vadd.f32 %v6841_v5, %v14197_v30 }
 0x95a   : > { %v8682_v50 = vmax.f32 %v8681_v53, %v7519_v54  ;;  %v7521_v44 = vadd.f32 %v7520_v1, %v14189_v17  ;;  %v6845_v62 = vpop.f32.mrf.mxu1 }
 0x95b   : > { %v7522_v37 = vpop.f32.mrf.mxu0  ;;  %v8660_v24 = vmax.f32 %v8659_v7, %v6842_v46  ;;  %v6846_v26 = vadd.f32 %v6845_v62, %v14191_v21 }
 0x95c   : > { %v8703_v2 = vmax.f32 %v8702_v31, %v7521_v44  ;;  %v7523_v3 = vadd.f32 %v7522_v37, %v14185_v22  ;;  %v6847_v16 = vpop.f32.mrf.mxu1 }
 0x95d   : > { %v7524_v58 = vpop.f32.mrf.mxu0  ;;  %v8640_v11 = vmax.f32 %v8639_v45, %v6846_v26  ;;  %v6848_v38 = vadd.f32 %v6847_v16, %v14197_v30 }
 0x95e   : > { %v8683_v19 = vmax.f32 %v8682_v50, %v7523_v3  ;;  %v7525_v63 = vadd.f32 %v7524_v58, %v14189_v17  ;;  %v6849_v51 = vpop.f32.mrf.mxu1 }
 0x95f   : > { %v7528_v36 = vpop.f32.mrf.mxu0  ;;  %v8661_v55 = vmax.f32 %v8660_v24, %v6848_v38  ;;  %v6850_v10 = vadd.f32 %v6849_v51, %v14191_v21 }
 0x960   : > { %v8704_v41 = vmax.f32 %v8703_v2, %v7525_v63  ;;  %v7529_v20 = vadd.f32 %v7528_v36, %v14185_v22  ;;  %v6851_v56 = vpop.f32.mrf.mxu1 }
 0x961   : > { %v7530_v0 = vpop.f32.mrf.mxu0  ;;  %v8641_v49 = vmax.f32 %v8640_v11, %v6850_v10  ;;  %v6852_v13 = vadd.f32 %v6851_v56, %v14197_v30 }
 0x962   : > { %v8684_v32 = vmax.f32 %v8683_v19, %v7529_v20  ;;  %v7531_v33 = vadd.f32 %v7530_v0, %v14189_v17  ;;  %v6855_v23 = vpop.f32.mrf.mxu1 }
 0x963   : > { %v7532_v8 = vpop.f32.mrf.mxu0  ;;  %v8662_v59 = vmax.f32 %v8661_v55, %v6852_v13  ;;  %v6856_v4 = vadd.f32 %v6855_v23, %v14191_v21 }
 0x964   : > { %v8705_v27 = vmax.f32 %v8704_v41, %v7531_v33  ;;  %v7533_v52 = vadd.f32 %v7532_v8, %v14185_v22  ;;  %v6857_v15 = vpop.f32.mrf.mxu1 }
 0x965   : > { %v7534_v6 = vpop.f32.mrf.mxu0  ;;  %v8642_v47 = vmax.f32 %v8641_v49, %v6856_v4  ;;  %v6858_v40 = vadd.f32 %v6857_v15, %v14197_v30 }
 0x966   : > { %v8685_v57 = vmax.f32 %v8684_v32, %v7533_v52  ;;  %v7535_v14 = vadd.f32 %v7534_v6, %v14189_v17  ;;  %v6859_v9 = vpop.f32.mrf.mxu1 }
 0x967   : > { %v7538_v35 = vpop.f32.mrf.mxu0  ;;  %v8663_v39 = vmax.f32 %v8662_v59, %v6858_v40  ;;  %v6860_v29 = vadd.f32 %v6859_v9, %v14191_v21 }
 0x968   : > { %v8706_v25 = vmax.f32 %v8705_v27, %v7535_v14  ;;  %v7539_v53 = vadd.f32 %v7538_v35, %v14185_v22  ;;  %v6861_v48 = vpop.f32.mrf.mxu1 }
 0x969   : > { %v7540_v18 = vpop.f32.mrf.mxu0  ;;  %v8643_v42 = vmax.f32 %v8642_v47, %v6860_v29  ;;  %v6862_v7 = vadd.f32 %v6861_v48, %v14197_v30 }
 0x96a   : > { %v8686_v60 = vmax.f32 %v8685_v57, %v7539_v53  ;;  %v7541_v31 = vadd.f32 %v7540_v18, %v14189_v17  ;;  %v6865_v61 = vpop.f32.mrf.mxu1 }
 0x96b   : > { %v7542_v54 = vpop.f32.mrf.mxu0  ;;  %v8664_v5 = vmax.f32 %v8663_v39, %v6862_v7  ;;  %v6866_v45 = vadd.f32 %v6865_v61, %v14191_v21 }
 0x96c   : > { %v8707_v1 = vmax.f32 %v8706_v25, %v7541_v31  ;;  %v7543_v50 = vadd.f32 %v7542_v54, %v14185_v22  ;;  %v6867_v46 = vpop.f32.mrf.mxu1 }
 0x96d   : > { %v7544_v44 = vpop.f32.mrf.mxu0  ;;  %v8644_v62 = vmax.f32 %v8643_v42, %v6866_v45  ;;  %v6868_v24 = vadd.f32 %v6867_v46, %v14197_v30 }
 0x96e   : > { %v8687_v37 = vmax.f32 %v8686_v60, %v7543_v50  ;;  %v7545_v2 = vadd.f32 %v7544_v44, %v14189_v17  ;;  %v6869_v26 = vpop.f32.mrf.mxu1 }
 0x96f   : > { %v7548_v3 = vpop.f32.mrf.mxu0  ;;  %v8665_v58 = vmax.f32 %v8664_v5, %v6868_v24  ;;  %v6870_v19 = vadd.f32 %v6869_v26, %v14191_v21 }
 0x970   : > { %v8688_v16 = vrot.slane %v8687_v37, 4  ;;  %v8708_v11 = vmax.f32 %v8707_v1, %v7545_v2  ;;  %v6871_v38 = vpop.f32.mrf.mxu1  ;;  %v7549_v13 = vadd.f32 %v7548_v3, %v14185_v22 }
 0x971   : > { %v7550_v63 = vpop.f32.mrf.mxu0  ;;  %v8645_v55 = vmax.f32 %v8644_v62, %v6870_v19  ;;  %v6872_v41 = vadd.f32 %v6871_v38, %v14197_v30 }
 0x972   : > { %v8689_v51 = vmax.f32 %v8687_v37, %v8688_v16  ;;  %v8709_v36 = vrot.slane %v8708_v11, 4  ;;  %v6875_v10 = vpop.f32.mrf.mxu1  ;;  %v7551_v15 = vadd.f32 %v7550_v63, %v14189_v17 }
 0x973   : > { %v7552_v20 = vpop.f32.mrf.mxu0  ;;  %v8646_v49 = vrot.slane %v8645_v55, 4  ;;  %v8666_v32 = vmax.f32 %v8665_v58, %v6872_v41  ;;  %v6876_v6 = vadd.f32 %v6875_v10, %v14191_v21 }
 0x974   : > { %v8690_v56 = vrot.slane %v8689_v51, 2  ;;  %v8710_v0 = vmax.f32 %v8708_v11, %v8709_v36  ;;  %v7553_v33 = vadd.f32 %v7552_v20, %v14185_v22  ;;  %v6877_v23 = vpop.f32.mrf.mxu1 }
 0x975   : > { %v7554_v8 = vpop.f32.mrf.mxu0  ;;  %v8647_v4 = vmax.f32 %v8645_v55, %v8646_v49  ;;  %v8667_v52 = vrot.slane %v8666_v32, 4  ;;  %v6878_v29 = vadd.f32 %v6877_v23, %v14197_v30 }
 0x976   : > { %v8691_v59 = vmax.f32 %v8689_v51, %v8690_v56  ;;  %v8711_v27 = vrot.slane %v8710_v0, 2  ;;  %v8841_v47 = vmax.f32 %v7549_v13, %v7553_v33  ;;  %v7555_v57 = vadd.f32 %v7554_v8, %v14189_v17  ;;  %v6879_v40 = vpop.f32.mrf.mxu1 }
 0x977   : > { %v7558_v14 = vpop.f32.mrf.mxu0  ;;  %v8648_v39 = vrot.slane %v8647_v4, 2  ;;  %v8668_v25 = vmax.f32 %v8666_v32, %v8667_v52  ;;  %v6880_v48 = vadd.f32 %v6879_v40, %v14191_v21 }
 0x978   : > { %v8692_v9 = vrot.slane %v8691_v59, 1  ;;  %v8712_v35 = vmax.f32 %v8710_v0, %v8711_v27  ;;  %v8862_v53 = vmax.f32 %v7551_v15, %v7555_v57  ;;  %v7559_v18 = vadd.f32 %v7558_v14, %v14185_v22  ;;  %v6881_v42 = vpop.f32.mrf.mxu1 }
 0x979   : > { %v7560_v60 = vpop.f32.mrf.mxu0  ;;  %v8649_v61 = vmax.f32 %v8647_v4, %v8648_v39  ;;  %v8669_v54 = vrot.slane %v8668_v25, 2  ;;  %v8799_v5 = vmax.f32 %v6876_v6, %v6880_v48  ;;  %v6882_v45 = vadd.f32 %v6881_v42, %v14197_v30 }
 0x97a   : > { %v8693_v7 = vmax.f32 %v8691_v59, %v8692_v9  ;;  %v8713_v31 = vrot.slane %v8712_v35, 1  ;;  %v8842_v1 = vmax.f32 %v8841_v47, %v7559_v18  ;;  %v7561_v50 = vadd.f32 %v7560_v60, %v14189_v17  ;;  %v6885_v46 = vpop.f32.mrf.mxu1 }
 0x97b   : > { %v7562_v44 = vpop.f32.mrf.mxu0  ;;  %v8650_v24 = vrot.slane %v8649_v61, 1  ;;  %v8670_v2 = vmax.f32 %v8668_v25, %v8669_v54  ;;  %v8820_v26 = vmax.f32 %v6878_v29, %v6882_v45  ;;  %v6886_v16 = vadd.f32 %v6885_v46, %v14191_v21 }
 0x97c   : > { %v14835_v62 = vsel %vm9131_vm5, %v8693_v7, %v14755_v12  ;;  %v8714_v37 = vmax.f32 %v8712_v35, %v8713_v31  ;;  %v8863_v3 = vmax.f32 %v8862_v53, %v7561_v50  ;;  %v7563_v58 = vadd.f32 %v7562_v44, %v14185_v22  ;;  %v6887_v11 = vpop.f32.mrf.mxu1 }
 0x97d   : > { %v7564_v19 = vpop.f32.mrf.mxu0  ;;  %v8651_v63 = vmax.f32 %v8649_v61, %v8650_v24  ;;  %v8671_v51 = vrot.slane %v8670_v2, 1  ;;  %v6888_v12 = vadd.f32 %v6887_v11, %v14197_v30  ;;  %v8800_v36 = vmax.f32 %v8799_v5, %v6886_v16 }
 0x97e   : > { %v14841_v38 = vsel %vm9131_vm5, %v8714_v37, %v14761_v43  ;;  %v8843_v55 = vmax.f32 %v8842_v1, %v7563_v58  ;;  %v7565_v41 = vadd.f32 %v7564_v19, %v14189_v17  ;;  %v6889_v10 = vpop.f32.mrf.mxu1 }
 0x97f   : > { %v7568_v20 = vpop.f32.mrf.mxu0  ;;  %v14847_v56 = vsel %vm9131_vm5, %v8651_v63, %v14767_v28  ;;  %v8672_v0 = vmax.f32 %v8670_v2, %v8671_v51  ;;  %v8821_v49 = vmax.f32 %v8820_v26, %v6888_v12  ;;  %v6890_v32 = vadd.f32 %v6889_v10, %v14191_v21 }
 0x980   : > { %v8864_v43 = vmax.f32 %v8863_v3, %v7565_v41  ;;  %v7569_v13 = vadd.f32 %v7568_v20, %v14185_v22  ;;  %v6891_v33 = vpop.f32.mrf.mxu1 }
 0x981   : > { %v7570_v23 = vpop.f32.mrf.mxu0  ;;  %v14853_v8 = vsel %vm9131_vm5, %v8672_v0, %v14773_v34  ;;  %v8801_v59 = vmax.f32 %v8800_v36, %v6890_v32  ;;  %v6892_v27 = vadd.f32 %v6891_v33, %v14197_v30 }
 0x982   : > { %v7571_v4 = vadd.f32 %v7570_v23, %v14189_v17  ;;  %v8844_v28 = vmax.f32 %v8843_v55, %v7569_v13  ;;  %v6895_v52 = vpop.f32.mrf.mxu1 }
 0x983   : > { %v7572_v15 = vpop.f32.mrf.mxu0  ;;  %v8822_v6 = vmax.f32 %v8821_v49, %v6892_v27  ;;  %v6896_v57 = vadd.f32 %v6895_v52, %v14191_v21 }
 0x984   : > { %v8865_v47 = vmax.f32 %v8864_v43, %v7571_v4  ;;  %v7573_v40 = vadd.f32 %v7572_v15, %v14185_v22  ;;  %v6897_v14 = vpop.f32.mrf.mxu1 }
 0x985   : > { %v7574_v9 = vpop.f32.mrf.mxu0  ;;  %v8802_v35 = vmax.f32 %v8801_v59, %v6896_v57  ;;  %v6898_v34 = vadd.f32 %v6897_v14, %v14197_v30 }
 0x986   : > { %v8845_v39 = vmax.f32 %v8844_v28, %v7573_v40  ;;  %v7575_v25 = vadd.f32 %v7574_v9, %v14189_v17  ;;  %v6899_v29 = vpop.f32.mrf.mxu1 }
 0x987   : > { %v7578_v53 = vpop.f32.mrf.mxu0  ;;  %v8823_v48 = vmax.f32 %v8822_v6, %v6898_v34  ;;  %v6900_v42 = vadd.f32 %v6899_v29, %v14191_v21 }
 0x988   : > { %v8866_v18 = vmax.f32 %v8865_v47, %v7575_v25  ;;  %v7579_v60 = vadd.f32 %v7578_v53, %v14185_v22  ;;  %v6901_v7 = vpop.f32.mrf.mxu1 }
 0x989   : > { %v7580_v31 = vpop.f32.mrf.mxu0  ;;  %v8803_v61 = vmax.f32 %v8802_v35, %v6900_v42  ;;  %v6902_v5 = vadd.f32 %v6901_v7, %v14197_v30 }
 0x98a   : > { %v8846_v54 = vmax.f32 %v8845_v39, %v7579_v60  ;;  %v7581_v1 = vadd.f32 %v7580_v31, %v14189_v17  ;;  %v6905_v45 = vpop.f32.mrf.mxu1 }
 0x98b   : > { %v7582_v50 = vpop.f32.mrf.mxu0  ;;  %v8824_v46 = vmax.f32 %v8823_v48, %v6902_v5  ;;  %v6906_v37 = vadd.f32 %v6905_v45, %v14191_v21 }
 0x98c   : > { %v8867_v44 = vmax.f32 %v8866_v18, %v7581_v1  ;;  %v7583_v24 = vadd.f32 %v7582_v50, %v14185_v22  ;;  %v6907_v2 = vpop.f32.mrf.mxu1 }
 0x98d   : > { %v7584_v26 = vpop.f32.mrf.mxu0  ;;  %v8804_v3 = vmax.f32 %v8803_v61, %v6906_v37  ;;  %v6908_v58 = vadd.f32 %v6907_v2, %v14197_v30 }
 0x98e   : > { %v8847_v16 = vmax.f32 %v8846_v54, %v7583_v24  ;;  %v7585_v11 = vadd.f32 %v7584_v26, %v14189_v17  ;;  %v6909_v19 = vpop.f32.mrf.mxu1 }
 0x98f   : > { %v7588_v63 = vpop.f32.mrf.mxu0  ;;  %v8825_v51 = vmax.f32 %v8824_v46, %v6908_v58  ;;  %v6910_v36 = vadd.f32 %v6909_v19, %v14191_v21 }
 0x990   : > { %v8868_v12 = vmax.f32 %v8867_v44, %v7585_v11  ;;  %v7589_v55 = vadd.f32 %v7588_v63, %v14185_v22  ;;  %v6911_v41 = vpop.f32.mrf.mxu1 }
 0x991   : > { %v7590_v10 = vpop.f32.mrf.mxu0  ;;  %v8805_v20 = vmax.f32 %v8804_v3, %v6910_v36  ;;  %v6912_v49 = vadd.f32 %v6911_v41, %v14197_v30 }
 0x992   : > { %v8848_v0 = vmax.f32 %v8847_v16, %v7589_v55  ;;  %v7591_v32 = vadd.f32 %v7590_v10, %v14189_v17  ;;  %v6915_v43 = vpop.f32.mrf.mxu1 }
 0x993   : > { %v7592_v13 = vpop.f32.mrf.mxu0  ;;  %v8826_v33 = vmax.f32 %v8825_v51, %v6912_v49  ;;  %v6916_v59 = vadd.f32 %v6915_v43, %v14191_v21 }
 0x994   : > { %v8869_v23 = vmax.f32 %v8868_v12, %v7591_v32  ;;  %v7593_v27 = vadd.f32 %v7592_v13, %v14185_v22  ;;  %v6917_v4 = vpop.f32.mrf.mxu1 }
 0x995   : > { %v7594_v28 = vpop.f32.mrf.mxu0  ;;  %v8806_v52 = vmax.f32 %v8805_v20, %v6916_v59  ;;  %v6918_v6 = vadd.f32 %v6917_v4, %v14197_v30 }
 0x996   : > { %v8849_v15 = vmax.f32 %v8848_v0, %v7593_v27  ;;  %v7595_v47 = vadd.f32 %v7594_v28, %v14189_v17  ;;  %v6919_v57 = vpop.f32.mrf.mxu1 }
 0x997   : > { %v7598_v40 = vpop.f32.mrf.mxu0  ;;  %v8827_v14 = vmax.f32 %v8826_v33, %v6918_v6  ;;  %v6920_v35 = vadd.f32 %v6919_v57, %v14191_v21 }
 0x998   : > { %v8870_v9 = vmax.f32 %v8869_v23, %v7595_v47  ;;  %v7599_v39 = vadd.f32 %v7598_v40, %v14185_v22  ;;  %v6921_v34 = vpop.f32.mrf.mxu1 }
 0x999   : > { %v7600_v25 = vpop.f32.mrf.mxu0  ;;  %v8807_v29 = vmax.f32 %v8806_v52, %v6920_v35  ;;  %v6922_v48 = vadd.f32 %v6921_v34, %v14197_v30 }
 0x99a   : > { %v8850_v53 = vmax.f32 %v8849_v15, %v7599_v39  ;;  %v7601_v18 = vadd.f32 %v7600_v25, %v14189_v17  ;;  %v6925_v42 = vpop.f32.mrf.mxu1 }
 0x99b   : > { %v7602_v60 = vpop.f32.mrf.mxu0  ;;  %v8828_v7 = vmax.f32 %v8827_v14, %v6922_v48  ;;  %v6926_v61 = vadd.f32 %v6925_v42, %v14191_v21 }
 0x99c   : > { %v8871_v31 = vmax.f32 %v8870_v9, %v7601_v18  ;;  %v7603_v54 = vadd.f32 %v7602_v60, %v14185_v22  ;;  %v6927_v5 = vpop.f32.mrf.mxu1 }
 0x99d   : > { %v7604_v1 = vpop.f32.mrf.mxu0  ;;  %v8808_v45 = vmax.f32 %v8807_v29, %v6926_v61  ;;  %v6928_v46 = vadd.f32 %v6927_v5, %v14197_v30 }
 0x99e   : > { %v8851_v50 = vmax.f32 %v8850_v53, %v7603_v54  ;;  %v7605_v44 = vadd.f32 %v7604_v1, %v14189_v17  ;;  %v6929_v37 = vpop.f32.mrf.mxu1 }
 0x99f   : > { %v7608_v24 = vpop.f32.mrf.mxu0  ;;  %v8829_v2 = vmax.f32 %v8828_v7, %v6928_v46  ;;  %v6930_v3 = vadd.f32 %v6929_v37, %v14191_v21 }
 0x9a0   : > { %v8872_v26 = vmax.f32 %v8871_v31, %v7605_v44  ;;  %v7609_v16 = vadd.f32 %v7608_v24, %v14185_v22  ;;  %v6931_v58 = vpop.f32.mrf.mxu1 }
 0x9a1   : > { %v7610_v11 = vpop.f32.mrf.mxu0  ;;  %v8809_v19 = vmax.f32 %v8808_v45, %v6930_v3  ;;  %v6932_v51 = vadd.f32 %v6931_v58, %v14197_v30 }
 0x9a2   : > { %v8852_v63 = vmax.f32 %v8851_v50, %v7609_v16  ;;  %v7611_v12 = vadd.f32 %v7610_v11, %v14189_v17  ;;  %v6935_v36 = vpop.f32.mrf.mxu1 }
 0x9a3   : > { %v7612_v55 = vpop.f32.mrf.mxu0  ;;  %v8830_v41 = vmax.f32 %v8829_v2, %v6932_v51  ;;  %v6936_v20 = vadd.f32 %v6935_v36, %v14191_v21 }
 0x9a4   : > { %v8873_v10 = vmax.f32 %v8872_v26, %v7611_v12  ;;  %v7613_v0 = vadd.f32 %v7612_v55, %v14185_v22  ;;  %v6937_v49 = vpop.f32.mrf.mxu1 }
 0x9a5   : > { %v7614_v32 = vpop.f32.mrf.mxu0  ;;  %v8810_v43 = vmax.f32 %v8809_v19, %v6936_v20  ;;  %v6938_v33 = vadd.f32 %v6937_v49, %v14197_v30 }
 0x9a6   : > { %v8853_v13 = vmax.f32 %v8852_v63, %v7613_v0  ;;  %v7615_v23 = vadd.f32 %v7614_v32, %v14189_v17  ;;  %v6939_v59 = vpop.f32.mrf.mxu1 }
 0x9a7   : > { %v7618_v27 = vpop.f32.mrf.mxu0  ;;  %v8831_v4 = vmax.f32 %v8830_v41, %v6938_v33  ;;  %v6940_v52 = vadd.f32 %v6939_v59, %v14191_v21 }
 0x9a8   : > { %v8874_v28 = vmax.f32 %v8873_v10, %v7615_v23  ;;  %v7619_v15 = vadd.f32 %v7618_v27, %v14185_v22  ;;  %v6941_v6 = vpop.f32.mrf.mxu1 }
 0x9a9   : > { %v7620_v47 = vpop.f32.mrf.mxu0  ;;  %v8811_v57 = vmax.f32 %v8810_v43, %v6940_v52  ;;  %v6942_v14 = vadd.f32 %v6941_v6, %v14197_v30 }
 0x9aa   : > { %v8854_v40 = vmax.f32 %v8853_v13, %v7619_v15  ;;  %v7621_v9 = vadd.f32 %v7620_v47, %v14189_v17  ;;  %v6945_v35 = vpop.f32.mrf.mxu1 }
 0x9ab   : > { %v7622_v39 = vpop.f32.mrf.mxu0  ;;  %v8832_v34 = vmax.f32 %v8831_v4, %v6942_v14  ;;  %v6946_v29 = vadd.f32 %v6945_v35, %v14191_v21 }
 0x9ac   : > { %v8875_v25 = vmax.f32 %v8874_v28, %v7621_v9  ;;  %v7623_v53 = vadd.f32 %v7622_v39, %v14185_v22  ;;  %v6947_v48 = vpop.f32.mrf.mxu1 }
 0x9ad   : > { %v7624_v18 = vpop.f32.mrf.mxu0  ;;  %v8812_v42 = vmax.f32 %v8811_v57, %v6946_v29  ;;  %v6948_v7 = vadd.f32 %v6947_v48, %v14197_v30 }
 0x9ae   : > { %v8855_v60 = vmax.f32 %v8854_v40, %v7623_v53  ;;  %v7625_v31 = vadd.f32 %v7624_v18, %v14189_v17  ;;  %v6949_v61 = vpop.f32.mrf.mxu1 }
 0x9af   : > { %v14901_v54 = vpop.f32.mrf.mxu0  ;;  %v8833_v1 = vmax.f32 %v8832_v34, %v6948_v7  ;;  %v6950_v50 = vadd.f32 %v6949_v61, %v14191_v21 }
 0x9b0   : > { %v8856_v5 = vrot.slane %v8855_v60, 4  ;;  %v8876_v45 = vmax.f32 %v8875_v25, %v7625_v31  ;;  %v6951_v46 = vpop.f32.mrf.mxu1 }
 0x9b1   : > { %v14904_v44 = vpop.f32.mrf.mxu0  ;;  %v8813_v2 = vmax.f32 %v8812_v42, %v6950_v50  ;;  %v6952_v26 = vadd.f32 %v6951_v46, %v14197_v30 }
 0x9b2   : > { %v8857_v37 = vmax.f32 %v8855_v60, %v8856_v5  ;;  %v8877_v24 = vrot.slane %v8876_v45, 4  ;;  %v14907_v3 = vpop.f32.mrf.mxu1 }
 0x9b3   : > { %v7632_v16 = vpop.f32.mrf.mxu0  ;;  %v8814_v19 = vrot.slane %v8813_v2, 4  ;;  %v8834_v63 = vmax.f32 %v8833_v1, %v6952_v26 }
 0x9b4   : > { %v8858_v58 = vrot.slane %v8857_v37, 2  ;;  %v8878_v11 = vmax.f32 %v8876_v45, %v8877_v24  ;;  %v14909_v51 = vpop.f32.mrf.mxu1  ;;  %v7633_v24 = vadd.f32 %v7632_v16, %v14185_v22 }
 0x9b5   : > { %v7634_v12 = vpop.f32.mrf.mxu0  ;;  %v8815_v41 = vmax.f32 %v8813_v2, %v8814_v19  ;;  %v8835_v10 = vrot.slane %v8834_v63, 4 }
 0x9b6   : > { %v8859_v36 = vmax.f32 %v8857_v37, %v8858_v58  ;;  %v8879_v55 = vrot.slane %v8878_v11, 2  ;;  %v6959_v20 = vpop.f32.mrf.mxu1  ;;  %v7635_v58 = vadd.f32 %v7634_v12, %v14189_v17 }
 0x9b7   : > { %v7638_v0 = vpop.f32.mrf.mxu0  ;;  %v8816_v43 = vrot.slane %v8815_v41, 2  ;;  %v8836_v13 = vmax.f32 %v8834_v63, %v8835_v10  ;;  %v6960_v19 = vadd.f32 %v6959_v20, %v14191_v21 }
 0x9b8   : > { %v8860_v49 = vrot.slane %v8859_v36, 1  ;;  %v8880_v32 = vmax.f32 %v8878_v11, %v8879_v55  ;;  %v6961_v33 = vpop.f32.mrf.mxu1  ;;  %v7639_v11 = vadd.f32 %v7638_v0, %v14185_v22  ;;  %v7631_v55 = vadd.f32 %v14904_v44, %v14189_v17 }
 0x9b9   : > { %v7640_v23 = vpop.f32.mrf.mxu0  ;;  %v8817_v4 = vmax.f32 %v8815_v41, %v8816_v43  ;;  %v8837_v28 = vrot.slane %v8836_v13, 2  ;;  %v6962_v12 = vadd.f32 %v6961_v33, %v14197_v30 }
 0x9ba   : > { %v8861_v59 = vmax.f32 %v8859_v36, %v8860_v49  ;;  %v8881_v27 = vrot.slane %v8880_v32, 1  ;;  %v6965_v52 = vpop.f32.mrf.mxu1  ;;  %v7641_v16 = vadd.f32 %v7640_v23, %v14189_v17  ;;  %v6958_v23 = vadd.f32 %v14909_v51, %v14197_v30 }
 0x9bb   : > { %v7642_v15 = vpop.f32.mrf.mxu0  ;;  %v8818_v57 = vrot.slane %v8817_v4, 1  ;;  %v8838_v40 = vmax.f32 %v8836_v13, %v8837_v28  ;;  %v6966_v0 = vadd.f32 %v6965_v52, %v14191_v21 }
 0x9bc   : > { %v14913_v6 = vsel %vm9133_vm6, %v8861_v59, %v14835_v62  ;;  %v8882_v47 = vmax.f32 %v8880_v32, %v8881_v27  ;;  %v6967_v14 = vpop.f32.mrf.mxu1  ;;  %v7643_v10 = vadd.f32 %v7642_v15, %v14185_v22  ;;  %v9030_v32 = vmax.f32 %v7631_v55, %v7635_v58 }
 0x9bd   : > { %v7644_v9 = vpop.f32.mrf.mxu0  ;;  %v8819_v39 = vmax.f32 %v8817_v4, %v8818_v57  ;;  %v8839_v34 = vrot.slane %v8838_v40, 1  ;;  %v6968_v27 = vadd.f32 %v6967_v14, %v14197_v30  ;;  %v8988_v57 = vmax.f32 %v6958_v23, %v6962_v12 }
 0x9be   : > { %v14917_v35 = vsel %vm9133_vm6, %v8882_v47, %v14841_v38  ;;  %v6969_v25 = vpop.f32.mrf.mxu1  ;;  %v7645_v13 = vadd.f32 %v7644_v9, %v14189_v17  ;;  %v9031_v28 = vmax.f32 %v9030_v32, %v7641_v16 }
 0x9bf   : > { %v7648_v29 = vpop.f32.mrf.mxu0  ;;  %v14921_v53 = vsel %vm9133_vm6, %v8819_v39, %v14847_v56  ;;  %v8840_v48 = vmax.f32 %v8838_v40, %v8839_v34 }
 0x9c0   : > { %v6971_v62 = vpop.f32.mrf.mxu1  ;;  %v7649_v44 = vadd.f32 %v7648_v29, %v14185_v22  ;;  %v9032_v29 = vmax.f32 %v9031_v28, %v7645_v13 }
 0x9c1   : > { %v7650_v18 = vpop.f32.mrf.mxu0  ;;  %v14925_v42 = vsel %vm9133_vm6, %v8840_v48, %v14853_v8  ;;  %v7629_v8 = vadd.f32 %v14901_v54, %v14185_v22  ;;  %v6956_v54 = vadd.f32 %v14907_v3, %v14191_v21  ;;  %v6970_v3 = vadd.f32 %v6969_v25, %v14191_v21 }
 0x9c2   : > { %v6975_v60 = vpop.f32.mrf.mxu1  ;;  %v7651_v15 = vadd.f32 %v7650_v18, %v14189_v17  ;;  %v6972_v9 = vadd.f32 %v6971_v62, %v14197_v30 }
 0x9c3   : > { %v7652_v7 = vpop.f32.mrf.mxu0  ;;  %v9009_v41 = vmax.f32 %v7629_v8, %v7633_v24  ;;  %v8967_v59 = vmax.f32 %v6956_v54, %v6960_v19  ;;  %v6976_v39 = vadd.f32 %v6975_v60, %v14191_v21  ;;  %v8989_v24 = vmax.f32 %v8988_v57, %v6968_v27 }
 0x9c4   : > { %v6977_v31 = vpop.f32.mrf.mxu1  ;;  %v7653_v47 = vadd.f32 %v7652_v7, %v14185_v22  ;;  %v9033_v19 = vmax.f32 %v9032_v29, %v7651_v15 }
 0x9c5   : > { %v7654_v38 = vpop.f32.mrf.mxu0  ;;  %v9010_v43 = vmax.f32 %v9009_v41, %v7639_v11  ;;  %v8968_v40 = vmax.f32 %v8967_v59, %v6966_v0  ;;  %v6978_v18 = vadd.f32 %v6977_v31, %v14197_v30  ;;  %v8990_v41 = vmax.f32 %v8989_v24, %v6972_v9 }
 0x9c6   : > { %v6979_v61 = vpop.f32.mrf.mxu1  ;;  %v7655_v25 = vadd.f32 %v7654_v38, %v14189_v17 }
 0x9c7   : > { %v7658_v5 = vpop.f32.mrf.mxu0  ;;  %v9011_v52 = vmax.f32 %v9010_v43, %v7643_v10  ;;  %v8969_v8 = vmax.f32 %v8968_v40, %v6970_v3  ;;  %v6980_v7 = vadd.f32 %v6979_v61, %v14191_v21  ;;  %v8991_v32 = vmax.f32 %v8990_v41, %v6978_v18 }
 0x9c8   : > { %v6981_v1 = vpop.f32.mrf.mxu1  ;;  %v7659_v48 = vadd.f32 %v7658_v5, %v14185_v22  ;;  %v9034_v12 = vmax.f32 %v9033_v19, %v7655_v25 }
 0x9c9   : > { %v7660_v45 = vpop.f32.mrf.mxu0  ;;  %v9012_v14 = vmax.f32 %v9011_v52, %v7649_v44  ;;  %v8970_v16 = vmax.f32 %v8969_v8, %v6976_v39  ;;  %v6982_v38 = vadd.f32 %v6981_v1, %v14197_v30 }
 0x9ca   : > { %v6985_v50 = vpop.f32.mrf.mxu1  ;;  %v7661_v60 = vadd.f32 %v7660_v45, %v14189_v17 }
 0x9cb   : > { %v7662_v46 = vpop.f32.mrf.mxu0  ;;  %v9013_v62 = vmax.f32 %v9012_v14, %v7653_v47  ;;  %v6986_v5 = vadd.f32 %v6985_v50, %v14191_v21  ;;  %v8971_v43 = vmax.f32 %v8970_v16, %v6980_v7  ;;  %v8992_v27 = vmax.f32 %v8991_v32, %v6982_v38 }
 0x9cc   : > { %v14927_v37 = vpop.f32.mrf.mxu1  ;;  %v7663_v55 = vadd.f32 %v7662_v46, %v14185_v22  ;;  %v9035_v44 = vmax.f32 %v9034_v12, %v7661_v60 }
 0x9cd   : > { %v7664_v56 = vpop.f32.mrf.mxu0  ;;  %v9014_v31 = vmax.f32 %v9013_v62, %v7659_v48  ;;  %v6988_v45 = vadd.f32 %v14927_v37, %v14197_v30 }
 0x9ce   : > { %v14930_v2 = vpop.f32.mrf.mxu1  ;;  %v7665_v61 = vadd.f32 %v7664_v56, %v14189_v17  ;;  %v8972_v56 = vmax.f32 %v8971_v43, %v6986_v5 }
 0x9cf   : > { %v7668_v26 = vpop.f32.mrf.mxu0  ;;  %v6990_v46 = vadd.f32 %v14930_v2, %v14191_v21  ;;  %v9015_v50 = vmax.f32 %v9014_v31, %v7663_v55  ;;  %v8993_v57 = vmax.f32 %v8992_v27, %v6988_v45 }
 0x9d0   : > { %v14937_v63 = vpop.f32.mrf.mxu1  ;;  %v7669_v0 = vadd.f32 %v7668_v26, %v14185_v22  ;;  %v9036_v52 = vmax.f32 %v9035_v44, %v7665_v61 }
 0x9d1   : > { %v7670_v36 = vpop.f32.mrf.mxu0  ;;  %v6992_v26 = vadd.f32 %v14937_v63, %v14197_v30  ;;  %v8973_v40 = vmax.f32 %v8972_v56, %v6990_v46 }
 0x9d2   : > { %v6995_v49 = vpop.f32.mrf.mxu1  ;;  %v7671_v23 = vadd.f32 %v7670_v36, %v14189_v17  ;;  %v9016_v15 = vmax.f32 %v9015_v50, %v7669_v0 }
 0x9d3   : > { %v7672_v20 = vpop.f32.mrf.mxu0  ;;  %v6996_v3 = vadd.f32 %v6995_v49, %v14191_v21  ;;  %v8994_v25 = vmax.f32 %v8993_v57, %v6992_v26 }
 0x9d4   : > { %v6997_v4 = vpop.f32.mrf.mxu1  ;;  %v7673_v59 = vadd.f32 %v7672_v20, %v14185_v22  ;;  %v9037_v29 = vmax.f32 %v9036_v52, %v7671_v23 }
 0x9d5   : > { %v7674_v33 = vpop.f32.mrf.mxu0  ;;  %v6998_v36 = vadd.f32 %v6997_v4, %v14197_v30  ;;  %v8974_v48 = vmax.f32 %v8973_v40, %v6996_v3 }
 0x9d6   : > { %v6999_v51 = vpop.f32.mrf.mxu1  ;;  %v7675_v2 = vadd.f32 %v7674_v33, %v14189_v17  ;;  %v9017_v63 = vmax.f32 %v9016_v15, %v7673_v59 }
 0x9d7   : > { %v7678_v34 = vpop.f32.mrf.mxu0  ;;  %v7000_v20 = vadd.f32 %v6999_v51, %v14191_v21  ;;  %v8995_v19 = vmax.f32 %v8994_v25, %v6998_v36 }
 0x9d8   : > { %v7001_v58 = vpop.f32.mrf.mxu1  ;;  %v7679_v47 = vadd.f32 %v7678_v34, %v14185_v22  ;;  %v9038_v18 = vmax.f32 %v9037_v29, %v7675_v2 }
 0x9d9   : > { %v7680_v11 = vpop.f32.mrf.mxu0  ;;  %v7002_v33 = vadd.f32 %v7001_v58, %v14197_v30  ;;  %v8975_v62 = vmax.f32 %v8974_v48, %v7000_v20 }
 0x9da   : > { %v7005_v10 = vpop.f32.mrf.mxu1  ;;  %v7681_v49 = vadd.f32 %v7680_v11, %v14189_v17  ;;  %v9018_v4 = vmax.f32 %v9017_v63, %v7679_v47 }
 0x9db   : > { %v7682_v54 = vpop.f32.mrf.mxu0  ;;  %v7006_v34 = vadd.f32 %v7005_v10, %v14191_v21  ;;  %v8996_v10 = vmax.f32 %v8995_v19, %v7002_v33 }
 0x9dc   : > { %v7007_v13 = vpop.f32.mrf.mxu1  ;;  %v7683_v14 = vadd.f32 %v7682_v54, %v14185_v22  ;;  %v9039_v16 = vmax.f32 %v9038_v18, %v7681_v49 }
 0x9dd   : > { %v7684_v1 = vpop.f32.mrf.mxu0  ;;  %v7008_v11 = vadd.f32 %v7007_v13, %v14197_v30  ;;  %v8976_v54 = vmax.f32 %v8975_v62, %v7006_v34 }
 0x9de   : > { %v7009_v28 = vpop.f32.mrf.mxu1  ;;  %v7685_v51 = vadd.f32 %v7684_v1, %v14189_v17  ;;  %v9019_v58 = vmax.f32 %v9018_v4, %v7683_v14 }
 0x9df   : > { %v7688_v37 = vpop.f32.mrf.mxu0  ;;  %v7010_v60 = vadd.f32 %v7009_v28, %v14191_v21  ;;  %v8997_v13 = vmax.f32 %v8996_v10, %v7008_v11 }
 0x9e0   : > { %v7011_v9 = vpop.f32.mrf.mxu1  ;;  %v7689_v7 = vadd.f32 %v7688_v37, %v14185_v22  ;;  %v9040_v32 = vmax.f32 %v9039_v16, %v7685_v51 }
 0x9e1   : > { %v7690_v39 = vpop.f32.mrf.mxu0  ;;  %v7012_v12 = vadd.f32 %v7011_v9, %v14197_v30  ;;  %v8977_v1 = vmax.f32 %v8976_v54, %v7010_v60 }
 0x9e2   : > { %v7015_v24 = vpop.f32.mrf.mxu1  ;;  %v7691_v38 = vadd.f32 %v7690_v39, %v14189_v17  ;;  %v9020_v43 = vmax.f32 %v9019_v58, %v7689_v7 }
 0x9e3   : > { %v7692_v8 = vpop.f32.mrf.mxu0  ;;  %v7016_v31 = vadd.f32 %v7015_v24, %v14191_v21  ;;  %v8998_v3 = vmax.f32 %v8997_v13, %v7012_v12  ;;  %v9057_v12 = vld [vmem:[#allocation3 + $0x30] sm:$0xff] }
 0x9e4   : > { %v7017_v55 = vpop.f32.mrf.mxu1  ;;  %v7693_v5 = vadd.f32 %v7692_v8, %v14185_v22  ;;  %v9041_v27 = vmax.f32 %v9040_v32, %v7691_v38 }
 0x9e5   : > { %v7694_v41 = vpop.f32.mrf.mxu0  ;;  %v7018_v44 = vadd.f32 %v7017_v55, %v14197_v30  ;;  %v8978_v28 = vmax.f32 %v8977_v1, %v7016_v31 }
 0x9e6   : > { %v7019_v61 = vpop.f32.mrf.mxu1  ;;  %v7695_v45 = vadd.f32 %v7694_v41, %v14189_v17  ;;  %v9021_v56 = vmax.f32 %v9020_v43, %v7693_v5  ;;  %v9058_v43 = vld [vmem:[#allocation3 + $0x38] sm:$0xff] }
 0x9e7   : > { %v7698_v0 = vpop.f32.mrf.mxu0  ;;  %v7020_v50 = vadd.f32 %v7019_v61, %v14191_v21  ;;  %v8999_v36 = vmax.f32 %v8998_v3, %v7018_v44 }
 0x9e8   : > { %v7699_v46 = vadd.f32 %v7698_v0, %v14185_v22  ;;  %v7021_v23 = vpop.f32.mrf.mxu1  ;;  %v9042_v2 = vmax.f32 %v9041_v27, %v7695_v45 }
 0x9e9   : > { %v7700_v59 = vpop.f32.mrf.mxu0  ;;  %v7022_v37 = vadd.f32 %v7021_v23, %v14197_v30  ;;  %v8979_v20 = vmax.f32 %v8978_v28, %v7020_v50  ;;  %v9055_v50 = vld [vmem:[#allocation3 + $0x20] sm:$0xff] }
 0x9ea   : > { %v7701_v26 = vadd.f32 %v7700_v59, %v14189_v17  ;;  %v7025_v52 = vpop.f32.mrf.mxu1  ;;  %v9022_v47 = vmax.f32 %v9021_v56, %v7699_v46 }
 0x9eb   : > { %v7702_v15 = vpop.f32.mrf.mxu0  ;;  %v7026_v57 = vadd.f32 %v7025_v52, %v14191_v21  ;;  %v9000_v25 = vmax.f32 %v8999_v36, %v7022_v37 }
 0x9ec   : > { %v7703_v40 = vadd.f32 %v7702_v15, %v14185_v22  ;;  %v7027_v9 = vpop.f32.mrf.mxu1  ;;  %v9043_v29 = vmax.f32 %v9042_v2, %v7701_v26  ;;  %v9056_v26 = vld [vmem:[#allocation3 + $0x28] sm:$0xff] }
 0x9ed   : > { %v7704_v39 = vpop.f32.mrf.mxu0  ;;  %v7028_v49 = vadd.f32 %v7027_v9, %v14197_v30  ;;  %v8980_v33 = vmax.f32 %v8979_v20, %v7026_v57 }
 0x9ee   : > { %v9023_v63 = vmax.f32 %v9022_v47, %v7703_v40  ;;  %v7705_v14 = vadd.f32 %v7704_v39, %v14189_v17  ;;  %v7029_v48 = vpop.f32.mrf.mxu1 }
 0x9ef   : > { %v7030_v8 = vadd.f32 %v7029_v48, %v14191_v21  ;;  %v9001_v18 = vmax.f32 %v9000_v25, %v7028_v49 }
 0x9f0   : > { %v9024_v34 = vrot.slane %v9023_v63, 4  ;;  %v9044_v24 = vmax.f32 %v9043_v29, %v7705_v14  ;;  %v7031_v4 = vpop.f32.mrf.mxu1 }
 0x9f1   : > { %v8981_v7 = vmax.f32 %v8980_v33, %v7030_v8  ;;  %v7032_v19 = vadd.f32 %v7031_v4, %v14197_v30 }
 0x9f2   : > { %v9025_v22 = vmax.f32 %v9023_v63, %v9024_v34  ;;  %v9045_v51 = vrot.slane %v9044_v24, 4 }
 0x9f3   : > { %v8982_v60 = vrot.slane %v8981_v7, 4  ;;  %v9002_v55 = vmax.f32 %v9001_v18, %v7032_v19 }
 0x9f4   : > { %v9026_v62 = vrot.slane %v9025_v22, 2  ;;  %v9046_v11 = vmax.f32 %v9044_v24, %v9045_v51 }
 0x9f5   : > { %v8983_v16 = vmax.f32 %v8981_v7, %v8982_v60  ;;  %v9003_v58 = vrot.slane %v9002_v55, 4 }
 0x9f6   : > { %v9027_v41 = vmax.f32 %v9025_v22, %v9026_v62  ;;  %v9047_v17 = vrot.slane %v9046_v11, 2 }
 0x9f7   : > { %v8984_v10 = vrot.slane %v8983_v16, 2  ;;  %v9004_v54 = vmax.f32 %v9002_v55, %v9003_v58 }
 0x9f8   : > { %v9028_v38 = vrot.slane %v9027_v41, 1  ;;  %v9048_v5 = vmax.f32 %v9046_v11, %v9047_v17 }
 0x9f9   : > { %v8985_v61 = vmax.f32 %v8983_v16, %v8984_v10  ;;  %v9005_v0 = vrot.slane %v9004_v54, 2 }
 0x9fa   : > { %v9029_v21 = vmax.f32 %v9027_v41, %v9028_v38  ;;  %v9049_v31 = vrot.slane %v9048_v5, 1 }
 0x9fb   : > { %v8986_v45 = vrot.slane %v8985_v61, 1  ;;  %v9006_v46 = vmax.f32 %v9004_v54, %v9005_v0 }
 0x9fc   : > { %v9178_v30 = vsel %vm9135_vm7, %v9029_v21, %v14913_v6  ;;  %v9050_v32 = vmax.f32 %v9048_v5, %v9049_v31 }
 0x9fd   : > { %v9200_v13 = vmax.f32 %v9057_v12, %v9178_v30  ;;  %v8987_v44 = vmax.f32 %v8985_v61, %v8986_v45  ;;  %v9007_v23 = vrot.slane %v9006_v46, 1 }
 0x9fe   : > { %v9185_v1 = vsel %vm9135_vm7, %v9050_v32, %v14917_v35 }
 0x9ff   : > { %9208 = vst [vmem:[#allocation3 + $0x30] sm:$0xff] %v9200_v13  ;;  %v9201_v59 = vmax.f32 %v9058_v43, %v9185_v1  ;;  %v9164_v27 = vsel %vm9135_vm7, %v8987_v44, %v14921_v53  ;;  %v9008_v56 = vmax.f32 %v9006_v46, %v9007_v23 }
 0xa00   : > { %v9198_v6 = vmax.f32 %v9055_v50, %v9164_v27 }
 0xa01   : > { %9209 = vst [vmem:[#allocation3 + $0x38] sm:$0xff] %v9201_v59  ;;  %v9171_v3 = vsel %vm9135_vm7, %v9008_v56, %v14925_v42 }
 0xa02   : > { %9206 = vst [vmem:[#allocation3 + $0x20] sm:$0xff] %v9198_v6  ;;  %v9199_v35 = vmax.f32 %v9056_v26, %v9171_v3 }
 0xa04   : > { %9207 = vst [vmem:[#allocation3 + $0x28] sm:$0xff] %v9199_v35 }
 0xa05   : > { %9919 = shalt.err (!%p9916_p3)
}
 0xa06   : > { %9643 = dma.vmem_to_hbm [thread:$0]  (%p15014_p10), %s9221_s22, 1024, %s15051_s7, [#allocation4]  }
 0xa07   : > { %9951 = dma.done.wait (%p15014_p10), [#allocation4], 1024  }
 0xa08   : > { %9953 = vsyncadd (%p15014_p10), [#allocation4], 4294966272 }
 0xa09 PF: > { %s18_s28 = sadd.s32 1, %s9972_s28   ;;  %s15638_s24 = smov %s9960_s25 }
 0xa0a   : > { %p15_p4 = scmp.ge.s32.totalorder %s18_s28, 5   ;;  %s15639_s25 = smov %s10055_s10 }
 0xa0b   : > { %s15640_s26 = smov %s9968_s27  ;;  %s15641_s27 = smov %s15643_s30 }
 0xa0c   :  { %17 = sbr.rel (!%p15_p4) target bundleno = 3 (0x3), region = 123 }
 0xa11   :  { %9233 = vsyncpa [#allocation4], 1 }
 0xa12   :  { %9235 = vsyncpa [#allocation4 + $0x1], 1 }

</bundles_post_ra>
